<compile_context>
chip_gen: v7x
topology: tpu7x:2x2x1
jax: 0.10.0
libtpu: 0.0.40
codegen_flags: <defaults>
</compile_context>

<pallas_src>
import functools

import jax
import jax.numpy as jnp
from jax.experimental import pallas as pl
from jax.experimental.pallas import tpu as pltpu


# Tap order must match the weight packing in _pack_weight (dh-major).
_TAPS = tuple((dh, dw) for dh in range(3) for dw in range(3))


def _gelu_tanh(x):
    # tanh-approx GELU: the tanh runs on the EUP (frees VALU slots vs. erf poly).
    c = 0.7978845608028654  # sqrt(2/pi)
    return 0.5 * x * (1.0 + jnp.tanh(c * (x + 0.044715 * (x * x * x))))


# ----------------------------------------------------------------------------
# Fused kernel: one batch element per grid step, everything resident in VMEM.
# ----------------------------------------------------------------------------
def _rdb5c_kernel(x_ref, w1, b1, w2, b2, w3, b3, w4, b4, w5, b5, o_ref,
                  cols_ref, slab_ref, *, H, W, nf, gc, compute_dtype):
    slab_sizes = (nf, gc, gc, gc, gc)
    slab_offs = (0, nf, nf + gc, nf + 2 * gc, nf + 3 * gc)

    def add_slab(s, data_f32):
        """Append channel slab `s` (H, W, cs) to the incremental im2col buffer."""
        cs = slab_sizes[s]
        base = 9 * slab_offs[s]
        # Reusable zero-padded spatial buffer (f32 to keep slices layout-simple).
        slab_ref[...] = jnp.zeros_like(slab_ref)
        slab_ref[1:H + 1, 1:W + 1, :cs] = data_f32
        for t, (dh, dw) in enumerate(_TAPS):
            patch = slab_ref[dh:dh + H, dw:dw + W, :cs].reshape(H * W, cs)
            cols_ref[:, base + t * cs: base + (t + 1) * cs] = patch.astype(compute_dtype)

    def conv(cin, w_ref, b_ref):
        # ONE bf16 MXU matmul per conv: K = 9*cin, f32 accumulation.
        acc = jnp.dot(cols_ref[:, :9 * cin], w_ref[...],
                      preferred_element_type=jnp.float32)
        return acc + b_ref[...].astype(jnp.float32)        # (H*W, Cout) f32

    x = x_ref[0].astype(jnp.float32)                       # (H, W, nf)
    add_slab(0, x)
    a1 = _gelu_tanh(conv(nf, w1, b1))                      # (H*W, gc)
    add_slab(1, a1.reshape(H, W, gc))
    a2 = _gelu_tanh(conv(nf + gc, w2, b2))
    add_slab(2, a2.reshape(H, W, gc))
    a3 = _gelu_tanh(conv(nf + 2 * gc, w3, b3))
    add_slab(3, a3.reshape(H, W, gc))
    a4 = _gelu_tanh(conv(nf + 3 * gc, w4, b4))
    add_slab(4, a4.reshape(H, W, gc))
    a5 = conv(nf + 4 * gc, w5, b5)                         # (H*W, nf), no GELU

    out = a5.reshape(H, W, nf) * 0.2 + x                   # residual in f32
    o_ref[...] = out.reshape(1, H, W, nf).astype(o_ref.dtype)


# ----------------------------------------------------------------------------
# Wrapper: weight packing + pallas_call
# ----------------------------------------------------------------------------
def _pack_weight(w_hwio, slab_sizes, dtype):
    """(3,3,Cin,Cout) HWIO -> (9*Cin, Cout), rows ordered (slab, tap, channel)."""
    _, _, cin, cout = w_hwio.shape
    w9 = w_hwio.reshape(9, cin, cout)                      # tap-major
    parts, off = [], 0
    for cs in slab_sizes:
        parts.append(w9[:, off:off + cs, :].reshape(9 * cs, cout))
        off += cs
    assert off == cin, (off, cin)
    return jnp.concatenate(parts, axis=0).astype(dtype)


def rdb5c_forward_nhwc(x, params, *, compute_dtype=jnp.bfloat16,
                       vmem_limit_bytes=64 * 1024 * 1024):
    N, H, W, nf = x.shape
    gc = params[0][0].shape[-1]
    slab_sizes = (nf, gc, gc, gc, gc)
    c_total = nf + 4 * gc

    packed = []
    for k, (w, b) in enumerate(params, start=1):
        packed.append(_pack_weight(w, slab_sizes[:k], compute_dtype))
        packed.append(b.reshape(1, -1).astype(jnp.float32))

    def _whole(shape):
        nd = len(shape)
        return pl.BlockSpec(shape, lambda n, _nd=nd: (0,) * _nd)

    in_specs = [pl.BlockSpec((1, H, W, nf), lambda n: (n, 0, 0, 0))]
    in_specs += [_whole(a.shape) for a in packed]

    kern = functools.partial(_rdb5c_kernel, H=H, W=W, nf=nf, gc=gc,
                             compute_dtype=compute_dtype)

    return pl.pallas_call(
        kern,
        out_shape=jax.ShapeDtypeStruct((N, H, W, nf), x.dtype),
        grid=(N,),
        in_specs=in_specs,
        out_specs=pl.BlockSpec((1, H, W, nf), lambda n: (n, 0, 0, 0)),
        scratch_shapes=[
            pltpu.VMEM((H * W, 9 * c_total), compute_dtype),      # incremental im2col
            pltpu.VMEM((H + 2, W + 2, max(nf, gc)), jnp.float32),  # reusable padded slab
        ],
        compiler_params=pltpu.CompilerParams(
            dimension_semantics=("parallel",),
            vmem_limit_bytes=vmem_limit_bytes,
        ),
    )(x, *packed)


def rdb5c_forward_nchw(x_nchw, params, **kw):
    x = jnp.transpose(x_nchw, (0, 2, 3, 1))     # NCHW -> NHWC
    y = rdb5c_forward_nhwc(x, params, **kw)
    return jnp.transpose(y, (0, 3, 1, 2))       # NHWC -> NCHW


# ----------------------------------------------------------------------------
# Pure-JAX reference (exact-erf GELU, f32) for the correctness check
# ----------------------------------------------------------------------------
def _ref_conv(x, w, b):
    y = jax.lax.conv_general_dilated(
        x, w, window_strides=(1, 1), padding="SAME",
        dimension_numbers=("NHWC", "HWIO", "NHWC"))
    return y + b.reshape(1, 1, 1, -1)


def rdb5c_reference_nhwc(x, params):
    (w1, b1), (w2, b2), (w3, b3), (w4, b4), (w5, b5) = params
    g = lambda v: jax.nn.gelu(v, approximate=False)
    x1 = g(_ref_conv(x, w1, b1))
    x2 = g(_ref_conv(jnp.concatenate([x, x1], -1), w2, b2))
    x3 = g(_ref_conv(jnp.concatenate([x, x1, x2], -1), w3, b3))
    x4 = g(_ref_conv(jnp.concatenate([x, x1, x2, x3], -1), w4, b4))
    x5 = _ref_conv(jnp.concatenate([x, x1, x2, x3, x4], -1), w5, b5)
    return x5 * 0.2 + x


# ----------------------------------------------------------------------------
# Deterministic parameter init (synthetic — shapes match the PyTorch module)
# ----------------------------------------------------------------------------
def init_params(key, nf, gc):
    shapes = [
        (nf, gc), (nf + gc, gc), (nf + 2 * gc, gc), (nf + 3 * gc, gc), (nf + 4 * gc, nf),
    ]
    params = []
    for cin, cout in shapes:
        key, kw, kb = jax.random.split(key, 3)
        w = jax.random.normal(kw, (3, 3, cin, cout), jnp.float32) * 0.05   # HWIO
        b = jax.random.normal(kb, (cout,), jnp.float32) * 0.01
        params.append((w, b))
    return params


if __name__ == "__main__":
    nf, gc = 8, 4
    N, H, W = 2, 16, 16

    key = jax.random.PRNGKey(0)
    kx, kp = jax.random.split(key)
    x_nchw = jax.random.normal(kx, (N, nf, H, W), jnp.float32)
    params = init_params(kp, nf, gc)

    out = jax.jit(rdb5c_forward_nchw)(x_nchw, params)
    out = jax.block_until_ready(out)

    # sanity check against pure-JAX f32 / exact-GELU reference.
    # bf16 matmul operands + tanh-GELU introduce a few e-3 absolute error over the
    # 5-conv dense chain, so the gate is 2e-2 (output magnitude ~O(1..4)).
    ref = rdb5c_reference_nhwc(jnp.transpose(x_nchw, (0, 2, 3, 1)), params)
    ref = jnp.transpose(ref, (0, 3, 1, 2))
    assert out.shape == x_nchw.shape and out.dtype == x_nchw.dtype
    err = float(jnp.max(jnp.abs(out - ref)))
    assert err < 2e-2, err

    print("KERNEL_OK")
</pallas_src>

<mosaic_0001>
module attributes {stable_mosaic.version = 11 : i64} {
  func.func @_rdb5c_kernel(%arg0: i32, %arg1: memref<1x16x16x8xf32, #tpu.memory_space<vmem>>, %arg2: memref<72x4xbf16, #tpu.memory_space<vmem>>, %arg3: memref<1x4xf32, #tpu.memory_space<vmem>>, %arg4: memref<108x4xbf16, #tpu.memory_space<vmem>>, %arg5: memref<1x4xf32, #tpu.memory_space<vmem>>, %arg6: memref<144x4xbf16, #tpu.memory_space<vmem>>, %arg7: memref<1x4xf32, #tpu.memory_space<vmem>>, %arg8: memref<180x4xbf16, #tpu.memory_space<vmem>>, %arg9: memref<1x4xf32, #tpu.memory_space<vmem>>, %arg10: memref<216x8xbf16, #tpu.memory_space<vmem>>, %arg11: memref<1x8xf32, #tpu.memory_space<vmem>>, %arg12: memref<1x16x16x8xf32, #tpu.memory_space<vmem>>, %arg13: memref<256x216xbf16, #tpu.memory_space<vmem>>, %arg14: memref<18x18x8xf32, #tpu.memory_space<vmem>>) attributes {dimension_semantics = [#tpu.dimension_semantics<parallel>], iteration_bounds = array<i64: 2>, scalar_prefetch = 0 : i64, scratch_operands = 2 : i64, tpu.core_type = #tpu.core_type<tc>, window_params = [{transform_indices = @transform_0, window_bounds = array<i64: 1, 16, 16, 8>}, {pipeline_mode = #tpu.pipeline_mode<synchronous>, transform_indices = @transform_1, window_bounds = array<i64: 72, 4>}, {pipeline_mode = #tpu.pipeline_mode<synchronous>, transform_indices = @transform_2, window_bounds = array<i64: 1, 4>}, {pipeline_mode = #tpu.pipeline_mode<synchronous>, transform_indices = @transform_3, window_bounds = array<i64: 108, 4>}, {pipeline_mode = #tpu.pipeline_mode<synchronous>, transform_indices = @transform_4, window_bounds = array<i64: 1, 4>}, {pipeline_mode = #tpu.pipeline_mode<synchronous>, transform_indices = @transform_5, window_bounds = array<i64: 144, 4>}, {pipeline_mode = #tpu.pipeline_mode<synchronous>, transform_indices = @transform_6, window_bounds = array<i64: 1, 4>}, {pipeline_mode = #tpu.pipeline_mode<synchronous>, transform_indices = @transform_7, window_bounds = array<i64: 180, 4>}, {pipeline_mode = #tpu.pipeline_mode<synchronous>, transform_indices = @transform_8, window_bounds = array<i64: 1, 4>}, {pipeline_mode = #tpu.pipeline_mode<synchronous>, transform_indices = @transform_9, window_bounds = array<i64: 216, 8>}, {pipeline_mode = #tpu.pipeline_mode<synchronous>, transform_indices = @transform_10, window_bounds = array<i64: 1, 8>}, {transform_indices = @transform_11, window_bounds = array<i64: 1, 16, 16, 8>}]} {
    %c0 = arith.constant 0 : index
    %c0_0 = arith.constant 0 : index
    %c0_1 = arith.constant 0 : index
    %c0_2 = arith.constant 0 : index
    %0 = vector.load %arg1[%c0, %c0_0, %c0_1, %c0_2] : memref<1x16x16x8xf32, #tpu.memory_space<vmem>>, vector<1x16x16x8xf32>
    %1 = vector.shape_cast %0 : vector<1x16x16x8xf32> to vector<16x16x8xf32>
    %cst = arith.constant 0.000000e+00 : f32
    %2 = vector.broadcast %cst : f32 to vector<18x18x8xf32>
    %c0_3 = arith.constant 0 : index
    %c0_4 = arith.constant 0 : index
    %c0_5 = arith.constant 0 : index
    %3 = vector.load %arg14[%c0_3, %c0_4, %c0_5] : memref<18x18x8xf32, #tpu.memory_space<vmem>>, vector<18x18x8xf32>
    tpu.vector_store %arg14[%c0_3, %c0_4, %c0_5], %2 {strides = array<i32>} : memref<18x18x8xf32, #tpu.memory_space<vmem>>, vector<18x18x8xf32>,
    %c1 = arith.constant 1 : index
    %c1_6 = arith.constant 1 : index
    %c0_7 = arith.constant 0 : index
    %4 = vector.load %arg14[%c1, %c1_6, %c0_7] : memref<18x18x8xf32, #tpu.memory_space<vmem>>, vector<16x16x8xf32>
    tpu.vector_store %arg14[%c1, %c1_6, %c0_7], %1 {strides = array<i32>} : memref<18x18x8xf32, #tpu.memory_space<vmem>>, vector<16x16x8xf32>,
    %c0_8 = arith.constant 0 : index
    %c0_9 = arith.constant 0 : index
    %c0_10 = arith.constant 0 : index
    %5 = vector.load %arg14[%c0_8, %c0_9, %c0_10] : memref<18x18x8xf32, #tpu.memory_space<vmem>>, vector<16x16x8xf32>
    %6 = vector.shape_cast %5 : vector<16x16x8xf32> to vector<256x8xf32>
    %7 = arith.truncf %6 : vector<256x8xf32> to vector<256x8xbf16>
    %c0_11 = arith.constant 0 : index
    %c0_12 = arith.constant 0 : index
    %8 = vector.load %arg13[%c0_11, %c0_12] : memref<256x216xbf16, #tpu.memory_space<vmem>>, vector<256x8xbf16>
    tpu.vector_store %arg13[%c0_11, %c0_12], %7 {strides = array<i32>} : memref<256x216xbf16, #tpu.memory_space<vmem>>, vector<256x8xbf16>,
    %c0_13 = arith.constant 0 : index
    %c1_14 = arith.constant 1 : index
    %c0_15 = arith.constant 0 : index
    %9 = vector.load %arg14[%c0_13, %c1_14, %c0_15] : memref<18x18x8xf32, #tpu.memory_space<vmem>>, vector<16x16x8xf32>
    %10 = vector.shape_cast %9 : vector<16x16x8xf32> to vector<256x8xf32>
    %11 = arith.truncf %10 : vector<256x8xf32> to vector<256x8xbf16>
    %c0_16 = arith.constant 0 : index
    %c8 = arith.constant 8 : index
    %12 = vector.load %arg13[%c0_16, %c8] : memref<256x216xbf16, #tpu.memory_space<vmem>>, vector<256x8xbf16>
    tpu.vector_store %arg13[%c0_16, %c8], %11 {strides = array<i32>} : memref<256x216xbf16, #tpu.memory_space<vmem>>, vector<256x8xbf16>,
    %c0_17 = arith.constant 0 : index
    %c2 = arith.constant 2 : index
    %c0_18 = arith.constant 0 : index
    %13 = vector.load %arg14[%c0_17, %c2, %c0_18] : memref<18x18x8xf32, #tpu.memory_space<vmem>>, vector<16x16x8xf32>
    %14 = vector.shape_cast %13 : vector<16x16x8xf32> to vector<256x8xf32>
    %15 = arith.truncf %14 : vector<256x8xf32> to vector<256x8xbf16>
    %c0_19 = arith.constant 0 : index
    %c16 = arith.constant 16 : index
    %16 = vector.load %arg13[%c0_19, %c16] : memref<256x216xbf16, #tpu.memory_space<vmem>>, vector<256x8xbf16>
    tpu.vector_store %arg13[%c0_19, %c16], %15 {strides = array<i32>} : memref<256x216xbf16, #tpu.memory_space<vmem>>, vector<256x8xbf16>,
    %c1_20 = arith.constant 1 : index
    %c0_21 = arith.constant 0 : index
    %c0_22 = arith.constant 0 : index
    %17 = vector.load %arg14[%c1_20, %c0_21, %c0_22] : memref<18x18x8xf32, #tpu.memory_space<vmem>>, vector<16x16x8xf32>
    %18 = vector.shape_cast %17 : vector<16x16x8xf32> to vector<256x8xf32>
    %19 = arith.truncf %18 : vector<256x8xf32> to vector<256x8xbf16>
    %c0_23 = arith.constant 0 : index
    %c24 = arith.constant 24 : index
    %20 = vector.load %arg13[%c0_23, %c24] : memref<256x216xbf16, #tpu.memory_space<vmem>>, vector<256x8xbf16>
    tpu.vector_store %arg13[%c0_23, %c24], %19 {strides = array<i32>} : memref<256x216xbf16, #tpu.memory_space<vmem>>, vector<256x8xbf16>,
    %c1_24 = arith.constant 1 : index
    %c1_25 = arith.constant 1 : index
    %c0_26 = arith.constant 0 : index
    %21 = vector.load %arg14[%c1_24, %c1_25, %c0_26] : memref<18x18x8xf32, #tpu.memory_space<vmem>>, vector<16x16x8xf32>
    %22 = vector.shape_cast %21 : vector<16x16x8xf32> to vector<256x8xf32>
    %23 = arith.truncf %22 : vector<256x8xf32> to vector<256x8xbf16>
    %c0_27 = arith.constant 0 : index
    %c32 = arith.constant 32 : index
    %24 = vector.load %arg13[%c0_27, %c32] : memref<256x216xbf16, #tpu.memory_space<vmem>>, vector<256x8xbf16>
    tpu.vector_store %arg13[%c0_27, %c32], %23 {strides = array<i32>} : memref<256x216xbf16, #tpu.memory_space<vmem>>, vector<256x8xbf16>,
    %c1_28 = arith.constant 1 : index
    %c2_29 = arith.constant 2 : index
    %c0_30 = arith.constant 0 : index
    %25 = vector.load %arg14[%c1_28, %c2_29, %c0_30] : memref<18x18x8xf32, #tpu.memory_space<vmem>>, vector<16x16x8xf32>
    %26 = vector.shape_cast %25 : vector<16x16x8xf32> to vector<256x8xf32>
    %27 = arith.truncf %26 : vector<256x8xf32> to vector<256x8xbf16>
    %c0_31 = arith.constant 0 : index
    %c40 = arith.constant 40 : index
    %28 = vector.load %arg13[%c0_31, %c40] : memref<256x216xbf16, #tpu.memory_space<vmem>>, vector<256x8xbf16>
    tpu.vector_store %arg13[%c0_31, %c40], %27 {strides = array<i32>} : memref<256x216xbf16, #tpu.memory_space<vmem>>, vector<256x8xbf16>,
    %c2_32 = arith.constant 2 : index
    %c0_33 = arith.constant 0 : index
    %c0_34 = arith.constant 0 : index
    %29 = vector.load %arg14[%c2_32, %c0_33, %c0_34] : memref<18x18x8xf32, #tpu.memory_space<vmem>>, vector<16x16x8xf32>
    %30 = vector.shape_cast %29 : vector<16x16x8xf32> to vector<256x8xf32>
    %31 = arith.truncf %30 : vector<256x8xf32> to vector<256x8xbf16>
    %c0_35 = arith.constant 0 : index
    %c48 = arith.constant 48 : index
    %32 = vector.load %arg13[%c0_35, %c48] : memref<256x216xbf16, #tpu.memory_space<vmem>>, vector<256x8xbf16>
    tpu.vector_store %arg13[%c0_35, %c48], %31 {strides = array<i32>} : memref<256x216xbf16, #tpu.memory_space<vmem>>, vector<256x8xbf16>,
    %c2_36 = arith.constant 2 : index
    %c1_37 = arith.constant 1 : index
    %c0_38 = arith.constant 0 : index
    %33 = vector.load %arg14[%c2_36, %c1_37, %c0_38] : memref<18x18x8xf32, #tpu.memory_space<vmem>>, vector<16x16x8xf32>
    %34 = vector.shape_cast %33 : vector<16x16x8xf32> to vector<256x8xf32>
    %35 = arith.truncf %34 : vector<256x8xf32> to vector<256x8xbf16>
    %c0_39 = arith.constant 0 : index
    %c56 = arith.constant 56 : index
    %36 = vector.load %arg13[%c0_39, %c56] : memref<256x216xbf16, #tpu.memory_space<vmem>>, vector<256x8xbf16>
    tpu.vector_store %arg13[%c0_39, %c56], %35 {strides = array<i32>} : memref<256x216xbf16, #tpu.memory_space<vmem>>, vector<256x8xbf16>,
    %c2_40 = arith.constant 2 : index
    %c2_41 = arith.constant 2 : index
    %c0_42 = arith.constant 0 : index
    %37 = vector.load %arg14[%c2_40, %c2_41, %c0_42] : memref<18x18x8xf32, #tpu.memory_space<vmem>>, vector<16x16x8xf32>
    %38 = vector.shape_cast %37 : vector<16x16x8xf32> to vector<256x8xf32>
    %39 = arith.truncf %38 : vector<256x8xf32> to vector<256x8xbf16>
    %c0_43 = arith.constant 0 : index
    %c64 = arith.constant 64 : index
    %40 = vector.load %arg13[%c0_43, %c64] : memref<256x216xbf16, #tpu.memory_space<vmem>>, vector<256x8xbf16>
    tpu.vector_store %arg13[%c0_43, %c64], %39 {strides = array<i32>} : memref<256x216xbf16, #tpu.memory_space<vmem>>, vector<256x8xbf16>,
    %c0_44 = arith.constant 0 : index
    %c0_45 = arith.constant 0 : index
    %41 = vector.load %arg13[%c0_44, %c0_45] : memref<256x216xbf16, #tpu.memory_space<vmem>>, vector<256x72xbf16>
    %c0_46 = arith.constant 0 : index
    %c0_47 = arith.constant 0 : index
    %42 = vector.load %arg2[%c0_46, %c0_47] : memref<72x4xbf16, #tpu.memory_space<vmem>>, vector<72x4xbf16>
    %cst_48 = arith.constant dense<0.000000e+00> : vector<256x4xf32>
    %43 = tpu.matmul %41, %42, %cst_48 {dimension_numbers = #tpu.dot_dimension_numbers<[1], [0], [0], [1], [0, 0, 1, 1], [], []>} : vector<256x72xbf16>, vector<72x4xbf16>, vector<256x4xf32> -> vector<256x4xf32>
    %c0_49 = arith.constant 0 : index
    %c0_50 = arith.constant 0 : index
    %44 = vector.load %arg3[%c0_49, %c0_50] : memref<1x4xf32, #tpu.memory_space<vmem>>, vector<1x4xf32>
    %45 = vector.broadcast %44 : vector<1x4xf32> to vector<256x4xf32>
    %46 = arith.addf %43, %45 : vector<256x4xf32>
    %cst_51 = arith.constant 5.000000e-01 : f32
    %47 = vector.broadcast %cst_51 : f32 to vector<256x4xf32>
    %48 = arith.mulf %47, %46 : vector<256x4xf32>
    %49 = arith.mulf %46, %46 : vector<256x4xf32>
    %50 = arith.mulf %49, %46 : vector<256x4xf32>
    %cst_52 = arith.constant 4.471500e-02 : f32
    %51 = vector.broadcast %cst_52 : f32 to vector<256x4xf32>
    %52 = arith.mulf %51, %50 : vector<256x4xf32>
    %53 = arith.addf %46, %52 : vector<256x4xf32>
    %cst_53 = arith.constant 0.797884583 : f32
    %54 = vector.broadcast %cst_53 : f32 to vector<256x4xf32>
    %55 = arith.mulf %54, %53 : vector<256x4xf32>
    %56 = math.tanh %55 : vector<256x4xf32>
    %cst_54 = arith.constant 1.000000e+00 : f32
    %57 = vector.broadcast %cst_54 : f32 to vector<256x4xf32>
    %58 = arith.addf %57, %56 : vector<256x4xf32>
    %59 = arith.mulf %48, %58 : vector<256x4xf32>
    %60 = vector.shape_cast %59 : vector<256x4xf32> to vector<16x16x4xf32>
    %cst_55 = arith.constant 0.000000e+00 : f32
    %61 = vector.broadcast %cst_55 : f32 to vector<18x18x8xf32>
    %c0_56 = arith.constant 0 : index
    %c0_57 = arith.constant 0 : index
    %c0_58 = arith.constant 0 : index
    %62 = vector.load %arg14[%c0_56, %c0_57, %c0_58] : memref<18x18x8xf32, #tpu.memory_space<vmem>>, vector<18x18x8xf32>
    tpu.vector_store %arg14[%c0_56, %c0_57, %c0_58], %61 {strides = array<i32>} : memref<18x18x8xf32, #tpu.memory_space<vmem>>, vector<18x18x8xf32>,
    %c1_59 = arith.constant 1 : index
    %c1_60 = arith.constant 1 : index
    %c0_61 = arith.constant 0 : index
    %63 = vector.load %arg14[%c1_59, %c1_60, %c0_61] : memref<18x18x8xf32, #tpu.memory_space<vmem>>, vector<16x16x4xf32>
    tpu.vector_store %arg14[%c1_59, %c1_60, %c0_61], %60 {strides = array<i32>} : memref<18x18x8xf32, #tpu.memory_space<vmem>>, vector<16x16x4xf32>,
    %c0_62 = arith.constant 0 : index
    %c0_63 = arith.constant 0 : index
    %c0_64 = arith.constant 0 : index
    %64 = vector.load %arg14[%c0_62, %c0_63, %c0_64] : memref<18x18x8xf32, #tpu.memory_space<vmem>>, vector<16x16x4xf32>
    %65 = vector.shape_cast %64 : vector<16x16x4xf32> to vector<256x4xf32>
    %66 = arith.truncf %65 : vector<256x4xf32> to vector<256x4xbf16>
    %c0_65 = arith.constant 0 : index
    %c72 = arith.constant 72 : index
    %67 = vector.load %arg13[%c0_65, %c72] : memref<256x216xbf16, #tpu.memory_space<vmem>>, vector<256x4xbf16>
    tpu.vector_store %arg13[%c0_65, %c72], %66 {strides = array<i32>} : memref<256x216xbf16, #tpu.memory_space<vmem>>, vector<256x4xbf16>,
    %c0_66 = arith.constant 0 : index
    %c1_67 = arith.constant 1 : index
    %c0_68 = arith.constant 0 : index
    %68 = vector.load %arg14[%c0_66, %c1_67, %c0_68] : memref<18x18x8xf32, #tpu.memory_space<vmem>>, vector<16x16x4xf32>
    %69 = vector.shape_cast %68 : vector<16x16x4xf32> to vector<256x4xf32>
    %70 = arith.truncf %69 : vector<256x4xf32> to vector<256x4xbf16>
    %c0_69 = arith.constant 0 : index
    %c76 = arith.constant 76 : index
    %71 = vector.load %arg13[%c0_69, %c76] : memref<256x216xbf16, #tpu.memory_space<vmem>>, vector<256x4xbf16>
    tpu.vector_store %arg13[%c0_69, %c76], %70 {strides = array<i32>} : memref<256x216xbf16, #tpu.memory_space<vmem>>, vector<256x4xbf16>,
    %c0_70 = arith.constant 0 : index
    %c2_71 = arith.constant 2 : index
    %c0_72 = arith.constant 0 : index
    %72 = vector.load %arg14[%c0_70, %c2_71, %c0_72] : memref<18x18x8xf32, #tpu.memory_space<vmem>>, vector<16x16x4xf32>
    %73 = vector.shape_cast %72 : vector<16x16x4xf32> to vector<256x4xf32>
    %74 = arith.truncf %73 : vector<256x4xf32> to vector<256x4xbf16>
    %c0_73 = arith.constant 0 : index
    %c80 = arith.constant 80 : index
    %75 = vector.load %arg13[%c0_73, %c80] : memref<256x216xbf16, #tpu.memory_space<vmem>>, vector<256x4xbf16>
    tpu.vector_store %arg13[%c0_73, %c80], %74 {strides = array<i32>} : memref<256x216xbf16, #tpu.memory_space<vmem>>, vector<256x4xbf16>,
    %c1_74 = arith.constant 1 : index
    %c0_75 = arith.constant 0 : index
    %c0_76 = arith.constant 0 : index
    %76 = vector.load %arg14[%c1_74, %c0_75, %c0_76] : memref<18x18x8xf32, #tpu.memory_space<vmem>>, vector<16x16x4xf32>
    %77 = vector.shape_cast %76 : vector<16x16x4xf32> to vector<256x4xf32>
    %78 = arith.truncf %77 : vector<256x4xf32> to vector<256x4xbf16>
    %c0_77 = arith.constant 0 : index
    %c84 = arith.constant 84 : index
    %79 = vector.load %arg13[%c0_77, %c84] : memref<256x216xbf16, #tpu.memory_space<vmem>>, vector<256x4xbf16>
    tpu.vector_store %arg13[%c0_77, %c84], %78 {strides = array<i32>} : memref<256x216xbf16, #tpu.memory_space<vmem>>, vector<256x4xbf16>,
    %c1_78 = arith.constant 1 : index
    %c1_79 = arith.constant 1 : index
    %c0_80 = arith.constant 0 : index
    %80 = vector.load %arg14[%c1_78, %c1_79, %c0_80] : memref<18x18x8xf32, #tpu.memory_space<vmem>>, vector<16x16x4xf32>
    %81 = vector.shape_cast %80 : vector<16x16x4xf32> to vector<256x4xf32>
    %82 = arith.truncf %81 : vector<256x4xf32> to vector<256x4xbf16>
    %c0_81 = arith.constant 0 : index
    %c88 = arith.constant 88 : index
    %83 = vector.load %arg13[%c0_81, %c88] : memref<256x216xbf16, #tpu.memory_space<vmem>>, vector<256x4xbf16>
    tpu.vector_store %arg13[%c0_81, %c88], %82 {strides = array<i32>} : memref<256x216xbf16, #tpu.memory_space<vmem>>, vector<256x4xbf16>,
    %c1_82 = arith.constant 1 : index
    %c2_83 = arith.constant 2 : index
    %c0_84 = arith.constant 0 : index
    %84 = vector.load %arg14[%c1_82, %c2_83, %c0_84] : memref<18x18x8xf32, #tpu.memory_space<vmem>>, vector<16x16x4xf32>
    %85 = vector.shape_cast %84 : vector<16x16x4xf32> to vector<256x4xf32>
    %86 = arith.truncf %85 : vector<256x4xf32> to vector<256x4xbf16>
    %c0_85 = arith.constant 0 : index
    %c92 = arith.constant 92 : index
    %87 = vector.load %arg13[%c0_85, %c92] : memref<256x216xbf16, #tpu.memory_space<vmem>>, vector<256x4xbf16>
    tpu.vector_store %arg13[%c0_85, %c92], %86 {strides = array<i32>} : memref<256x216xbf16, #tpu.memory_space<vmem>>, vector<256x4xbf16>,
    %c2_86 = arith.constant 2 : index
    %c0_87 = arith.constant 0 : index
    %c0_88 = arith.constant 0 : index
    %88 = vector.load %arg14[%c2_86, %c0_87, %c0_88] : memref<18x18x8xf32, #tpu.memory_space<vmem>>, vector<16x16x4xf32>
    %89 = vector.shape_cast %88 : vector<16x16x4xf32> to vector<256x4xf32>
    %90 = arith.truncf %89 : vector<256x4xf32> to vector<256x4xbf16>
    %c0_89 = arith.constant 0 : index
    %c96 = arith.constant 96 : index
    %91 = vector.load %arg13[%c0_89, %c96] : memref<256x216xbf16, #tpu.memory_space<vmem>>, vector<256x4xbf16>
    tpu.vector_store %arg13[%c0_89, %c96], %90 {strides = array<i32>} : memref<256x216xbf16, #tpu.memory_space<vmem>>, vector<256x4xbf16>,
    %c2_90 = arith.constant 2 : index
    %c1_91 = arith.constant 1 : index
    %c0_92 = arith.constant 0 : index
    %92 = vector.load %arg14[%c2_90, %c1_91, %c0_92] : memref<18x18x8xf32, #tpu.memory_space<vmem>>, vector<16x16x4xf32>
    %93 = vector.shape_cast %92 : vector<16x16x4xf32> to vector<256x4xf32>
    %94 = arith.truncf %93 : vector<256x4xf32> to vector<256x4xbf16>
    %c0_93 = arith.constant 0 : index
    %c100 = arith.constant 100 : index
    %95 = vector.load %arg13[%c0_93, %c100] : memref<256x216xbf16, #tpu.memory_space<vmem>>, vector<256x4xbf16>
    tpu.vector_store %arg13[%c0_93, %c100], %94 {strides = array<i32>} : memref<256x216xbf16, #tpu.memory_space<vmem>>, vector<256x4xbf16>,
    %c2_94 = arith.constant 2 : index
    %c2_95 = arith.constant 2 : index
    %c0_96 = arith.constant 0 : index
    %96 = vector.load %arg14[%c2_94, %c2_95, %c0_96] : memref<18x18x8xf32, #tpu.memory_space<vmem>>, vector<16x16x4xf32>
    %97 = vector.shape_cast %96 : vector<16x16x4xf32> to vector<256x4xf32>
    %98 = arith.truncf %97 : vector<256x4xf32> to vector<256x4xbf16>
    %c0_97 = arith.constant 0 : index
    %c104 = arith.constant 104 : index
    %99 = vector.load %arg13[%c0_97, %c104] : memref<256x216xbf16, #tpu.memory_space<vmem>>, vector<256x4xbf16>
    tpu.vector_store %arg13[%c0_97, %c104], %98 {strides = array<i32>} : memref<256x216xbf16, #tpu.memory_space<vmem>>, vector<256x4xbf16>,
    %c0_98 = arith.constant 0 : index
    %c0_99 = arith.constant 0 : index
    %100 = vector.load %arg13[%c0_98, %c0_99] : memref<256x216xbf16, #tpu.memory_space<vmem>>, vector<256x108xbf16>
    %c0_100 = arith.constant 0 : index
    %c0_101 = arith.constant 0 : index
    %101 = vector.load %arg4[%c0_100, %c0_101] : memref<108x4xbf16, #tpu.memory_space<vmem>>, vector<108x4xbf16>
    %cst_102 = arith.constant dense<0.000000e+00> : vector<256x4xf32>
    %102 = tpu.matmul %100, %101, %cst_102 {dimension_numbers = #tpu.dot_dimension_numbers<[1], [0], [0], [1], [0, 0, 1, 1], [], []>} : vector<256x108xbf16>, vector<108x4xbf16>, vector<256x4xf32> -> vector<256x4xf32>
    %c0_103 = arith.constant 0 : index
    %c0_104 = arith.constant 0 : index
    %103 = vector.load %arg5[%c0_103, %c0_104] : memref<1x4xf32, #tpu.memory_space<vmem>>, vector<1x4xf32>
    %104 = vector.broadcast %103 : vector<1x4xf32> to vector<256x4xf32>
    %105 = arith.addf %102, %104 : vector<256x4xf32>
    %cst_105 = arith.constant 5.000000e-01 : f32
    %106 = vector.broadcast %cst_105 : f32 to vector<256x4xf32>
    %107 = arith.mulf %106, %105 : vector<256x4xf32>
    %108 = arith.mulf %105, %105 : vector<256x4xf32>
    %109 = arith.mulf %108, %105 : vector<256x4xf32>
    %cst_106 = arith.constant 4.471500e-02 : f32
    %110 = vector.broadcast %cst_106 : f32 to vector<256x4xf32>
    %111 = arith.mulf %110, %109 : vector<256x4xf32>
    %112 = arith.addf %105, %111 : vector<256x4xf32>
    %cst_107 = arith.constant 0.797884583 : f32
    %113 = vector.broadcast %cst_107 : f32 to vector<256x4xf32>
    %114 = arith.mulf %113, %112 : vector<256x4xf32>
    %115 = math.tanh %114 : vector<256x4xf32>
    %cst_108 = arith.constant 1.000000e+00 : f32
    %116 = vector.broadcast %cst_108 : f32 to vector<256x4xf32>
    %117 = arith.addf %116, %115 : vector<256x4xf32>
    %118 = arith.mulf %107, %117 : vector<256x4xf32>
    %119 = vector.shape_cast %118 : vector<256x4xf32> to vector<16x16x4xf32>
    %cst_109 = arith.constant 0.000000e+00 : f32
    %120 = vector.broadcast %cst_109 : f32 to vector<18x18x8xf32>
    %c0_110 = arith.constant 0 : index
    %c0_111 = arith.constant 0 : index
    %c0_112 = arith.constant 0 : index
    %121 = vector.load %arg14[%c0_110, %c0_111, %c0_112] : memref<18x18x8xf32, #tpu.memory_space<vmem>>, vector<18x18x8xf32>
    tpu.vector_store %arg14[%c0_110, %c0_111, %c0_112], %120 {strides = array<i32>} : memref<18x18x8xf32, #tpu.memory_space<vmem>>, vector<18x18x8xf32>,
    %c1_113 = arith.constant 1 : index
    %c1_114 = arith.constant 1 : index
    %c0_115 = arith.constant 0 : index
    %122 = vector.load %arg14[%c1_113, %c1_114, %c0_115] : memref<18x18x8xf32, #tpu.memory_space<vmem>>, vector<16x16x4xf32>
    tpu.vector_store %arg14[%c1_113, %c1_114, %c0_115], %119 {strides = array<i32>} : memref<18x18x8xf32, #tpu.memory_space<vmem>>, vector<16x16x4xf32>,
    %c0_116 = arith.constant 0 : index
    %c0_117 = arith.constant 0 : index
    %c0_118 = arith.constant 0 : index
    %123 = vector.load %arg14[%c0_116, %c0_117, %c0_118] : memref<18x18x8xf32, #tpu.memory_space<vmem>>, vector<16x16x4xf32>
    %124 = vector.shape_cast %123 : vector<16x16x4xf32> to vector<256x4xf32>
    %125 = arith.truncf %124 : vector<256x4xf32> to vector<256x4xbf16>
    %c0_119 = arith.constant 0 : index
    %c108 = arith.constant 108 : index
    %126 = vector.load %arg13[%c0_119, %c108] : memref<256x216xbf16, #tpu.memory_space<vmem>>, vector<256x4xbf16>
    tpu.vector_store %arg13[%c0_119, %c108], %125 {strides = array<i32>} : memref<256x216xbf16, #tpu.memory_space<vmem>>, vector<256x4xbf16>,
    %c0_120 = arith.constant 0 : index
    %c1_121 = arith.constant 1 : index
    %c0_122 = arith.constant 0 : index
    %127 = vector.load %arg14[%c0_120, %c1_121, %c0_122] : memref<18x18x8xf32, #tpu.memory_space<vmem>>, vector<16x16x4xf32>
    %128 = vector.shape_cast %127 : vector<16x16x4xf32> to vector<256x4xf32>
    %129 = arith.truncf %128 : vector<256x4xf32> to vector<256x4xbf16>
    %c0_123 = arith.constant 0 : index
    %c112 = arith.constant 112 : index
    %130 = vector.load %arg13[%c0_123, %c112] : memref<256x216xbf16, #tpu.memory_space<vmem>>, vector<256x4xbf16>
    tpu.vector_store %arg13[%c0_123, %c112], %129 {strides = array<i32>} : memref<256x216xbf16, #tpu.memory_space<vmem>>, vector<256x4xbf16>,
    %c0_124 = arith.constant 0 : index
    %c2_125 = arith.constant 2 : index
    %c0_126 = arith.constant 0 : index
    %131 = vector.load %arg14[%c0_124, %c2_125, %c0_126] : memref<18x18x8xf32, #tpu.memory_space<vmem>>, vector<16x16x4xf32>
    %132 = vector.shape_cast %131 : vector<16x16x4xf32> to vector<256x4xf32>
    %133 = arith.truncf %132 : vector<256x4xf32> to vector<256x4xbf16>
    %c0_127 = arith.constant 0 : index
    %c116 = arith.constant 116 : index
    %134 = vector.load %arg13[%c0_127, %c116] : memref<256x216xbf16, #tpu.memory_space<vmem>>, vector<256x4xbf16>
    tpu.vector_store %arg13[%c0_127, %c116], %133 {strides = array<i32>} : memref<256x216xbf16, #tpu.memory_space<vmem>>, vector<256x4xbf16>,
    %c1_128 = arith.constant 1 : index
    %c0_129 = arith.constant 0 : index
    %c0_130 = arith.constant 0 : index
    %135 = vector.load %arg14[%c1_128, %c0_129, %c0_130] : memref<18x18x8xf32, #tpu.memory_space<vmem>>, vector<16x16x4xf32>
    %136 = vector.shape_cast %135 : vector<16x16x4xf32> to vector<256x4xf32>
    %137 = arith.truncf %136 : vector<256x4xf32> to vector<256x4xbf16>
    %c0_131 = arith.constant 0 : index
    %c120 = arith.constant 120 : index
    %138 = vector.load %arg13[%c0_131, %c120] : memref<256x216xbf16, #tpu.memory_space<vmem>>, vector<256x4xbf16>
    tpu.vector_store %arg13[%c0_131, %c120], %137 {strides = array<i32>} : memref<256x216xbf16, #tpu.memory_space<vmem>>, vector<256x4xbf16>,
    %c1_132 = arith.constant 1 : index
    %c1_133 = arith.constant 1 : index
    %c0_134 = arith.constant 0 : index
    %139 = vector.load %arg14[%c1_132, %c1_133, %c0_134] : memref<18x18x8xf32, #tpu.memory_space<vmem>>, vector<16x16x4xf32>
    %140 = vector.shape_cast %139 : vector<16x16x4xf32> to vector<256x4xf32>
    %141 = arith.truncf %140 : vector<256x4xf32> to vector<256x4xbf16>
    %c0_135 = arith.constant 0 : index
    %c124 = arith.constant 124 : index
    %142 = vector.load %arg13[%c0_135, %c124] : memref<256x216xbf16, #tpu.memory_space<vmem>>, vector<256x4xbf16>
    tpu.vector_store %arg13[%c0_135, %c124], %141 {strides = array<i32>} : memref<256x216xbf16, #tpu.memory_space<vmem>>, vector<256x4xbf16>,
    %c1_136 = arith.constant 1 : index
    %c2_137 = arith.constant 2 : index
    %c0_138 = arith.constant 0 : index
    %143 = vector.load %arg14[%c1_136, %c2_137, %c0_138] : memref<18x18x8xf32, #tpu.memory_space<vmem>>, vector<16x16x4xf32>
    %144 = vector.shape_cast %143 : vector<16x16x4xf32> to vector<256x4xf32>
    %145 = arith.truncf %144 : vector<256x4xf32> to vector<256x4xbf16>
    %c0_139 = arith.constant 0 : index
    %c128 = arith.constant 128 : index
    %146 = vector.load %arg13[%c0_139, %c128] : memref<256x216xbf16, #tpu.memory_space<vmem>>, vector<256x4xbf16>
    tpu.vector_store %arg13[%c0_139, %c128], %145 {strides = array<i32>} : memref<256x216xbf16, #tpu.memory_space<vmem>>, vector<256x4xbf16>,
    %c2_140 = arith.constant 2 : index
    %c0_141 = arith.constant 0 : index
    %c0_142 = arith.constant 0 : index
    %147 = vector.load %arg14[%c2_140, %c0_141, %c0_142] : memref<18x18x8xf32, #tpu.memory_space<vmem>>, vector<16x16x4xf32>
    %148 = vector.shape_cast %147 : vector<16x16x4xf32> to vector<256x4xf32>
    %149 = arith.truncf %148 : vector<256x4xf32> to vector<256x4xbf16>
    %c0_143 = arith.constant 0 : index
    %c132 = arith.constant 132 : index
    %150 = vector.load %arg13[%c0_143, %c132] : memref<256x216xbf16, #tpu.memory_space<vmem>>, vector<256x4xbf16>
    tpu.vector_store %arg13[%c0_143, %c132], %149 {strides = array<i32>} : memref<256x216xbf16, #tpu.memory_space<vmem>>, vector<256x4xbf16>,
    %c2_144 = arith.constant 2 : index
    %c1_145 = arith.constant 1 : index
    %c0_146 = arith.constant 0 : index
    %151 = vector.load %arg14[%c2_144, %c1_145, %c0_146] : memref<18x18x8xf32, #tpu.memory_space<vmem>>, vector<16x16x4xf32>
    %152 = vector.shape_cast %151 : vector<16x16x4xf32> to vector<256x4xf32>
    %153 = arith.truncf %152 : vector<256x4xf32> to vector<256x4xbf16>
    %c0_147 = arith.constant 0 : index
    %c136 = arith.constant 136 : index
    %154 = vector.load %arg13[%c0_147, %c136] : memref<256x216xbf16, #tpu.memory_space<vmem>>, vector<256x4xbf16>
    tpu.vector_store %arg13[%c0_147, %c136], %153 {strides = array<i32>} : memref<256x216xbf16, #tpu.memory_space<vmem>>, vector<256x4xbf16>,
    %c2_148 = arith.constant 2 : index
    %c2_149 = arith.constant 2 : index
    %c0_150 = arith.constant 0 : index
    %155 = vector.load %arg14[%c2_148, %c2_149, %c0_150] : memref<18x18x8xf32, #tpu.memory_space<vmem>>, vector<16x16x4xf32>
    %156 = vector.shape_cast %155 : vector<16x16x4xf32> to vector<256x4xf32>
    %157 = arith.truncf %156 : vector<256x4xf32> to vector<256x4xbf16>
    %c0_151 = arith.constant 0 : index
    %c140 = arith.constant 140 : index
    %158 = vector.load %arg13[%c0_151, %c140] : memref<256x216xbf16, #tpu.memory_space<vmem>>, vector<256x4xbf16>
    tpu.vector_store %arg13[%c0_151, %c140], %157 {strides = array<i32>} : memref<256x216xbf16, #tpu.memory_space<vmem>>, vector<256x4xbf16>,
    %c0_152 = arith.constant 0 : index
    %c0_153 = arith.constant 0 : index
    %159 = vector.load %arg13[%c0_152, %c0_153] : memref<256x216xbf16, #tpu.memory_space<vmem>>, vector<256x144xbf16>
    %c0_154 = arith.constant 0 : index
    %c0_155 = arith.constant 0 : index
    %160 = vector.load %arg6[%c0_154, %c0_155] : memref<144x4xbf16, #tpu.memory_space<vmem>>, vector<144x4xbf16>
    %cst_156 = arith.constant dense<0.000000e+00> : vector<256x4xf32>
    %161 = tpu.matmul %159, %160, %cst_156 {dimension_numbers = #tpu.dot_dimension_numbers<[1], [0], [0], [1], [0, 0, 1, 1], [], []>} : vector<256x144xbf16>, vector<144x4xbf16>, vector<256x4xf32> -> vector<256x4xf32>
    %c0_157 = arith.constant 0 : index
    %c0_158 = arith.constant 0 : index
    %162 = vector.load %arg7[%c0_157, %c0_158] : memref<1x4xf32, #tpu.memory_space<vmem>>, vector<1x4xf32>
    %163 = vector.broadcast %162 : vector<1x4xf32> to vector<256x4xf32>
    %164 = arith.addf %161, %163 : vector<256x4xf32>
    %cst_159 = arith.constant 5.000000e-01 : f32
    %165 = vector.broadcast %cst_159 : f32 to vector<256x4xf32>
    %166 = arith.mulf %165, %164 : vector<256x4xf32>
    %167 = arith.mulf %164, %164 : vector<256x4xf32>
    %168 = arith.mulf %167, %164 : vector<256x4xf32>
    %cst_160 = arith.constant 4.471500e-02 : f32
    %169 = vector.broadcast %cst_160 : f32 to vector<256x4xf32>
    %170 = arith.mulf %169, %168 : vector<256x4xf32>
    %171 = arith.addf %164, %170 : vector<256x4xf32>
    %cst_161 = arith.constant 0.797884583 : f32
    %172 = vector.broadcast %cst_161 : f32 to vector<256x4xf32>
    %173 = arith.mulf %172, %171 : vector<256x4xf32>
    %174 = math.tanh %173 : vector<256x4xf32>
    %cst_162 = arith.constant 1.000000e+00 : f32
    %175 = vector.broadcast %cst_162 : f32 to vector<256x4xf32>
    %176 = arith.addf %175, %174 : vector<256x4xf32>
    %177 = arith.mulf %166, %176 : vector<256x4xf32>
    %178 = vector.shape_cast %177 : vector<256x4xf32> to vector<16x16x4xf32>
    %cst_163 = arith.constant 0.000000e+00 : f32
    %179 = vector.broadcast %cst_163 : f32 to vector<18x18x8xf32>
    %c0_164 = arith.constant 0 : index
    %c0_165 = arith.constant 0 : index
    %c0_166 = arith.constant 0 : index
    %180 = vector.load %arg14[%c0_164, %c0_165, %c0_166] : memref<18x18x8xf32, #tpu.memory_space<vmem>>, vector<18x18x8xf32>
    tpu.vector_store %arg14[%c0_164, %c0_165, %c0_166], %179 {strides = array<i32>} : memref<18x18x8xf32, #tpu.memory_space<vmem>>, vector<18x18x8xf32>,
    %c1_167 = arith.constant 1 : index
    %c1_168 = arith.constant 1 : index
    %c0_169 = arith.constant 0 : index
    %181 = vector.load %arg14[%c1_167, %c1_168, %c0_169] : memref<18x18x8xf32, #tpu.memory_space<vmem>>, vector<16x16x4xf32>
    tpu.vector_store %arg14[%c1_167, %c1_168, %c0_169], %178 {strides = array<i32>} : memref<18x18x8xf32, #tpu.memory_space<vmem>>, vector<16x16x4xf32>,
    %c0_170 = arith.constant 0 : index
    %c0_171 = arith.constant 0 : index
    %c0_172 = arith.constant 0 : index
    %182 = vector.load %arg14[%c0_170, %c0_171, %c0_172] : memref<18x18x8xf32, #tpu.memory_space<vmem>>, vector<16x16x4xf32>
    %183 = vector.shape_cast %182 : vector<16x16x4xf32> to vector<256x4xf32>
    %184 = arith.truncf %183 : vector<256x4xf32> to vector<256x4xbf16>
    %c0_173 = arith.constant 0 : index
    %c144 = arith.constant 144 : index
    %185 = vector.load %arg13[%c0_173, %c144] : memref<256x216xbf16, #tpu.memory_space<vmem>>, vector<256x4xbf16>
    tpu.vector_store %arg13[%c0_173, %c144], %184 {strides = array<i32>} : memref<256x216xbf16, #tpu.memory_space<vmem>>, vector<256x4xbf16>,
    %c0_174 = arith.constant 0 : index
    %c1_175 = arith.constant 1 : index
    %c0_176 = arith.constant 0 : index
    %186 = vector.load %arg14[%c0_174, %c1_175, %c0_176] : memref<18x18x8xf32, #tpu.memory_space<vmem>>, vector<16x16x4xf32>
    %187 = vector.shape_cast %186 : vector<16x16x4xf32> to vector<256x4xf32>
    %188 = arith.truncf %187 : vector<256x4xf32> to vector<256x4xbf16>
    %c0_177 = arith.constant 0 : index
    %c148 = arith.constant 148 : index
    %189 = vector.load %arg13[%c0_177, %c148] : memref<256x216xbf16, #tpu.memory_space<vmem>>, vector<256x4xbf16>
    tpu.vector_store %arg13[%c0_177, %c148], %188 {strides = array<i32>} : memref<256x216xbf16, #tpu.memory_space<vmem>>, vector<256x4xbf16>,
    %c0_178 = arith.constant 0 : index
    %c2_179 = arith.constant 2 : index
    %c0_180 = arith.constant 0 : index
    %190 = vector.load %arg14[%c0_178, %c2_179, %c0_180] : memref<18x18x8xf32, #tpu.memory_space<vmem>>, vector<16x16x4xf32>
    %191 = vector.shape_cast %190 : vector<16x16x4xf32> to vector<256x4xf32>
    %192 = arith.truncf %191 : vector<256x4xf32> to vector<256x4xbf16>
    %c0_181 = arith.constant 0 : index
    %c152 = arith.constant 152 : index
    %193 = vector.load %arg13[%c0_181, %c152] : memref<256x216xbf16, #tpu.memory_space<vmem>>, vector<256x4xbf16>
    tpu.vector_store %arg13[%c0_181, %c152], %192 {strides = array<i32>} : memref<256x216xbf16, #tpu.memory_space<vmem>>, vector<256x4xbf16>,
    %c1_182 = arith.constant 1 : index
    %c0_183 = arith.constant 0 : index
    %c0_184 = arith.constant 0 : index
    %194 = vector.load %arg14[%c1_182, %c0_183, %c0_184] : memref<18x18x8xf32, #tpu.memory_space<vmem>>, vector<16x16x4xf32>
    %195 = vector.shape_cast %194 : vector<16x16x4xf32> to vector<256x4xf32>
    %196 = arith.truncf %195 : vector<256x4xf32> to vector<256x4xbf16>
    %c0_185 = arith.constant 0 : index
    %c156 = arith.constant 156 : index
    %197 = vector.load %arg13[%c0_185, %c156] : memref<256x216xbf16, #tpu.memory_space<vmem>>, vector<256x4xbf16>
    tpu.vector_store %arg13[%c0_185, %c156], %196 {strides = array<i32>} : memref<256x216xbf16, #tpu.memory_space<vmem>>, vector<256x4xbf16>,
    %c1_186 = arith.constant 1 : index
    %c1_187 = arith.constant 1 : index
    %c0_188 = arith.constant 0 : index
    %198 = vector.load %arg14[%c1_186, %c1_187, %c0_188] : memref<18x18x8xf32, #tpu.memory_space<vmem>>, vector<16x16x4xf32>
    %199 = vector.shape_cast %198 : vector<16x16x4xf32> to vector<256x4xf32>
    %200 = arith.truncf %199 : vector<256x4xf32> to vector<256x4xbf16>
    %c0_189 = arith.constant 0 : index
    %c160 = arith.constant 160 : index
    %201 = vector.load %arg13[%c0_189, %c160] : memref<256x216xbf16, #tpu.memory_space<vmem>>, vector<256x4xbf16>
    tpu.vector_store %arg13[%c0_189, %c160], %200 {strides = array<i32>} : memref<256x216xbf16, #tpu.memory_space<vmem>>, vector<256x4xbf16>,
    %c1_190 = arith.constant 1 : index
    %c2_191 = arith.constant 2 : index
    %c0_192 = arith.constant 0 : index
    %202 = vector.load %arg14[%c1_190, %c2_191, %c0_192] : memref<18x18x8xf32, #tpu.memory_space<vmem>>, vector<16x16x4xf32>
    %203 = vector.shape_cast %202 : vector<16x16x4xf32> to vector<256x4xf32>
    %204 = arith.truncf %203 : vector<256x4xf32> to vector<256x4xbf16>
    %c0_193 = arith.constant 0 : index
    %c164 = arith.constant 164 : index
    %205 = vector.load %arg13[%c0_193, %c164] : memref<256x216xbf16, #tpu.memory_space<vmem>>, vector<256x4xbf16>
    tpu.vector_store %arg13[%c0_193, %c164], %204 {strides = array<i32>} : memref<256x216xbf16, #tpu.memory_space<vmem>>, vector<256x4xbf16>,
    %c2_194 = arith.constant 2 : index
    %c0_195 = arith.constant 0 : index
    %c0_196 = arith.constant 0 : index
    %206 = vector.load %arg14[%c2_194, %c0_195, %c0_196] : memref<18x18x8xf32, #tpu.memory_space<vmem>>, vector<16x16x4xf32>
    %207 = vector.shape_cast %206 : vector<16x16x4xf32> to vector<256x4xf32>
    %208 = arith.truncf %207 : vector<256x4xf32> to vector<256x4xbf16>
    %c0_197 = arith.constant 0 : index
    %c168 = arith.constant 168 : index
    %209 = vector.load %arg13[%c0_197, %c168] : memref<256x216xbf16, #tpu.memory_space<vmem>>, vector<256x4xbf16>
    tpu.vector_store %arg13[%c0_197, %c168], %208 {strides = array<i32>} : memref<256x216xbf16, #tpu.memory_space<vmem>>, vector<256x4xbf16>,
    %c2_198 = arith.constant 2 : index
    %c1_199 = arith.constant 1 : index
    %c0_200 = arith.constant 0 : index
    %210 = vector.load %arg14[%c2_198, %c1_199, %c0_200] : memref<18x18x8xf32, #tpu.memory_space<vmem>>, vector<16x16x4xf32>
    %211 = vector.shape_cast %210 : vector<16x16x4xf32> to vector<256x4xf32>
    %212 = arith.truncf %211 : vector<256x4xf32> to vector<256x4xbf16>
    %c0_201 = arith.constant 0 : index
    %c172 = arith.constant 172 : index
    %213 = vector.load %arg13[%c0_201, %c172] : memref<256x216xbf16, #tpu.memory_space<vmem>>, vector<256x4xbf16>
    tpu.vector_store %arg13[%c0_201, %c172], %212 {strides = array<i32>} : memref<256x216xbf16, #tpu.memory_space<vmem>>, vector<256x4xbf16>,
    %c2_202 = arith.constant 2 : index
    %c2_203 = arith.constant 2 : index
    %c0_204 = arith.constant 0 : index
    %214 = vector.load %arg14[%c2_202, %c2_203, %c0_204] : memref<18x18x8xf32, #tpu.memory_space<vmem>>, vector<16x16x4xf32>
    %215 = vector.shape_cast %214 : vector<16x16x4xf32> to vector<256x4xf32>
    %216 = arith.truncf %215 : vector<256x4xf32> to vector<256x4xbf16>
    %c0_205 = arith.constant 0 : index
    %c176 = arith.constant 176 : index
    %217 = vector.load %arg13[%c0_205, %c176] : memref<256x216xbf16, #tpu.memory_space<vmem>>, vector<256x4xbf16>
    tpu.vector_store %arg13[%c0_205, %c176], %216 {strides = array<i32>} : memref<256x216xbf16, #tpu.memory_space<vmem>>, vector<256x4xbf16>,
    %c0_206 = arith.constant 0 : index
    %c0_207 = arith.constant 0 : index
    %218 = vector.load %arg13[%c0_206, %c0_207] : memref<256x216xbf16, #tpu.memory_space<vmem>>, vector<256x180xbf16>
    %c0_208 = arith.constant 0 : index
    %c0_209 = arith.constant 0 : index
    %219 = vector.load %arg8[%c0_208, %c0_209] : memref<180x4xbf16, #tpu.memory_space<vmem>>, vector<180x4xbf16>
    %cst_210 = arith.constant dense<0.000000e+00> : vector<256x4xf32>
    %220 = tpu.matmul %218, %219, %cst_210 {dimension_numbers = #tpu.dot_dimension_numbers<[1], [0], [0], [1], [0, 0, 1, 1], [], []>} : vector<256x180xbf16>, vector<180x4xbf16>, vector<256x4xf32> -> vector<256x4xf32>
    %c0_211 = arith.constant 0 : index
    %c0_212 = arith.constant 0 : index
    %221 = vector.load %arg9[%c0_211, %c0_212] : memref<1x4xf32, #tpu.memory_space<vmem>>, vector<1x4xf32>
    %222 = vector.broadcast %221 : vector<1x4xf32> to vector<256x4xf32>
    %223 = arith.addf %220, %222 : vector<256x4xf32>
    %cst_213 = arith.constant 5.000000e-01 : f32
    %224 = vector.broadcast %cst_213 : f32 to vector<256x4xf32>
    %225 = arith.mulf %224, %223 : vector<256x4xf32>
    %226 = arith.mulf %223, %223 : vector<256x4xf32>
    %227 = arith.mulf %226, %223 : vector<256x4xf32>
    %cst_214 = arith.constant 4.471500e-02 : f32
    %228 = vector.broadcast %cst_214 : f32 to vector<256x4xf32>
    %229 = arith.mulf %228, %227 : vector<256x4xf32>
    %230 = arith.addf %223, %229 : vector<256x4xf32>
    %cst_215 = arith.constant 0.797884583 : f32
    %231 = vector.broadcast %cst_215 : f32 to vector<256x4xf32>
    %232 = arith.mulf %231, %230 : vector<256x4xf32>
    %233 = math.tanh %232 : vector<256x4xf32>
    %cst_216 = arith.constant 1.000000e+00 : f32
    %234 = vector.broadcast %cst_216 : f32 to vector<256x4xf32>
    %235 = arith.addf %234, %233 : vector<256x4xf32>
    %236 = arith.mulf %225, %235 : vector<256x4xf32>
    %237 = vector.shape_cast %236 : vector<256x4xf32> to vector<16x16x4xf32>
    %cst_217 = arith.constant 0.000000e+00 : f32
    %238 = vector.broadcast %cst_217 : f32 to vector<18x18x8xf32>
    %c0_218 = arith.constant 0 : index
    %c0_219 = arith.constant 0 : index
    %c0_220 = arith.constant 0 : index
    %239 = vector.load %arg14[%c0_218, %c0_219, %c0_220] : memref<18x18x8xf32, #tpu.memory_space<vmem>>, vector<18x18x8xf32>
    tpu.vector_store %arg14[%c0_218, %c0_219, %c0_220], %238 {strides = array<i32>} : memref<18x18x8xf32, #tpu.memory_space<vmem>>, vector<18x18x8xf32>,
    %c1_221 = arith.constant 1 : index
    %c1_222 = arith.constant 1 : index
    %c0_223 = arith.constant 0 : index
    %240 = vector.load %arg14[%c1_221, %c1_222, %c0_223] : memref<18x18x8xf32, #tpu.memory_space<vmem>>, vector<16x16x4xf32>
    tpu.vector_store %arg14[%c1_221, %c1_222, %c0_223], %237 {strides = array<i32>} : memref<18x18x8xf32, #tpu.memory_space<vmem>>, vector<16x16x4xf32>,
    %c0_224 = arith.constant 0 : index
    %c0_225 = arith.constant 0 : index
    %c0_226 = arith.constant 0 : index
    %241 = vector.load %arg14[%c0_224, %c0_225, %c0_226] : memref<18x18x8xf32, #tpu.memory_space<vmem>>, vector<16x16x4xf32>
    %242 = vector.shape_cast %241 : vector<16x16x4xf32> to vector<256x4xf32>
    %243 = arith.truncf %242 : vector<256x4xf32> to vector<256x4xbf16>
    %c0_227 = arith.constant 0 : index
    %c180 = arith.constant 180 : index
    %244 = vector.load %arg13[%c0_227, %c180] : memref<256x216xbf16, #tpu.memory_space<vmem>>, vector<256x4xbf16>
    tpu.vector_store %arg13[%c0_227, %c180], %243 {strides = array<i32>} : memref<256x216xbf16, #tpu.memory_space<vmem>>, vector<256x4xbf16>,
    %c0_228 = arith.constant 0 : index
    %c1_229 = arith.constant 1 : index
    %c0_230 = arith.constant 0 : index
    %245 = vector.load %arg14[%c0_228, %c1_229, %c0_230] : memref<18x18x8xf32, #tpu.memory_space<vmem>>, vector<16x16x4xf32>
    %246 = vector.shape_cast %245 : vector<16x16x4xf32> to vector<256x4xf32>
    %247 = arith.truncf %246 : vector<256x4xf32> to vector<256x4xbf16>
    %c0_231 = arith.constant 0 : index
    %c184 = arith.constant 184 : index
    %248 = vector.load %arg13[%c0_231, %c184] : memref<256x216xbf16, #tpu.memory_space<vmem>>, vector<256x4xbf16>
    tpu.vector_store %arg13[%c0_231, %c184], %247 {strides = array<i32>} : memref<256x216xbf16, #tpu.memory_space<vmem>>, vector<256x4xbf16>,
    %c0_232 = arith.constant 0 : index
    %c2_233 = arith.constant 2 : index
    %c0_234 = arith.constant 0 : index
    %249 = vector.load %arg14[%c0_232, %c2_233, %c0_234] : memref<18x18x8xf32, #tpu.memory_space<vmem>>, vector<16x16x4xf32>
    %250 = vector.shape_cast %249 : vector<16x16x4xf32> to vector<256x4xf32>
    %251 = arith.truncf %250 : vector<256x4xf32> to vector<256x4xbf16>
    %c0_235 = arith.constant 0 : index
    %c188 = arith.constant 188 : index
    %252 = vector.load %arg13[%c0_235, %c188] : memref<256x216xbf16, #tpu.memory_space<vmem>>, vector<256x4xbf16>
    tpu.vector_store %arg13[%c0_235, %c188], %251 {strides = array<i32>} : memref<256x216xbf16, #tpu.memory_space<vmem>>, vector<256x4xbf16>,
    %c1_236 = arith.constant 1 : index
    %c0_237 = arith.constant 0 : index
    %c0_238 = arith.constant 0 : index
    %253 = vector.load %arg14[%c1_236, %c0_237, %c0_238] : memref<18x18x8xf32, #tpu.memory_space<vmem>>, vector<16x16x4xf32>
    %254 = vector.shape_cast %253 : vector<16x16x4xf32> to vector<256x4xf32>
    %255 = arith.truncf %254 : vector<256x4xf32> to vector<256x4xbf16>
    %c0_239 = arith.constant 0 : index
    %c192 = arith.constant 192 : index
    %256 = vector.load %arg13[%c0_239, %c192] : memref<256x216xbf16, #tpu.memory_space<vmem>>, vector<256x4xbf16>
    tpu.vector_store %arg13[%c0_239, %c192], %255 {strides = array<i32>} : memref<256x216xbf16, #tpu.memory_space<vmem>>, vector<256x4xbf16>,
    %c1_240 = arith.constant 1 : index
    %c1_241 = arith.constant 1 : index
    %c0_242 = arith.constant 0 : index
    %257 = vector.load %arg14[%c1_240, %c1_241, %c0_242] : memref<18x18x8xf32, #tpu.memory_space<vmem>>, vector<16x16x4xf32>
    %258 = vector.shape_cast %257 : vector<16x16x4xf32> to vector<256x4xf32>
    %259 = arith.truncf %258 : vector<256x4xf32> to vector<256x4xbf16>
    %c0_243 = arith.constant 0 : index
    %c196 = arith.constant 196 : index
    %260 = vector.load %arg13[%c0_243, %c196] : memref<256x216xbf16, #tpu.memory_space<vmem>>, vector<256x4xbf16>
    tpu.vector_store %arg13[%c0_243, %c196], %259 {strides = array<i32>} : memref<256x216xbf16, #tpu.memory_space<vmem>>, vector<256x4xbf16>,
    %c1_244 = arith.constant 1 : index
    %c2_245 = arith.constant 2 : index
    %c0_246 = arith.constant 0 : index
    %261 = vector.load %arg14[%c1_244, %c2_245, %c0_246] : memref<18x18x8xf32, #tpu.memory_space<vmem>>, vector<16x16x4xf32>
    %262 = vector.shape_cast %261 : vector<16x16x4xf32> to vector<256x4xf32>
    %263 = arith.truncf %262 : vector<256x4xf32> to vector<256x4xbf16>
    %c0_247 = arith.constant 0 : index
    %c200 = arith.constant 200 : index
    %264 = vector.load %arg13[%c0_247, %c200] : memref<256x216xbf16, #tpu.memory_space<vmem>>, vector<256x4xbf16>
    tpu.vector_store %arg13[%c0_247, %c200], %263 {strides = array<i32>} : memref<256x216xbf16, #tpu.memory_space<vmem>>, vector<256x4xbf16>,
    %c2_248 = arith.constant 2 : index
    %c0_249 = arith.constant 0 : index
    %c0_250 = arith.constant 0 : index
    %265 = vector.load %arg14[%c2_248, %c0_249, %c0_250] : memref<18x18x8xf32, #tpu.memory_space<vmem>>, vector<16x16x4xf32>
    %266 = vector.shape_cast %265 : vector<16x16x4xf32> to vector<256x4xf32>
    %267 = arith.truncf %266 : vector<256x4xf32> to vector<256x4xbf16>
    %c0_251 = arith.constant 0 : index
    %c204 = arith.constant 204 : index
    %268 = vector.load %arg13[%c0_251, %c204] : memref<256x216xbf16, #tpu.memory_space<vmem>>, vector<256x4xbf16>
    tpu.vector_store %arg13[%c0_251, %c204], %267 {strides = array<i32>} : memref<256x216xbf16, #tpu.memory_space<vmem>>, vector<256x4xbf16>,
    %c2_252 = arith.constant 2 : index
    %c1_253 = arith.constant 1 : index
    %c0_254 = arith.constant 0 : index
    %269 = vector.load %arg14[%c2_252, %c1_253, %c0_254] : memref<18x18x8xf32, #tpu.memory_space<vmem>>, vector<16x16x4xf32>
    %270 = vector.shape_cast %269 : vector<16x16x4xf32> to vector<256x4xf32>
    %271 = arith.truncf %270 : vector<256x4xf32> to vector<256x4xbf16>
    %c0_255 = arith.constant 0 : index
    %c208 = arith.constant 208 : index
    %272 = vector.load %arg13[%c0_255, %c208] : memref<256x216xbf16, #tpu.memory_space<vmem>>, vector<256x4xbf16>
    tpu.vector_store %arg13[%c0_255, %c208], %271 {strides = array<i32>} : memref<256x216xbf16, #tpu.memory_space<vmem>>, vector<256x4xbf16>,
    %c2_256 = arith.constant 2 : index
    %c2_257 = arith.constant 2 : index
    %c0_258 = arith.constant 0 : index
    %273 = vector.load %arg14[%c2_256, %c2_257, %c0_258] : memref<18x18x8xf32, #tpu.memory_space<vmem>>, vector<16x16x4xf32>
    %274 = vector.shape_cast %273 : vector<16x16x4xf32> to vector<256x4xf32>
    %275 = arith.truncf %274 : vector<256x4xf32> to vector<256x4xbf16>
    %c0_259 = arith.constant 0 : index
    %c212 = arith.constant 212 : index
    %276 = vector.load %arg13[%c0_259, %c212] : memref<256x216xbf16, #tpu.memory_space<vmem>>, vector<256x4xbf16>
    tpu.vector_store %arg13[%c0_259, %c212], %275 {strides = array<i32>} : memref<256x216xbf16, #tpu.memory_space<vmem>>, vector<256x4xbf16>,
    %c0_260 = arith.constant 0 : index
    %c0_261 = arith.constant 0 : index
    %277 = vector.load %arg13[%c0_260, %c0_261] : memref<256x216xbf16, #tpu.memory_space<vmem>>, vector<256x216xbf16>
    %c0_262 = arith.constant 0 : index
    %c0_263 = arith.constant 0 : index
    %278 = vector.load %arg10[%c0_262, %c0_263] : memref<216x8xbf16, #tpu.memory_space<vmem>>, vector<216x8xbf16>
    %cst_264 = arith.constant dense<0.000000e+00> : vector<256x8xf32>
    %279 = tpu.matmul %277, %278, %cst_264 {dimension_numbers = #tpu.dot_dimension_numbers<[1], [0], [0], [1], [0, 0, 1, 1], [], []>} : vector<256x216xbf16>, vector<216x8xbf16>, vector<256x8xf32> -> vector<256x8xf32>
    %c0_265 = arith.constant 0 : index
    %c0_266 = arith.constant 0 : index
    %280 = vector.load %arg11[%c0_265, %c0_266] : memref<1x8xf32, #tpu.memory_space<vmem>>, vector<1x8xf32>
    %281 = vector.broadcast %280 : vector<1x8xf32> to vector<256x8xf32>
    %282 = arith.addf %279, %281 : vector<256x8xf32>
    %283 = vector.shape_cast %282 : vector<256x8xf32> to vector<16x16x8xf32>
    %cst_267 = arith.constant 2.000000e-01 : f32
    %284 = vector.broadcast %cst_267 : f32 to vector<16x16x8xf32>
    %285 = arith.mulf %283, %284 : vector<16x16x8xf32>
    %286 = arith.addf %285, %1 : vector<16x16x8xf32>
    %287 = vector.shape_cast %286 : vector<16x16x8xf32> to vector<1x16x16x8xf32>
    %c0_268 = arith.constant 0 : index
    %c0_269 = arith.constant 0 : index
    %c0_270 = arith.constant 0 : index
    %c0_271 = arith.constant 0 : index
    %288 = vector.load %arg12[%c0_268, %c0_269, %c0_270, %c0_271] : memref<1x16x16x8xf32, #tpu.memory_space<vmem>>, vector<1x16x16x8xf32>
    tpu.vector_store %arg12[%c0_268, %c0_269, %c0_270, %c0_271], %287 {strides = array<i32>} : memref<1x16x16x8xf32, #tpu.memory_space<vmem>>, vector<1x16x16x8xf32>,
    return
  }
  func.func @transform_0(%arg0: i32) -> (i32, i32, i32, i32) {
    %c0_i32 = arith.constant 0 : i32
    %c0_i32_0 = arith.constant 0 : i32
    %c0_i32_1 = arith.constant 0 : i32
    %c0_i32_2 = arith.constant 0 : i32
    return %arg0, %c0_i32, %c0_i32_0, %c0_i32_1 : i32, i32, i32, i32
  }
  func.func @transform_1(%arg0: i32) -> (i32, i32) {
    %c0_i32 = arith.constant 0 : i32
    %c0_i32_0 = arith.constant 0 : i32
    %c0_i32_1 = arith.constant 0 : i32
    return %c0_i32, %c0_i32_0 : i32, i32
  }
  func.func @transform_2(%arg0: i32) -> (i32, i32) {
    %c0_i32 = arith.constant 0 : i32
    %c0_i32_0 = arith.constant 0 : i32
    %c0_i32_1 = arith.constant 0 : i32
    return %c0_i32, %c0_i32_0 : i32, i32
  }
  func.func @transform_3(%arg0: i32) -> (i32, i32) {
    %c0_i32 = arith.constant 0 : i32
    %c0_i32_0 = arith.constant 0 : i32
    %c0_i32_1 = arith.constant 0 : i32
    return %c0_i32, %c0_i32_0 : i32, i32
  }
  func.func @transform_4(%arg0: i32) -> (i32, i32) {
    %c0_i32 = arith.constant 0 : i32
    %c0_i32_0 = arith.constant 0 : i32
    %c0_i32_1 = arith.constant 0 : i32
    return %c0_i32, %c0_i32_0 : i32, i32
  }
  func.func @transform_5(%arg0: i32) -> (i32, i32) {
    %c0_i32 = arith.constant 0 : i32
    %c0_i32_0 = arith.constant 0 : i32
    %c0_i32_1 = arith.constant 0 : i32
    return %c0_i32, %c0_i32_0 : i32, i32
  }
  func.func @transform_6(%arg0: i32) -> (i32, i32) {
    %c0_i32 = arith.constant 0 : i32
    %c0_i32_0 = arith.constant 0 : i32
    %c0_i32_1 = arith.constant 0 : i32
    return %c0_i32, %c0_i32_0 : i32, i32
  }
  func.func @transform_7(%arg0: i32) -> (i32, i32) {
    %c0_i32 = arith.constant 0 : i32
    %c0_i32_0 = arith.constant 0 : i32
    %c0_i32_1 = arith.constant 0 : i32
    return %c0_i32, %c0_i32_0 : i32, i32
  }
  func.func @transform_8(%arg0: i32) -> (i32, i32) {
    %c0_i32 = arith.constant 0 : i32
    %c0_i32_0 = arith.constant 0 : i32
    %c0_i32_1 = arith.constant 0 : i32
    return %c0_i32, %c0_i32_0 : i32, i32
  }
  func.func @transform_9(%arg0: i32) -> (i32, i32) {
    %c0_i32 = arith.constant 0 : i32
    %c0_i32_0 = arith.constant 0 : i32
    %c0_i32_1 = arith.constant 0 : i32
    return %c0_i32, %c0_i32_0 : i32, i32
  }
  func.func @transform_10(%arg0: i32) -> (i32, i32) {
    %c0_i32 = arith.constant 0 : i32
    %c0_i32_0 = arith.constant 0 : i32
    %c0_i32_1 = arith.constant 0 : i32
    return %c0_i32, %c0_i32_0 : i32, i32
  }
  func.func @transform_11(%arg0: i32) -> (i32, i32, i32, i32) {
    %c0_i32 = arith.constant 0 : i32
    %c0_i32_0 = arith.constant 0 : i32
    %c0_i32_1 = arith.constant 0 : i32
    %c0_i32_2 = arith.constant 0 : i32
    return %arg0, %c0_i32, %c0_i32_0, %c0_i32_1 : i32, i32, i32, i32
  }
}

</mosaic_0001>

<bundles_post_ra>
// kernel: rdb5c_forward_nchw.1
= control target key start
LH: loop header
LB: loop body
LE: loop exit
PB: predicated region body
PF: predicated region fallthrough
CT: control target
= control target key end

     0   :  { %s15885_s0 = inlined_call_operand.hbm [shape: f32[2,16,16,8], index: 0, kind: input, shape index: {}]   ;;  %s15886_s1 = inlined_call_operand.hbm [shape: bf16[72,4], index: 1, kind: input, shape index: {}]   ;;  %s15887_s2 = inlined_call_operand.hbm [shape: f32[1,4], index: 2, kind: input, shape index: {}]   ;;  %s15888_s3 = inlined_call_operand.hbm [shape: bf16[108,4], index: 3, kind: input, shape index: {}]   ;;  %s15889_s4 = inlined_call_operand.hbm [shape: f32[1,4], index: 4, kind: input, shape index: {}]   ;;  %s15890_s5 = inlined_call_operand.hbm [shape: bf16[144,4], index: 5, kind: input, shape index: {}]   ;;  %s15891_s6 = inlined_call_operand.hbm [shape: f32[1,4], index: 6, kind: input, shape index: {}]   ;;  %s15892_s7 = inlined_call_operand.hbm [shape: bf16[180,4], index: 7, kind: input, shape index: {}]   ;;  %s15893_s8 = inlined_call_operand.hbm [shape: f32[1,4], index: 8, kind: input, shape index: {}]   ;;  %s15894_s9 = inlined_call_operand.hbm [shape: bf16[216,8], index: 9, kind: input, shape index: {}]   ;;  %s15895_s10 = inlined_call_operand.hbm [shape: f32[1,8], index: 10, kind: input, shape index: {}]   ;;  %s15896_s11 = inlined_call_operand.hbm [shape: f32[2,16,16,8], index: 11, kind: output, shape index: {}]  }
   0x1   :  { %15943 = sst [smem:[#allocation49_spill]] %s15885_s0 }
   0x2   :  { %15944 = sst [smem:[#allocation50_spill]] %s15886_s1 }
   0x3   :  { %15945 = sst [smem:[#allocation51_spill]] %s15896_s11 }
   0x4   :  { %16 = vsyncpa [#allocation5], 0 }
   0x5   :  { %18 = vsyncpa [#allocation5 + $0x1], 0 }
   0x6   :  { %19 = vsyncpa [#allocation8], 0 }
   0x7   :  { %20 = vsyncpa [#allocation11], 0 }
   0x8   :  { %21 = vsyncpa [#allocation14], 0 }
   0x9   :  { %22 = vsyncpa [#allocation17], 0 }
   0xa   :  { %23 = vsyncpa [#allocation20], 0 }
   0xb   :  { %24 = vsyncpa [#allocation6], 0 }
   0xc   :  { %26 = vsyncpa [#allocation6 + $0x1], 0  ;;  %s11020_s17 = smov 0   ;;  %s11022_s18 = smov 0  }
   0xd   :  { %s11024_s19 = smov 0   ;;  %s11026_s20 = smov 0  }
   0xe LB: > { %s10910_s21 = smov [#allocation7]   ;;  %s11041_s23 = sadd.s32 4294967295, %s10908_s20   ;;  %s10908_s20 = sphi %s11026_s20, %s16055_s20   ;;  %s10904_s19 = sphi %s11024_s19, %s16054_s19   ;;  %s10900_s18 = sphi %s11022_s18, %s16053_s18   ;;  %s10896_s17 = sphi %s11020_s17, %s16052_s17  }
   0xf   : > { %s311_s22 = sshll.u32 %s10910_s21, 4  ;;  %p9701_p0 = scmp.ge.s32.totalorder %s10908_s20, 1  ;;  %s11046_s22 = int_to_ptr.vmem [resolvable:$true] %s311_s22 }
  0x10   : > { %p15900_p1 = scmp.eq.s32.totalorder %s11041_s23, 0  ;;  %p299_p2 = scmp.lt.s32.totalorder %s10908_s20, 3 }
  0x11   : > { %s10911_s25 = smov [#allocation10]   ;;  %s10912_s28 = smov [#allocation13]  }
  0x12   : > { %p11048_p3 = pnand %p9701_p0, %p299_p2  ;;  %s335_s26 = sshll.u32 %s10911_s25, 4  ;;  %s11061_s26 = int_to_ptr.vmem [resolvable:$true] %s335_s26 }
  0x13   : > { %s359_s29 = sshll.u32 %s10912_s28, 4  ;;  %s15949_s1 = sld [smem:[#allocation50_spill]]  ;;  %s11063_s29 = int_to_ptr.vmem [resolvable:$true] %s359_s29 }
  0x14   : > { %s15946_s24 = scalar_select %p11048_p3, 1, 0 }
  0x15   : > { %p10064_p5 = pneg %p11048_p3 }
  0x16   : > { %15947 = sst [smem:[#allocation30_spill]] %s15946_s24 }
  0x17   : > { %p11057_p6 = pnand %p10064_p5, %p15900_p1 }
  0x19   : > { %s10512_s13 = scalar_lea.hbm %s15949_s1, 576  ;;  %p11073_p8 = pneg %p11057_p6 }
  0x1a   : > { %p10513_p7 = scmp.ne.s32.totalorder %s15949_s1, %s10512_s13  ;;  %p10519_p11 = scmp.lt.u32.totalorder %s10512_s13, %s15949_s1 }
  0x1c   : > { %p10515_p9 = pnand %p11073_p8, %p10513_p7 }
  0x1e   : > { %p10516_p10 = pneg %p10515_p9 }
  0x20   : > { %p10521_p12 = pnand %p10519_p11, %p10516_p10 }
  0x22   : > { %10524 = shalt.err (!%p10521_p12)
}
  0x23   : > { %s10525_s28 = scalar_lea.vmem %s11046_s22, 576  ;;  %p10533_p5 = scmp.lt.s32.totalorder %s11046_s22, %s11046_s22 }
  0x24   : > { %p10526_p13 = scmp.ne.s32.totalorder %s11046_s22, %s10525_s28  ;;  %p10534_p4 = scmp.lt.s32.totalorder %s10525_s28, %s10525_s28 }
  0x26   : > { %p10528_p0 = pnand %p10526_p13, %p11073_p8  ;;  %p10535_p7 = por %p10534_p4, %p10533_p5 }
  0x28   : > { %p10529_p2 = pneg %p10528_p0 }
  0x2a   : > { %p10536_p9 = pnand %p10535_p7, %p10529_p2 }
  0x2c   : > { %10539 = shalt.err (!%p10536_p9)
}
  0x2d   : > { %s10913_s30 = smov 64   ;;  %s10914_s12 = smov 4  }
  0x2e   : > { %10067 = dma.hbm_to_vmem [thread:$0]  (!%p11057_p6), %s15949_s1, 576, %s11046_s22, [#allocation8], %s10913_s30, %s10913_s30, %s10914_s12  }
  0x2f   : > { %s10540_s25 = scalar_lea.hbm %s15888_s3, 896 }
  0x30   : > { %p10541_p4 = scmp.ne.s32.totalorder %s15888_s3, %s10540_s25  ;;  %p10547_p12 = scmp.lt.u32.totalorder %s10540_s25, %s15888_s3 }
  0x32   : > { %p10543_p10 = pnand %p10541_p4, %p11073_p8 }
  0x34   : > { %p10544_p11 = pneg %p10543_p10 }
  0x36   : > { %p10549_p13 = pnand %p10547_p12, %p10544_p11 }
  0x38   : > { %10552 = shalt.err (!%p10549_p13)
}
  0x39   : > { %s10553_s22 = scalar_lea.vmem %s11061_s26, 896  ;;  %p10561_p7 = scmp.lt.s32.totalorder %s11061_s26, %s11061_s26 }
  0x3a   : > { %p10554_p0 = scmp.ne.s32.totalorder %s11061_s26, %s10553_s22  ;;  %p10562_p9 = scmp.lt.s32.totalorder %s10553_s22, %s10553_s22 }
  0x3c   : > { %p10556_p2 = pnand %p10554_p0, %p11073_p8  ;;  %p10563_p4 = por %p10562_p9, %p10561_p7 }
  0x3e   : > { %p10557_p5 = pneg %p10556_p2 }
  0x40   : > { %p10564_p10 = pnand %p10563_p4, %p10557_p5 }
  0x42   : > { %10567 = shalt.err (!%p10564_p10)
}
  0x43   : > { %10073 = dma.hbm_to_vmem [thread:$0]  (!%p11057_p6), %s15888_s3, 896, %s11061_s26, [#allocation11], %s10913_s30, %s10913_s30, %s10914_s12  }
  0x44   : > { %s10568_s14 = scalar_lea.hbm %s15890_s5, 1152 }
  0x45   : > { %p10569_p11 = scmp.ne.s32.totalorder %s15890_s5, %s10568_s14  ;;  %p10575_p0 = scmp.lt.u32.totalorder %s10568_s14, %s15890_s5 }
  0x47   : > { %p10571_p12 = pnand %p10569_p11, %p11073_p8 }
  0x49   : > { %p10572_p13 = pneg %p10571_p12 }
  0x4b   : > { %p10577_p2 = pnand %p10575_p0, %p10572_p13 }
  0x4d   : > { %10580 = shalt.err (!%p10577_p2)
}
  0x4e   : > { %s10581_s26 = scalar_lea.vmem %s11063_s29, 1152  ;;  %p10589_p4 = scmp.lt.s32.totalorder %s11063_s29, %s11063_s29 }
  0x4f   : > { %p10582_p5 = scmp.ne.s32.totalorder %s11063_s29, %s10581_s26  ;;  %p10590_p10 = scmp.lt.s32.totalorder %s10581_s26, %s10581_s26 }
  0x51   : > { %p10584_p7 = pnand %p10582_p5, %p11073_p8  ;;  %p10591_p11 = por %p10590_p10, %p10589_p4 }
  0x53   : > { %p10585_p9 = pneg %p10584_p7 }
  0x55   : > { %p10592_p12 = pnand %p10591_p11, %p10585_p9 }
  0x57   : > { %10595 = shalt.err (!%p10592_p12)
}
  0x58   : > { %10079 = dma.hbm_to_vmem [thread:$0]  (!%p11057_p6), %s15890_s5, 1152, %s11063_s29, [#allocation14], %s10913_s30, %s10913_s30, %s10914_s12  }
  0x59   : > { %s10915_s11 = smov [#allocation16]   ;;  %s10916_s13 = smov [#allocation19]  }
  0x5a   : > { %s383_s24 = sshll.u32 %s10915_s11, 4  ;;  %s407_s14 = sshll.u32 %s10916_s13, 4  ;;  %s384_s24 = int_to_ptr.vmem [resolvable:$true] %s383_s24  ;;  %s408_s14 = int_to_ptr.vmem [resolvable:$true] %s407_s14 }
  0x5b   : > { %s10596_s25 = scalar_lea.hbm %s15892_s7, 1472 }
  0x5c   : > { %p10597_p13 = scmp.ne.s32.totalorder %s15892_s7, %s10596_s25  ;;  %p10603_p5 = scmp.lt.u32.totalorder %s10596_s25, %s15892_s7 }
  0x5e   : > { %p10599_p0 = pnand %p10597_p13, %p11073_p8 }
  0x60   : > { %p10600_p2 = pneg %p10599_p0 }
  0x62   : > { %p10605_p7 = pnand %p10603_p5, %p10600_p2 }
  0x64   : > { %10608 = shalt.err (!%p10605_p7)
}
  0x65   : > { %s10609_s29 = scalar_lea.vmem %s384_s24, 1472  ;;  %p10617_p11 = scmp.lt.s32.totalorder %s384_s24, %s384_s24 }
  0x66   : > { %p10610_p9 = scmp.ne.s32.totalorder %s384_s24, %s10609_s29  ;;  %p10618_p12 = scmp.lt.s32.totalorder %s10609_s29, %s10609_s29 }
  0x68   : > { %p10612_p4 = pnand %p10610_p9, %p11073_p8  ;;  %p10619_p1 = por %p10618_p12, %p10617_p11 }
  0x6a   : > { %p10613_p10 = pneg %p10612_p4 }
  0x6c   : > { %p10620_p3 = pnand %p10619_p1, %p10613_p10 }
  0x6e   : > { %10623 = shalt.err (!%p10620_p3)
}
  0x6f   : > { %10085 = dma.hbm_to_vmem [thread:$0]  (!%p11057_p6), %s15892_s7, 1472, %s384_s24, [#allocation17], %s10913_s30, %s10913_s30, %s10914_s12  }
  0x70   : > { %s10624_s15 = scalar_lea.hbm %s15894_s9, 1728 }
  0x71   : > { %p10625_p1 = scmp.ne.s32.totalorder %s15894_s9, %s10624_s15  ;;  %p10631_p0 = scmp.lt.u32.totalorder %s10624_s15, %s15894_s9 }
  0x73   : > { %p10627_p3 = pnand %p10625_p1, %p11073_p8 }
  0x75   : > { %p10628_p13 = pneg %p10627_p3 }
  0x77   : > { %p10633_p2 = pnand %p10631_p0, %p10628_p13 }
  0x79   : > { %10636 = shalt.err (!%p10633_p2)
}
  0x7a   : > { %s10637_s22 = scalar_lea.vmem %s408_s14, 1728  ;;  %p10645_p4 = scmp.lt.s32.totalorder %s408_s14, %s408_s14 }
  0x7b   : > { %p10638_p5 = scmp.ne.s32.totalorder %s408_s14, %s10637_s22  ;;  %p10646_p10 = scmp.lt.s32.totalorder %s10637_s22, %s10637_s22 }
  0x7d   : > { %p10640_p7 = pnand %p10638_p5, %p11073_p8  ;;  %p10647_p11 = por %p10646_p10, %p10645_p4 }
  0x7f   : > { %p10641_p9 = pneg %p10640_p7 }
  0x81   : > { %p10648_p12 = pnand %p10647_p11, %p10641_p9 }
  0x83   : > { %10651 = shalt.err (!%p10648_p12)
}
  0x84   : > { %10091 = dma.hbm_to_vmem [thread:$0]  (!%p11057_p6), %s15894_s9, 1728, %s408_s14, [#allocation20], %s10913_s30, %s10913_s30, %s10914_s12  }
  0x85   : > { %s10917_s1 = smov [#allocation9]   ;;  %s10918_s11 = smov [#allocation12]  }
  0x86   : > { %s325_s0 = sshll.u32 %s10917_s1, 4  ;;  %s349_s13 = sshll.u32 %s10918_s11, 4  ;;  %s326_s0 = int_to_ptr.vmem [resolvable:$true] %s325_s0  ;;  %s350_s13 = int_to_ptr.vmem [resolvable:$true] %s349_s13 }
  0x87   : > { %s10652_s25 = scalar_lea.hbm %s15887_s2, 16 }
  0x88   : > { %p10653_p1 = scmp.ne.s32.totalorder %s15887_s2, %s10652_s25  ;;  %p10659_p0 = scmp.lt.u32.totalorder %s10652_s25, %s15887_s2 }
  0x8a   : > { %p10655_p3 = pnand %p10653_p1, %p11073_p8 }
  0x8c   : > { %p10656_p13 = pneg %p10655_p3 }
  0x8e   : > { %p10661_p2 = pnand %p10659_p0, %p10656_p13 }
  0x90   : > { %10664 = shalt.err (!%p10661_p2)
}
  0x91   : > { %s10665_s30 = scalar_lea.vmem %s326_s0, 16  ;;  %s10672_s12 = scalar_lea.vmem %s326_s0, 32 }
  0x92   : > { %p10666_p5 = scmp.ne.s32.totalorder %s326_s0, %s10665_s30  ;;  %p10673_p4 = scmp.lt.s32.totalorder %s326_s0, %s326_s0 }
  0x93   : > { %p10674_p10 = scmp.lt.s32.totalorder %s10672_s12, %s10665_s30 }
  0x94   : > { %p10668_p7 = pnand %p10666_p5, %p11073_p8 }
  0x95   : > { %p10675_p11 = por %p10674_p10, %p10673_p4 }
  0x96   : > { %p10669_p9 = pneg %p10668_p7 }
  0x98   : > { %p10676_p12 = pnand %p10675_p11, %p10669_p9 }
  0x9a   : > { %10679 = shalt.err (!%p10676_p12)
}
  0x9b   : > { %10070 = dma.hbm_to_vmem [thread:$0]  (!%p11057_p6), %s15887_s2, 16, %s326_s0, [#allocation8]  }
  0x9c   : > { %s10680_s15 = scalar_lea.hbm %s15889_s4, 16 }
  0x9d   : > { %p10681_p1 = scmp.ne.s32.totalorder %s15889_s4, %s10680_s15  ;;  %p10687_p0 = scmp.lt.u32.totalorder %s10680_s15, %s15889_s4 }
  0x9f   : > { %p10683_p3 = pnand %p10681_p1, %p11073_p8 }
  0xa1   : > { %p10684_p13 = pneg %p10683_p3 }
  0xa3   : > { %p10689_p2 = pnand %p10687_p0, %p10684_p13 }
  0xa5   : > { %10692 = shalt.err (!%p10689_p2)
}
  0xa6   : > { %s10693_s22 = scalar_lea.vmem %s350_s13, 16  ;;  %s10700_s0 = scalar_lea.vmem %s350_s13, 32 }
  0xa7   : > { %p10694_p5 = scmp.ne.s32.totalorder %s350_s13, %s10693_s22  ;;  %p10701_p4 = scmp.lt.s32.totalorder %s350_s13, %s350_s13 }
  0xa8   : > { %p10702_p10 = scmp.lt.s32.totalorder %s10700_s0, %s10693_s22 }
  0xa9   : > { %p10696_p7 = pnand %p10694_p5, %p11073_p8 }
  0xaa   : > { %p10703_p11 = por %p10702_p10, %p10701_p4 }
  0xab   : > { %p10697_p9 = pneg %p10696_p7 }
  0xad   : > { %p10704_p12 = pnand %p10703_p11, %p10697_p9 }
  0xaf   : > { %10707 = shalt.err (!%p10704_p12)
}
  0xb0   : > { %10076 = dma.hbm_to_vmem [thread:$0]  (!%p11057_p6), %s15889_s4, 16, %s350_s13, [#allocation11]  }
  0xb1   : > { %s10919_s12 = smov [#allocation15]   ;;  %s10920_s29 = smov [#allocation18]  }
  0xb2   : > { %s373_s14 = sshll.u32 %s10919_s12, 4  ;;  %s397_s1 = sshll.u32 %s10920_s29, 4  ;;  %s374_s14 = int_to_ptr.vmem [resolvable:$true] %s373_s14  ;;  %s398_s1 = int_to_ptr.vmem [resolvable:$true] %s397_s1 }
  0xb3   : > { %s10708_s21 = scalar_lea.hbm %s15891_s6, 16 }
  0xb4   : > { %p10709_p1 = scmp.ne.s32.totalorder %s15891_s6, %s10708_s21  ;;  %p10715_p0 = scmp.lt.u32.totalorder %s10708_s21, %s15891_s6 }
  0xb6   : > { %p10711_p3 = pnand %p10709_p1, %p11073_p8 }
  0xb8   : > { %p10712_p13 = pneg %p10711_p3 }
  0xba   : > { %p10717_p2 = pnand %p10715_p0, %p10712_p13 }
  0xbc   : > { %10720 = shalt.err (!%p10717_p2)
}
  0xbd   : > { %s10721_s13 = scalar_lea.vmem %s374_s14, 16  ;;  %s10728_s0 = scalar_lea.vmem %s374_s14, 32 }
  0xbe   : > { %p10722_p5 = scmp.ne.s32.totalorder %s374_s14, %s10721_s13  ;;  %p10729_p4 = scmp.lt.s32.totalorder %s374_s14, %s374_s14 }
  0xbf   : > { %p10730_p10 = scmp.lt.s32.totalorder %s10728_s0, %s10721_s13 }
  0xc0   : > { %p10724_p7 = pnand %p10722_p5, %p11073_p8 }
  0xc1   : > { %p10731_p11 = por %p10730_p10, %p10729_p4 }
  0xc2   : > { %p10725_p9 = pneg %p10724_p7 }
  0xc4   : > { %p10732_p12 = pnand %p10731_p11, %p10725_p9 }
  0xc6   : > { %10735 = shalt.err (!%p10732_p12)
}
  0xc7   : > { %10082 = dma.hbm_to_vmem [thread:$0]  (!%p11057_p6), %s15891_s6, 16, %s374_s14, [#allocation14]  }
  0xc8   : > { %s10736_s11 = scalar_lea.hbm %s15893_s8, 16 }
  0xc9   : > { %p10737_p1 = scmp.ne.s32.totalorder %s15893_s8, %s10736_s11  ;;  %p10743_p0 = scmp.lt.u32.totalorder %s10736_s11, %s15893_s8 }
  0xcb   : > { %p10739_p3 = pnand %p10737_p1, %p11073_p8 }
  0xcd   : > { %p10740_p13 = pneg %p10739_p3 }
  0xcf   : > { %p10745_p2 = pnand %p10743_p0, %p10740_p13 }
  0xd1   : > { %10748 = shalt.err (!%p10745_p2)
}
  0xd2   : > { %s10749_s26 = scalar_lea.vmem %s398_s1, 16  ;;  %s10756_s14 = scalar_lea.vmem %s398_s1, 32 }
  0xd3   : > { %p10750_p5 = scmp.ne.s32.totalorder %s398_s1, %s10749_s26  ;;  %p10757_p4 = scmp.lt.s32.totalorder %s398_s1, %s398_s1 }
  0xd4   : > { %p10758_p10 = scmp.lt.s32.totalorder %s10756_s14, %s10749_s26 }
  0xd5   : > { %p10752_p7 = pnand %p10750_p5, %p11073_p8 }
  0xd6   : > { %p10759_p11 = por %p10758_p10, %p10757_p4 }
  0xd7   : > { %p10753_p9 = pneg %p10752_p7 }
  0xd9   : > { %p10760_p12 = pnand %p10759_p11, %p10753_p9 }
  0xdb   : > { %10763 = shalt.err (!%p10760_p12)
}
  0xdc   : > { %10088 = dma.hbm_to_vmem [thread:$0]  (!%p11057_p6), %s15893_s8, 16, %s398_s1, [#allocation17]  }
  0xdd   : > { %s10921_s0 = smov [#allocation21]   ;;  %s10764_s29 = scalar_lea.hbm %s15895_s10, 16 }
  0xde   : > { %s421_s24 = sshll.u32 %s10921_s0, 4  ;;  %p10765_p1 = scmp.ne.s32.totalorder %s15895_s10, %s10764_s29  ;;  %s422_s24 = int_to_ptr.vmem [resolvable:$true] %s421_s24 }
  0xdf   : > { %p10771_p0 = scmp.lt.u32.totalorder %s10764_s29, %s15895_s10 }
  0xe0   : > { %p10767_p3 = pnand %p10765_p1, %p11073_p8 }
  0xe2   : > { %p10768_p13 = pneg %p10767_p3 }
  0xe4   : > { %p10773_p2 = pnand %p10771_p0, %p10768_p13 }
  0xe6   : > { %10776 = shalt.err (!%p10773_p2)
}
  0xe7   : > { %s10777_s1 = scalar_lea.vmem %s422_s24, 16  ;;  %s10784_s28 = scalar_lea.vmem %s422_s24, 32 }
  0xe8   : > { %p10778_p5 = scmp.ne.s32.totalorder %s422_s24, %s10777_s1  ;;  %p10785_p4 = scmp.lt.s32.totalorder %s422_s24, %s422_s24 }
  0xe9   : > { %p10786_p10 = scmp.lt.s32.totalorder %s10784_s28, %s10777_s1 }
  0xea   : > { %p10780_p7 = pnand %p10778_p5, %p11073_p8 }
  0xeb   : > { %p10787_p11 = por %p10786_p10, %p10785_p4 }
  0xec   : > { %p10781_p9 = pneg %p10780_p7 }
  0xee   : > { %p10788_p12 = pnand %p10787_p11, %p10781_p9 }
  0xf0   : > { %10791 = shalt.err (!%p10788_p12)
}
  0xf1   : > { %10094 = dma.hbm_to_vmem [thread:$0]  (!%p11057_p6), %s15895_s10, 16, %s422_s24, [#allocation20]  }
  0xf2   : > { %s9700_s16 = sadd.s32 4294967294, %s10908_s20   ;;  %s11283_s27 = sadd.s32 1, %s10908_s20  }
  0xf3   : > { %s36_s22 = ssub.s32 %s10908_s20, %s11283_s27  ;;  %s39_s13 = sadd.s32 1, %s10904_s19 }
  0xf4   : > { %p37_p8 = scmp.eq.s32.totalorder %s36_s22, 0  ;;  %p46_p1 = scmp.ne.s32.totalorder %s10904_s19, %s10900_s18 }
  0xf5   : > { %p47_p3 = scmp.eq.s32.totalorder %s10908_s20, 0  ;;  %p52_p13 = scmp.ne.s32.totalorder %s10900_s18, %s10896_s17 }
  0xf6   : > { %s11294_s0 = scalar_select %p37_p8, %s10904_s19, %s39_s13  }
  0xf7   : > { %p11296_p0 = por %p47_p3, %p46_p1  ;;  %p15952_p2 = scmp.eq.s32.totalorder %s11041_s23, 0 }
  0xf8   : > { %p286_p5 = scmp.eq.s32.totalorder %s11041_s23, 1  ;;  %p292_p7 = scmp.eq.s32.totalorder %s9700_s16, 1 }
  0xf9   : > { %p11302_p6 = por %p15952_p2, %p52_p13  ;;  %p10113_p9 = scmp.lt.s32.totalorder %s10908_s20, 2 }
  0xfa   : > { %s432_s12 = sand.u32 1, %s10904_s19   ;;  %p11309_p4 = por %p286_p5, %p46_p1 }
  0xfb   : > { %p11313_p10 = por %p292_p7, %p52_p13  ;;  %s9713_s15 = sshll.u32 %s432_s12, 8 }
  0xfc   : > { %s15954_s29 = scalar_select %p11309_p4, 1, 0 }
  0xfd   : > { %s15955_s11 = scalar_select %p11313_p10, 1, 0 }
  0xfe   : > { %s9866_s21 = sshll.u32 %s10908_s20, 12  ;;  %s15956_s28 = sld [smem:[#allocation49_spill]] }
  0xff   : > { %s436_s14 = scalar_lea.vmem [#allocation4], %s9713_s15  ;;  %p11327_p11 = pnand %p10113_p9, %p11296_p0 }
 0x100   : > { %s443_s16 = sshll.u32 %s436_s14, 4  ;;  %s11331_s13 = scalar_lea.sflag [#allocation5], %s432_s12  ;;  %s11323_s16 = int_to_ptr.vmem [resolvable:$true] %s443_s16 }
 0x101   : > { %p10794_p8 = pneg %p11327_p11 }
 0x104   : > { %s11321_s26 = scalar_lea.hbm %s15956_s28, %s9866_s21  ;;  %s10797_s30 = scalar_lea.hbm %s15956_s28, 8192 }
 0x105   : > { %s10792_s25 = scalar_lea.hbm %s11321_s26, 4096  ;;  %p10798_p13 = scmp.lt.u32.totalorder %s11321_s26, %s15956_s28 }
 0x106   : > { %p10793_p12 = scmp.ne.s32.totalorder %s11321_s26, %s10792_s25  ;;  %p10799_p0 = scmp.lt.u32.totalorder %s10797_s30, %s10792_s25 }
 0x107   : > { %p10801_p5 = scmp.lt.u32.totalorder %s10792_s25, %s11321_s26 }
 0x108   : > { %p10795_p1 = pnand %p10794_p8, %p10793_p12  ;;  %p10800_p2 = por %p10799_p0, %p10798_p13 }
 0x10a   : > { %p10796_p3 = pneg %p10795_p1  ;;  %p10802_p7 = por %p10801_p5, %p10800_p2 }
 0x10c   : > { %p10803_p9 = pnand %p10802_p7, %p10796_p3 }
 0x10e   : > { %10806 = shalt.err (!%p10803_p9)
}
 0x10f   : > { %s10807_s12 = scalar_lea.vmem %s11323_s16, 4096  ;;  %s10922_s15 = smov [#allocation4]  }
 0x110   : > { %p10808_p12 = scmp.ne.s32.totalorder %s11323_s16, %s10807_s12  ;;  %s10812_s21 = sshll.u32 %s10922_s15, 4  ;;  %s10813_s21 = int_to_ptr.vmem [resolvable:$false] %s10812_s21 }
 0x111   : > { %s10814_s1 = scalar_lea.vmem %s10813_s21, 8192  ;;  %p10815_p4 = scmp.lt.s32.totalorder %s11323_s16, %s10813_s21 }
 0x112   : > { %p10810_p1 = pnand %p10808_p12, %p10794_p8  ;;  %p10816_p13 = scmp.lt.s32.totalorder %s10814_s1, %s10807_s12 }
 0x114   : > { %p10811_p10 = pneg %p10810_p1  ;;  %p10817_p0 = por %p10816_p13, %p10815_p4 }
 0x116   : > { %p10818_p2 = pnand %p10817_p0, %p10811_p10 }
 0x118   : > { %10821 = shalt.err (!%p10818_p2)
}
 0x119   : > { %s10923_s25 = smov 128   ;;  %s10924_s30 = smov 8  }
 0x11a   : > { %10098 = dma.hbm_to_vmem [thread:$0]  (!%p11327_p11), %s11321_s26, 4096, %s11323_s16, %s11331_s13, %s10923_s25, %s10923_s25, %s10924_s30  }
 0x11b   : > { %s15958_s14 = sld [smem:[#allocation30_spill]] }
 0x121   : > { %p15959_p8 = scmp.ne.s32.totalorder %s15958_s14, 0 }
 0x123   : > { %455 = sbr.rel (%p15959_p8) target bundleno = 2739 (0xab3), region = 64 }
 0x12a   : > { %s11362_s15 = sand.u32 1, %s10900_s18  }
 0x12b   : > { %s15923_s12 = sshll.u32 %s11362_s15, 8  ;;  %s458_s21 = scalar_lea.sflag [#allocation5], %s11362_s15 }
 0x12c   : > { %s11368_s1 = scalar_lea.vmem [#allocation4], %s15923_s12 }
 0x12d   : > { %10867 = dma.done.wait (%p11302_p6), %s458_s21, 4096  }
 0x12e   : > { %10869 = vsyncadd (%p11302_p6), %s458_s21, 4294963200  ;;  %p15960_p4 = scmp.eq.s32.totalorder %s11041_s23, 0 }
 0x130   : > { %10871 = dma.done.wait (%p15960_p4), [#allocation8], 592   ;;  %p15961_p10 = pmov %p15960_p4 }
 0x131   : > { %p15962_p11 = pmov %p15960_p4 }
 0x132   : > { %10873 = vsyncadd (%p15961_p10), [#allocation8], 4294966704 }
 0x133   : > { %10875 = dma.done.wait (%p15962_p11), [#allocation11], 912   ;;  %p15963_p3 = pmov %p15960_p4 }
 0x135   : > { %10877 = vsyncadd (%p15963_p3), [#allocation11], 4294966384  ;;  %p15964_p5 = pmov %p15963_p3 }
 0x136   : > { %p15965_p7 = pmov %p15963_p3 }
 0x137   : > { %10879 = dma.done.wait (%p15964_p5), [#allocation14], 1168  }
 0x138   : > { %10881 = vsyncadd (%p15965_p7), [#allocation14], 4294966128  ;;  %p15966_p6 = pmov %p15963_p3 }
 0x139   : > { %p15967_p9 = pmov %p15963_p3 }
 0x13a   : > { %10883 = dma.done.wait (%p15966_p6), [#allocation17], 1488  }
 0x13b   : > { %10885 = vsyncadd (%p15967_p9), [#allocation17], 4294965808  ;;  %p15968_p12 = pmov %p15963_p3 }
 0x13c   : > { %p15969_p1 = pmov %p15963_p3 }
 0x13d   : > { %10887 = dma.done.wait (%p15968_p12), [#allocation20], 1744  }
 0x13e   : > { %10889 = vsyncadd (%p15969_p1), [#allocation20], 4294965552  ;;  %vm573_vm0 = vcmask 64512   ;;  %vm576_vm1 = vcmask 58368   ;;  %v15903_v0 = vmov 0.0   ;;  %v11503_v1 = vld [vmem:[%s11368_s1] sm:$0xff] }
 0x13f   : > { %574 = vst.msk [vmem:[#allocation3] sm:$0xff] %vm573_vm0, %v15903_v0  ;;  %575 = vst.msk [vmem:[#allocation3 + $0x8] sm:$0xff] %vm573_vm0, %v15903_v0  ;;  %v11506_v2 = vld [vmem:[%s11368_s1 + $0x8] sm:$0xff]  ;;  %v11509_v3 = vld [vmem:[%s11368_s1 + $0x10] sm:$0xff]  ;;  %s15941_s24 = smov 8   ;;  %s10927_s26 = smov 16  }
 0x140   : > { %577 = vst.msk [vmem:[#allocation3 + $0x10] sm:$0x3] %vm576_vm1, %v15903_v0  ;;  %580 = vst.msk [vmem:[#allocation3 + $0x28] sm:$0x3] %vm576_vm1, %v15903_v0  ;;  %v11518_v9 = vld [vmem:[%s11368_s1 + $0x18] sm:$0xff]  ;;  %v11521_v10 = vld [vmem:[%s11368_s1 + $0x20] sm:$0xff] }
 0x141   : > { %578 = vst.msk [vmem:[#allocation3 + $0x18] sm:$0xff] %vm573_vm0, %v15903_v0  ;;  %579 = vst.msk [vmem:[#allocation3 + $0x20] sm:$0xff] %vm573_vm0, %v15903_v0  ;;  %v11528_v12 = vld [vmem:[%s11368_s1 + $0x28] sm:$0xff]  ;;  %v11533_v13 = vld [vmem:[%s11368_s1 + $0x30] sm:$0xff]  ;;  %s15934_s16 = smov 24   ;;  %s15930_s22 = smov 32  }
 0x142   : > { %581 = vst.msk [vmem:[#allocation3 + $0x30] sm:$0xff] %vm573_vm0, %v15903_v0  ;;  %582 = vst.msk [vmem:[#allocation3 + $0x38] sm:$0xff] %vm573_vm0, %v15903_v0  ;;  %v11536_v14 = vld [vmem:[%s11368_s1 + $0x38] sm:$0xff]  ;;  %v11546_v15 = vld [vmem:[%s11368_s1 + $0x40] sm:$0xff]  ;;  %s15932_s13 = smov 40   ;;  %s15928_s25 = smov 48  }
 0x143   : > { %583 = vst.msk [vmem:[#allocation3 + $0x40] sm:$0x3] %vm576_vm1, %v15903_v0  ;;  %586 = vst.msk [vmem:[#allocation3 + $0x58] sm:$0x3] %vm576_vm1, %v15903_v0  ;;  %v11549_v16 = vld [vmem:[%s11368_s1 + $0x48] sm:$0xff]  ;;  %v11552_v17 = vld [vmem:[%s11368_s1 + $0x50] sm:$0xff] }
 0x144   : > { %584 = vst.msk [vmem:[#allocation3 + $0x48] sm:$0xff] %vm573_vm0, %v15903_v0  ;;  %585 = vst.msk [vmem:[#allocation3 + $0x50] sm:$0xff] %vm573_vm0, %v15903_v0  ;;  %v11560_v18 = vld [vmem:[%s11368_s1 + $0x58] sm:$0xff]  ;;  %v11565_v19 = vld [vmem:[%s11368_s1 + $0x60] sm:$0xff]  ;;  %s15926_s30 = smov 56   ;;  %s15924_s14 = smov 64  }
 0x145   : > { %587 = vst.msk [vmem:[#allocation3 + $0x60] sm:$0xff] %vm573_vm0, %v15903_v0  ;;  %588 = vst.msk [vmem:[#allocation3 + $0x68] sm:$0xff] %vm573_vm0, %v15903_v0  ;;  %v11568_v20 = vld [vmem:[%s11368_s1 + $0x68] sm:$0xff]  ;;  %v11577_v21 = vld [vmem:[%s11368_s1 + $0x70] sm:$0xff]  ;;  %vm1867_vm2 = vcmask 1043456   ;;  %vm838_vm3 = vcmask 130112  }
 0x146   : > { %589 = vst.msk [vmem:[#allocation3 + $0x70] sm:$0x3] %vm576_vm1, %v15903_v0  ;;  %592 = vst.msk [vmem:[#allocation3 + $0x88] sm:$0x3] %vm576_vm1, %v15903_v0  ;;  %v726_v4 = vld [vmem:[#allocation3 + $0x1] sm:$0xff]  ;;  %v11589_v25 = vld [vmem:[%s11368_s1 + $0x80] sm:$0xff] }
 0x147   : > { %590 = vst.msk [vmem:[#allocation3 + $0x78] sm:$0xff] %vm573_vm0, %v15903_v0  ;;  %591 = vst.msk [vmem:[#allocation3 + $0x80] sm:$0xff] %vm573_vm0, %v15903_v0  ;;  %v727_v5 = vld [vmem:[#allocation3 + $0x9] sm:$0xff]  ;;  %v662_v24 = vld [vmem:[#allocation3] sm:$0xff]  ;;  %vm967_vm4 = vcmask 195712   ;;  %vm1096_vm5 = vcmask 261312  }
 0x148   : > { %593 = vst.msk [vmem:[#allocation3 + $0x90] sm:$0xff] %vm573_vm0, %v15903_v0  ;;  %594 = vst.msk [vmem:[#allocation3 + $0x98] sm:$0xff] %vm573_vm0, %v15903_v0  ;;  %v855_v6 = vld [vmem:[#allocation3 + $0x2] sm:$0xff]  ;;  %v758_v7 = vpack.c.bf16 %v727_v5, %v726_v4  ;;  %v856_v8 = vld [vmem:[#allocation3 + $0xa] sm:$0xff]  ;;  %vm1225_vm6 = vcmask 326912   ;;  %vm1354_vm7 = vcmask 392512  }
 0x149   : > { %595 = vst.msk [vmem:[#allocation3 + $0xa0] sm:$0x3] %vm576_vm1, %v15903_v0  ;;  %598 = vst.msk [vmem:[#allocation3 + $0xb8] sm:$0x3] %vm576_vm1, %v15903_v0  ;;  %v887_v11 = vpack.c.bf16 %v856_v8, %v855_v6  ;;  %v11580_v22 = vld [vmem:[%s11368_s1 + $0x78] sm:$0xff]  ;;  %v11592_v26 = vld [vmem:[%s11368_s1 + $0x88] sm:$0xff] }
 0x14a   : > { %596 = vst.msk [vmem:[#allocation3 + $0xa8] sm:$0xff] %vm573_vm0, %v15903_v0  ;;  %597 = vst.msk [vmem:[#allocation3 + $0xb0] sm:$0xff] %vm573_vm0, %v15903_v0  ;;  %790 = vrot.lane.b32.xlu0 %v758_v7, %s15941_s24  ;;  %v663_v23 = vld [vmem:[#allocation3 + $0x8] sm:$0xff]  ;;  %vm1484_vm8 = vcmask 458112   ;;  %vm1613_vm9 = vcmask 523712   ;;  %vm1742_vm10 = vcmask 589312  }
 0x14b   : > { %599 = vst.msk [vmem:[#allocation3 + $0xc0] sm:$0xff] %vm573_vm0, %v15903_v0  ;;  %600 = vst.msk [vmem:[#allocation3 + $0xc8] sm:$0xff] %vm573_vm0, %v15903_v0  ;;  %919 = vrot.lane.b32.xlu1 %v887_v11, %s10927_s26  ;;  %v694_v30 = vpack.c.bf16 %v663_v23, %v662_v24  ;;  %vm1818_vm11 = vcmask 588800   ;;  %s10934_s21 = smov 72   ;;  %s15938_s12 = smov 80   ;;  %vm2374_vm12 = vcmask 31744  }
 0x14c   : > { %601 = vst.msk [vmem:[#allocation3 + $0xd0] sm:$0x3] %vm576_vm1, %v15903_v0  ;;  %604 = vst.msk [vmem:[#allocation3 + $0xe8] sm:$0x3] %vm576_vm1, %v15903_v0  ;;  %vm2519_vm13 = vcmask 622144   ;;  %vm2648_vm14 = vcmask 654944  }
 0x14d   : > { %602 = vst.msk [vmem:[#allocation3 + $0xd8] sm:$0xff] %vm573_vm0, %v15903_v0  ;;  %603 = vst.msk [vmem:[#allocation3 + $0xe0] sm:$0xff] %vm573_vm0, %v15903_v0  ;;  %vm15942_vm15 = vcmask 687744   ;;  %p16048_p0 = scmp.ne.s32.totalorder %s15954_s29, 0 }
 0x14e   : > { %605 = vst.msk [vmem:[#allocation3 + $0xf0] sm:$0xff] %vm573_vm0, %v15903_v0  ;;  %606 = vst.msk [vmem:[#allocation3 + $0xf8] sm:$0xff] %vm573_vm0, %v15903_v0 }
 0x14f   : > { %607 = vst.msk [vmem:[#allocation3 + $0x100] sm:$0x3] %vm576_vm1, %v15903_v0  ;;  %610 = vst.msk [vmem:[#allocation3 + $0x118] sm:$0x3] %vm576_vm1, %v15903_v0 }
 0x150   : > { %608 = vst.msk [vmem:[#allocation3 + $0x108] sm:$0xff] %vm573_vm0, %v15903_v0  ;;  %609 = vst.msk [vmem:[#allocation3 + $0x110] sm:$0xff] %vm573_vm0, %v15903_v0 }
 0x151   : > { %611 = vst.msk [vmem:[#allocation3 + $0x120] sm:$0xff] %vm573_vm0, %v15903_v0  ;;  %612 = vst.msk [vmem:[#allocation3 + $0x128] sm:$0xff] %vm573_vm0, %v15903_v0 }
 0x152   : > { %613 = vst.msk [vmem:[#allocation3 + $0x130] sm:$0x3] %vm576_vm1, %v15903_v0  ;;  %616 = vst.msk [vmem:[#allocation3 + $0x148] sm:$0x3] %vm576_vm1, %v15903_v0 }
 0x153   : > { %614 = vst.msk [vmem:[#allocation3 + $0x138] sm:$0xff] %vm573_vm0, %v15903_v0  ;;  %615 = vst.msk [vmem:[#allocation3 + $0x140] sm:$0xff] %vm573_vm0, %v15903_v0 }
 0x154   : > { %617 = vst.msk [vmem:[#allocation3 + $0x150] sm:$0xff] %vm573_vm0, %v15903_v0  ;;  %618 = vst.msk [vmem:[#allocation3 + $0x158] sm:$0xff] %vm573_vm0, %v15903_v0 }
 0x155   : > { %619 = vst.msk [vmem:[#allocation3 + $0x160] sm:$0x3] %vm576_vm1, %v15903_v0  ;;  %622 = vst.msk [vmem:[#allocation3 + $0x178] sm:$0x3] %vm576_vm1, %v15903_v0 }
 0x156   : > { %620 = vst.msk [vmem:[#allocation3 + $0x168] sm:$0xff] %vm573_vm0, %v15903_v0  ;;  %621 = vst.msk [vmem:[#allocation3 + $0x170] sm:$0xff] %vm573_vm0, %v15903_v0 }
 0x157   : > { %623 = vst.msk [vmem:[#allocation3 + $0x180] sm:$0xff] %vm573_vm0, %v15903_v0  ;;  %624 = vst.msk [vmem:[#allocation3 + $0x188] sm:$0xff] %vm573_vm0, %v15903_v0 }
 0x158   : > { %625 = vst.msk [vmem:[#allocation3 + $0x190] sm:$0x3] %vm576_vm1, %v15903_v0  ;;  %628 = vst.msk [vmem:[#allocation3 + $0x1a8] sm:$0x3] %vm576_vm1, %v15903_v0 }
 0x159   : > { %626 = vst.msk [vmem:[#allocation3 + $0x198] sm:$0xff] %vm573_vm0, %v15903_v0  ;;  %627 = vst.msk [vmem:[#allocation3 + $0x1a0] sm:$0xff] %vm573_vm0, %v15903_v0 }
 0x15a   : > { %630 = vst.msk [vmem:[#allocation3 + $0x19] sm:$0xff] %vm573_vm0, %v11503_v1  ;;  %631 = vst.msk [vmem:[#allocation3 + $0x21] sm:$0xff] %vm573_vm0, %v11506_v2 }
 0x15b   : > { %632 = vst.msk [vmem:[#allocation3 + $0x31] sm:$0xff] %vm573_vm0, %v11509_v3  ;;  %633 = vst.msk [vmem:[#allocation3 + $0x39] sm:$0xff] %vm573_vm0, %v11518_v9 }
 0x15c   : > { %2322 = vst.msk [vmem:[#allocation3 + $0x10] sm:$0x3] %vm576_vm1, %v15903_v0  ;;  %15970 = vst [vmem:[#allocation31_spill] sm:$0xff] %v11565_v19 }
 0x15d   : > { %634 = vst.msk [vmem:[#allocation3 + $0x49] sm:$0xff] %vm573_vm0, %v11521_v10  ;;  %635 = vst.msk [vmem:[#allocation3 + $0x51] sm:$0xff] %vm573_vm0, %v11528_v12 }
 0x15e   : > { %636 = vst.msk [vmem:[#allocation3 + $0x61] sm:$0xff] %vm573_vm0, %v11533_v13  ;;  %637 = vst.msk [vmem:[#allocation3 + $0x69] sm:$0xff] %vm573_vm0, %v11536_v14 }
 0x15f   : > { %638 = vst.msk [vmem:[#allocation3 + $0x79] sm:$0xff] %vm573_vm0, %v11546_v15  ;;  %639 = vst.msk [vmem:[#allocation3 + $0x81] sm:$0xff] %vm573_vm0, %v11549_v16 }
 0x160   : > { %640 = vst.msk [vmem:[#allocation3 + $0x91] sm:$0xff] %vm573_vm0, %v11552_v17  ;;  %15971 = vst [vmem:[#allocation32_spill] sm:$0xff] %v11568_v20 }
 0x161   : > { %641 = vst.msk [vmem:[#allocation3 + $0x99] sm:$0xff] %vm573_vm0, %v11560_v18  ;;  %642 = vst.msk [vmem:[#allocation3 + $0xa9] sm:$0xff] %vm573_vm0, %v11565_v19  ;;  %v728_v27 = vld [vmem:[#allocation3 + $0x19] sm:$0xff]  ;;  %v729_v28 = vld [vmem:[#allocation3 + $0x21] sm:$0xff] }
 0x162   : > { %643 = vst.msk [vmem:[#allocation3 + $0xb1] sm:$0xff] %vm573_vm0, %v11568_v20  ;;  %15972 = vst [vmem:[#allocation33_spill] sm:$0xff] %v11577_v21  ;;  %v857_v29 = vld [vmem:[#allocation3 + $0x1a] sm:$0xff]  ;;  %v11600_v31 = vpack.c.bf16 %v729_v28, %v728_v27  ;;  %v858_v32 = vld [vmem:[#allocation3 + $0x22] sm:$0xff] }
 0x163   : > { %15973 = vst [vmem:[#allocation34_spill] sm:$0xff] %v11580_v22  ;;  %644 = vst.msk [vmem:[#allocation3 + $0xc1] sm:$0xff] %vm573_vm0, %v11577_v21  ;;  %v984_v33 = vld [vmem:[#allocation3 + $0x18] sm:$0xff]  ;;  %v985_v34 = vld [vmem:[#allocation3 + $0x20] sm:$0xff]  ;;  %v11602_v35 = vpack.c.bf16 %v858_v32, %v857_v29 }
 0x164   : > { %645 = vst.msk [vmem:[#allocation3 + $0xc9] sm:$0xff] %vm573_vm0, %v11580_v22  ;;  %2321 = vst.msk [vmem:[#allocation3 + $0x8] sm:$0xff] %vm573_vm0, %v15903_v0  ;;  %v1016_v36 = vpack.c.bf16 %v985_v34, %v984_v33  ;;  %v11604_v37 = vld [vmem:[#allocation3 + $0x32] sm:$0xff]  ;;  %v860_v38 = vld [vmem:[#allocation3 + $0x3a] sm:$0xff]  ;;  %792 = vrot.lane.b32.xlu0 %v11600_v31, %s15941_s24 }
 0x165   : > { %15974 = vst [vmem:[#allocation35_spill] sm:$0xff] %v11589_v25  ;;  %15975 = vst [vmem:[#allocation36_spill] sm:$0xff] %v11592_v26  ;;  %v986_v39 = vld [vmem:[#allocation3 + $0x30] sm:$0xff]  ;;  %v987_v40 = vld [vmem:[#allocation3 + $0x38] sm:$0xff]  ;;  %921 = vrot.lane.b32.xlu1 %v11602_v35, %s10927_s26  ;;  %v11698_v27 = vpack.c.bf16 %v860_v38, %v11604_v37 }
 0x166   : > { %2320 = vst.msk [vmem:[#allocation3] sm:$0xff] %vm573_vm0, %v15903_v0  ;;  %646 = vst.msk [vmem:[#allocation3 + $0xd9] sm:$0xff] %vm573_vm0, %v11589_v25  ;;  %v1115_v41 = vld [vmem:[#allocation3 + $0x31] sm:$0xff]  ;;  %v1116_v42 = vld [vmem:[#allocation3 + $0x39] sm:$0xff]  ;;  %v11617_v43 = vpack.c.bf16 %v987_v40, %v986_v39  ;;  %v15980_v25 = vmov 0.0  }
 0x167   : > { %647 = vst.msk [vmem:[#allocation3 + $0xe1] sm:$0xff] %vm573_vm0, %v11592_v26  ;;  %710 = vst.msk [vmem:[#allocation2] sm:$0xff] %vm573_vm0, %v694_v30  ;;  %v11619_v44 = vld [vmem:[#allocation3 + $0x4a] sm:$0xff]  ;;  %v11621_v45 = vld [vmem:[#allocation3 + $0x52] sm:$0xff]  ;;  %v11655_v57 = vpack.c.bf16 %v1116_v42, %v1115_v41 }
 0x168   : > { %2325 = vst.msk [vmem:[#allocation3 + $0x28] sm:$0x3] %vm576_vm1, %v15903_v0  ;;  %v1374_v46 = vld [vmem:[#allocation3 + $0x48] sm:$0xff]  ;;  %2328 = vst.msk [vmem:[#allocation3 + $0x40] sm:$0x3] %vm576_vm1, %v15903_v0  ;;  %v1375_v47 = vld [vmem:[#allocation3 + $0x50] sm:$0xff]  ;;  %1048 = vrot.lane.b32.xlu0 %v1016_v36, %s15934_s16 }
 0x169   : > { %2323 = vst.msk [vmem:[#allocation3 + $0x18] sm:$0xff] %vm573_vm0, %v15903_v0  ;;  %2324 = vst.msk [vmem:[#allocation3 + $0x20] sm:$0xff] %vm573_vm0, %v15903_v0  ;;  %v11630_v48 = vld [vmem:[#allocation3 + $0x49] sm:$0xff]  ;;  %v11632_v49 = vld [vmem:[#allocation3 + $0x51] sm:$0xff]  ;;  %v11634_v50 = vpack.c.bf16 %v1375_v47, %v1374_v46  ;;  %1050 = vrot.lane.b32.xlu1 %v11617_v43, %s15934_s16 }
 0x16a   : > { %711 = vst.msk [vmem:[#allocation2 + $0x10] sm:$0xff] %vm573_vm0, %v1016_v36  ;;  %2326 = vst.msk [vmem:[#allocation3 + $0x30] sm:$0xff] %vm573_vm0, %v15903_v0  ;;  %v11636_v51 = vld [vmem:[#allocation3 + $0x62] sm:$0xff]  ;;  %v11638_v52 = vld [vmem:[#allocation3 + $0x6a] sm:$0xff] }
 0x16b   : > { %2327 = vst.msk [vmem:[#allocation3 + $0x38] sm:$0xff] %vm573_vm0, %v15903_v0  ;;  %v990_v53 = vld [vmem:[#allocation3 + $0x60] sm:$0xff]  ;;  %712 = vst.msk [vmem:[#allocation2 + $0x20] sm:$0xff] %vm573_vm0, %v11617_v43  ;;  %v991_v54 = vld [vmem:[#allocation3 + $0x68] sm:$0xff] }
 0x16c   : > { %2331 = vst.msk [vmem:[#allocation3 + $0x58] sm:$0x3] %vm576_vm1, %v15903_v0  ;;  %v11649_v55 = vld [vmem:[#allocation3 + $0x61] sm:$0xff]  ;;  %v11651_v56 = vld [vmem:[#allocation3 + $0x69] sm:$0xff]  ;;  %v11657_v58 = vpack.c.bf16 %v991_v54, %v990_v53  ;;  %v1378_v61 = vld [vmem:[#allocation3 + $0x78] sm:$0xff]  ;;  %1177 = vrot.lane.b32.xlu0 %v11600_v31, %s15930_s22 }
 0x16d   : > { %2329 = vst.msk [vmem:[#allocation3 + $0x48] sm:$0xff] %vm573_vm0, %v15903_v0  ;;  %2330 = vst.msk [vmem:[#allocation3 + $0x50] sm:$0xff] %vm573_vm0, %v15903_v0  ;;  %v11659_v59 = vld [vmem:[#allocation3 + $0x7a] sm:$0xff]  ;;  %v11661_v60 = vld [vmem:[#allocation3 + $0x82] sm:$0xff]  ;;  %1179 = vrot.lane.b32.xlu1 %v11655_v57, %s15930_s22 }
 0x16e   : > { %2334 = vst.msk [vmem:[#allocation3 + $0x70] sm:$0x3] %vm576_vm1, %v15903_v0  ;;  %v1379_v62 = vld [vmem:[#allocation3 + $0x80] sm:$0xff]  ;;  %v11677_v6 = vld [vmem:[#allocation3 + $0x92] sm:$0xff]  ;;  %v11702_v29 = vld [vmem:[#allocation3 + $0xaa] sm:$0xff] }
 0x16f   : > { %713 = vst.msk [vmem:[#allocation2 + $0x30] sm:$0xff] %vm573_vm0, %v11634_v50  ;;  %2332 = vst.msk [vmem:[#allocation3 + $0x60] sm:$0xff] %vm573_vm0, %v15903_v0  ;;  %v11671_v63 = vld [vmem:[#allocation3 + $0x79] sm:$0xff]  ;;  %v11673_v4 = vld [vmem:[#allocation3 + $0x81] sm:$0xff]  ;;  %v11675_v5 = vpack.c.bf16 %v1379_v62, %v1378_v61 }
 0x170   : > { %2333 = vst.msk [vmem:[#allocation3 + $0x68] sm:$0xff] %vm573_vm0, %v15903_v0  ;;  %v11679_v7 = vld [vmem:[#allocation3 + $0x9a] sm:$0xff]  ;;  %v994_v8 = vld [vmem:[#allocation3 + $0x90] sm:$0xff]  ;;  %714 = vst.msk [vmem:[#allocation2 + $0x40] sm:$0xff] %vm573_vm0, %v11657_v58  ;;  %1306 = vrot.lane.b32.xlu0 %v11602_v35, %s15932_s13 }
 0x171   : > { %2337 = vst.msk [vmem:[#allocation3 + $0x88] sm:$0x3] %vm576_vm1, %v15903_v0  ;;  %v995_v11 = vld [vmem:[#allocation3 + $0x98] sm:$0xff]  ;;  %v1382_v32 = vld [vmem:[#allocation3 + $0xa8] sm:$0xff]  ;;  %v1383_v31 = vld [vmem:[#allocation3 + $0xb0] sm:$0xff]  ;;  %1308 = vrot.lane.b32.xlu1 %v11698_v27, %s15932_s13 }
 0x172   : > { %2335 = vst.msk [vmem:[#allocation3 + $0x78] sm:$0xff] %vm573_vm0, %v15903_v0  ;;  %2336 = vst.msk [vmem:[#allocation3 + $0x80] sm:$0xff] %vm573_vm0, %v15903_v0  ;;  %v11691_v23 = vld [vmem:[#allocation3 + $0x91] sm:$0xff]  ;;  %v11693_v24 = vld [vmem:[#allocation3 + $0x99] sm:$0xff]  ;;  %v11700_v28 = vpack.c.bf16 %v995_v11, %v994_v8  ;;  %v11718_v36 = vpack.c.bf16 %v1383_v31, %v1382_v32 }
 0x173   : > { %v11704_v30 = vld [vmem:[#allocation3 + $0xb2] sm:$0xff]  ;;  %2340 = vst.msk [vmem:[#allocation3 + $0xa0] sm:$0x3] %vm576_vm1, %v15903_v0  ;;  %v11714_v33 = vld [vmem:[#allocation3 + $0xa9] sm:$0xff]  ;;  %v998_v39 = vld [vmem:[#allocation3 + $0xc0] sm:$0xff] }
 0x174   : > { %715 = vst.msk [vmem:[#allocation2 + $0x50] sm:$0xff] %vm573_vm0, %v11675_v5  ;;  %2338 = vst.msk [vmem:[#allocation3 + $0x90] sm:$0xff] %vm573_vm0, %v15903_v0  ;;  %v11716_v34 = vld [vmem:[#allocation3 + $0xb1] sm:$0xff]  ;;  %v11720_v37 = vld [vmem:[#allocation3 + $0xc2] sm:$0xff]  ;;  %1436 = vrot.lane.b32.xlu0 %v11617_v43, %s15928_s25 }
 0x175   : > { %2339 = vst.msk [vmem:[#allocation3 + $0x98] sm:$0xff] %vm573_vm0, %v15903_v0  ;;  %v11722_v38 = vld [vmem:[#allocation3 + $0xca] sm:$0xff]  ;;  %716 = vst.msk [vmem:[#allocation2 + $0x60] sm:$0xff] %vm573_vm0, %v11700_v28  ;;  %v11734_v41 = vld [vmem:[#allocation3 + $0xc1] sm:$0xff]  ;;  %1438 = vrot.lane.b32.xlu1 %v11634_v50, %s15928_s25 }
 0x176   : > { %2343 = vst.msk [vmem:[#allocation3 + $0xb8] sm:$0x3] %vm576_vm1, %v15903_v0  ;;  %v999_v40 = vld [vmem:[#allocation3 + $0xc8] sm:$0xff]  ;;  %v11742_v47 = vld [vmem:[#allocation3 + $0xda] sm:$0xff]  ;;  %v10205_v11 = vld [vmem:[#allocation7] sm:$0xff]  }
 0x177   : > { %2341 = vst.msk [vmem:[#allocation3 + $0xa8] sm:$0xff] %vm573_vm0, %v15903_v0  ;;  %2342 = vst.msk [vmem:[#allocation3 + $0xb0] sm:$0xff] %vm573_vm0, %v15903_v0  ;;  %v11736_v42 = vld [vmem:[#allocation3 + $0xc9] sm:$0xff]  ;;  %v11740_v46 = vpack.c.bf16 %v999_v40, %v998_v39  ;;  %v1386_v54 = vld [vmem:[#allocation3 + $0xd8] sm:$0xff]  ;;  %v11780_v39 = vpack.c.bf16 %v11632_v49, %v11630_v48  ;;  %9912 = vmatprep.subr.bf16.mxu0 %v10205_v11 }
 0x178   : > { %v11744_v53 = vld [vmem:[#allocation3 + $0xe2] sm:$0xff]  ;;  %2346 = vst.msk [vmem:[#allocation3 + $0xd0] sm:$0x3] %vm576_vm1, %v15903_v0  ;;  %v11754_v61 = vld [vmem:[#allocation3 + $0xd9] sm:$0xff]  ;;  %9913 = vmatpush3.bf16.msra.mxu0 %v10205_v11  ;;  %1565 = vrot.lane.b32.xlu0 %v11655_v57, %s15926_s30  ;;  %v1663_v11 = vpack.c.bf16 %v11621_v45, %v11619_v44 }
 0x179   : > { %717 = vst.msk [vmem:[#allocation2 + $0x70] sm:$0xff] %vm573_vm0, %v11718_v36  ;;  %2344 = vst.msk [vmem:[#allocation3 + $0xc0] sm:$0xff] %vm573_vm0, %v15903_v0  ;;  %v1387_v35 = vld [vmem:[#allocation3 + $0xe0] sm:$0xff]  ;;  %v11774_v31 = vld [vmem:[%s11368_s1 + $0x98] sm:$0xff]  ;;  %1567 = vrot.lane.b32.xlu1 %v11780_v39, %s15926_s30 }
 0x17a   : > { %2345 = vst.msk [vmem:[#allocation3 + $0xc8] sm:$0xff] %vm573_vm0, %v15903_v0  ;;  %v11756_v62 = vld [vmem:[#allocation3 + $0xe1] sm:$0xff]  ;;  %v11758_v8 = vpack.c.bf16 %v1387_v35, %v1386_v54  ;;  %718 = vst.msk [vmem:[#allocation2 + $0x80] sm:$0xff] %vm573_vm0, %v11740_v46  ;;  %v10206_v43 = vld [vmem:[#allocation7 + $0x8] sm:$0xff]  }
 0x17b   : > { %2349 = vst.msk [vmem:[#allocation3 + $0xe8] sm:$0x3] %vm576_vm1, %v15903_v0  ;;  %v11771_v32 = vld [vmem:[%s11368_s1 + $0x90] sm:$0xff]  ;;  %15977 = vst [vmem:[#allocation38_spill] sm:$0xff] %v11774_v31  ;;  %9914 = vmatprep.subr.bf16.mxu0 %v10206_v43  ;;  %v11789_v54 = vld [vmem:[%s11368_s1 + $0xa0] sm:$0xff] }
 0x17c   : > { %2347 = vst.msk [vmem:[#allocation3 + $0xd8] sm:$0xff] %vm573_vm0, %v15903_v0  ;;  %2348 = vst.msk [vmem:[#allocation3 + $0xe0] sm:$0xff] %vm573_vm0, %v15903_v0  ;;  %v10207_v40 = vld [vmem:[#allocation7 + $0x10] sm:$0xff]   ;;  %v11794_v48 = vld [vmem:[%s11368_s1 + $0xa8] sm:$0xff]  ;;  %9915 = vmatpush3.bf16.msra.mxu0 %v10206_v43  ;;  %1694 = vrot.lane.b32.xlu0 %v11698_v27, %s15924_s14 }
 0x17d   : > { %15976 = vst [vmem:[#allocation37_spill] sm:$0xff] %v11771_v32  ;;  %648 = vst.msk [vmem:[#allocation3 + $0xf1] sm:$0xff] %vm573_vm0, %v11771_v32  ;;  %v10208_v49 = vld [vmem:[#allocation7 + $0x18] sm:$0xff]   ;;  %9916 = vmatprep.subr.bf16.mxu0 %v10207_v40  ;;  %v10209_v35 = vld [vmem:[#allocation7 + $0x20] ss:$0 sps:$4 sm:$0xff]   ;;  %794 = vrot.lane.b32.xlu1 %v11655_v57, %s15941_s24 }
 0x17e   : > { %649 = vst.msk [vmem:[#allocation3 + $0xf9] sm:$0xff] %vm573_vm0, %v11774_v31  ;;  %719 = vst.msk [vmem:[#allocation2 + $0x90] sm:$0xff] %vm573_vm0, %v11758_v8  ;;  %v11821_v44 = vld [vmem:[%s11368_s1 + $0xb0] sm:$0xff]  ;;  %v11824_v45 = vld [vmem:[%s11368_s1 + $0xb8] sm:$0xff] }
 0x17f   : > { %15978 = vst [vmem:[#allocation39_spill] sm:$0xff] %v11789_v54  ;;  %15979 = vst [vmem:[#allocation40_spill] sm:$0xff] %v11794_v48 }
 0x180   : > { %650 = vst.msk [vmem:[#allocation3 + $0x109] sm:$0xff] %vm573_vm0, %v11789_v54  ;;  %651 = vst.msk [vmem:[#allocation3 + $0x111] sm:$0xff] %vm573_vm0, %v11794_v48  ;;  %9917 = vmatpush3.bf16.msra.mxu0 %v10207_v40  ;;  %1696 = vrot.lane.b32.xlu0 %v1663_v11, %s15924_s14 }
 0x181   : > { %15981 = vst [vmem:[#allocation41_spill] sm:$0xff] %v11821_v44  ;;  %15982 = vst [vmem:[#allocation42_spill] sm:$0xff] %v11824_v45  ;;  %9918 = vmatprep.subr.bf16.mxu0 %v10208_v49  ;;  %796 = vrot.lane.b32.xlu1 %v11780_v39, %s15941_s24 }
 0x182   : > { %652 = vst.msk [vmem:[#allocation3 + $0x121] sm:$0xff] %vm573_vm0, %v11821_v44  ;;  %653 = vst.msk [vmem:[#allocation3 + $0x129] sm:$0xff] %vm573_vm0, %v11824_v45  ;;  %v1869_v44 = vsel %vm1867_vm2, %v10209_v35, 0 }
 0x184   : > { %v1002_v31 = vld [vmem:[#allocation3 + $0xf0] sm:$0xff]  ;;  %9919 = vmatpush3.bf16.msra.mxu0 %v10208_v49  ;;  %923 = vrot.lane.b32.xlu0 %v11698_v27, %s10927_s26  ;;  %v1148_v27 = vpack.c.bf16 %v11651_v56, %v11649_v55  ;;  %v1277_v55 = vpack.c.bf16 %v11638_v52, %v11636_v51  ;;  %v1536_v51 = vpack.c.bf16 %v11673_v4, %v11671_v63  ;;  %v11934_v63 = vld [vmem:[%s11368_s1 + $0xd0] sm:$0xff]  ;;  %v11937_v4 = vld [vmem:[%s11368_s1 + $0xd8] sm:$0xff] }
 0x185   : > { %v11806_v0 = vld [vmem:[#allocation3 + $0xf2] sm:$0xff]  ;;  %v11808_v54 = vld [vmem:[#allocation3 + $0xfa] sm:$0xff]  ;;  %10018 = vmatprep.subr.msk.bf16.mxu0 %vm1867_vm2, %v10209_v35  ;;  %925 = vrot.lane.b32.xlu1 %v1663_v11, %s10927_s26  ;;  %15985 = vst [vmem:[#allocation45_spill] sm:$0xff] %v11934_v63  ;;  %15986 = vst [vmem:[#allocation46_spill] sm:$0xff] %v11937_v4 }
 0x186   : > { %v1003_v43 = vld [vmem:[#allocation3 + $0xf8] sm:$0xff]  ;;  %656 = vst.msk [vmem:[#allocation3 + $0x151] sm:$0xff] %vm573_vm0, %v11934_v63  ;;  %657 = vst.msk [vmem:[#allocation3 + $0x159] sm:$0xff] %vm573_vm0, %v11937_v4 }
 0x187   : > { %v11812_v48 = vld [vmem:[#allocation3 + $0xf1] sm:$0xff]  ;;  %v11814_v32 = vld [vmem:[#allocation3 + $0xf9] sm:$0xff]  ;;  %v11816_v26 = vpack.c.bf16 %v1003_v43, %v1002_v31  ;;  %v1390_v57 = vld [vmem:[#allocation3 + $0x108] sm:$0xff] }
 0x188   : > { %2352 = vst.msk [vmem:[#allocation3 + $0x100] sm:$0x3] %vm576_vm1, %v15980_v25  ;;  %v11830_v22 = vld [vmem:[#allocation3 + $0x109] sm:$0xff]  ;;  %v11839_v40 = vld [vmem:[#allocation3 + $0x112] sm:$0xff]  ;;  %9921 = vmatpush3.bf16.msra.mxu0 %v1869_v44  ;;  %1052 = vrot.lane.b32.xlu0 %v11634_v50, %s15934_s16 }
 0x189   : > { %2350 = vst.msk [vmem:[#allocation3 + $0xf0] sm:$0xff] %vm573_vm0, %v15980_v25  ;;  %2351 = vst.msk [vmem:[#allocation3 + $0xf8] sm:$0xff] %vm573_vm0, %v15980_v25  ;;  %v11837_v31 = vld [vmem:[#allocation3 + $0x10a] sm:$0xff]  ;;  %v1006_v49 = vld [vmem:[#allocation3 + $0x120] sm:$0xff]  ;;  %1054 = vrot.lane.b32.xlu1 %v11657_v58, %s15934_s16 }
 0x18a   : > { %v1391_v43 = vld [vmem:[#allocation3 + $0x110] sm:$0xff]  ;;  %720 = vst.msk [vmem:[#allocation2 + $0xa0] sm:$0xff] %vm573_vm0, %v11816_v26  ;;  %2353 = vst.msk [vmem:[#allocation3 + $0x108] sm:$0xff] %vm573_vm0, %v15980_v25  ;;  %v11866_v45 = vld [vmem:[#allocation3 + $0x122] sm:$0xff] }
 0x18b   : > { %v11845_v21 = vpack.c.bf16 %v1391_v43, %v1390_v57  ;;  %v11848_v20 = vld [vmem:[#allocation3 + $0x111] sm:$0xff]  ;;  %v1007_v57 = vld [vmem:[#allocation3 + $0x128] sm:$0xff] }
 0x18c   : > { %2355 = vst.msk [vmem:[#allocation3 + $0x118] sm:$0x3] %vm576_vm1, %v15980_v25  ;;  %v11862_v43 = vpack.c.bf16 %v1007_v57, %v1006_v49  ;;  %v11868_v35 = vld [vmem:[#allocation3 + $0x12a] sm:$0xff]  ;;  %v11876_v44 = vld [vmem:[#allocation3 + $0x121] sm:$0xff]  ;;  %v11884_v50 = vld [vmem:[%s11368_s1 + $0xc8] sm:$0xff]  ;;  %1181 = vrot.lane.b32.xlu0 %v11780_v39, %s15930_s22 }
 0x18d   : > { %2354 = vst.msk [vmem:[#allocation3 + $0x110] sm:$0xff] %vm573_vm0, %v15980_v25  ;;  %721 = vst.msk [vmem:[#allocation2 + $0xb0] sm:$0xff] %vm573_vm0, %v11845_v21  ;;  %v11878_v49 = vld [vmem:[#allocation3 + $0x129] sm:$0xff]  ;;  %1183 = vrot.lane.b32.xlu1 %v1148_v27, %s15930_s22  ;;  %v11957_v4 = vld [vmem:[#allocation3 + $0x15a] sm:$0xff] }
 0x18e   : > { %722 = vst.msk [vmem:[#allocation2 + $0xc0] sm:$0xff] %vm573_vm0, %v11862_v43  ;;  %v11881_v57 = vld [vmem:[%s11368_s1 + $0xc0] sm:$0xff]  ;;  %15984 = vst [vmem:[#allocation44_spill] sm:$0xff] %v11884_v50 }
 0x18f   : > { %15983 = vst [vmem:[#allocation43_spill] sm:$0xff] %v11881_v57  ;;  %654 = vst.msk [vmem:[#allocation3 + $0x139] sm:$0xff] %vm573_vm0, %v11881_v57 }
 0x190   : > { %2358 = vst.msk [vmem:[#allocation3 + $0x130] sm:$0x3] %vm576_vm1, %v15980_v25  ;;  %1310 = vrot.lane.b32.xlu0 %v1663_v11, %s15932_s13 }
 0x191   : > { %2356 = vst.msk [vmem:[#allocation3 + $0x120] sm:$0xff] %vm573_vm0, %v15980_v25  ;;  %2357 = vst.msk [vmem:[#allocation3 + $0x128] sm:$0xff] %vm573_vm0, %v15980_v25  ;;  %1312 = vrot.lane.b32.xlu1 %v1277_v55, %s15932_s13 }
 0x192   : > { %655 = vst.msk [vmem:[#allocation3 + $0x141] sm:$0xff] %vm573_vm0, %v11884_v50 }
 0x194   : > { %1440 = vrot.lane.b32.xlu0 %v11657_v58, %s15928_s25  ;;  %v1665_v58 = vpack.c.bf16 %v11661_v60, %v11659_v59  ;;  %v1010_v59 = vld [vmem:[#allocation3 + $0x150] sm:$0xff]  ;;  %v1011_v60 = vld [vmem:[#allocation3 + $0x158] sm:$0xff] }
 0x195   : > { %1442 = vrot.lane.b32.xlu1 %v11675_v5, %s15928_s25 }
 0x196   : > { %v1394_v56 = vld [vmem:[#allocation3 + $0x138] sm:$0xff] }
 0x197   : > { %v11915_v52 = vld [vmem:[#allocation3 + $0x139] sm:$0xff] }
 0x198   : > { %1569 = vrot.lane.b32.xlu0 %v1148_v27, %s15926_s30 }
 0x199   : > { %v1395_v57 = vld [vmem:[#allocation3 + $0x140] sm:$0xff]  ;;  %1571 = vrot.lane.b32.xlu1 %v1536_v51, %s15926_s30 }
 0x19a   : > { %v11905_v19 = vld [vmem:[#allocation3 + $0x13a] sm:$0xff]  ;;  %v11907_v39 = vld [vmem:[#allocation3 + $0x142] sm:$0xff]  ;;  %v11909_v50 = vpack.c.bf16 %v1395_v57, %v1394_v56  ;;  %v1150_v57 = vpack.c.bf16 %v11693_v24, %v11691_v23  ;;  %v11955_v56 = vld [vmem:[#allocation3 + $0x152] sm:$0xff]  ;;  %v1279_v23 = vpack.c.bf16 %v11679_v7, %v11677_v6 }
 0x19b   : > { %v11917_v11 = vld [vmem:[#allocation3 + $0x141] sm:$0xff]  ;;  %2359 = vst.msk [vmem:[#allocation3 + $0x138] sm:$0xff] %vm573_vm0, %v15980_v25 }
 0x19c   : > { %723 = vst.msk [vmem:[#allocation2 + $0xd0] sm:$0xff] %vm573_vm0, %v11909_v50  ;;  %2360 = vst.msk [vmem:[#allocation3 + $0x140] sm:$0xff] %vm573_vm0, %v15980_v25  ;;  %1698 = vrot.lane.b32.xlu0 %v1277_v55, %s15924_s14 }
 0x19d   : > { %2361 = vst.msk [vmem:[#allocation3 + $0x148] sm:$0x3] %vm576_vm1, %v15980_v25  ;;  %798 = vrot.lane.b32.xlu1 %v1148_v27, %s15941_s24  ;;  %v11947_v27 = vpack.c.bf16 %v1011_v60, %v1010_v59  ;;  %v11963_v59 = vld [vmem:[#allocation3 + $0x159] sm:$0xff]  ;;  %v11966_v60 = vld [vmem:[%s11368_s1 + $0xe0] sm:$0xff] }
 0x19e   : > { %15987 = vst [vmem:[#allocation47_spill] sm:$0xff] %v11966_v60  ;;  %658 = vst.msk [vmem:[#allocation3 + $0x169] sm:$0xff] %vm573_vm0, %v11966_v60 }
 0x19f   : > { %724 = vst.msk [vmem:[#allocation2 + $0xe0] sm:$0xff] %vm573_vm0, %v11947_v27 }
 0x1a0   : > { %1700 = vrot.lane.b32.xlu0 %v1665_v58, %s15924_s14  ;;  %2364 = vst.msk [vmem:[#allocation3 + $0x160] sm:$0x3] %vm576_vm1, %v15980_v25 }
 0x1a1   : > { %800 = vrot.lane.b32.xlu1 %v1536_v51, %s15941_s24 }
 0x1a4   : > { %927 = vrot.lane.b32.xlu0 %v1277_v55, %s10927_s26  ;;  %v11961_v55 = vld [vmem:[#allocation3 + $0x151] sm:$0xff] }
 0x1a5   : > { %929 = vrot.lane.b32.xlu1 %v1665_v58, %s10927_s26  ;;  %2362 = vst.msk [vmem:[#allocation3 + $0x150] sm:$0xff] %vm573_vm0, %v15980_v25  ;;  %2363 = vst.msk [vmem:[#allocation3 + $0x158] sm:$0xff] %vm573_vm0, %v15980_v25  ;;  %v1398_v24 = vld [vmem:[#allocation3 + $0x168] sm:$0xff] }
 0x1a6   : > { %v11999_v7 = vld [vmem:[#allocation3 + $0x169] sm:$0xff] }
 0x1a8   : > { %1056 = vrot.lane.b32.xlu0 %v11675_v5, %s15934_s16  ;;  %v11969_v5 = vld [vmem:[%s11368_s1 + $0xe8] sm:$0xff] }
 0x1a9   : > { %1058 = vrot.lane.b32.xlu1 %v11700_v28, %s15934_s16  ;;  %15988 = vst [vmem:[#allocation48_spill] sm:$0xff] %v11969_v5  ;;  %659 = vst.msk [vmem:[#allocation3 + $0x171] sm:$0xff] %vm573_vm0, %v11969_v5 }
 0x1ac   : > { %1185 = vrot.lane.b32.xlu0 %v1536_v51, %s15930_s22  ;;  %v1538_v51 = vpack.c.bf16 %v11716_v34, %v11714_v33 }
 0x1ad   : > { %1187 = vrot.lane.b32.xlu1 %v1150_v57, %s15930_s22 }
 0x1b0   : > { %1314 = vrot.lane.b32.xlu0 %v1665_v58, %s15932_s13  ;;  %v1399_v60 = vld [vmem:[#allocation3 + $0x170] sm:$0xff] }
 0x1b1   : > { %1316 = vrot.lane.b32.xlu1 %v1279_v23, %s15932_s13  ;;  %v11989_v63 = vpack.c.bf16 %v1399_v60, %v1398_v24  ;;  %v11995_v5 = vld [vmem:[#allocation3 + $0x16a] sm:$0xff]  ;;  %v11997_v6 = vld [vmem:[#allocation3 + $0x172] sm:$0xff] }
 0x1b2   : > { %v12001_v58 = vld [vmem:[#allocation3 + $0x171] sm:$0xff]  ;;  %2365 = vst.msk [vmem:[#allocation3 + $0x168] sm:$0xff] %vm573_vm0, %v15980_v25 }
 0x1b3   : > { %725 = vst.msk [vmem:[#allocation2 + $0xf0] sm:$0xff] %vm573_vm0, %v11989_v63  ;;  %2366 = vst.msk [vmem:[#allocation3 + $0x170] sm:$0xff] %vm573_vm0, %v15980_v25 }
 0x1b4   : > { %1444 = vrot.lane.b32.xlu0 %v11700_v28, %s15928_s25  ;;  %2367 = vst.msk [vmem:[#allocation3 + $0x178] sm:$0x3] %vm576_vm1, %v15980_v25  ;;  %v1667_v28 = vpack.c.bf16 %v11704_v30, %v11702_v29  ;;  %v1152_v29 = vpack.c.bf16 %v11736_v42, %v11734_v41  ;;  %v1281_v30 = vpack.c.bf16 %v11722_v38, %v11720_v37  ;;  %v12039_v41 = vld [vmem:[%s11368_s1 + $0xf8] sm:$0xff] }
 0x1b5   : > { %1446 = vrot.lane.b32.xlu1 %v11718_v36, %s15928_s25  ;;  %661 = vst.msk [vmem:[#allocation3 + $0x189] sm:$0xff] %vm573_vm0, %v12039_v41  ;;  %v1540_v37 = vpack.c.bf16 %v11756_v62, %v11754_v61 }
 0x1b8   : > { %1573 = vrot.lane.b32.xlu0 %v1150_v57, %s15926_s30 }
 0x1b9   : > { %1575 = vrot.lane.b32.xlu1 %v1538_v51, %s15926_s30 }
 0x1bc   : > { %1702 = vrot.lane.b32.xlu0 %v1279_v23, %s15924_s14  ;;  %v791_v33 = vpop.permute.xlu0 %790 }
 0x1bd   : > { %1704 = vrot.lane.b32.xlu1 %v1667_v28, %s15924_s14  ;;  %839 = vst.msk [vmem:[#allocation2] sm:$0xff] %vm838_vm3, %v791_v33  ;;  %v920_v34 = vpop.permute.xlu1 %919 }
 0x1be   : > { %968 = vst.msk [vmem:[#allocation2] sm:$0xff] %vm967_vm4, %v920_v34 }
 0x1c0   : > { %802 = vrot.lane.b32.xlu0 %v1150_v57, %s15941_s24 }
 0x1c1   : > { %804 = vrot.lane.b32.xlu1 %v1538_v51, %s15941_s24 }
 0x1c4   : > { %931 = vrot.lane.b32.xlu0 %v1279_v23, %s10927_s26 }
 0x1c5   : > { %933 = vrot.lane.b32.xlu1 %v1667_v28, %s10927_s26 }
 0x1c8   : > { %1060 = vrot.lane.b32.xlu0 %v11718_v36, %s15934_s16  ;;  %v12036_v36 = vld [vmem:[%s11368_s1 + $0xf0] sm:$0xff]  ;;  %s10935_s1 = smov 76  }
 0x1c9   : > { %1062 = vrot.lane.b32.xlu1 %v11740_v46, %s15934_s16  ;;  %660 = vst.msk [vmem:[#allocation3 + $0x181] sm:$0xff] %vm573_vm0, %v12036_v36 }
 0x1cc   : > { %1189 = vrot.lane.b32.xlu0 %v1538_v51, %s15930_s22  ;;  %v12065_v51 = vld [vmem:[#allocation3 + $0x18a] sm:$0xff] }
 0x1cd   : > { %1191 = vrot.lane.b32.xlu1 %v1152_v29, %s15930_s22 }
 0x1d0   : > { %1318 = vrot.lane.b32.xlu0 %v1667_v28, %s15932_s13  ;;  %v1014_v57 = vld [vmem:[#allocation3 + $0x180] sm:$0xff]  ;;  %v1015_v60 = vld [vmem:[#allocation3 + $0x188] sm:$0xff] }
 0x1d1   : > { %1320 = vrot.lane.b32.xlu1 %v1281_v30, %s15932_s13  ;;  %v12057_v24 = vpack.c.bf16 %v1015_v60, %v1014_v57  ;;  %v12062_v62 = vld [vmem:[#allocation3 + $0x182] sm:$0xff] }
 0x1d2   : > { %v12087_v57 = vld [vmem:[#allocation3 + $0x1a0] sm:$0xff] }
 0x1d4   : > { %1448 = vrot.lane.b32.xlu0 %v11740_v46, %s15928_s25  ;;  %v1669_v46 = vpack.c.bf16 %v11744_v53, %v11742_v47  ;;  %v12067_v47 = vld [vmem:[#allocation3 + $0x181] sm:$0xff]  ;;  %v12069_v53 = vld [vmem:[#allocation3 + $0x189] sm:$0xff] }
 0x1d5   : > { %1450 = vrot.lane.b32.xlu1 %v11758_v8, %s15928_s25  ;;  %2370 = vst.msk [vmem:[#allocation3 + $0x190] sm:$0x3] %vm576_vm1, %v15980_v25 }
 0x1d6   : > { %v793_v38 = vpop.permute.xlu0 %792  ;;  %2368 = vst.msk [vmem:[#allocation3 + $0x180] sm:$0xff] %vm573_vm0, %v15980_v25  ;;  %2369 = vst.msk [vmem:[#allocation3 + $0x188] sm:$0xff] %vm573_vm0, %v15980_v25 }
 0x1d7   : > { %840 = vst.msk [vmem:[#allocation2 + $0x10] sm:$0xff] %vm838_vm3, %v793_v38  ;;  %v922_v42 = vpop.permute.xlu1 %921 }
 0x1d8   : > { %969 = vst.msk [vmem:[#allocation2 + $0x10] sm:$0xff] %vm967_vm4, %v922_v42  ;;  %1577 = vrot.lane.b32.xlu0 %v1152_v29, %s15926_s30  ;;  %v12085_v42 = vld [vmem:[#allocation3 + $0x198] sm:$0xff] }
 0x1d9   : > { %1579 = vrot.lane.b32.xlu1 %v1540_v37, %s15926_s30 }
 0x1da   : > { %v1049_v23 = vpop.permute.xlu0 %1048 }
 0x1db   : > { %1097 = vst.msk [vmem:[#allocation2] sm:$0xff] %vm1096_vm5, %v1049_v23  ;;  %v1051_v61 = vpop.permute.xlu1 %1050 }
 0x1dc   : > { %1098 = vst.msk [vmem:[#allocation2 + $0x10] sm:$0xff] %vm1096_vm5, %v1051_v61  ;;  %1706 = vrot.lane.b32.xlu0 %v1281_v30, %s15924_s14  ;;  %v12097_v61 = vld [vmem:[#allocation3 + $0x19a] sm:$0xff] }
 0x1dd   : > { %1708 = vrot.lane.b32.xlu1 %v1669_v46, %s15924_s14 }
 0x1de   : > { %v1178_v28 = vpop.permute.xlu0 %1177 }
 0x1df   : > { %1226 = vst.msk [vmem:[#allocation2] sm:$0xff] %vm1225_vm6, %v1178_v28  ;;  %v1180_v33 = vpop.permute.xlu1 %1179  ;;  %v1154_v28 = vpack.c.bf16 %v11814_v32, %v11812_v48  ;;  %v12113_v32 = vld [vmem:[#allocation3 + $0x1a2] sm:$0xff] }
 0x1e0   : > { %1227 = vst.msk [vmem:[#allocation2 + $0x10] sm:$0xff] %vm1225_vm6, %v1180_v33  ;;  %806 = vrot.lane.b32.xlu0 %v1152_v29, %s15941_s24  ;;  %v1419_v29 = vpack.c.bf16 %v12087_v57, %v12085_v42 }
 0x1e1   : > { %808 = vrot.lane.b32.xlu1 %v1540_v37, %s15941_s24 }
 0x1e2   : > { %v1307_v34 = vpop.permute.xlu0 %1306 }
 0x1e3   : > { %1355 = vst.msk [vmem:[#allocation2] sm:$0xff] %vm1354_vm7, %v1307_v34  ;;  %v1309_v38 = vpop.permute.xlu1 %1308 }
 0x1e4   : > { %1356 = vst.msk [vmem:[#allocation2 + $0x10] sm:$0xff] %vm1354_vm7, %v1309_v38  ;;  %935 = vrot.lane.b32.xlu0 %v1281_v30, %s10927_s26  ;;  %v12095_v30 = vld [vmem:[#allocation3 + $0x199] sm:$0xff]  ;;  %v12111_v38 = vld [vmem:[#allocation3 + $0x1a1] sm:$0xff] }
 0x1e5   : > { %937 = vrot.lane.b32.xlu1 %v1669_v46, %s10927_s26  ;;  %2371 = vst.msk [vmem:[#allocation3 + $0x198] sm:$0xff] %vm573_vm0, %v15980_v25  ;;  %2372 = vst.msk [vmem:[#allocation3 + $0x1a0] sm:$0xff] %vm573_vm0, %v15980_v25 }
 0x1e6   : > { %v1437_v60 = vpop.permute.xlu0 %1436  ;;  %2373 = vst.msk [vmem:[#allocation3 + $0x1a8] sm:$0x3] %vm576_vm1, %v15980_v25 }
 0x1e7   : > { %1485 = vst.msk [vmem:[#allocation2] sm:$0xff] %vm1484_vm8, %v1437_v60  ;;  %v1439_v23 = vpop.permute.xlu1 %1438  ;;  %v1542_v60 = vpack.c.bf16 %v11848_v20, %v11830_v22 }
 0x1e8   : > { %1486 = vst.msk [vmem:[#allocation2 + $0x10] sm:$0xff] %vm1484_vm8, %v1439_v23  ;;  %1064 = vrot.lane.b32.xlu0 %v11758_v8, %s15934_s16  ;;  %v1283_v8 = vpack.c.bf16 %v11808_v54, %v11806_v0 }
 0x1e9   : > { %1066 = vrot.lane.b32.xlu1 %v11816_v26, %s15934_s16 }
 0x1ea   : > { %v1566_v33 = vpop.permute.xlu0 %1565 }
 0x1eb   : > { %1614 = vst.msk [vmem:[#allocation2] sm:$0xff] %vm1613_vm9, %v1566_v33  ;;  %v1568_v34 = vpop.permute.xlu1 %1567 }
 0x1ec   : > { %1615 = vst.msk [vmem:[#allocation2 + $0x10] sm:$0xff] %vm1613_vm9, %v1568_v34  ;;  %1193 = vrot.lane.b32.xlu0 %v1540_v37, %s15930_s22 }
 0x1ed   : > { %1195 = vrot.lane.b32.xlu1 %v1154_v28, %s15930_s22 }
 0x1ee   : > { %v1695_v48 = vpop.permute.xlu0 %1694 }
 0x1ef   : > { %1743 = vst.msk [vmem:[#allocation2] sm:$0xff] %vm1742_vm10, %v1695_v48  ;;  %v795_v37 = vpop.permute.xlu1 %794 }
 0x1f0   : > { %841 = vst.msk [vmem:[#allocation2 + $0x20] sm:$0xff] %vm838_vm3, %v795_v37  ;;  %1322 = vrot.lane.b32.xlu0 %v1669_v46, %s15932_s13 }
 0x1f1   : > { %1324 = vrot.lane.b32.xlu1 %v1283_v8, %s15932_s13 }
 0x1f2   : > { %v1697_v0 = vpop.permute.xlu0 %1696 }
 0x1f3   : > { %1744 = vst.msk [vmem:[#allocation2 + $0x10] sm:$0xff] %vm1742_vm10, %v1697_v0  ;;  %v797_v54 = vpop.permute.xlu1 %796 }
 0x1f4   : > { %842 = vst.msk [vmem:[#allocation2 + $0x30] sm:$0xff] %vm838_vm3, %v797_v54  ;;  %1452 = vrot.lane.b32.xlu0 %v11816_v26, %s15928_s25  ;;  %v1671_v26 = vpack.c.bf16 %v11839_v40, %v11837_v31 }
 0x1f5   : > { %1454 = vrot.lane.b32.xlu1 %v11845_v21, %s15928_s25 }
 0x1f6   : > { %v924_v23 = vpop.permute.xlu0 %923  ;;  %v1759_v46 = vld [vmem:[#allocation2] sm:$0xff] }
 0x1f7   : > { %970 = vst.msk [vmem:[#allocation2 + $0x20] sm:$0xff] %vm967_vm4, %v924_v23  ;;  %v926_v33 = vpop.permute.xlu1 %925  ;;  %9922 = vmatprep.mubr.msk.bf16.mxu0 %vm1818_vm11, %v1759_v46  ;;  %v1285_v46 = vpack.c.bf16 %v11868_v35, %v11866_v45  ;;  %v1544_v45 = vpack.c.bf16 %v11917_v11, %v11915_v52 }
 0x1f8   : > { %971 = vst.msk [vmem:[#allocation2 + $0x30] sm:$0xff] %vm967_vm4, %v926_v33  ;;  %1581 = vrot.lane.b32.xlu0 %v1154_v28, %s15926_s30 }
 0x1f9   : > { %1583 = vrot.lane.b32.xlu1 %v1542_v60, %s15926_s30 }
 0x1fa   : > { %v1053_v34 = vpop.permute.xlu0 %1052  ;;  %v1760_v48 = vld [vmem:[#allocation2 + $0x10] sm:$0xff] }
 0x1fb   : > { %1099 = vst.msk [vmem:[#allocation2 + $0x20] sm:$0xff] %vm1096_vm5, %v1053_v34  ;;  %v1055_v20 = vpop.permute.xlu1 %1054  ;;  %9923 = vmatmul.mubr.msk.bf16.vlgmr.msra.gmra.mrb[0].mxu0 %vm1818_vm11, %v1760_v48 }
 0x1fc   : > { %1100 = vst.msk [vmem:[#allocation2 + $0x30] sm:$0xff] %vm1096_vm5, %v1055_v20  ;;  %1710 = vrot.lane.b32.xlu0 %v1283_v8, %s15924_s14 }
 0x1fd   : > { %1712 = vrot.lane.b32.xlu1 %v1671_v26, %s15924_s14 }
 0x1fe   : > { %v1182_v22 = vpop.permute.xlu0 %1181 }
 0x1ff   : > { %1228 = vst.msk [vmem:[#allocation2 + $0x20] sm:$0xff] %vm1225_vm6, %v1182_v22  ;;  %v1184_v37 = vpop.permute.xlu1 %1183 }
 0x200   : > { %1229 = vst.msk [vmem:[#allocation2 + $0x30] sm:$0xff] %vm1225_vm6, %v1184_v37  ;;  %810 = vrot.lane.b32.xlu0 %v1154_v28, %s15941_s24  ;;  %v1156_v28 = vpack.c.bf16 %v11878_v49, %v11876_v44 }
 0x201   : > { %812 = vrot.lane.b32.xlu1 %v1542_v60, %s15941_s24 }
 0x202   : > { %v1311_v31 = vpop.permute.xlu0 %1310 }
 0x203   : > { %1357 = vst.msk [vmem:[#allocation2 + $0x20] sm:$0xff] %vm1354_vm7, %v1311_v31  ;;  %v1313_v40 = vpop.permute.xlu1 %1312  ;;  %v1158_v31 = vpack.c.bf16 %v11963_v59, %v11961_v55 }
 0x204   : > { %1358 = vst.msk [vmem:[#allocation2 + $0x30] sm:$0xff] %vm1354_vm7, %v1313_v40  ;;  %939 = vrot.lane.b32.xlu0 %v1283_v8, %s10927_s26 }
 0x205   : > { %941 = vrot.lane.b32.xlu1 %v1671_v26, %s10927_s26 }
 0x206   : > { %v1441_v0 = vpop.permute.xlu0 %1440 }
 0x207   : > { %1487 = vst.msk [vmem:[#allocation2 + $0x20] sm:$0xff] %vm1484_vm8, %v1441_v0  ;;  %v1443_v54 = vpop.permute.xlu1 %1442 }
 0x208   : > { %1488 = vst.msk [vmem:[#allocation2 + $0x30] sm:$0xff] %vm1484_vm8, %v1443_v54  ;;  %1068 = vrot.lane.b32.xlu0 %v11845_v21, %s15934_s16  ;;  %v1287_v54 = vpack.c.bf16 %v11957_v4, %v11955_v56  ;;  %v1546_v4 = vpack.c.bf16 %v12001_v58, %v11999_v7 }
 0x209   : > { %1070 = vrot.lane.b32.xlu1 %v11862_v43, %s15934_s16 }
 0x20a   : > { %v1570_v23 = vpop.permute.xlu0 %1569 }
 0x20b   : > { %1616 = vst.msk [vmem:[#allocation2 + $0x20] sm:$0xff] %vm1613_vm9, %v1570_v23  ;;  %v1572_v8 = vpop.permute.xlu1 %1571 }
 0x20c   : > { %1617 = vst.msk [vmem:[#allocation2 + $0x30] sm:$0xff] %vm1613_vm9, %v1572_v8  ;;  %1197 = vrot.lane.b32.xlu0 %v1542_v60, %s15930_s22 }
 0x20d   : > { %1199 = vrot.lane.b32.xlu1 %v1156_v28, %s15930_s22 }
 0x20e   : > { %v1699_v21 = vpop.permute.xlu0 %1698 }
 0x20f   : > { %1745 = vst.msk [vmem:[#allocation2 + $0x20] sm:$0xff] %vm1742_vm10, %v1699_v21  ;;  %v799_v33 = vpop.permute.xlu1 %798 }
 0x210   : > { %843 = vst.msk [vmem:[#allocation2 + $0x40] sm:$0xff] %vm838_vm3, %v799_v33  ;;  %1326 = vrot.lane.b32.xlu0 %v1671_v26, %s15932_s13 }
 0x211   : > { %1328 = vrot.lane.b32.xlu1 %v1285_v46, %s15932_s13 }
 0x212   : > { %v1701_v44 = vpop.permute.xlu0 %1700 }
 0x213   : > { %1746 = vst.msk [vmem:[#allocation2 + $0x30] sm:$0xff] %vm1742_vm10, %v1701_v44  ;;  %v801_v49 = vpop.permute.xlu1 %800 }
 0x214   : > { %844 = vst.msk [vmem:[#allocation2 + $0x50] sm:$0xff] %vm838_vm3, %v801_v49  ;;  %1456 = vrot.lane.b32.xlu0 %v11862_v43, %s15928_s25  ;;  %v1673_v43 = vpack.c.bf16 %v11907_v39, %v11905_v19 }
 0x215   : > { %1458 = vrot.lane.b32.xlu1 %v11909_v50, %s15928_s25 }
 0x216   : > { %v928_v35 = vpop.permute.xlu0 %927  ;;  %v1761_v60 = vld [vmem:[#allocation2 + $0x20] sm:$0xff] }
 0x217   : > { %972 = vst.msk [vmem:[#allocation2 + $0x40] sm:$0xff] %vm967_vm4, %v928_v35  ;;  %v930_v26 = vpop.permute.xlu1 %929  ;;  %9926 = vmatprep.mubr.msk.bf16.mxu0 %vm1818_vm11, %v1761_v60 }
 0x218   : > { %973 = vst.msk [vmem:[#allocation2 + $0x50] sm:$0xff] %vm967_vm4, %v930_v26  ;;  %1585 = vrot.lane.b32.xlu0 %v1156_v28, %s15926_s30  ;;  %v1289_v26 = vpack.c.bf16 %v12065_v51, %v12062_v62  ;;  %v1548_v62 = vpack.c.bf16 %v12111_v38, %v12095_v30 }
 0x219   : > { %1587 = vrot.lane.b32.xlu1 %v1544_v45, %s15926_s30 }
 0x21a   : > { %v1057_v34 = vpop.permute.xlu0 %1056  ;;  %v1762_v48 = vld [vmem:[#allocation2 + $0x30] sm:$0xff] }
 0x21b   : > { %1101 = vst.msk [vmem:[#allocation2 + $0x40] sm:$0xff] %vm1096_vm5, %v1057_v34  ;;  %v1059_v52 = vpop.permute.xlu1 %1058  ;;  %9927 = vmatmul.mubr.msk.bf16.gmra.mrb[4].mxu0 %vm1818_vm11, %v1762_v48 }
 0x21c   : > { %1102 = vst.msk [vmem:[#allocation2 + $0x50] sm:$0xff] %vm1096_vm5, %v1059_v52  ;;  %1714 = vrot.lane.b32.xlu0 %v1285_v46, %s15924_s14 }
 0x21d   : > { %1716 = vrot.lane.b32.xlu1 %v1673_v43, %s15924_s14 }
 0x21e   : > { %v1186_v11 = vpop.permute.xlu0 %1185 }
 0x21f   : > { %1230 = vst.msk [vmem:[#allocation2 + $0x40] sm:$0xff] %vm1225_vm6, %v1186_v11  ;;  %v1188_v20 = vpop.permute.xlu1 %1187 }
 0x220   : > { %1231 = vst.msk [vmem:[#allocation2 + $0x50] sm:$0xff] %vm1225_vm6, %v1188_v20  ;;  %814 = vrot.lane.b32.xlu0 %v1156_v28, %s15941_s24  ;;  %v2407_v20 = vld [vmem:[#allocation3] sm:$0xff] }
 0x221   : > { %816 = vrot.lane.b32.xlu1 %v1544_v45, %s15941_s24 }
 0x222   : > { %v1315_v19 = vpop.permute.xlu0 %1314 }
 0x223   : > { %1359 = vst.msk [vmem:[#allocation2 + $0x40] sm:$0xff] %vm1354_vm7, %v1315_v19  ;;  %v1317_v39 = vpop.permute.xlu1 %1316  ;;  %v2408_v19 = vld [vmem:[#allocation3 + $0x8] sm:$0xff] }
 0x224   : > { %1360 = vst.msk [vmem:[#allocation2 + $0x50] sm:$0xff] %vm1354_vm7, %v1317_v39  ;;  %943 = vrot.lane.b32.xlu0 %v1285_v46, %s10927_s26  ;;  %v2439_v39 = vpack.c.bf16 %v2408_v19, %v2407_v20 }
 0x225   : > { %945 = vrot.lane.b32.xlu1 %v1673_v43, %s10927_s26 }
 0x226   : > { %v1445_v22 = vpop.permute.xlu0 %1444 }
 0x227   : > { %1489 = vst.msk [vmem:[#allocation2 + $0x40] sm:$0xff] %vm1484_vm8, %v1445_v22  ;;  %v1447_v37 = vpop.permute.xlu1 %1446 }
 0x228   : > { %1490 = vst.msk [vmem:[#allocation2 + $0x50] sm:$0xff] %vm1484_vm8, %v1447_v37  ;;  %1072 = vrot.lane.b32.xlu0 %v11909_v50, %s15934_s16 }
 0x229   : > { %1074 = vrot.lane.b32.xlu1 %v11947_v27, %s15934_s16 }
 0x22a   : > { %v1574_v40 = vpop.permute.xlu0 %1573 }
 0x22b   : > { %1618 = vst.msk [vmem:[#allocation2 + $0x40] sm:$0xff] %vm1613_vm9, %v1574_v40  ;;  %v1576_v0 = vpop.permute.xlu1 %1575  ;;  %v2537_v40 = vld [vmem:[#allocation3 + $0x9] sm:$0xff] }
 0x22c   : > { %1619 = vst.msk [vmem:[#allocation2 + $0x50] sm:$0xff] %vm1613_vm9, %v1576_v0  ;;  %1201 = vrot.lane.b32.xlu0 %v1544_v45, %s15930_s22  ;;  %v1160_v45 = vpack.c.bf16 %v12069_v53, %v12067_v47 }
 0x22d   : > { %1203 = vrot.lane.b32.xlu1 %v1158_v31, %s15930_s22 }
 0x22e   : > { %v1703_v50 = vpop.permute.xlu0 %1702 }
 0x22f   : > { %1747 = vst.msk [vmem:[#allocation2 + $0x40] sm:$0xff] %vm1742_vm10, %v1703_v50  ;;  %v1705_v28 = vpop.permute.xlu1 %1704 }
 0x230   : > { %1748 = vst.msk [vmem:[#allocation2 + $0x50] sm:$0xff] %vm1742_vm10, %v1705_v28  ;;  %1330 = vrot.lane.b32.xlu0 %v1673_v43, %s15932_s13  ;;  %v2665_v28 = vld [vmem:[#allocation3 + $0x2] sm:$0xff] }
 0x231   : > { %1332 = vrot.lane.b32.xlu1 %v1287_v54, %s15932_s13 }
 0x232   : > { %v803_v55 = vpop.permute.xlu0 %802 }
 0x233   : > { %845 = vst.msk [vmem:[#allocation2 + $0x60] sm:$0xff] %vm838_vm3, %v803_v55  ;;  %v805_v59 = vpop.permute.xlu1 %804  ;;  %v2666_v55 = vld [vmem:[#allocation3 + $0xa] sm:$0xff] }
 0x234   : > { %846 = vst.msk [vmem:[#allocation2 + $0x70] sm:$0xff] %vm838_vm3, %v805_v59  ;;  %1460 = vrot.lane.b32.xlu0 %v11947_v27, %s15928_s25  ;;  %v1675_v27 = vpack.c.bf16 %v11997_v6, %v11995_v5  ;;  %v2697_v59 = vpack.c.bf16 %v2666_v55, %v2665_v28 }
 0x235   : > { %1462 = vrot.lane.b32.xlu1 %v11989_v63, %s15928_s25  ;;  %4150 = vst.msk [vmem:[#allocation3 + $0x10] sm:$0x3] %vm576_vm1, %v15980_v25 }
 0x236   : > { %v932_v56 = vpop.permute.xlu0 %931  ;;  %v1763_v23 = vld [vmem:[#allocation2 + $0x40] sm:$0xff] }
 0x237   : > { %974 = vst.msk [vmem:[#allocation2 + $0x60] sm:$0xff] %vm967_vm4, %v932_v56  ;;  %v934_v8 = vpop.permute.xlu1 %933  ;;  %9930 = vmatprep.mubr.msk.bf16.mxu0 %vm1818_vm11, %v1763_v23  ;;  %v1764_v46 = vld [vmem:[#allocation2 + $0x50] sm:$0xff] }
 0x238   : > { %975 = vst.msk [vmem:[#allocation2 + $0x70] sm:$0xff] %vm967_vm4, %v934_v8  ;;  %1589 = vrot.lane.b32.xlu0 %v1158_v31, %s15926_s30  ;;  %9931 = vmatmul.mubr.msk.bf16.gmra.mrb[8].mxu0 %vm1818_vm11, %v1764_v46 }
 0x239   : > { %1591 = vrot.lane.b32.xlu1 %v1546_v4, %s15926_s30 }
 0x23a   : > { %v1061_v7 = vpop.permute.xlu0 %1060 }
 0x23b   : > { %1103 = vst.msk [vmem:[#allocation2 + $0x60] sm:$0xff] %vm1096_vm5, %v1061_v7  ;;  %v1063_v58 = vpop.permute.xlu1 %1062 }
 0x23c   : > { %1104 = vst.msk [vmem:[#allocation2 + $0x70] sm:$0xff] %vm1096_vm5, %v1063_v58  ;;  %1718 = vrot.lane.b32.xlu0 %v1287_v54, %s15924_s14 }
 0x23d   : > { %1720 = vrot.lane.b32.xlu1 %v1675_v27, %s15924_s14 }
 0x23e   : > { %v1190_v21 = vpop.permute.xlu0 %1189 }
 0x23f   : > { %1232 = vst.msk [vmem:[#allocation2 + $0x60] sm:$0xff] %vm1225_vm6, %v1190_v21  ;;  %v1192_v33 = vpop.permute.xlu1 %1191 }
 0x240   : > { %1233 = vst.msk [vmem:[#allocation2 + $0x70] sm:$0xff] %vm1225_vm6, %v1192_v33  ;;  %818 = vrot.lane.b32.xlu0 %v1158_v31, %s15941_s24  ;;  %v2536_v31 = vld [vmem:[#allocation3 + $0x1] sm:$0xff] }
 0x241   : > { %820 = vrot.lane.b32.xlu1 %v1546_v4, %s15941_s24  ;;  %v2568_v0 = vpack.c.bf16 %v2537_v40, %v2536_v31  ;;  %4148 = vst.msk [vmem:[#allocation3] sm:$0xff] %vm573_vm0, %v15980_v25  ;;  %4149 = vst.msk [vmem:[#allocation3 + $0x8] sm:$0xff] %vm573_vm0, %v15980_v25 }
 0x242   : > { %v1319_v5 = vpop.permute.xlu0 %1318 }
 0x243   : > { %1361 = vst.msk [vmem:[#allocation2 + $0x60] sm:$0xff] %vm1354_vm7, %v1319_v5  ;;  %v1321_v6 = vpop.permute.xlu1 %1320 }
 0x244   : > { %1362 = vst.msk [vmem:[#allocation2 + $0x70] sm:$0xff] %vm1354_vm7, %v1321_v6  ;;  %947 = vrot.lane.b32.xlu0 %v1287_v54, %s10927_s26 }
 0x245   : > { %949 = vrot.lane.b32.xlu1 %v1675_v27, %s10927_s26 }
 0x246   : > { %v1449_v44 = vpop.permute.xlu0 %1448 }
 0x247   : > { %1491 = vst.msk [vmem:[#allocation2 + $0x60] sm:$0xff] %vm1484_vm8, %v1449_v44  ;;  %v1451_v49 = vpop.permute.xlu1 %1450 }
 0x248   : > { %1492 = vst.msk [vmem:[#allocation2 + $0x70] sm:$0xff] %vm1484_vm8, %v1451_v49  ;;  %1076 = vrot.lane.b32.xlu0 %v11989_v63, %s15934_s16 }
 0x249   : > { %1078 = vrot.lane.b32.xlu1 %v12057_v24, %s15934_s16  ;;  %s10942_s16 = smov 104  }
 0x24a   : > { %v1578_v35 = vpop.permute.xlu0 %1577 }
 0x24b   : > { %1620 = vst.msk [vmem:[#allocation2 + $0x60] sm:$0xff] %vm1613_vm9, %v1578_v35  ;;  %v1580_v60 = vpop.permute.xlu1 %1579 }
 0x24c   : > { %1621 = vst.msk [vmem:[#allocation2 + $0x70] sm:$0xff] %vm1613_vm9, %v1580_v60  ;;  %1205 = vrot.lane.b32.xlu0 %v1546_v4, %s15930_s22 }
 0x24d   : > { %1207 = vrot.lane.b32.xlu1 %v1160_v45, %s15930_s22  ;;  %s10940_s22 = smov 88  }
 0x24e   : > { %v1707_v63 = vpop.permute.xlu0 %1706 }
 0x24f   : > { %1749 = vst.msk [vmem:[#allocation2 + $0x60] sm:$0xff] %vm1742_vm10, %v1707_v63  ;;  %v1709_v43 = vpop.permute.xlu1 %1708 }
 0x250   : > { %1750 = vst.msk [vmem:[#allocation2 + $0x70] sm:$0xff] %vm1742_vm10, %v1709_v43  ;;  %1334 = vrot.lane.b32.xlu0 %v1675_v27, %s15932_s13 }
 0x251   : > { %1336 = vrot.lane.b32.xlu1 %v1289_v26, %s15932_s13  ;;  %s10941_s13 = smov 92  }
 0x252   : > { %v807_v47 = vpop.permute.xlu0 %806 }
 0x253   : > { %847 = vst.msk [vmem:[#allocation2 + $0x80] sm:$0xff] %vm838_vm3, %v807_v47  ;;  %v809_v53 = vpop.permute.xlu1 %808 }
 0x254   : > { %848 = vst.msk [vmem:[#allocation2 + $0x90] sm:$0xff] %vm838_vm3, %v809_v53  ;;  %1464 = vrot.lane.b32.xlu0 %v12057_v24, %s15928_s25  ;;  %v1677_v24 = vpack.c.bf16 %v12113_v32, %v12097_v61 }
 0x255   : > { %1466 = vrot.lane.b32.xlu1 %v1419_v29, %s15928_s25  ;;  %s10939_s25 = smov 100  }
 0x256   : > { %v936_v51 = vpop.permute.xlu0 %935  ;;  %v1765_v34 = vld [vmem:[#allocation2 + $0x60] sm:$0xff] }
 0x257   : > { %976 = vst.msk [vmem:[#allocation2 + $0x80] sm:$0xff] %vm967_vm4, %v936_v51  ;;  %v938_v48 = vpop.permute.xlu1 %937  ;;  %9934 = vmatprep.mubr.msk.bf16.mxu0 %vm1818_vm11, %v1765_v34  ;;  %v1766_v52 = vld [vmem:[#allocation2 + $0x70] sm:$0xff] }
 0x258   : > { %977 = vst.msk [vmem:[#allocation2 + $0x90] sm:$0xff] %vm967_vm4, %v938_v48  ;;  %9935 = vmatmul.mubr.msk.bf16.gmra.mrb[12].mxu0 %vm1818_vm11, %v1766_v52  ;;  %1593 = vrot.lane.b32.xlu0 %v1160_v45, %s15926_s30 }
 0x259   : > { %1595 = vrot.lane.b32.xlu1 %v1548_v62, %s15926_s30  ;;  %s15936_s30 = smov 84  }
 0x25a   : > { %v1065_v42 = vpop.permute.xlu0 %1064 }
 0x25b   : > { %1105 = vst.msk [vmem:[#allocation2 + $0x80] sm:$0xff] %vm1096_vm5, %v1065_v42  ;;  %v1067_v57 = vpop.permute.xlu1 %1066 }
 0x25c   : > { %1106 = vst.msk [vmem:[#allocation2 + $0x90] sm:$0xff] %vm1096_vm5, %v1067_v57  ;;  %1722 = vrot.lane.b32.xlu0 %v1289_v26, %s15924_s14 }
 0x25d   : > { %1724 = vrot.lane.b32.xlu1 %v1677_v24, %s15924_s14  ;;  %s10937_s14 = smov 96  }
 0x25e   : > { %v1194_v29 = vpop.permute.xlu0 %1193 }
 0x25f   : > { %1234 = vst.msk [vmem:[#allocation2 + $0x80] sm:$0xff] %vm1225_vm6, %v1194_v29  ;;  %v1196_v30 = vpop.permute.xlu1 %1195 }
 0x260   : > { %1235 = vst.msk [vmem:[#allocation2 + $0x90] sm:$0xff] %vm1225_vm6, %v1196_v30  ;;  %2471 = vrot.lane.b32.xlu0 %v2439_v39, %s10934_s21 }
 0x262   : > { %v1323_v38 = vpop.permute.xlu0 %1322 }
 0x263   : > { %1363 = vst.msk [vmem:[#allocation2 + $0x80] sm:$0xff] %vm1354_vm7, %v1323_v38  ;;  %v1325_v61 = vpop.permute.xlu1 %1324 }
 0x264   : > { %1364 = vst.msk [vmem:[#allocation2 + $0x90] sm:$0xff] %vm1354_vm7, %v1325_v61  ;;  %2600 = vrot.lane.b32.xlu0 %v2568_v0, %s10935_s1 }
 0x266   : > { %v1453_v32 = vpop.permute.xlu0 %1452 }
 0x267   : > { %1493 = vst.msk [vmem:[#allocation2 + $0x80] sm:$0xff] %vm1484_vm8, %v1453_v32  ;;  %v1455_v11 = vpop.permute.xlu1 %1454 }
 0x268   : > { %1494 = vst.msk [vmem:[#allocation2 + $0x90] sm:$0xff] %vm1484_vm8, %v1455_v11  ;;  %2729 = vrot.lane.b32.xlu0 %v2697_v59, %s15938_s12 }
 0x26a   : > { %v1582_v22 = vpop.permute.xlu0 %1581 }
 0x26b   : > { %1622 = vst.msk [vmem:[#allocation2 + $0x80] sm:$0xff] %vm1613_vm9, %v1582_v22  ;;  %v1584_v37 = vpop.permute.xlu1 %1583 }
 0x26c   : > { %1623 = vst.msk [vmem:[#allocation2 + $0x90] sm:$0xff] %vm1613_vm9, %v1584_v37 }
 0x26e   : > { %v1711_v54 = vpop.permute.xlu0 %1710 }
 0x26f   : > { %1751 = vst.msk [vmem:[#allocation2 + $0x80] sm:$0xff] %vm1742_vm10, %v1711_v54  ;;  %v1713_v50 = vpop.permute.xlu1 %1712 }
 0x270   : > { %1752 = vst.msk [vmem:[#allocation2 + $0x90] sm:$0xff] %vm1742_vm10, %v1713_v50 }
 0x272   : > { %v811_v4 = vpop.permute.xlu0 %810 }
 0x273   : > { %849 = vst.msk [vmem:[#allocation2 + $0xa0] sm:$0xff] %vm838_vm3, %v811_v4  ;;  %v813_v56 = vpop.permute.xlu1 %812 }
 0x274   : > { %850 = vst.msk [vmem:[#allocation2 + $0xb0] sm:$0xff] %vm838_vm3, %v813_v56 }
 0x276   : > { %v940_v23 = vpop.permute.xlu0 %939  ;;  %v1767_v8 = vld [vmem:[#allocation2 + $0x80] sm:$0xff] }
 0x277   : > { %978 = vst.msk [vmem:[#allocation2 + $0xa0] sm:$0xff] %vm967_vm4, %v940_v23  ;;  %v942_v46 = vpop.permute.xlu1 %941  ;;  %9938 = vmatprep.mubr.msk.bf16.mxu0 %vm1818_vm11, %v1767_v8  ;;  %v1768_v27 = vld [vmem:[#allocation2 + $0x90] sm:$0xff] }
 0x278   : > { %979 = vst.msk [vmem:[#allocation2 + $0xb0] sm:$0xff] %vm967_vm4, %v942_v46  ;;  %9939 = vmatmul.mubr.msk.bf16.gmra.mrb[16].mxu0 %vm1818_vm11, %v1768_v27  ;;  %v12353_v8 = vld [vmem:[#allocation9] ss:$0 sm:$0xff] }
 0x27a   : > { %v1069_v7 = vpop.permute.xlu0 %1068 }
 0x27b   : > { %1107 = vst.msk [vmem:[#allocation2 + $0xa0] sm:$0xff] %vm1096_vm5, %v1069_v7  ;;  %v1071_v58 = vpop.permute.xlu1 %1070 }
 0x27c   : > { %1108 = vst.msk [vmem:[#allocation2 + $0xb0] sm:$0xff] %vm1096_vm5, %v1071_v58 }
 0x27e   : > { %v1198_v21 = vpop.permute.xlu0 %1197 }
 0x27f   : > { %1236 = vst.msk [vmem:[#allocation2 + $0xa0] sm:$0xff] %vm1225_vm6, %v1198_v21  ;;  %v1200_v33 = vpop.permute.xlu1 %1199 }
 0x280   : > { %1237 = vst.msk [vmem:[#allocation2 + $0xb0] sm:$0xff] %vm1225_vm6, %v1200_v33 }
 0x282   : > { %v1327_v5 = vpop.permute.xlu0 %1326 }
 0x283   : > { %1365 = vst.msk [vmem:[#allocation2 + $0xa0] sm:$0xff] %vm1354_vm7, %v1327_v5  ;;  %v1329_v6 = vpop.permute.xlu1 %1328 }
 0x284   : > { %1366 = vst.msk [vmem:[#allocation2 + $0xb0] sm:$0xff] %vm1354_vm7, %v1329_v6 }
 0x286   : > { %v1457_v44 = vpop.permute.xlu0 %1456 }
 0x287   : > { %1495 = vst.msk [vmem:[#allocation2 + $0xa0] sm:$0xff] %vm1484_vm8, %v1457_v44  ;;  %v1459_v49 = vpop.permute.xlu1 %1458 }
 0x288   : > { %1496 = vst.msk [vmem:[#allocation2 + $0xb0] sm:$0xff] %vm1484_vm8, %v1459_v49 }
 0x28a   : > { %v1586_v45 = vpop.permute.xlu0 %1585 }
 0x28b   : > { %1624 = vst.msk [vmem:[#allocation2 + $0xa0] sm:$0xff] %vm1613_vm9, %v1586_v45  ;;  %v1588_v35 = vpop.permute.xlu1 %1587 }
 0x28c   : > { %1625 = vst.msk [vmem:[#allocation2 + $0xb0] sm:$0xff] %vm1613_vm9, %v1588_v35 }
 0x28e   : > { %v1715_v60 = vpop.permute.xlu0 %1714 }
 0x28f   : > { %1753 = vst.msk [vmem:[#allocation2 + $0xa0] sm:$0xff] %vm1742_vm10, %v1715_v60  ;;  %v1717_v26 = vpop.permute.xlu1 %1716 }
 0x290   : > { %1754 = vst.msk [vmem:[#allocation2 + $0xb0] sm:$0xff] %vm1742_vm10, %v1717_v26 }
 0x292   : > { %v815_v63 = vpop.permute.xlu0 %814 }
 0x293   : > { %851 = vst.msk [vmem:[#allocation2 + $0xc0] sm:$0xff] %vm838_vm3, %v815_v63  ;;  %v817_v43 = vpop.permute.xlu1 %816 }
 0x294   : > { %852 = vst.msk [vmem:[#allocation2 + $0xd0] sm:$0xff] %vm838_vm3, %v817_v43 }
 0x296   : > { %v944_v47 = vpop.permute.xlu0 %943  ;;  %v1769_v53 = vld [vmem:[#allocation2 + $0xa0] sm:$0xff] }
 0x297   : > { %980 = vst.msk [vmem:[#allocation2 + $0xc0] sm:$0xff] %vm967_vm4, %v944_v47  ;;  %v946_v62 = vpop.permute.xlu1 %945  ;;  %9942 = vmatprep.mubr.msk.bf16.mxu0 %vm1818_vm11, %v1769_v53  ;;  %v1770_v51 = vld [vmem:[#allocation2 + $0xb0] sm:$0xff] }
 0x298   : > { %981 = vst.msk [vmem:[#allocation2 + $0xd0] sm:$0xff] %vm967_vm4, %v946_v62  ;;  %9943 = vmatmul.mubr.msk.bf16.gmra.mrb[20].mxu0 %vm1818_vm11, %v1770_v51 }
 0x29a   : > { %v1073_v34 = vpop.permute.xlu0 %1072 }
 0x29b   : > { %1109 = vst.msk [vmem:[#allocation2 + $0xc0] sm:$0xff] %vm1096_vm5, %v1073_v34  ;;  %v1075_v48 = vpop.permute.xlu1 %1074 }
 0x29c   : > { %1110 = vst.msk [vmem:[#allocation2 + $0xd0] sm:$0xff] %vm1096_vm5, %v1075_v48 }
 0x29e   : > { %v1202_v52 = vpop.permute.xlu0 %1201 }
 0x29f   : > { %1238 = vst.msk [vmem:[#allocation2 + $0xc0] sm:$0xff] %vm1225_vm6, %v1202_v52  ;;  %v1204_v24 = vpop.permute.xlu1 %1203 }
 0x2a0   : > { %1239 = vst.msk [vmem:[#allocation2 + $0xd0] sm:$0xff] %vm1225_vm6, %v1204_v24 }
 0x2a2   : > { %v1331_v42 = vpop.permute.xlu0 %1330 }
 0x2a3   : > { %1367 = vst.msk [vmem:[#allocation2 + $0xc0] sm:$0xff] %vm1354_vm7, %v1331_v42  ;;  %v1333_v57 = vpop.permute.xlu1 %1332 }
 0x2a4   : > { %1368 = vst.msk [vmem:[#allocation2 + $0xd0] sm:$0xff] %vm1354_vm7, %v1333_v57 }
 0x2a6   : > { %v1461_v29 = vpop.permute.xlu0 %1460 }
 0x2a7   : > { %1497 = vst.msk [vmem:[#allocation2 + $0xc0] sm:$0xff] %vm1484_vm8, %v1461_v29  ;;  %v1463_v30 = vpop.permute.xlu1 %1462 }
 0x2a8   : > { %1498 = vst.msk [vmem:[#allocation2 + $0xd0] sm:$0xff] %vm1484_vm8, %v1463_v30 }
 0x2aa   : > { %v1590_v38 = vpop.permute.xlu0 %1589 }
 0x2ab   : > { %1626 = vst.msk [vmem:[#allocation2 + $0xc0] sm:$0xff] %vm1613_vm9, %v1590_v38  ;;  %v1592_v61 = vpop.permute.xlu1 %1591 }
 0x2ac   : > { %1627 = vst.msk [vmem:[#allocation2 + $0xd0] sm:$0xff] %vm1613_vm9, %v1592_v61 }
 0x2ae   : > { %v1719_v32 = vpop.permute.xlu0 %1718 }
 0x2af   : > { %1755 = vst.msk [vmem:[#allocation2 + $0xc0] sm:$0xff] %vm1742_vm10, %v1719_v32  ;;  %v1721_v11 = vpop.permute.xlu1 %1720 }
 0x2b0   : > { %1756 = vst.msk [vmem:[#allocation2 + $0xd0] sm:$0xff] %vm1742_vm10, %v1721_v11 }
 0x2b2   : > { %v819_v20 = vpop.permute.xlu0 %818 }
 0x2b3   : > { %853 = vst.msk [vmem:[#allocation2 + $0xe0] sm:$0xff] %vm838_vm3, %v819_v20  ;;  %v821_v19 = vpop.permute.xlu1 %820 }
 0x2b4   : > { %854 = vst.msk [vmem:[#allocation2 + $0xf0] sm:$0xff] %vm838_vm3, %v821_v19  ;;  %vm3695_vm3 = vcmask 1045504  }
 0x2b6   : > { %v1771_v39 = vld [vmem:[#allocation2 + $0xc0] sm:$0xff]  ;;  %v948_v22 = vpop.permute.xlu0 %947 }
 0x2b7   : > { %9946 = vmatprep.mubr.msk.bf16.mxu0 %vm1818_vm11, %v1771_v39  ;;  %v1772_v37 = vld [vmem:[#allocation2 + $0xd0] sm:$0xff]  ;;  %982 = vst.msk [vmem:[#allocation2 + $0xe0] sm:$0xff] %vm967_vm4, %v948_v22  ;;  %v950_v31 = vpop.permute.xlu1 %949 }
 0x2b8   : > { %9947 = vmatmul.mubr.msk.bf16.gmra.mrb[24].mxu0 %vm1818_vm11, %v1772_v37  ;;  %983 = vst.msk [vmem:[#allocation2 + $0xf0] sm:$0xff] %vm967_vm4, %v950_v31  ;;  %vm15940_vm4 = vcmask 720544  }
 0x2ba   : > { %v1077_v40 = vpop.permute.xlu0 %1076 }
 0x2bb   : > { %1111 = vst.msk [vmem:[#allocation2 + $0xe0] sm:$0xff] %vm1096_vm5, %v1077_v40  ;;  %v1079_v0 = vpop.permute.xlu1 %1078 }
 0x2bc   : > { %1112 = vst.msk [vmem:[#allocation2 + $0xf0] sm:$0xff] %vm1096_vm5, %v1079_v0  ;;  %vm3035_vm5 = vcmask 753344  }
 0x2be   : > { %v1206_v54 = vpop.permute.xlu0 %1205 }
 0x2bf   : > { %1240 = vst.msk [vmem:[#allocation2 + $0xe0] sm:$0xff] %vm1225_vm6, %v1206_v54  ;;  %v1208_v50 = vpop.permute.xlu1 %1207 }
 0x2c0   : > { %1241 = vst.msk [vmem:[#allocation2 + $0xf0] sm:$0xff] %vm1225_vm6, %v1208_v50  ;;  %vm3164_vm6 = vcmask 786144  }
 0x2c2   : > { %v1335_v28 = vpop.permute.xlu0 %1334 }
 0x2c3   : > { %1369 = vst.msk [vmem:[#allocation2 + $0xe0] sm:$0xff] %vm1354_vm7, %v1335_v28  ;;  %v1337_v55 = vpop.permute.xlu1 %1336 }
 0x2c4   : > { %1370 = vst.msk [vmem:[#allocation2 + $0xf0] sm:$0xff] %vm1354_vm7, %v1337_v55  ;;  %vm3293_vm7 = vcmask 818944  }
 0x2c6   : > { %v1465_v59 = vpop.permute.xlu0 %1464 }
 0x2c7   : > { %1499 = vst.msk [vmem:[#allocation2 + $0xe0] sm:$0xff] %vm1484_vm8, %v1465_v59  ;;  %v1467_v4 = vpop.permute.xlu1 %1466 }
 0x2c8   : > { %1500 = vst.msk [vmem:[#allocation2 + $0xf0] sm:$0xff] %vm1484_vm8, %v1467_v4  ;;  %vm3422_vm8 = vcmask 851744  }
 0x2ca   : > { %v1594_v56 = vpop.permute.xlu0 %1593 }
 0x2cb   : > { %1628 = vst.msk [vmem:[#allocation2 + $0xe0] sm:$0xff] %vm1613_vm9, %v1594_v56  ;;  %v1596_v23 = vpop.permute.xlu1 %1595 }
 0x2cc   : > { %1629 = vst.msk [vmem:[#allocation2 + $0xf0] sm:$0xff] %vm1613_vm9, %v1596_v23  ;;  %vm3551_vm9 = vcmask 884544  }
 0x2ce   : > { %v9924_v46 = vpop.f32.mrb[0].mxu0  ;;  %v1723_v27 = vpop.permute.xlu0 %1722 }
 0x2cf   : > { %v1914_v7 = vadd.f32 %v9924_v46, %v12353_v8  ;;  %v1905_v58 = vpop.f32.mrb[1].mxu0  ;;  %1757 = vst.msk [vmem:[#allocation2 + $0xe0] sm:$0xff] %vm1742_vm10, %v1723_v27  ;;  %v1725_v21 = vpop.permute.xlu1 %1724 }
 0x2d0   : > { %v1906_v33 = vadd.f32 %v12353_v8, %v1905_v58  ;;  %v9925_v5 = vpop.f32.mrb[2].mxu0  ;;  %1758 = vst.msk [vmem:[#allocation2 + $0xf0] sm:$0xff] %vm1742_vm10, %v1725_v21  ;;  %vm3646_vm10 = vcmask 883712  }
 0x2d1   : > { %v2066_v6 = vmul.f32 %v1914_v7, %v1914_v7  ;;  %v1917_v44 = vadd.f32 %v9925_v5, %v12353_v8  ;;  %v1908_v49 = vpop.f32.mrb[3].mxu0  ;;  %v2034_v37 = vmul.f32 0.5, %v1914_v7 }
 0x2d2   : > { %v2064_v45 = vmul.f32 %v1906_v33, %v1906_v33  ;;  %v1909_v35 = vadd.f32 %v12353_v8, %v1908_v49  ;;  %v2472_v20 = vpop.permute.xlu0 %2471  ;;  %v2032_v0 = vmul.f32 0.5, %v1906_v33 }
 0x2d3   : > { %v2098_v60 = vmul.f32 %v2066_v6, %v1914_v7  ;;  %v2067_v26 = vmul.f32 %v1917_v44, %v1917_v44  ;;  %v2035_v55 = vmul.f32 0.5, %v1917_v44  ;;  %2520 = vst.msk [vmem:[#allocation2] sm:$0xff] %vm2519_vm13, %v2472_v20 }
 0x2d4   : > { %v2096_v63 = vmul.f32 %v2064_v45, %v1906_v33  ;;  %v2065_v43 = vmul.f32 %v1909_v35, %v1909_v35  ;;  %v2033_v56 = vmul.f32 0.5, %v1909_v35 }
 0x2d5   : > { %v2130_v47 = vmul.f32 0.044715, %v2098_v60  ;;  %v2099_v53 = vmul.f32 %v2067_v26, %v1917_v44 }
 0x2d6   : > { %v2128_v62 = vmul.f32 0.044715, %v2096_v63  ;;  %v2097_v51 = vmul.f32 %v2065_v43, %v1909_v35  ;;  %v1773_v34 = vld [vmem:[#allocation2 + $0xe0] sm:$0xff]  ;;  %v2601_v39 = vpop.permute.xlu0 %2600 }
 0x2d7   : > { %v2162_v48 = vadd.f32 %v2130_v47, %v1914_v7  ;;  %v2131_v52 = vmul.f32 0.044715, %v2099_v53  ;;  %9950 = vmatprep.mubr.msk.bf16.mxu0 %vm1818_vm11, %v1773_v34  ;;  %v1774_v24 = vld [vmem:[#allocation2 + $0xf0] sm:$0xff]  ;;  %2649 = vst.msk [vmem:[#allocation2] sm:$0xff] %vm2648_vm14, %v2601_v39 }
 0x2d8   : > { %v2160_v42 = vadd.f32 %v2128_v62, %v1906_v33  ;;  %v2129_v57 = vmul.f32 0.044715, %v2097_v51  ;;  %9951 = vmatmul.mubr.msk.bf16.gmra.mrb[28].mxu0 %vm1818_vm11, %v1774_v24  ;;  %vm4346_vm11 = vcmask 917344  }
 0x2d9   : > { %v2194_v29 = vmul.f32 0.7978846, %v2162_v48  ;;  %v2163_v30 = vadd.f32 %v2131_v52, %v1917_v44 }
 0x2da   : > { %v2192_v38 = vmul.f32 0.7978846, %v2160_v42  ;;  %v2161_v61 = vadd.f32 %v2129_v57, %v1909_v35  ;;  %v2730_v7 = vpop.permute.xlu0 %2729 }
 0x2db   : > { %10252 = vtanh.f32 %v2194_v29  ;;  %v2195_v32 = vmul.f32 0.7978846, %v2163_v30  ;;  %2778 = vst.msk [vmem:[#allocation2] sm:$0xff] %vm15942_vm15, %v2730_v7 }
 0x2dc   : > { %10254 = vtanh.f32 %v2192_v38  ;;  %v2193_v11 = vmul.f32 0.7978846, %v2161_v61 }
 0x2dd   : > { %10256 = vtanh.f32 %v2195_v32 }
 0x2de   : > { %10258 = vtanh.f32 %v2193_v11 }
 0x2e5   : > { %v10253_v19 = vpop.eup %10252 }
 0x2e6   : > { %v10255_v22 = vpop.eup %10254  ;;  %v2258_v31 = vadd.f32 1.0, %v10253_v19 }
 0x2e7   : > { %v10257_v40 = vpop.eup %10256  ;;  %v2256_v54 = vadd.f32 1.0, %v10255_v22 }
 0x2e8   : > { %v10259_v50 = vpop.eup %10258  ;;  %v2290_v28 = vmul.f32 %v2258_v31, %v2034_v37  ;;  %v2259_v59 = vadd.f32 1.0, %v10257_v40 }
 0x2e9   : > { %v2288_v4 = vmul.f32 %v2256_v54, %v2032_v0  ;;  %v2257_v23 = vadd.f32 1.0, %v10259_v50 }
 0x2ea   : > { %v2291_v46 = vmul.f32 %v2259_v59, %v2035_v55  ;;  %2377 = vst.msk [vmem:[#allocation3 + $0x31] sm:$0xff] %vm2374_vm12, %v2290_v28 }
 0x2eb   : > { %v2289_v27 = vmul.f32 %v2257_v23, %v2033_v56  ;;  %2375 = vst.msk [vmem:[#allocation3 + $0x19] sm:$0xff] %vm2374_vm12, %v2288_v4 }
 0x2ec   : > { %2378 = vst.msk [vmem:[#allocation3 + $0x39] sm:$0xff] %vm2374_vm12, %v2291_v46 }
 0x2ed   : > { %2376 = vst.msk [vmem:[#allocation3 + $0x21] sm:$0xff] %vm2374_vm12, %v2289_v27 }
 0x2ee   : > { %v9928_v58 = vpop.f32.mrb[4].mxu0 }
 0x2ef   : > { %v12372_v21 = vadd.f32 %v9928_v58, %v12353_v8  ;;  %v1921_v33 = vpop.f32.mrb[5].mxu0 }
 0x2f0   : > { %v12375_v5 = vadd.f32 %v12353_v8, %v1921_v33  ;;  %v9929_v6 = vpop.f32.mrb[6].mxu0 }
 0x2f1   : > { %v2070_v44 = vmul.f32 %v12372_v21, %v12372_v21  ;;  %v12380_v49 = vadd.f32 %v9929_v6, %v12353_v8  ;;  %v1924_v45 = vpop.f32.mrb[7].mxu0  ;;  %v3181_v26 = vld [vmem:[#allocation3 + $0x30] sm:$0xff]  ;;  %v2038_v7 = vmul.f32 0.5, %v12372_v21 }
 0x2f2   : > { %v2068_v35 = vmul.f32 %v12375_v5, %v12375_v5  ;;  %v12385_v60 = vadd.f32 %v12353_v8, %v1924_v45  ;;  %v3310_v63 = vld [vmem:[#allocation3 + $0x31] sm:$0xff]  ;;  %v2923_v34 = vld [vmem:[#allocation3 + $0x19] sm:$0xff]  ;;  %v2036_v6 = vmul.f32 0.5, %v12375_v5 }
 0x2f3   : > { %v2102_v43 = vmul.f32 %v2070_v44, %v12372_v21  ;;  %v2071_v47 = vmul.f32 %v12380_v49, %v12380_v49  ;;  %v3182_v53 = vld [vmem:[#allocation3 + $0x38] sm:$0xff] }
 0x2f4   : > { %v3054_v62 = vld [vmem:[#allocation3 + $0x32] sm:$0xff]  ;;  %v2100_v48 = vmul.f32 %v2068_v35, %v12375_v5  ;;  %v2069_v52 = vmul.f32 %v12385_v60, %v12385_v60  ;;  %v3213_v24 = vpack.c.bf16 %v3182_v53, %v3181_v26  ;;  %v3055_v57 = vld [vmem:[#allocation3 + $0x3a] sm:$0xff]  ;;  %v3053_v11 = vld [vmem:[#allocation3 + $0x22] sm:$0xff]  ;;  %v2039_v26 = vmul.f32 0.5, %v12380_v49 }
 0x2f5   : > { %v2794_v51 = vld [vmem:[#allocation3 + $0x18] sm:$0xff]  ;;  %v2795_v29 = vld [vmem:[#allocation3 + $0x20] sm:$0xff]  ;;  %4154 = vst.msk [vmem:[#allocation3 + $0x30] sm:$0xff] %vm573_vm0, %v15980_v25  ;;  %v2134_v30 = vmul.f32 0.044715, %v2102_v43  ;;  %v2103_v38 = vmul.f32 %v2071_v47, %v12380_v49  ;;  %v3085_v4 = vpack.c.bf16 %v3055_v57, %v3054_v62  ;;  %v2037_v53 = vmul.f32 0.5, %v12385_v60 }
 0x2f6   : > { %v3311_v42 = vld [vmem:[#allocation3 + $0x39] sm:$0xff]  ;;  %v2924_v61 = vld [vmem:[#allocation3 + $0x21] sm:$0xff]  ;;  %v2132_v20 = vmul.f32 0.044715, %v2100_v48  ;;  %v2101_v19 = vmul.f32 %v2069_v52, %v12385_v60  ;;  %3245 = vrot.lane.b32.xlu0 %v3213_v24, %s10937_s14  ;;  %2860 = vrot.lane.b32.xlu1 %v3213_v24, %s15936_s30  ;;  %v2826_v56 = vpack.c.bf16 %v2795_v29, %v2794_v51 }
 0x2f7   : > { %4156 = vst.msk [vmem:[#allocation3 + $0x40] sm:$0x3] %vm576_vm1, %v15980_v25  ;;  %v3052_v32 = vld [vmem:[#allocation3 + $0x1a] sm:$0xff]  ;;  %4153 = vst.msk [vmem:[#allocation3 + $0x28] sm:$0x3] %vm576_vm1, %v15980_v25  ;;  %v2166_v39 = vadd.f32 %v2134_v30, %v12372_v21  ;;  %v3342_v40 = vpack.c.bf16 %v3311_v42, %v3310_v63  ;;  %v2955_v23 = vpack.c.bf16 %v2924_v61, %v2923_v34 }
 0x2f8   : > { %4155 = vst.msk [vmem:[#allocation3 + $0x38] sm:$0xff] %vm573_vm0, %v15980_v25  ;;  %4151 = vst.msk [vmem:[#allocation3 + $0x18] sm:$0xff] %vm573_vm0, %v15980_v25  ;;  %v2135_v22 = vmul.f32 0.044715, %v2103_v38  ;;  %v2164_v37 = vadd.f32 %v2132_v20, %v12375_v5  ;;  %v2133_v31 = vmul.f32 0.044715, %v2101_v19  ;;  %v3084_v43 = vpack.c.bf16 %v3053_v11, %v3052_v32 }
 0x2f9   : > { %4152 = vst.msk [vmem:[#allocation3 + $0x20] sm:$0xff] %vm573_vm0, %v15980_v25  ;;  %v2198_v0 = vmul.f32 0.7978846, %v2166_v39 }
 0x2fa   : > { %v2167_v54 = vadd.f32 %v2135_v22, %v12380_v49  ;;  %v2196_v50 = vmul.f32 0.7978846, %v2164_v37  ;;  %v2165_v28 = vadd.f32 %v2133_v31, %v12385_v60  ;;  %3374 = vrot.lane.b32.xlu0 %v3342_v40, %s10939_s25  ;;  %2989 = vrot.lane.b32.xlu1 %v3342_v40, %s10940_s22 }
 0x2fb   : > { %10260 = vtanh.f32 %v2198_v0 }
 0x2fc   : > { %v2199_v55 = vmul.f32 0.7978846, %v2167_v54  ;;  %10262 = vtanh.f32 %v2196_v50  ;;  %v2197_v59 = vmul.f32 0.7978846, %v2165_v28 }
 0x2fe   : > { %10264 = vtanh.f32 %v2199_v55  ;;  %3118 = vrot.lane.b32.xlu1 %v3085_v4, %s10941_s13  ;;  %2733 = vrot.lane.b32.xlu0 %v3085_v4, %s15938_s12 }
 0x2ff   : > { %10266 = vtanh.f32 %v2197_v59 }
 0x302   : > { %2475 = vrot.lane.b32.xlu1 %v3213_v24, %s10934_s21  ;;  %2858 = vrot.lane.b32.xlu0 %v2826_v56, %s15936_s30 }
 0x305   : > { %v10261_v46 = vpop.eup %10260 }
 0x306   : > { %v10263_v27 = vpop.eup %10262  ;;  %v2262_v58 = vadd.f32 1.0, %v10261_v46  ;;  %3503 = vrot.lane.b32.xlu1 %v3085_v4, %s10942_s16  ;;  %2987 = vrot.lane.b32.xlu0 %v2955_v23, %s10940_s22 }
 0x307   : > { %v2260_v44 = vadd.f32 1.0, %v10263_v27 }
 0x308   : > { %v10265_v33 = vpop.eup %10264  ;;  %v2294_v35 = vmul.f32 %v2262_v58, %v2038_v7 }
 0x309   : > { %v10267_v45 = vpop.eup %10266  ;;  %v2263_v63 = vadd.f32 1.0, %v10265_v33  ;;  %v2292_v47 = vmul.f32 %v2260_v44, %v2036_v6  ;;  %v10210_v33 = vld [vmem:[#allocation10] sm:$0xff]  }
 0x30a   : > { %v2261_v21 = vadd.f32 1.0, %v10267_v45  ;;  %2381 = vst.msk [vmem:[#allocation3 + $0x61] sm:$0xff] %vm2374_vm12, %v2294_v35  ;;  %2604 = vrot.lane.b32.xlu1 %v3342_v40, %s10935_s1  ;;  %3116 = vrot.lane.b32.xlu0 %v3084_v43, %s10941_s13 }
 0x30b   : > { %v2295_v62 = vmul.f32 %v2263_v63, %v2039_v26  ;;  %2379 = vst.msk [vmem:[#allocation3 + $0x49] sm:$0xff] %vm2374_vm12, %v2292_v47  ;;  %v9932_v5 = vpop.f32.mrb[8].mxu0  ;;  %9954 = vmatprep.subr.bf16.mxu1 %v10210_v33 }
 0x30c   : > { %v2293_v51 = vmul.f32 %v2261_v21, %v2037_v53  ;;  %v12431_v49 = vadd.f32 %v9932_v5, %v12353_v8  ;;  %v1937_v34 = vpop.f32.mrb[9].mxu0  ;;  %9955 = vmatpush3.bf16.msra.mxu1 %v10210_v33  ;;  %v10212_v21 = vld [vmem:[#allocation10 + $0x10] sm:$0xff]  }
 0x30d   : > { %2382 = vst.msk [vmem:[#allocation3 + $0x69] sm:$0xff] %vm2374_vm12, %v2295_v62  ;;  %v12435_v60 = vadd.f32 %v12353_v8, %v1937_v34  ;;  %v9933_v48 = vpop.f32.mrb[10].mxu0  ;;  %v10213_v62 = vld [vmem:[#allocation10 + $0x18] sm:$0xff]  }
 0x30e   : > { %2380 = vst.msk [vmem:[#allocation3 + $0x51] sm:$0xff] %vm2374_vm12, %v2293_v51  ;;  %v2074_v52 = vmul.f32 %v12431_v49, %v12431_v49  ;;  %v12440_v24 = vadd.f32 %v9933_v48, %v12353_v8  ;;  %v1940_v42 = vpop.f32.mrb[11].mxu0  ;;  %2473 = vrot.lane.b32.xlu1 %v2826_v56, %s10934_s21  ;;  %v2042_v34 = vmul.f32 0.5, %v12431_v49 }
 0x30f   : > { %v2072_v57 = vmul.f32 %v12435_v60, %v12435_v60  ;;  %v12446_v29 = vadd.f32 %v12353_v8, %v1940_v42  ;;  %v2040_v42 = vmul.f32 0.5, %v12435_v60 }
 0x310   : > { %v2106_v30 = vmul.f32 %v2074_v52, %v12431_v49  ;;  %v2075_v38 = vmul.f32 %v12440_v24, %v12440_v24 }
 0x311   : > { %v2104_v61 = vmul.f32 %v2072_v57, %v12435_v60  ;;  %v2073_v32 = vmul.f32 %v12446_v29, %v12446_v29  ;;  %v3185_v19 = vld [vmem:[#allocation3 + $0x60] sm:$0xff] }
 0x312   : > { %v2138_v11 = vmul.f32 0.044715, %v2106_v30  ;;  %v2107_v20 = vmul.f32 %v2075_v38, %v12440_v24  ;;  %2602 = vrot.lane.b32.xlu1 %v2955_v23, %s10935_s1  ;;  %v3314_v39 = vld [vmem:[#allocation3 + $0x61] sm:$0xff]  ;;  %v12457_v50 = vld [vmem:[#allocation3 + $0x49] sm:$0xff] }
 0x313   : > { %v2136_v22 = vmul.f32 0.044715, %v2104_v61  ;;  %v2105_v37 = vmul.f32 %v2073_v32, %v12446_v29  ;;  %v3183_v54 = vld [vmem:[#allocation3 + $0x48] sm:$0xff]  ;;  %v2043_v32 = vmul.f32 0.5, %v12440_v24 }
 0x314   : > { %v3186_v31 = vld [vmem:[#allocation3 + $0x68] sm:$0xff]  ;;  %v2170_v28 = vadd.f32 %v2138_v11, %v12431_v49  ;;  %v2139_v55 = vmul.f32 0.044715, %v2107_v20  ;;  %v10214_v20 = vld [vmem:[#allocation10 + $0x20] sm:$0xff]  }
 0x315   : > { %v3315_v40 = vld [vmem:[#allocation3 + $0x69] sm:$0xff]  ;;  %v3215_v59 = vpack.c.bf16 %v3186_v31, %v3185_v19  ;;  %v12462_v23 = vld [vmem:[#allocation3 + $0x51] sm:$0xff]  ;;  %v2168_v46 = vadd.f32 %v2136_v22, %v12435_v60  ;;  %v2137_v27 = vmul.f32 0.044715, %v2105_v37 }
 0x316   : > { %v3443_v0 = vld [vmem:[#allocation3 + $0x62] sm:$0xff]  ;;  %v3444_v4 = vld [vmem:[#allocation3 + $0x6a] sm:$0xff]  ;;  %v12471_v58 = vld [vmem:[#allocation3 + $0x52] sm:$0xff]  ;;  %v2202_v6 = vmul.f32 0.7978846, %v2170_v28  ;;  %v2171_v44 = vadd.f32 %v2139_v55, %v12440_v24  ;;  %2731 = vrot.lane.b32.xlu1 %v3084_v43, %s15938_s12  ;;  %v3344_v63 = vpack.c.bf16 %v3315_v40, %v3314_v39  ;;  %v2041_v39 = vmul.f32 0.5, %v12446_v29 }
 0x317   : > { %v3184_v56 = vld [vmem:[#allocation3 + $0x50] sm:$0xff]  ;;  %4160 = vst.msk [vmem:[#allocation3 + $0x60] sm:$0xff] %vm573_vm0, %v15980_v25  ;;  %4161 = vst.msk [vmem:[#allocation3 + $0x68] sm:$0xff] %vm573_vm0, %v15980_v25  ;;  %3249 = vrot.lane.b32.xlu0 %v3215_v59, %s10937_s14  ;;  %v2200_v45 = vmul.f32 0.7978846, %v2168_v46  ;;  %v2169_v35 = vadd.f32 %v2137_v27, %v12446_v29  ;;  %v10211_v43 = vld [vmem:[#allocation10 + $0x8] sm:$0xff]   ;;  %v3473_v53 = vpack.c.bf16 %v3444_v4, %v3443_v0 }
 0x318   : > { %4162 = vst.msk [vmem:[#allocation3 + $0x70] sm:$0x3] %vm576_vm1, %v15980_v25  ;;  %v12469_v7 = vld [vmem:[#allocation3 + $0x4a] sm:$0xff]  ;;  %4159 = vst.msk [vmem:[#allocation3 + $0x58] sm:$0x3] %vm576_vm1, %v15980_v25  ;;  %10268 = vtanh.f32 %v2202_v6  ;;  %9956 = vmatprep.subr.bf16.mxu1 %v10211_v43  ;;  %v12491_v30 = vpack.c.bf16 %v3184_v56, %v3183_v54  ;;  %v12502_v24 = vpack.c.bf16 %v12462_v23, %v12457_v50  ;;  %v10215_v29 = vld [vmem:[#allocation10 + $0x28] sm:$0xff]  }
 0x319   : > { %4157 = vst.msk [vmem:[#allocation3 + $0x48] sm:$0xff] %vm573_vm0, %v15980_v25  ;;  %4158 = vst.msk [vmem:[#allocation3 + $0x50] sm:$0xff] %vm573_vm0, %v15980_v25  ;;  %v2203_v26 = vmul.f32 0.7978846, %v2171_v44  ;;  %10270 = vtanh.f32 %v2200_v45  ;;  %v2201_v47 = vmul.f32 0.7978846, %v2169_v35  ;;  %9957 = vmatpush3.bf16.msra.mxu1 %v10211_v43  ;;  %v12514_v0 = vpack.c.bf16 %v12471_v58, %v12469_v7 }
 0x31a   : > { %2864 = vrot.lane.b32.xlu1 %v3215_v59, %s15936_s30  ;;  %9958 = vmatprep.subr.bf16.mxu1 %v10212_v21  ;;  %v10216_v28 = vld [vmem:[#allocation10 + $0x30] sm:$0x3f]  }
 0x31b   : > { %10272 = vtanh.f32 %v2203_v26  ;;  %3378 = vrot.lane.b32.xlu0 %v3344_v63, %s10939_s25  ;;  %v3697_v7 = vsel %vm3695_vm3, %v10216_v28, 0 }
 0x31c   : > { %10274 = vtanh.f32 %v2201_v47 }
 0x31d   : > { %9959 = vmatpush3.bf16.msra.mxu1 %v10212_v21 }
 0x31e   : > { %2993 = vrot.lane.b32.xlu1 %v3344_v63, %s10940_s22  ;;  %9960 = vmatprep.subr.bf16.mxu1 %v10213_v62 }
 0x31f   : > { %3507 = vrot.lane.b32.xlu0 %v3473_v53, %s10942_s16 }
 0x321   : > { %9961 = vmatpush3.bf16.msra.mxu1 %v10213_v62 }
 0x322   : > { %v10269_v51 = vpop.eup %10268  ;;  %3122 = vrot.lane.b32.xlu1 %v3473_v53, %s10941_s13  ;;  %9962 = vmatprep.subr.bf16.mxu1 %v10214_v20 }
 0x323   : > { %2479 = vrot.lane.b32.xlu0 %v3215_v59, %s10934_s21  ;;  %v10271_v5 = vpop.eup %10270  ;;  %v2266_v48 = vadd.f32 1.0, %v10269_v51 }
 0x324   : > { %v2264_v57 = vadd.f32 1.0, %v10271_v5 }
 0x325   : > { %v10273_v52 = vpop.eup %10272  ;;  %v2298_v61 = vmul.f32 %v2266_v48, %v2042_v34  ;;  %9963 = vmatpush3.bf16.msra.mxu1 %v10214_v20 }
 0x326   : > { %v10275_v38 = vpop.eup %10274  ;;  %v2267_v11 = vadd.f32 1.0, %v10273_v52  ;;  %v2296_v19 = vmul.f32 %v2264_v57, %v2040_v42  ;;  %3247 = vrot.lane.b32.xlu1 %v12491_v30, %s10937_s14  ;;  %9964 = vmatprep.subr.bf16.mxu1 %v10215_v29 }
 0x327   : > { %v2265_v22 = vadd.f32 1.0, %v10275_v38  ;;  %2608 = vrot.lane.b32.xlu0 %v3344_v63, %s10935_s1  ;;  %2385 = vst.msk [vmem:[#allocation3 + $0x91] sm:$0xff] %vm2374_vm12, %v2298_v61 }
 0x328   : > { %v2299_v49 = vmul.f32 %v2267_v11, %v2043_v32  ;;  %2383 = vst.msk [vmem:[#allocation3 + $0x79] sm:$0xff] %vm2374_vm12, %v2296_v19 }
 0x329   : > { %v2297_v60 = vmul.f32 %v2265_v22, %v2041_v39  ;;  %9965 = vmatpush3.bf16.msra.mxu1 %v10215_v29 }
 0x32a   : > { %2386 = vst.msk [vmem:[#allocation3 + $0x99] sm:$0xff] %vm2374_vm12, %v2299_v49  ;;  %2606 = vrot.lane.b32.xlu1 %v12502_v24, %s10935_s1  ;;  %10019 = vmatprep.subr.msk.bf16.mxu1 %vm3695_vm3, %v10216_v28  ;;  %vm4475_vm3 = vcmask 950144  }
 0x32b   : > { %2384 = vst.msk [vmem:[#allocation3 + $0x81] sm:$0xff] %vm2374_vm12, %v2297_v60  ;;  %2737 = vrot.lane.b32.xlu0 %v3473_v53, %s15938_s12  ;;  %v9936_v37 = vpop.f32.mrb[12].mxu0 }
 0x32c   : > { %v12510_v31 = vadd.f32 %v9936_v37, %v12353_v8  ;;  %v1953_v40 = vpop.f32.mrb[13].mxu0 }
 0x32d   : > { %v12517_v54 = vadd.f32 %v12353_v8, %v1953_v40  ;;  %v9937_v50 = vpop.f32.mrb[14].mxu0  ;;  %9967 = vmatpush3.bf16.msra.mxu1 %v3697_v7 }
 0x32e   : > { %v2078_v55 = vmul.f32 %v12510_v31, %v12510_v31  ;;  %v12522_v59 = vadd.f32 %v9937_v50, %v12353_v8  ;;  %v1956_v4 = vpop.f32.mrb[15].mxu0  ;;  %2735 = vrot.lane.b32.xlu1 %v12514_v0, %s15938_s12  ;;  %v2804_v46 = vld [vmem:[#allocation3 + $0x90] sm:$0xff] }
 0x32f   : > { %3376 = vrot.lane.b32.xlu0 %v12502_v24, %s10939_s25  ;;  %v2076_v56 = vmul.f32 %v12517_v54, %v12517_v54  ;;  %v12531_v23 = vadd.f32 %v12353_v8, %v1956_v4  ;;  %v2933_v27 = vld [vmem:[#allocation3 + $0x91] sm:$0xff]  ;;  %v3316_v35 = vld [vmem:[#allocation3 + $0x79] sm:$0xff] }
 0x330   : > { %v2110_v58 = vmul.f32 %v2078_v55, %v12510_v31  ;;  %v2079_v33 = vmul.f32 %v12522_v59, %v12522_v59  ;;  %v3187_v45 = vld [vmem:[#allocation3 + $0x78] sm:$0xff]  ;;  %v2047_v7 = vmul.f32 0.5, %v12522_v59 }
 0x331   : > { %v2805_v6 = vld [vmem:[#allocation3 + $0x98] sm:$0xff]  ;;  %v2108_v26 = vmul.f32 %v2076_v56, %v12517_v54  ;;  %v2077_v63 = vmul.f32 %v12531_v23, %v12531_v23  ;;  %v2044_v56 = vmul.f32 0.5, %v12517_v54 }
 0x332   : > { %v3062_v44 = vld [vmem:[#allocation3 + $0x92] sm:$0xff]  ;;  %v12539_v47 = vpack.c.bf16 %v2805_v6, %v2804_v46  ;;  %v3063_v53 = vld [vmem:[#allocation3 + $0x9a] sm:$0xff]  ;;  %v2142_v62 = vmul.f32 0.044715, %v2110_v58  ;;  %v2111_v51 = vmul.f32 %v2079_v33, %v12522_v59  ;;  %v3446_v48 = vld [vmem:[#allocation3 + $0x82] sm:$0xff] }
 0x333   : > { %v2934_v43 = vld [vmem:[#allocation3 + $0x99] sm:$0xff]  ;;  %4166 = vst.msk [vmem:[#allocation3 + $0x90] sm:$0xff] %vm573_vm0, %v15980_v25  ;;  %2477 = vrot.lane.b32.xlu0 %v12491_v30, %s10934_s21  ;;  %v3317_v5 = vld [vmem:[#allocation3 + $0x81] sm:$0xff]  ;;  %v2140_v52 = vmul.f32 0.044715, %v2108_v26  ;;  %v2109_v42 = vmul.f32 %v2077_v63, %v12531_v23  ;;  %v12569_v29 = vpack.c.bf16 %v3063_v53, %v3062_v44 }
 0x334   : > { %v3188_v21 = vld [vmem:[#allocation3 + $0x80] sm:$0xff]  ;;  %4168 = vst.msk [vmem:[#allocation3 + $0xa0] sm:$0x3] %vm576_vm1, %v15980_v25  ;;  %2868 = vrot.lane.b32.xlu1 %v12539_v47, %s15936_s30  ;;  %4165 = vst.msk [vmem:[#allocation3 + $0x88] sm:$0x3] %vm576_vm1, %v15980_v25  ;;  %v2174_v57 = vadd.f32 %v2142_v62, %v12510_v31  ;;  %v12561_v11 = vpack.c.bf16 %v2934_v43, %v2933_v27  ;;  %v12581_v40 = vpack.c.bf16 %v3317_v5, %v3316_v35 }
 0x335   : > { %v3445_v34 = vld [vmem:[#allocation3 + $0x7a] sm:$0xff]  ;;  %4167 = vst.msk [vmem:[#allocation3 + $0x98] sm:$0xff] %vm573_vm0, %v15980_v25  ;;  %v2143_v38 = vmul.f32 0.044715, %v2111_v51  ;;  %v2172_v61 = vadd.f32 %v2140_v52, %v12517_v54  ;;  %v2141_v32 = vmul.f32 0.044715, %v2109_v42  ;;  %v12575_v37 = vpack.c.bf16 %v3188_v21, %v3187_v45 }
 0x336   : > { %4163 = vst.msk [vmem:[#allocation3 + $0x78] sm:$0xff] %vm573_vm0, %v15980_v25  ;;  %4164 = vst.msk [vmem:[#allocation3 + $0x80] sm:$0xff] %vm573_vm0, %v15980_v25  ;;  %v2206_v20 = vmul.f32 0.7978846, %v2174_v57  ;;  %v12590_v33 = vpack.c.bf16 %v3446_v48, %v3445_v34 }
 0x337   : > { %v2175_v19 = vadd.f32 %v2143_v38, %v12522_v59  ;;  %3505 = vrot.lane.b32.xlu0 %v12514_v0, %s10942_s16  ;;  %v2204_v39 = vmul.f32 0.7978846, %v2172_v61  ;;  %v2173_v22 = vadd.f32 %v2141_v32, %v12531_v23 }
 0x338   : > { %2997 = vrot.lane.b32.xlu1 %v12561_v11, %s10940_s22  ;;  %10276 = vtanh.f32 %v2206_v20 }
 0x339   : > { %v2207_v49 = vmul.f32 0.7978846, %v2175_v19  ;;  %10278 = vtanh.f32 %v2204_v39  ;;  %v2205_v60 = vmul.f32 0.7978846, %v2173_v22 }
 0x33b   : > { %10280 = vtanh.f32 %v2207_v49  ;;  %2862 = vrot.lane.b32.xlu0 %v12491_v30, %s15936_s30  ;;  %v2046_v30 = vmul.f32 0.5, %v12510_v31 }
 0x33c   : > { %10282 = vtanh.f32 %v2205_v60  ;;  %3126 = vrot.lane.b32.xlu1 %v12569_v29, %s10941_s13 }
 0x33f   : > { %2991 = vrot.lane.b32.xlu0 %v12502_v24, %s10940_s22 }
 0x340   : > { %3251 = vrot.lane.b32.xlu1 %v12575_v37, %s10937_s14 }
 0x342   : > { %v10277_v50 = vpop.eup %10276 }
 0x343   : > { %3120 = vrot.lane.b32.xlu0 %v12514_v0, %s10941_s13  ;;  %v10279_v28 = vpop.eup %10278  ;;  %v2270_v55 = vadd.f32 1.0, %v10277_v50  ;;  %v2045_v0 = vmul.f32 0.5, %v12531_v23 }
 0x344   : > { %3380 = vrot.lane.b32.xlu1 %v12581_v40, %s10939_s25  ;;  %v2268_v24 = vadd.f32 1.0, %v10279_v28 }
 0x345   : > { %v10281_v4 = vpop.eup %10280  ;;  %v2302_v27 = vmul.f32 %v2270_v55, %v2046_v30 }
 0x346   : > { %v10283_v46 = vpop.eup %10282  ;;  %v2271_v58 = vadd.f32 1.0, %v10281_v4  ;;  %v2300_v6 = vmul.f32 %v2268_v24, %v2044_v56 }
 0x347   : > { %v2269_v44 = vadd.f32 1.0, %v10283_v46  ;;  %3253 = vrot.lane.b32.xlu0 %v12539_v47, %s10937_s14  ;;  %2389 = vst.msk [vmem:[#allocation3 + $0xc1] sm:$0xff] %vm2374_vm12, %v2302_v27 }
 0x348   : > { %v2303_v31 = vmul.f32 %v2271_v58, %v2047_v7  ;;  %3509 = vrot.lane.b32.xlu1 %v12590_v33, %s10942_s16  ;;  %2387 = vst.msk [vmem:[#allocation3 + $0xa9] sm:$0xff] %vm2374_vm12, %v2300_v6 }
 0x349   : > { %v2301_v54 = vmul.f32 %v2269_v44, %v2045_v0 }
 0x34a   : > { %2390 = vst.msk [vmem:[#allocation3 + $0xc9] sm:$0xff] %vm2374_vm12, %v2303_v31 }
 0x34b   : > { %2388 = vst.msk [vmem:[#allocation3 + $0xb1] sm:$0xff] %vm2374_vm12, %v2301_v54  ;;  %3382 = vrot.lane.b32.xlu0 %v12561_v11, %s10939_s25  ;;  %v9940_v59 = vpop.f32.mrb[16].mxu0 }
 0x34c   : > { %2481 = vrot.lane.b32.xlu1 %v12575_v37, %s10934_s21  ;;  %v12606_v23 = vadd.f32 %v9940_v59, %v12353_v8  ;;  %v1969_v45 = vpop.f32.mrb[17].mxu0 }
 0x34d   : > { %v12609_v35 = vadd.f32 %v12353_v8, %v1969_v45  ;;  %v9941_v26 = vpop.f32.mrb[18].mxu0 }
 0x34e   : > { %v2082_v63 = vmul.f32 %v12606_v23, %v12606_v23  ;;  %v12614_v43 = vadd.f32 %v9941_v26, %v12353_v8  ;;  %v1972_v53 = vpop.f32.mrb[19].mxu0  ;;  %v2808_v51 = vld [vmem:[#allocation3 + $0xc0] sm:$0xff] }
 0x34f   : > { %3511 = vrot.lane.b32.xlu0 %v12569_v29, %s10942_s16  ;;  %v2080_v21 = vmul.f32 %v12609_v35, %v12609_v35  ;;  %v12621_v62 = vadd.f32 %v12353_v8, %v1972_v53  ;;  %v2937_v5 = vld [vmem:[#allocation3 + $0xc1] sm:$0xff]  ;;  %v3320_v38 = vld [vmem:[#allocation3 + $0xa9] sm:$0xff]  ;;  %v2048_v53 = vmul.f32 0.5, %v12609_v35 }
 0x350   : > { %2610 = vrot.lane.b32.xlu1 %v12581_v40, %s10935_s1  ;;  %v2114_v34 = vmul.f32 %v2082_v63, %v12606_v23  ;;  %v2083_v48 = vmul.f32 %v12614_v43, %v12614_v43  ;;  %v3191_v57 = vld [vmem:[#allocation3 + $0xa8] sm:$0xff] }
 0x351   : > { %v2809_v52 = vld [vmem:[#allocation3 + $0xc8] sm:$0xff]  ;;  %v2112_v61 = vmul.f32 %v2080_v21, %v12609_v35  ;;  %v2081_v32 = vmul.f32 %v12621_v62, %v12621_v62 }
 0x352   : > { %v3066_v42 = vld [vmem:[#allocation3 + $0xc2] sm:$0xff]  ;;  %v3067_v19 = vld [vmem:[#allocation3 + $0xca] sm:$0xff]  ;;  %v2146_v22 = vmul.f32 0.044715, %v2114_v34  ;;  %v2115_v49 = vmul.f32 %v2083_v48, %v12614_v43  ;;  %v3450_v28 = vld [vmem:[#allocation3 + $0xb2] sm:$0xff]  ;;  %v12651_v46 = vpack.c.bf16 %v2809_v52, %v2808_v51 }
 0x353   : > { %v2938_v20 = vld [vmem:[#allocation3 + $0xc9] sm:$0xff]  ;;  %4172 = vst.msk [vmem:[#allocation3 + $0xc0] sm:$0xff] %vm573_vm0, %v15980_v25  ;;  %2483 = vrot.lane.b32.xlu0 %v12539_v47, %s10934_s21  ;;  %v3321_v60 = vld [vmem:[#allocation3 + $0xb1] sm:$0xff]  ;;  %v2144_v30 = vmul.f32 0.044715, %v2112_v61  ;;  %v2113_v55 = vmul.f32 %v2081_v32, %v12621_v62 }
 0x354   : > { %v3192_v39 = vld [vmem:[#allocation3 + $0xb0] sm:$0xff]  ;;  %4174 = vst.msk [vmem:[#allocation3 + $0xd0] sm:$0x3] %vm576_vm1, %v15980_v25  ;;  %2739 = vrot.lane.b32.xlu1 %v12590_v33, %s15938_s12  ;;  %4171 = vst.msk [vmem:[#allocation3 + $0xb8] sm:$0x3] %vm576_vm1, %v15980_v25  ;;  %v2178_v47 = vadd.f32 %v2146_v22, %v12606_v23  ;;  %v12659_v31 = vpack.c.bf16 %v2938_v20, %v2937_v5  ;;  %v2051_v5 = vmul.f32 0.5, %v12614_v43 }
 0x355   : > { %v3449_v50 = vld [vmem:[#allocation3 + $0xaa] sm:$0xff]  ;;  %4173 = vst.msk [vmem:[#allocation3 + $0xc8] sm:$0xff] %vm573_vm0, %v15980_v25  ;;  %v2147_v4 = vmul.f32 0.044715, %v2115_v49  ;;  %v2176_v56 = vadd.f32 %v2144_v30, %v12609_v35  ;;  %v2145_v24 = vmul.f32 0.044715, %v2113_v55  ;;  %v12671_v54 = vpack.c.bf16 %v3192_v39, %v3191_v57 }
 0x356   : > { %4169 = vst.msk [vmem:[#allocation3 + $0xa8] sm:$0xff] %vm573_vm0, %v15980_v25  ;;  %4170 = vst.msk [vmem:[#allocation3 + $0xb0] sm:$0xff] %vm573_vm0, %v15980_v25  ;;  %v2210_v27 = vmul.f32 0.7978846, %v2178_v47  ;;  %v12680_v48 = vpack.c.bf16 %v3321_v60, %v3320_v38 }
 0x357   : > { %v2179_v7 = vadd.f32 %v2147_v4, %v12614_v43  ;;  %2612 = vrot.lane.b32.xlu0 %v12561_v11, %s10935_s1  ;;  %v2208_v58 = vmul.f32 0.7978846, %v2176_v56  ;;  %v2177_v6 = vadd.f32 %v2145_v24, %v12621_v62  ;;  %v12665_v11 = vpack.c.bf16 %v3067_v19, %v3066_v42 }
 0x358   : > { %2872 = vrot.lane.b32.xlu1 %v12651_v46, %s15936_s30  ;;  %10284 = vtanh.f32 %v2210_v27 }
 0x359   : > { %v2211_v0 = vmul.f32 0.7978846, %v2179_v7  ;;  %10286 = vtanh.f32 %v2208_v58  ;;  %v2209_v44 = vmul.f32 0.7978846, %v2177_v6 }
 0x35b   : > { %10288 = vtanh.f32 %v2211_v0  ;;  %2741 = vrot.lane.b32.xlu0 %v12569_v29, %s15938_s12  ;;  %v2050_v29 = vmul.f32 0.5, %v12606_v23 }
 0x35c   : > { %10290 = vtanh.f32 %v2209_v44  ;;  %3001 = vrot.lane.b32.xlu1 %v12659_v31, %s10940_s22 }
 0x35f   : > { %2866 = vrot.lane.b32.xlu0 %v12575_v37, %s15936_s30 }
 0x360   : > { %3130 = vrot.lane.b32.xlu1 %v12665_v11, %s10941_s13 }
 0x362   : > { %v10285_v59 = vpop.eup %10284 }
 0x363   : > { %2995 = vrot.lane.b32.xlu0 %v12581_v40, %s10940_s22  ;;  %v10287_v45 = vpop.eup %10286  ;;  %v2274_v26 = vadd.f32 1.0, %v10285_v59  ;;  %v2049_v40 = vmul.f32 0.5, %v12621_v62  ;;  %v12694_v62 = vpack.c.bf16 %v3450_v28, %v3449_v50 }
 0x364   : > { %3255 = vrot.lane.b32.xlu1 %v12671_v54, %s10937_s14  ;;  %v2272_v37 = vadd.f32 1.0, %v10287_v45 }
 0x365   : > { %v10289_v63 = vpop.eup %10288  ;;  %v2306_v51 = vmul.f32 %v2274_v26, %v2050_v29 }
 0x366   : > { %v10291_v21 = vpop.eup %10290  ;;  %v2275_v34 = vadd.f32 1.0, %v10289_v63  ;;  %v2304_v52 = vmul.f32 %v2272_v37, %v2048_v53 }
 0x367   : > { %v2273_v42 = vadd.f32 1.0, %v10291_v21  ;;  %3124 = vrot.lane.b32.xlu0 %v12590_v33, %s10941_s13  ;;  %2393 = vst.msk [vmem:[#allocation3 + $0xf1] sm:$0xff] %vm2374_vm12, %v2306_v51 }
 0x368   : > { %v2307_v23 = vmul.f32 %v2275_v34, %v2051_v5  ;;  %3384 = vrot.lane.b32.xlu1 %v12680_v48, %s10939_s25  ;;  %2391 = vst.msk [vmem:[#allocation3 + $0xd9] sm:$0xff] %vm2374_vm12, %v2304_v52  ;;  %v12689_v43 = vpop.permute.xlu0 %3245  ;;  %v12691_v57 = vpop.permute.xlu1 %2860 }
 0x369   : > { %v2305_v35 = vmul.f32 %v2273_v42, %v2049_v40 }
 0x36a   : > { %2394 = vst.msk [vmem:[#allocation3 + $0xf9] sm:$0xff] %vm2374_vm12, %v2307_v23 }
 0x36b   : > { %2392 = vst.msk [vmem:[#allocation3 + $0xe1] sm:$0xff] %vm2374_vm12, %v2305_v35  ;;  %3257 = vrot.lane.b32.xlu0 %v12651_v46, %s10937_s14  ;;  %v9944_v33 = vpop.f32.mrb[20].mxu0 }
 0x36c   : > { %3513 = vrot.lane.b32.xlu1 %v12694_v62, %s10942_s16  ;;  %v12702_v38 = vadd.f32 %v9944_v33, %v12353_v8  ;;  %v12704_v61 = vpop.permute.xlu0 %3374  ;;  %v12706_v32 = vpop.permute.xlu1 %2989 }
 0x36d   : > { %v1985_v20 = vpop.f32.mrb[21].mxu0 }
 0x36e   : > { %v2086_v19 = vmul.f32 %v12702_v38, %v12702_v38  ;;  %v12711_v39 = vadd.f32 %v12353_v8, %v1985_v20  ;;  %v9945_v22 = vpop.f32.mrb[22].mxu0  ;;  %v2812_v50 = vld [vmem:[#allocation3 + $0xf0] sm:$0xff] }
 0x36f   : > { %3386 = vrot.lane.b32.xlu0 %v12659_v31, %s10939_s25  ;;  %v12716_v49 = vadd.f32 %v9945_v22, %v12353_v8  ;;  %v1988_v60 = vpop.f32.mrb[23].mxu0  ;;  %v12720_v28 = vld [vmem:[#allocation3 + $0xf1] sm:$0xff]  ;;  %v12736_v58 = vld [vmem:[#allocation3 + $0xd9] sm:$0xff] }
 0x370   : > { %2485 = vrot.lane.b32.xlu1 %v12671_v54, %s10934_s21  ;;  %v2118_v30 = vmul.f32 %v2086_v19, %v12702_v38  ;;  %v2084_v55 = vmul.f32 %v12711_v39, %v12711_v39  ;;  %v12726_v47 = vadd.f32 %v12353_v8, %v1988_v60  ;;  %v12728_v4 = vpop.permute.xlu1 %3118  ;;  %v12730_v56 = vpop.permute.xlu0 %2733  ;;  %v12734_v7 = vld [vmem:[#allocation3 + $0xd8] sm:$0xff] }
 0x371   : > { %v2813_v24 = vld [vmem:[#allocation3 + $0xf8] sm:$0xff]  ;;  %v2087_v6 = vmul.f32 %v12716_v49, %v12716_v49 }
 0x372   : > { %v12732_v27 = vld [vmem:[#allocation3 + $0xf2] sm:$0xff]  ;;  %v12740_v44 = vld [vmem:[#allocation3 + $0xfa] sm:$0xff]  ;;  %v2150_v8 = vmul.f32 0.044715, %v2118_v30  ;;  %v2116_v45 = vmul.f32 %v2084_v55, %v12711_v39  ;;  %v2085_v29 = vmul.f32 %v12726_v47, %v12726_v47  ;;  %v12755_v53 = vld [vmem:[#allocation3 + $0xe2] sm:$0xff]  ;;  %v12782_v55 = vpack.c.bf16 %v2813_v24, %v2812_v50 }
 0x373   : > { %v2942_v0 = vld [vmem:[#allocation3 + $0xf9] sm:$0xff]  ;;  %4178 = vst.msk [vmem:[#allocation3 + $0xf0] sm:$0xff] %vm573_vm0, %v15980_v25  ;;  %3515 = vrot.lane.b32.xlu0 %v12665_v11, %s10942_s16  ;;  %v12751_v26 = vld [vmem:[#allocation3 + $0xe1] sm:$0xff]  ;;  %v2119_v37 = vmul.f32 %v2087_v6, %v12716_v49 }
 0x374   : > { %v12742_v59 = vld [vmem:[#allocation3 + $0xe0] sm:$0xff]  ;;  %4180 = vst.msk [vmem:[#allocation3 + $0x100] sm:$0x3] %vm576_vm1, %v15980_v25  ;;  %2614 = vrot.lane.b32.xlu1 %v12680_v48, %s10935_s1  ;;  %4177 = vst.msk [vmem:[#allocation3 + $0xe8] sm:$0x3] %vm576_vm1, %v15980_v25  ;;  %v2182_v21 = vadd.f32 %v2150_v8, %v12702_v38  ;;  %v2117_v5 = vmul.f32 %v2085_v29, %v12726_v47  ;;  %v2476_v34 = vpop.permute.xlu1 %2475  ;;  %v2859_v52 = vpop.permute.xlu0 %2858  ;;  %v12791_v50 = vpack.c.bf16 %v2942_v0, %v12720_v28 }
 0x375   : > { %v12753_v63 = vld [vmem:[#allocation3 + $0xda] sm:$0xff]  ;;  %4179 = vst.msk [vmem:[#allocation3 + $0xf8] sm:$0xff] %vm573_vm0, %v15980_v25  ;;  %v2148_v51 = vmul.f32 0.044715, %v2116_v45  ;;  %v2151_v40 = vmul.f32 0.044715, %v2119_v37  ;;  %v12807_v28 = vpack.c.bf16 %v12740_v44, %v12732_v27  ;;  %v12818_v27 = vpack.c.bf16 %v12742_v59, %v12734_v7 }
 0x376   : > { %4175 = vst.msk [vmem:[#allocation3 + $0xd8] sm:$0xff] %vm573_vm0, %v15980_v25  ;;  %4176 = vst.msk [vmem:[#allocation3 + $0xe0] sm:$0xff] %vm573_vm0, %v15980_v25  ;;  %v2214_v42 = vmul.f32 0.7978846, %v2182_v21  ;;  %v2149_v35 = vmul.f32 0.044715, %v2117_v5 }
 0x377   : > { %2522 = vst.msk [vmem:[#allocation2 + $0x20] sm:$0xff] %vm2519_vm13, %v2476_v34  ;;  %v2180_v23 = vadd.f32 %v2148_v51, %v12711_v39  ;;  %2487 = vrot.lane.b32.xlu0 %v12651_v46, %s10934_s21  ;;  %v2183_v33 = vadd.f32 %v2151_v40, %v12716_v49  ;;  %v2052_v29 = vmul.f32 0.5, %v12711_v39  ;;  %v2053_v51 = vmul.f32 0.5, %v12726_v47 }
 0x378   : > { %2907 = vst.msk [vmem:[#allocation2] sm:$0xff] %vm15940_vm4, %v2859_v52  ;;  %2743 = vrot.lane.b32.xlu1 %v12694_v62, %s15938_s12  ;;  %10292 = vtanh.f32 %v2214_v42  ;;  %v2181_v19 = vadd.f32 %v2149_v35, %v12726_v47  ;;  %v3504_v22 = vpop.permute.xlu1 %3503  ;;  %v2988_v60 = vpop.permute.xlu0 %2987  ;;  %v12841_v47 = vld [vmem:[#allocation3 + $0x198] sm:$0xff]  ;;  %v12843_v52 = vld [vmem:[#allocation3 + $0x1a0] sm:$0xff] }
 0x379   : > { %v2212_v20 = vmul.f32 0.7978846, %v2180_v23  ;;  %v2215_v30 = vmul.f32 0.7978846, %v2183_v33  ;;  %3036 = vst.msk [vmem:[#allocation2] sm:$0xff] %vm3035_vm5, %v2988_v60  ;;  %v12868_v33 = vpack.c.bf16 %v12755_v53, %v12753_v63 }
 0x37a   : > { %v2213_v6 = vmul.f32 0.7978846, %v2181_v19 }
 0x37b   : > { %10294 = vtanh.f32 %v2212_v20  ;;  %2616 = vrot.lane.b32.xlu0 %v12659_v31, %s10935_s1 }
 0x37c   : > { %10296 = vtanh.f32 %v2215_v30  ;;  %2876 = vrot.lane.b32.xlu1 %v12782_v55, %s15936_s30  ;;  %v2605_v46 = vpop.permute.xlu1 %2604  ;;  %v3117_v8 = vpop.permute.xlu0 %3116 }
 0x37d   : > { %10298 = vtanh.f32 %v2213_v6  ;;  %2651 = vst.msk [vmem:[#allocation2 + $0x20] sm:$0xff] %vm2648_vm14, %v2605_v46 }
 0x37e   : > { %3165 = vst.msk [vmem:[#allocation2] sm:$0xff] %vm3164_vm6, %v3117_v8 }
 0x37f   : > { %2780 = vst.msk [vmem:[#allocation2 + $0x20] sm:$0xff] %vm15942_vm15, %v12730_v56  ;;  %2745 = vrot.lane.b32.xlu0 %v12665_v11, %s15938_s12  ;;  %v2054_v11 = vmul.f32 0.5, %v12702_v38  ;;  %v2055_v38 = vmul.f32 0.5, %v12716_v49 }
 0x380   : > { %3294 = vst.msk [vmem:[#allocation2] sm:$0xff] %vm3293_vm7, %v12689_v43  ;;  %3005 = vrot.lane.b32.xlu1 %v12791_v50, %s10940_s22  ;;  %v2474_v31 = vpop.permute.xlu1 %2473 }
 0x381   : > { %3423 = vst.msk [vmem:[#allocation2] sm:$0xff] %vm3422_vm8, %v12704_v61 }
 0x382   : > { %3552 = vst.msk [vmem:[#allocation2] sm:$0xff] %vm3551_vm9, %v3504_v22  ;;  %v10293_v56 = vpop.eup %10292 }
 0x383   : > { %2521 = vst.msk [vmem:[#allocation2 + $0x10] sm:$0xff] %vm2519_vm13, %v2474_v31  ;;  %2870 = vrot.lane.b32.xlu0 %v12671_v54, %s15936_s30  ;;  %v2278_v43 = vadd.f32 1.0, %v10293_v56 }
 0x384   : > { %3134 = vrot.lane.b32.xlu1 %v12807_v28, %s10941_s13  ;;  %v2603_v24 = vpop.permute.xlu1 %2602 }
 0x385   : > { %v10295_v61 = vpop.eup %10294  ;;  %v2310_v45 = vmul.f32 %v2278_v43, %v2054_v11  ;;  %2650 = vst.msk [vmem:[#allocation2 + $0x10] sm:$0xff] %vm2648_vm14, %v2603_v24 }
 0x386   : > { %v10297_v0 = vpop.eup %10296  ;;  %v2276_v37 = vadd.f32 1.0, %v10295_v61 }
 0x387   : > { %v10299_v54 = vpop.eup %10298  ;;  %v2279_v44 = vadd.f32 1.0, %v10297_v0  ;;  %2999 = vrot.lane.b32.xlu0 %v12680_v48, %s10940_s22  ;;  %2397 = vst.msk [vmem:[#allocation3 + $0x121] sm:$0xff] %vm2374_vm12, %v2310_v45  ;;  %v12834_v48 = vpack.c.bf16 %v12751_v26, %v12736_v58  ;;  %v3228_v58 = vpack.c.bf16 %v12843_v52, %v12841_v47  ;;  %v12906_v45 = vld [vmem:[#allocation3 + $0x199] sm:$0xff] }
 0x388   : > { %v2308_v21 = vmul.f32 %v2276_v37, %v2052_v29  ;;  %v2277_v39 = vadd.f32 1.0, %v10299_v54  ;;  %3259 = vrot.lane.b32.xlu1 %v12818_v27, %s10937_s14  ;;  %v2732_v49 = vpop.permute.xlu1 %2731 }
 0x389   : > { %v3568_v5 = vld [vmem:[#allocation2] sm:$0xff]  ;;  %v2311_v34 = vmul.f32 %v2279_v44, %v2055_v38  ;;  %v12828_v7 = vpop.permute.xlu0 %3249  ;;  %2779 = vst.msk [vmem:[#allocation2 + $0x10] sm:$0xff] %vm15942_vm15, %v2732_v49 }
 0x38a   : > { %9968 = vmatprep.mubr.msk.bf16.mxu1 %vm3646_vm10, %v3568_v5  ;;  %2395 = vst.msk [vmem:[#allocation3 + $0x109] sm:$0xff] %vm2374_vm12, %v2308_v21  ;;  %v2309_v59 = vmul.f32 %v2277_v39, %v2053_v51 }
 0x38b   : > { %2398 = vst.msk [vmem:[#allocation3 + $0x129] sm:$0xff] %vm2374_vm12, %v2311_v34  ;;  %3128 = vrot.lane.b32.xlu0 %v12694_v62, %s10941_s13  ;;  %v9948_v40 = vpop.f32.mrb[24].mxu0  ;;  %v12924_v34 = vld [vmem:[#allocation3 + $0x19a] sm:$0xff] }
 0x38c   : > { %2908 = vst.msk [vmem:[#allocation2 + $0x10] sm:$0xff] %vm15940_vm4, %v12691_v57  ;;  %3388 = vrot.lane.b32.xlu1 %v12834_v48, %s10939_s25  ;;  %v12854_v57 = vld [vmem:[#allocation9] ss:$0 sm:$0xff]  ;;  %v2001_v26 = vpop.f32.mrb[25].mxu0  ;;  %v12864_v23 = vpop.permute.xlu1 %2864 }
 0x38d   : > { %2396 = vst.msk [vmem:[#allocation3 + $0x111] sm:$0xff] %vm2374_vm12, %v2309_v59  ;;  %v12857_v62 = vadd.f32 %v12854_v57, %v9948_v40  ;;  %v12859_v42 = vpop.permute.xlu0 %3378  ;;  %v9949_v35 = vpop.f32.mrb[26].mxu0 }
 0x38e   : > { %3037 = vst.msk [vmem:[#allocation2 + $0x10] sm:$0xff] %vm3035_vm5, %v12706_v32  ;;  %v12862_v32 = vadd.f32 %v12854_v57, %v2001_v26  ;;  %v12873_v20 = vadd.f32 %v12854_v57, %v9949_v35  ;;  %v2004_v19 = vpop.f32.mrb[27].mxu0  ;;  %v12884_v63 = vld [vmem:[#allocation3 + $0x120] sm:$0xff] }
 0x38f   : > { %3166 = vst.msk [vmem:[#allocation2 + $0x10] sm:$0xff] %vm3164_vm6, %v12728_v4  ;;  %v2090_v4 = vmul.f32 %v12857_v62, %v12857_v62  ;;  %3261 = vrot.lane.b32.xlu0 %v12782_v55, %s10937_s14  ;;  %v12880_v60 = vadd.f32 %v12854_v57, %v2004_v19  ;;  %v12893_v31 = vld [vmem:[#allocation3 + $0x121] sm:$0xff] }
 0x390   : > { %v2088_v22 = vmul.f32 %v12862_v32, %v12862_v32  ;;  %3517 = vrot.lane.b32.xlu1 %v12868_v33, %s10942_s16  ;;  %v2091_v30 = vmul.f32 %v12873_v20, %v12873_v20  ;;  %v12898_v43 = vpop.permute.xlu1 %2993  ;;  %v12935_v26 = vld [vmem:[#allocation3 + $0x1a1] sm:$0xff]  ;;  %4199 = vst.msk [vmem:[#allocation3 + $0x198] sm:$0xff] %vm573_vm0, %v15980_v25 }
 0x391   : > { %v2122_v53 = vmul.f32 %v2090_v4, %v12857_v62  ;;  %v12889_v6 = vpop.permute.xlu0 %3507  ;;  %v3199_v46 = vld [vmem:[#allocation3 + $0x108] sm:$0xff]  ;;  %v2089_v11 = vmul.f32 %v12880_v60, %v12880_v60 }
 0x392   : > { %v12891_v8 = vld [vmem:[#allocation3 + $0x109] sm:$0xff]  ;;  %v2120_v56 = vmul.f32 %v2088_v22, %v12862_v32  ;;  %v2123_v37 = vmul.f32 %v2091_v30, %v12873_v20 }
 0x393   : > { %v12900_v61 = vld [vmem:[#allocation3 + $0x128] sm:$0xff]  ;;  %v2154_v29 = vmul.f32 0.044715, %v2122_v53  ;;  %3390 = vrot.lane.b32.xlu0 %v12791_v50, %s10939_s25  ;;  %v2121_v51 = vmul.f32 %v2089_v11, %v12880_v60 }
 0x394   : > { %v12902_v24 = vld [vmem:[#allocation3 + $0x129] sm:$0xff]  ;;  %v3329_v38 = vld [vmem:[#allocation3 + $0x111] sm:$0xff]  ;;  %v2152_v21 = vmul.f32 0.044715, %v2120_v56  ;;  %2489 = vrot.lane.b32.xlu1 %v12818_v27, %s10934_s21  ;;  %v2155_v59 = vmul.f32 0.044715, %v2123_v37  ;;  %v12943_v22 = vpop.permute.xlu1 %3122 }
 0x395   : > { %v12904_v0 = vld [vmem:[#allocation3 + $0x122] sm:$0xff]  ;;  %v3200_v54 = vld [vmem:[#allocation3 + $0x110] sm:$0xff]  ;;  %v2186_v49 = vadd.f32 %v2154_v29, %v12857_v62  ;;  %v2480_v40 = vpop.permute.xlu0 %2479  ;;  %v2153_v19 = vmul.f32 0.044715, %v2121_v51 }
 0x396   : > { %v12911_v44 = vld [vmem:[#allocation3 + $0x10a] sm:$0xff]  ;;  %4184 = vst.msk [vmem:[#allocation3 + $0x120] sm:$0xff] %vm573_vm0, %v15980_v25  ;;  %v12918_v39 = vld [vmem:[#allocation3 + $0x112] sm:$0xff]  ;;  %v12937_v35 = vld [vmem:[#allocation3 + $0x1a2] sm:$0xff]  ;;  %v2184_v4 = vadd.f32 %v2152_v21, %v12862_v32  ;;  %v2187_v30 = vadd.f32 %v2155_v59, %v12873_v20 }
 0x397   : > { %4181 = vst.msk [vmem:[#allocation3 + $0x108] sm:$0xff] %vm573_vm0, %v15980_v25  ;;  %v12922_v5 = vld [vmem:[#allocation3 + $0x12a] sm:$0xff]  ;;  %4182 = vst.msk [vmem:[#allocation3 + $0x110] sm:$0xff] %vm573_vm0, %v15980_v25  ;;  %v2218_v53 = vmul.f32 0.7978846, %v2186_v49  ;;  %3519 = vrot.lane.b32.xlu0 %v12807_v28, %s10942_s16  ;;  %v2185_v11 = vadd.f32 %v2153_v19, %v12880_v60  ;;  %v12970_v19 = vpack.c.bf16 %v3329_v38, %v12891_v8  ;;  %v2059_v8 = vmul.f32 0.5, %v12873_v20 }
 0x398   : > { %4183 = vst.msk [vmem:[#allocation3 + $0x118] sm:$0x3] %vm576_vm1, %v15980_v25  ;;  %4186 = vst.msk [vmem:[#allocation3 + $0x130] sm:$0x3] %vm576_vm1, %v15980_v25  ;;  %v2216_v56 = vmul.f32 0.7978846, %v2184_v4  ;;  %2618 = vrot.lane.b32.xlu1 %v12834_v48, %s10935_s1  ;;  %v3248_v51 = vpop.permute.xlu1 %3247 }
 0x399   : > { %4185 = vst.msk [vmem:[#allocation3 + $0x128] sm:$0xff] %vm573_vm0, %v15980_v25  ;;  %4200 = vst.msk [vmem:[#allocation3 + $0x1a0] sm:$0xff] %vm573_vm0, %v15980_v25  ;;  %10300 = vtanh.f32 %v2218_v53  ;;  %v2219_v29 = vmul.f32 0.7978846, %v2187_v30  ;;  %v2609_v37 = vpop.permute.xlu0 %2608  ;;  %v2217_v21 = vmul.f32 0.7978846, %v2185_v11 }
 0x39a   : > { %2524 = vst.msk [vmem:[#allocation2 + $0x40] sm:$0xff] %vm2519_vm13, %v2480_v40  ;;  %10302 = vtanh.f32 %v2216_v56  ;;  %v12962_v40 = vpack.c.bf16 %v3200_v54, %v3199_v46  ;;  %v2058_v46 = vmul.f32 0.5, %v12857_v62  ;;  %v2056_v56 = vmul.f32 0.5, %v12862_v32 }
 0x39b   : > { %4201 = vst.msk [vmem:[#allocation3 + $0x1a8] sm:$0x3] %vm576_vm1, %v15980_v25  ;;  %10304 = vtanh.f32 %v2219_v29  ;;  %2874 = vrot.lane.b32.xlu0 %v12818_v27, %s15936_s30  ;;  %v12984_v62 = vpack.c.bf16 %v12918_v39, %v12911_v44 }
 0x39c   : > { %2653 = vst.msk [vmem:[#allocation2 + $0x40] sm:$0xff] %vm2648_vm14, %v2609_v37  ;;  %10306 = vtanh.f32 %v2217_v21  ;;  %2747 = vrot.lane.b32.xlu1 %v12868_v33, %s15938_s12  ;;  %v2607_v59 = vpop.permute.xlu1 %2606 }
 0x39d   : > { %3295 = vst.msk [vmem:[#allocation2 + $0x10] sm:$0xff] %vm3293_vm7, %v3248_v51  ;;  %v2738_v49 = vpop.permute.xlu0 %2737 }
 0x39e   : > { %2782 = vst.msk [vmem:[#allocation2 + $0x40] sm:$0xff] %vm15942_vm15, %v2738_v49  ;;  %v2057_v49 = vmul.f32 0.5, %v12880_v60 }
 0x39f   : > { %3003 = vrot.lane.b32.xlu0 %v12834_v48, %s10940_s22 }
 0x3a0   : > { %3263 = vrot.lane.b32.xlu1 %v12962_v40, %s10937_s14  ;;  %v2736_v27 = vpop.permute.xlu1 %2735 }
 0x3a1   : > { %v3377_v4 = vpop.permute.xlu0 %3376 }
 0x3a2   : > { %3424 = vst.msk [vmem:[#allocation2 + $0x10] sm:$0xff] %vm3422_vm8, %v3377_v4 }
 0x3a3   : > { %v10301_v53 = vpop.eup %10300  ;;  %3132 = vrot.lane.b32.xlu0 %v12868_v33, %s10941_s13 }
 0x3a4   : > { %v10303_v30 = vpop.eup %10302  ;;  %v2282_v54 = vadd.f32 1.0, %v10301_v53  ;;  %3392 = vrot.lane.b32.xlu1 %v12970_v19, %s10939_s25 }
 0x3a5   : > { %v10305_v48 = vpop.eup %10304  ;;  %v2280_v11 = vadd.f32 1.0, %v10303_v30  ;;  %v2478_v29 = vpop.permute.xlu0 %2477 }
 0x3a6   : > { %v10307_v37 = vpop.eup %10306  ;;  %v2314_v21 = vmul.f32 %v2282_v54, %v2058_v46  ;;  %v2283_v38 = vadd.f32 1.0, %v10305_v48  ;;  %2523 = vst.msk [vmem:[#allocation2 + $0x30] sm:$0xff] %vm2519_vm13, %v2478_v29  ;;  %v12980_v33 = vpop.permute.xlu1 %2868 }
 0x3a7   : > { %v2312_v51 = vmul.f32 %v2280_v11, %v2056_v56  ;;  %v2281_v4 = vadd.f32 1.0, %v10307_v37  ;;  %2652 = vst.msk [vmem:[#allocation2 + $0x30] sm:$0xff] %vm2648_vm14, %v2607_v59  ;;  %2491 = vrot.lane.b32.xlu0 %v12782_v55, %s10934_s21 }
 0x3a8   : > { %2401 = vst.msk [vmem:[#allocation3 + $0x151] sm:$0xff] %vm2374_vm12, %v2314_v21  ;;  %v2315_v32 = vmul.f32 %v2283_v38, %v2059_v8  ;;  %3521 = vrot.lane.b32.xlu1 %v12984_v62, %s10942_s16 }
 0x3a9   : > { %2781 = vst.msk [vmem:[#allocation2 + $0x30] sm:$0xff] %vm15942_vm15, %v2736_v27  ;;  %v2313_v20 = vmul.f32 %v2281_v4, %v2057_v49  ;;  %v3506_v60 = vpop.permute.xlu0 %3505 }
 0x3aa   : > { %2399 = vst.msk [vmem:[#allocation3 + $0x139] sm:$0xff] %vm2374_vm12, %v2312_v51  ;;  %2402 = vst.msk [vmem:[#allocation3 + $0x159] sm:$0xff] %vm2374_vm12, %v2315_v32  ;;  %v13001_v55 = vpop.permute.xlu1 %2997 }
 0x3ab   : > { %2910 = vst.msk [vmem:[#allocation2 + $0x30] sm:$0xff] %vm15940_vm4, %v12864_v23  ;;  %2620 = vrot.lane.b32.xlu0 %v12791_v50, %s10935_s1  ;;  %v9952_v23 = vpop.f32.mrb[28].mxu0 }
 0x3ac   : > { %3039 = vst.msk [vmem:[#allocation2 + $0x30] sm:$0xff] %vm3035_vm5, %v12898_v43  ;;  %2493 = vrot.lane.b32.xlu1 %v12962_v40, %s10934_s21  ;;  %v13011_v39 = vadd.f32 %v12854_v57, %v9952_v23  ;;  %v2017_v43 = vpop.f32.mrb[29].mxu0 }
 0x3ad   : > { %3553 = vst.msk [vmem:[#allocation2 + $0x10] sm:$0xff] %vm3551_vm9, %v3506_v60  ;;  %v2863_v44 = vpop.permute.xlu0 %2862  ;;  %v13017_v27 = vadd.f32 %v12854_v57, %v2017_v43 }
 0x3ae   : > { %2400 = vst.msk [vmem:[#allocation3 + $0x141] sm:$0xff] %vm2374_vm12, %v2313_v20  ;;  %v13014_v59 = vpop.permute.xlu1 %3126  ;;  %v2094_v50 = vmul.f32 %v13011_v39, %v13011_v39 }
 0x3af   : > { %3168 = vst.msk [vmem:[#allocation2 + $0x30] sm:$0xff] %vm3164_vm6, %v12943_v22  ;;  %v9953_v22 = vpop.f32.mrb[30].mxu0  ;;  %2749 = vrot.lane.b32.xlu0 %v12807_v28, %s15938_s12  ;;  %v2092_v46 = vmul.f32 %v13017_v27, %v13017_v27  ;;  %v13040_v21 = vld [vmem:[#allocation3 + $0x150] sm:$0xff] }
 0x3b0   : > { %2909 = vst.msk [vmem:[#allocation2 + $0x20] sm:$0xff] %vm15940_vm4, %v2863_v44  ;;  %v13024_v53 = vadd.f32 %v12854_v57, %v9953_v22  ;;  %v2020_v30 = vpop.f32.mrb[31].mxu0  ;;  %2622 = vrot.lane.b32.xlu1 %v12970_v19, %s10935_s1  ;;  %v2126_v29 = vmul.f32 %v2094_v50, %v13011_v39  ;;  %v13044_v38 = vld [vmem:[#allocation3 + $0x151] sm:$0xff] }
 0x3b1   : > { %v13031_v54 = vadd.f32 %v12854_v57, %v2020_v30  ;;  %v13033_v48 = vld [vmem:[#allocation3 + $0x138] sm:$0xff]  ;;  %v2992_v28 = vpop.permute.xlu0 %2991  ;;  %v2124_v49 = vmul.f32 %v2092_v46, %v13017_v27 }
 0x3b2   : > { %v13035_v56 = vld [vmem:[#allocation3 + $0x139] sm:$0xff]  ;;  %v2095_v37 = vmul.f32 %v13024_v53, %v13024_v53  ;;  %3038 = vst.msk [vmem:[#allocation2 + $0x20] sm:$0xff] %vm3035_vm5, %v2992_v28  ;;  %v3252_v57 = vpop.permute.xlu1 %3251  ;;  %v2158_v23 = vmul.f32 0.044715, %v2126_v29 }
 0x3b3   : > { %v13042_v8 = vld [vmem:[#allocation3 + $0x158] sm:$0xff]  ;;  %v2093_v4 = vmul.f32 %v13031_v54, %v13031_v54  ;;  %3297 = vst.msk [vmem:[#allocation2 + $0x30] sm:$0xff] %vm3293_vm7, %v3252_v57  ;;  %2878 = vrot.lane.b32.xlu0 %v12962_v40, %s15936_s30  ;;  %v2156_v30 = vmul.f32 0.044715, %v2124_v49 }
 0x3b4   : > { %v3569_v11 = vld [vmem:[#allocation2 + $0x10] sm:$0xff]  ;;  %v13046_v51 = vld [vmem:[#allocation3 + $0x159] sm:$0xff]  ;;  %v2127_v44 = vmul.f32 %v2095_v37, %v13024_v53  ;;  %2751 = vrot.lane.b32.xlu1 %v12984_v62, %s15938_s12  ;;  %v2190_v28 = vadd.f32 %v2158_v23, %v13011_v39  ;;  %v13086_v37 = vpack.c.bf16 %v12900_v61, %v12884_v63 }
 0x3b5   : > { %9969 = vmatmul.mubr.msk.bf16.vlgmr.msra.gmra.mrb[0].mxu1 %vm3646_vm10, %v3569_v11  ;;  %v3204_v32 = vld [vmem:[#allocation3 + $0x140] sm:$0xff]  ;;  %v13065_v22 = vld [vmem:[#allocation3 + $0x152] sm:$0xff]  ;;  %v2125_v46 = vmul.f32 %v2093_v4, %v13031_v54  ;;  %v3121_v40 = vpop.permute.xlu0 %3120  ;;  %v2188_v57 = vadd.f32 %v2156_v30, %v13017_v27  ;;  %v2966_v30 = vpack.c.bf16 %v12902_v24, %v12893_v31 }
 0x3b6   : > { %v13053_v20 = vld [vmem:[#allocation3 + $0x141] sm:$0xff]  ;;  %4190 = vst.msk [vmem:[#allocation3 + $0x150] sm:$0xff] %vm573_vm0, %v15980_v25  ;;  %v2159_v11 = vmul.f32 0.044715, %v2127_v44  ;;  %v3381_v29 = vpop.permute.xlu1 %3380  ;;  %v2222_v4 = vmul.f32 0.7978846, %v2190_v28 }
 0x3b7   : > { %v13055_v60 = vld [vmem:[#allocation3 + $0x13a] sm:$0xff]  ;;  %v13061_v43 = vld [vmem:[#allocation3 + $0x142] sm:$0xff]  ;;  %3167 = vst.msk [vmem:[#allocation2 + $0x20] sm:$0xff] %vm3164_vm6, %v3121_v40  ;;  %v2157_v49 = vmul.f32 0.044715, %v2125_v46  ;;  %3007 = vrot.lane.b32.xlu0 %v12970_v19, %s10940_s22  ;;  %v13114_v40 = vpack.c.bf16 %v12922_v5, %v12904_v0  ;;  %v13126_v0 = vpack.c.bf16 %v3204_v32, %v13033_v48  ;;  %v2061_v48 = vmul.f32 0.5, %v13031_v54 }
 0x3b8   : > { %4187 = vst.msk [vmem:[#allocation3 + $0x138] sm:$0xff] %vm573_vm0, %v15980_v25  ;;  %v13067_v50 = vld [vmem:[#allocation3 + $0x15a] sm:$0xff]  ;;  %4188 = vst.msk [vmem:[#allocation3 + $0x140] sm:$0xff] %vm573_vm0, %v15980_v25  ;;  %v2191_v23 = vadd.f32 %v2159_v11, %v13024_v53  ;;  %2880 = vrot.lane.b32.xlu1 %v13086_v37, %s15936_s30  ;;  %v2220_v63 = vmul.f32 0.7978846, %v2188_v57  ;;  %10308 = vtanh.f32 %v2222_v4  ;;  %v2063_v4 = vmul.f32 0.5, %v13024_v53 }
 0x3b9   : > { %4189 = vst.msk [vmem:[#allocation3 + $0x148] sm:$0x3] %vm576_vm1, %v15980_v25  ;;  %4192 = vst.msk [vmem:[#allocation3 + $0x160] sm:$0x3] %vm576_vm1, %v15980_v25  ;;  %v2189_v61 = vadd.f32 %v2157_v49, %v13031_v54 }
 0x3ba   : > { %4191 = vst.msk [vmem:[#allocation3 + $0x158] sm:$0xff] %vm573_vm0, %v15980_v25  ;;  %v2223_v44 = vmul.f32 0.7978846, %v2191_v23  ;;  %v3510_v19 = vpop.permute.xlu1 %3509  ;;  %10310 = vtanh.f32 %v2220_v63 }
 0x3bb   : > { %3296 = vst.msk [vmem:[#allocation2 + $0x20] sm:$0xff] %vm3293_vm7, %v12828_v7  ;;  %v13102_v7 = vpop.permute.xlu0 %3253  ;;  %v2221_v46 = vmul.f32 0.7978846, %v2189_v61  ;;  %3136 = vrot.lane.b32.xlu0 %v12984_v62, %s10941_s13  ;;  %v2062_v62 = vmul.f32 0.5, %v13011_v39 }
 0x3bc   : > { %3426 = vst.msk [vmem:[#allocation2 + $0x30] sm:$0xff] %vm3422_vm8, %v3381_v29  ;;  %3425 = vst.msk [vmem:[#allocation2 + $0x20] sm:$0xff] %vm3422_vm8, %v12859_v42  ;;  %10312 = vtanh.f32 %v2223_v44  ;;  %3009 = vrot.lane.b32.xlu1 %v2966_v30, %s10940_s22  ;;  %v2060_v29 = vmul.f32 0.5, %v13017_v27 }
 0x3bd   : > { %3554 = vst.msk [vmem:[#allocation2 + $0x20] sm:$0xff] %vm3551_vm9, %v12889_v6  ;;  %3555 = vst.msk [vmem:[#allocation2 + $0x30] sm:$0xff] %vm3551_vm9, %v3510_v19  ;;  %10314 = vtanh.f32 %v2221_v46  ;;  %v3353_v19 = vpack.c.bf16 %v13053_v20, %v13035_v56 }
 0x3be   : > { %v2482_v6 = vpop.permute.xlu1 %2481 }
 0x3bf   : > { %v13110_v42 = vpop.permute.xlu0 %3382  ;;  %2525 = vst.msk [vmem:[#allocation2 + $0x50] sm:$0xff] %vm2519_vm13, %v2482_v6  ;;  %3265 = vrot.lane.b32.xlu0 %v13086_v37, %s10937_s14 }
 0x3c0   : > { %3138 = vrot.lane.b32.xlu1 %v13114_v40, %s10941_s13 }
 0x3c2   : > { %v2611_v28 = vpop.permute.xlu1 %2610  ;;  %v10309_v5 = vpop.eup %10308 }
 0x3c3   : > { %v13121_v24 = vpop.permute.xlu0 %3511  ;;  %2654 = vst.msk [vmem:[#allocation2 + $0x50] sm:$0xff] %vm2648_vm14, %v2611_v28  ;;  %3394 = vrot.lane.b32.xlu0 %v2966_v30, %s10939_s25  ;;  %v2286_v49 = vadd.f32 1.0, %v10309_v5 }
 0x3c4   : > { %v3570_v31 = vld [vmem:[#allocation2 + $0x20] sm:$0xff]  ;;  %v3571_v11 = vld [vmem:[#allocation2 + $0x30] sm:$0xff]  ;;  %v10311_v57 = vpop.eup %10310  ;;  %3267 = vrot.lane.b32.xlu1 %v13126_v0, %s10937_s14 }
 0x3c5   : > { %9972 = vmatprep.mubr.msk.bf16.mxu1 %vm3646_vm10, %v3570_v31  ;;  %v2284_v23 = vadd.f32 1.0, %v10311_v57  ;;  %v2318_v27 = vmul.f32 %v2286_v49, %v2062_v62 }
 0x3c6   : > { %9973 = vmatmul.mubr.msk.bf16.gmra.mrb[4].mxu1 %vm3646_vm10, %v3571_v11  ;;  %v10313_v39 = vpop.eup %10312  ;;  %v2740_v44 = vpop.permute.xlu1 %2739 }
 0x3c7   : > { %v2484_v32 = vpop.permute.xlu0 %2483  ;;  %v10315_v63 = vpop.eup %10314  ;;  %v2287_v61 = vadd.f32 1.0, %v10313_v39  ;;  %v2316_v46 = vmul.f32 %v2284_v23, %v2060_v29  ;;  %2783 = vst.msk [vmem:[#allocation2 + $0x50] sm:$0xff] %vm15942_vm15, %v2740_v44  ;;  %3523 = vrot.lane.b32.xlu0 %v13114_v40, %s10942_s16 }
 0x3c8   : > { %2526 = vst.msk [vmem:[#allocation2 + $0x60] sm:$0xff] %vm2519_vm13, %v2484_v32  ;;  %v2285_v6 = vadd.f32 1.0, %v10315_v63  ;;  %3396 = vrot.lane.b32.xlu1 %v3353_v19, %s10939_s25  ;;  %v2839_v63 = vpack.c.bf16 %v13042_v8, %v13040_v21  ;;  %v2968_v21 = vpack.c.bf16 %v13046_v51, %v13044_v38 }
 0x3c9   : > { %2405 = vst.msk [vmem:[#allocation3 + $0x181] sm:$0xff] %vm2374_vm12, %v2318_v27  ;;  %v2319_v53 = vmul.f32 %v2287_v61, %v2063_v4  ;;  %2403 = vst.msk [vmem:[#allocation3 + $0x169] sm:$0xff] %vm2374_vm12, %v2316_v46 }
 0x3ca   : > { %2912 = vst.msk [vmem:[#allocation2 + $0x50] sm:$0xff] %vm15940_vm4, %v12980_v33  ;;  %v2317_v54 = vmul.f32 %v2285_v6, %v2061_v48  ;;  %v13153_v20 = vpop.permute.xlu1 %2872  ;;  %v3482_v33 = vpack.c.bf16 %v13061_v43, %v13055_v60 }
 0x3cb   : > { %3041 = vst.msk [vmem:[#allocation2 + $0x50] sm:$0xff] %vm3035_vm5, %v13001_v55  ;;  %v2613_v56 = vpop.permute.xlu0 %2612  ;;  %2495 = vrot.lane.b32.xlu0 %v13086_v37, %s10934_s21 }
 0x3cc   : > { %2406 = vst.msk [vmem:[#allocation3 + $0x189] sm:$0xff] %vm2374_vm12, %v2319_v53  ;;  %2404 = vst.msk [vmem:[#allocation3 + $0x171] sm:$0xff] %vm2374_vm12, %v2317_v54  ;;  %3525 = vrot.lane.b32.xlu1 %v3482_v33, %s10942_s16 }
 0x3cd   : > { %3170 = vst.msk [vmem:[#allocation2 + $0x50] sm:$0xff] %vm3164_vm6, %v13014_v59 }
 0x3ce   : > { %2655 = vst.msk [vmem:[#allocation2 + $0x60] sm:$0xff] %vm2648_vm14, %v2613_v56  ;;  %v13162_v31 = vpop.permute.xlu1 %3001 }
 0x3cf   : > { %v2742_v55 = vpop.permute.xlu0 %2741  ;;  %2624 = vrot.lane.b32.xlu0 %v2966_v30, %s10935_s1 }
 0x3d0   : > { %2784 = vst.msk [vmem:[#allocation2 + $0x60] sm:$0xff] %vm15942_vm15, %v2742_v55  ;;  %2497 = vrot.lane.b32.xlu1 %v13126_v0, %s10934_s21  ;;  %v3207_v59 = vld [vmem:[#allocation3 + $0x168] sm:$0xff]  ;;  %v13167_v62 = vld [vmem:[#allocation3 + $0x180] sm:$0xff] }
 0x3d1   : > { %v13169_v60 = vld [vmem:[#allocation3 + $0x181] sm:$0xff]  ;;  %v3336_v28 = vld [vmem:[#allocation3 + $0x169] sm:$0xff] }
 0x3d2   : > { %v13176_v5 = vpop.permute.xlu1 %3130 }
 0x3d3   : > { %v2867_v43 = vpop.permute.xlu0 %2866  ;;  %v13171_v37 = vld [vmem:[#allocation3 + $0x188] sm:$0xff]  ;;  %v3208_v29 = vld [vmem:[#allocation3 + $0x170] sm:$0xff]  ;;  %2753 = vrot.lane.b32.xlu0 %v13114_v40, %s15938_s12 }
 0x3d4   : > { %v13173_v11 = vld [vmem:[#allocation3 + $0x182] sm:$0xff]  ;;  %2911 = vst.msk [vmem:[#allocation2 + $0x40] sm:$0xff] %vm15940_vm4, %v2867_v43  ;;  %v3465_v30 = vld [vmem:[#allocation3 + $0x16a] sm:$0xff]  ;;  %v3466_v4 = vld [vmem:[#allocation3 + $0x172] sm:$0xff]  ;;  %2626 = vrot.lane.b32.xlu1 %v3353_v19, %s10935_s1  ;;  %v3226_v61 = vpack.c.bf16 %v3208_v29, %v3207_v59 }
 0x3d5   : > { %v13178_v57 = vld [vmem:[#allocation3 + $0x189] sm:$0xff]  ;;  %4196 = vst.msk [vmem:[#allocation3 + $0x180] sm:$0xff] %vm573_vm0, %v15980_v25  ;;  %v3337_v49 = vld [vmem:[#allocation3 + $0x171] sm:$0xff]  ;;  %4193 = vst.msk [vmem:[#allocation3 + $0x168] sm:$0xff] %vm573_vm0, %v15980_v25  ;;  %v3484_v46 = vpack.c.bf16 %v3466_v4, %v3465_v30 }
 0x3d6   : > { %v13186_v39 = vld [vmem:[#allocation3 + $0x18a] sm:$0xff]  ;;  %4195 = vst.msk [vmem:[#allocation3 + $0x178] sm:$0x3] %vm576_vm1, %v15980_v25  ;;  %v3256_v23 = vpop.permute.xlu1 %3255  ;;  %v2970_v30 = vpack.c.bf16 %v13178_v57, %v13169_v60 }
 0x3d7   : > { %4194 = vst.msk [vmem:[#allocation3 + $0x170] sm:$0xff] %vm573_vm0, %v15980_v25  ;;  %4197 = vst.msk [vmem:[#allocation3 + $0x188] sm:$0xff] %vm573_vm0, %v15980_v25  ;;  %v2996_v40 = vpop.permute.xlu0 %2995  ;;  %2882 = vrot.lane.b32.xlu0 %v13126_v0, %s15936_s30 }
 0x3d8   : > { %4198 = vst.msk [vmem:[#allocation3 + $0x190] sm:$0x3] %vm576_vm1, %v15980_v25  ;;  %2755 = vrot.lane.b32.xlu1 %v3482_v33, %s15938_s12 }
 0x3d9   : > { %3040 = vst.msk [vmem:[#allocation2 + $0x40] sm:$0xff] %vm3035_vm5, %v2996_v40 }
 0x3da   : > { %3299 = vst.msk [vmem:[#allocation2 + $0x50] sm:$0xff] %vm3293_vm7, %v3256_v23  ;;  %v3385_v32 = vpop.permute.xlu1 %3384 }
 0x3db   : > { %v3125_v48 = vpop.permute.xlu0 %3124  ;;  %3428 = vst.msk [vmem:[#allocation2 + $0x50] sm:$0xff] %vm3422_vm8, %v3385_v32  ;;  %3011 = vrot.lane.b32.xlu0 %v3353_v19, %s10940_s22 }
 0x3dc   : > { %3169 = vst.msk [vmem:[#allocation2 + $0x40] sm:$0xff] %vm3164_vm6, %v3125_v48  ;;  %2884 = vrot.lane.b32.xlu1 %v2839_v63, %s15936_s30  ;;  %v3486_v48 = vpack.c.bf16 %v12937_v35, %v12924_v34 }
 0x3dd   : > { %3298 = vst.msk [vmem:[#allocation2 + $0x40] sm:$0xff] %vm3293_vm7, %v13102_v7 }
 0x3de   : > { %3427 = vst.msk [vmem:[#allocation2 + $0x40] sm:$0xff] %vm3422_vm8, %v13110_v42  ;;  %v3514_v27 = vpop.permute.xlu1 %3513  ;;  %v3097_v42 = vpack.c.bf16 %v13067_v50, %v13065_v22  ;;  %v3355_v22 = vpack.c.bf16 %v3337_v49, %v3336_v28  ;;  %v2841_v28 = vpack.c.bf16 %v13171_v37, %v13167_v62  ;;  %v3099_v49 = vpack.c.bf16 %v13186_v39, %v13173_v11 }
 0x3df   : > { %3556 = vst.msk [vmem:[#allocation2 + $0x40] sm:$0xff] %vm3551_vm9, %v13121_v24  ;;  %v3258_v0 = vpop.permute.xlu0 %3257  ;;  %3557 = vst.msk [vmem:[#allocation2 + $0x50] sm:$0xff] %vm3551_vm9, %v3514_v27  ;;  %3140 = vrot.lane.b32.xlu0 %v3482_v33, %s10941_s13  ;;  %v3357_v11 = vpack.c.bf16 %v12935_v26, %v12906_v45 }
 0x3e0   : > { %3013 = vrot.lane.b32.xlu1 %v2968_v21, %s10940_s22 }
 0x3e2   : > { %v2486_v7 = vpop.permute.xlu1 %2485 }
 0x3e3   : > { %v3387_v8 = vpop.permute.xlu0 %3386  ;;  %2527 = vst.msk [vmem:[#allocation2 + $0x70] sm:$0xff] %vm2519_vm13, %v2486_v7  ;;  %3269 = vrot.lane.b32.xlu0 %v2839_v63, %s10937_s14  ;;  %v4363_v7 = vld [vmem:[#allocation3 + $0x1] sm:$0xff] }
 0x3e4   : > { %3142 = vrot.lane.b32.xlu1 %v3097_v42, %s10941_s13 }
 0x3e6   : > { %v3572_v24 = vld [vmem:[#allocation2 + $0x40] sm:$0xff]  ;;  %v2615_v51 = vpop.permute.xlu1 %2614  ;;  %v3573_v44 = vld [vmem:[#allocation2 + $0x50] sm:$0xff] }
 0x3e7   : > { %v3516_v38 = vpop.permute.xlu0 %3515  ;;  %9976 = vmatprep.mubr.msk.bf16.mxu1 %vm3646_vm10, %v3572_v24  ;;  %2656 = vst.msk [vmem:[#allocation2 + $0x70] sm:$0xff] %vm2648_vm14, %v2615_v51  ;;  %3398 = vrot.lane.b32.xlu0 %v2968_v21, %s10939_s25  ;;  %v4234_v51 = vld [vmem:[#allocation3] sm:$0xff] }
 0x3e8   : > { %9977 = vmatmul.mubr.msk.bf16.gmra.mrb[8].mxu1 %vm3646_vm10, %v3573_v44  ;;  %3271 = vrot.lane.b32.xlu1 %v3226_v61, %s10937_s14  ;;  %v4235_v44 = vld [vmem:[#allocation3 + $0x8] sm:$0xff] }
 0x3ea   : > { %v2744_v19 = vpop.permute.xlu1 %2743 }
 0x3eb   : > { %v2488_v50 = vpop.permute.xlu0 %2487  ;;  %2785 = vst.msk [vmem:[#allocation2 + $0x70] sm:$0xff] %vm15942_vm15, %v2744_v19  ;;  %3527 = vrot.lane.b32.xlu0 %v3097_v42, %s10942_s16  ;;  %v4266_v19 = vpack.c.bf16 %v4235_v44, %v4234_v51 }
 0x3ec   : > { %2528 = vst.msk [vmem:[#allocation2 + $0x80] sm:$0xff] %vm2519_vm13, %v2488_v50  ;;  %3400 = vrot.lane.b32.xlu1 %v3355_v22, %s10939_s25 }
 0x3ed   : > { %2914 = vst.msk [vmem:[#allocation2 + $0x70] sm:$0xff] %vm15940_vm4, %v13153_v20 }
 0x3ee   : > { %3043 = vst.msk [vmem:[#allocation2 + $0x70] sm:$0xff] %vm3035_vm5, %v13162_v31  ;;  %v2877_v53 = vpop.permute.xlu1 %2876 }
 0x3ef   : > { %v2617_v6 = vpop.permute.xlu0 %2616  ;;  %3172 = vst.msk [vmem:[#allocation2 + $0x70] sm:$0xff] %vm3164_vm6, %v13176_v5  ;;  %2499 = vrot.lane.b32.xlu0 %v2839_v63, %s10934_s21 }
 0x3f0   : > { %2657 = vst.msk [vmem:[#allocation2 + $0x80] sm:$0xff] %vm2648_vm14, %v2617_v6  ;;  %3529 = vrot.lane.b32.xlu1 %v3484_v46, %s10942_s16 }
 0x3f2   : > { %v3006_v56 = vpop.permute.xlu1 %3005 }
 0x3f3   : > { %v2746_v54 = vpop.permute.xlu0 %2745  ;;  %2628 = vrot.lane.b32.xlu0 %v2968_v21, %s10935_s1 }
 0x3f4   : > { %2786 = vst.msk [vmem:[#allocation2 + $0x80] sm:$0xff] %vm15942_vm15, %v2746_v54  ;;  %2501 = vrot.lane.b32.xlu1 %v3226_v61, %s10934_s21 }
 0x3f6   : > { %v3135_v33 = vpop.permute.xlu1 %3134 }
 0x3f7   : > { %v2871_v20 = vpop.permute.xlu0 %2870  ;;  %2757 = vrot.lane.b32.xlu0 %v3097_v42, %s15938_s12  ;;  %v4364_v42 = vld [vmem:[#allocation3 + $0x9] sm:$0xff] }
 0x3f8   : > { %2913 = vst.msk [vmem:[#allocation2 + $0x60] sm:$0xff] %vm15940_vm4, %v2871_v20  ;;  %2630 = vrot.lane.b32.xlu1 %v3355_v22, %s10935_s1 }
 0x3fa   : > { %v3260_v31 = vpop.permute.xlu1 %3259 }
 0x3fb   : > { %v3000_v55 = vpop.permute.xlu0 %2999  ;;  %3301 = vst.msk [vmem:[#allocation2 + $0x70] sm:$0xff] %vm3293_vm7, %v3260_v31  ;;  %2886 = vrot.lane.b32.xlu0 %v3226_v61, %s15936_s30  ;;  %v4395_v61 = vpack.c.bf16 %v4364_v42, %v4363_v7 }
 0x3fc   : > { %3042 = vst.msk [vmem:[#allocation2 + $0x60] sm:$0xff] %vm3035_vm5, %v3000_v55  ;;  %2759 = vrot.lane.b32.xlu1 %v3484_v46, %s15938_s12  ;;  %s10950_s12 = smov 12  }
 0x3fe   : > { %v3389_v43 = vpop.permute.xlu1 %3388 }
 0x3ff   : > { %v3129_v59 = vpop.permute.xlu0 %3128  ;;  %3430 = vst.msk [vmem:[#allocation2 + $0x70] sm:$0xff] %vm3422_vm8, %v3389_v43  ;;  %3015 = vrot.lane.b32.xlu0 %v3355_v22, %s10940_s22  ;;  %v4492_v22 = vld [vmem:[#allocation3 + $0x2] sm:$0xff] }
 0x400   : > { %3171 = vst.msk [vmem:[#allocation2 + $0x60] sm:$0xff] %vm3164_vm6, %v3129_v59  ;;  %2888 = vrot.lane.b32.xlu1 %v2841_v28, %s15936_s30  ;;  %s10949_s30 = smov 124  }
 0x401   : > { %3300 = vst.msk [vmem:[#allocation2 + $0x60] sm:$0xff] %vm3293_vm7, %v3258_v0 }
 0x402   : > { %3429 = vst.msk [vmem:[#allocation2 + $0x60] sm:$0xff] %vm3422_vm8, %v3387_v8  ;;  %v3518_v29 = vpop.permute.xlu1 %3517 }
 0x403   : > { %3558 = vst.msk [vmem:[#allocation2 + $0x60] sm:$0xff] %vm3551_vm9, %v3516_v38  ;;  %v3262_v5 = vpop.permute.xlu0 %3261  ;;  %3559 = vst.msk [vmem:[#allocation2 + $0x70] sm:$0xff] %vm3551_vm9, %v3518_v29  ;;  %3144 = vrot.lane.b32.xlu0 %v3484_v46, %s10941_s13  ;;  %v4493_v46 = vld [vmem:[#allocation3 + $0xa] sm:$0xff] }
 0x404   : > { %3017 = vrot.lane.b32.xlu1 %v2970_v30, %s10940_s22  ;;  %5939 = vst.msk [vmem:[#allocation3] sm:$0xff] %vm573_vm0, %v15980_v25  ;;  %v4524_v6 = vpack.c.bf16 %v4493_v46, %v4492_v22  ;;  %5940 = vst.msk [vmem:[#allocation3 + $0x8] sm:$0xff] %vm573_vm0, %v15980_v25  ;;  %s10944_s22 = smov 108  }
 0x405   : > { %5941 = vst.msk [vmem:[#allocation3 + $0x10] sm:$0x3] %vm576_vm1, %v15980_v25 }
 0x406   : > { %v2490_v37 = vpop.permute.xlu1 %2489 }
 0x407   : > { %v3391_v62 = vpop.permute.xlu0 %3390  ;;  %2529 = vst.msk [vmem:[#allocation2 + $0x90] sm:$0xff] %vm2519_vm13, %v2490_v37  ;;  %3273 = vrot.lane.b32.xlu0 %v2841_v28, %s10937_s14 }
 0x408   : > { %3146 = vrot.lane.b32.xlu1 %v3099_v49, %s10941_s13  ;;  %s10945_s13 = smov 116  }
 0x40a   : > { %v3574_v4 = vld [vmem:[#allocation2 + $0x60] sm:$0xff]  ;;  %v2619_v60 = vpop.permute.xlu1 %2618  ;;  %v3575_v57 = vld [vmem:[#allocation2 + $0x70] sm:$0xff] }
 0x40b   : > { %v3520_v40 = vpop.permute.xlu0 %3519  ;;  %9980 = vmatprep.mubr.msk.bf16.mxu1 %vm3646_vm10, %v3574_v4  ;;  %2658 = vst.msk [vmem:[#allocation2 + $0x90] sm:$0xff] %vm2648_vm14, %v2619_v60  ;;  %3402 = vrot.lane.b32.xlu0 %v2970_v30, %s10939_s25 }
 0x40c   : > { %9981 = vmatmul.mubr.msk.bf16.gmra.mrb[12].mxu1 %vm3646_vm10, %v3575_v57  ;;  %3275 = vrot.lane.b32.xlu1 %v3228_v58, %s10937_s14  ;;  %s10948_s14 = smov 120  }
 0x40e   : > { %v2748_v23 = vpop.permute.xlu1 %2747 }
 0x40f   : > { %v2875_v39 = vpop.permute.xlu0 %2874  ;;  %2787 = vst.msk [vmem:[#allocation2 + $0x90] sm:$0xff] %vm15942_vm15, %v2748_v23  ;;  %3531 = vrot.lane.b32.xlu0 %v3099_v49, %s10942_s16 }
 0x410   : > { %2915 = vst.msk [vmem:[#allocation2 + $0x80] sm:$0xff] %vm15940_vm4, %v2875_v39  ;;  %2916 = vst.msk [vmem:[#allocation2 + $0x90] sm:$0xff] %vm15940_vm4, %v2877_v53  ;;  %3404 = vrot.lane.b32.xlu1 %v3357_v11, %s10939_s25  ;;  %s10947_s25 = smov 4  }
 0x411   : > { %3045 = vst.msk [vmem:[#allocation2 + $0x90] sm:$0xff] %vm3035_vm5, %v3006_v56 }
 0x412   : > { %3174 = vst.msk [vmem:[#allocation2 + $0x90] sm:$0xff] %vm3164_vm6, %v3135_v33  ;;  %v3264_v52 = vpop.permute.xlu1 %3263 }
 0x413   : > { %v3004_v47 = vpop.permute.xlu0 %3003  ;;  %3303 = vst.msk [vmem:[#allocation2 + $0x90] sm:$0xff] %vm3293_vm7, %v3264_v52  ;;  %4298 = vrot.lane.b32.xlu0 %v4266_v19, %s10944_s22 }
 0x414   : > { %3044 = vst.msk [vmem:[#allocation2 + $0x80] sm:$0xff] %vm3035_vm5, %v3004_v47  ;;  %3533 = vrot.lane.b32.xlu1 %v3486_v48, %s10942_s16  ;;  %s10943_s16 = smov 112  }
 0x416   : > { %v3393_v45 = vpop.permute.xlu1 %3392 }
 0x417   : > { %v3133_v58 = vpop.permute.xlu0 %3132  ;;  %3432 = vst.msk [vmem:[#allocation2 + $0x90] sm:$0xff] %vm3422_vm8, %v3393_v45 }
 0x418   : > { %3173 = vst.msk [vmem:[#allocation2 + $0x80] sm:$0xff] %vm3164_vm6, %v3133_v58  ;;  %4427 = vrot.lane.b32.xlu1 %v4395_v61, %s10943_s16 }
 0x419   : > { %3302 = vst.msk [vmem:[#allocation2 + $0x80] sm:$0xff] %vm3293_vm7, %v3262_v5 }
 0x41a   : > { %3431 = vst.msk [vmem:[#allocation2 + $0x80] sm:$0xff] %vm3422_vm8, %v3391_v62  ;;  %v3522_v26 = vpop.permute.xlu1 %3521 }
 0x41b   : > { %3560 = vst.msk [vmem:[#allocation2 + $0x80] sm:$0xff] %vm3551_vm9, %v3520_v40  ;;  %v2492_v34 = vpop.permute.xlu0 %2491  ;;  %3561 = vst.msk [vmem:[#allocation2 + $0x90] sm:$0xff] %vm3551_vm9, %v3522_v26 }
 0x41c   : > { %2530 = vst.msk [vmem:[#allocation2 + $0xa0] sm:$0xff] %vm2519_vm13, %v2492_v34  ;;  %4556 = vrot.lane.b32.xlu1 %v4524_v6, %s10945_s13  ;;  %v13367_v6 = vld [vmem:[#allocation12] ss:$0 sm:$0xff] }
 0x41e   : > { %v2494_v32 = vpop.permute.xlu1 %2493 }
 0x41f   : > { %v2621_v35 = vpop.permute.xlu0 %2620  ;;  %2531 = vst.msk [vmem:[#allocation2 + $0xb0] sm:$0xff] %vm2519_vm13, %v2494_v32 }
 0x420   : > { %2659 = vst.msk [vmem:[#allocation2 + $0xa0] sm:$0xff] %vm2648_vm14, %v2621_v35 }
 0x422   : > { %v3576_v63 = vld [vmem:[#allocation2 + $0x80] sm:$0xff]  ;;  %v2623_v27 = vpop.permute.xlu1 %2622  ;;  %v3577_v21 = vld [vmem:[#allocation2 + $0x90] sm:$0xff] }
 0x423   : > { %v2750_v0 = vpop.permute.xlu0 %2749  ;;  %9984 = vmatprep.mubr.msk.bf16.mxu1 %vm3646_vm10, %v3576_v63  ;;  %2660 = vst.msk [vmem:[#allocation2 + $0xb0] sm:$0xff] %vm2648_vm14, %v2623_v27 }
 0x424   : > { %2788 = vst.msk [vmem:[#allocation2 + $0xa0] sm:$0xff] %vm15942_vm15, %v2750_v0  ;;  %9985 = vmatmul.mubr.msk.bf16.gmra.mrb[16].mxu1 %vm3646_vm10, %v3577_v21 }
 0x426   : > { %v2752_v24 = vpop.permute.xlu1 %2751 }
 0x427   : > { %v2879_v8 = vpop.permute.xlu0 %2878  ;;  %2789 = vst.msk [vmem:[#allocation2 + $0xb0] sm:$0xff] %vm15942_vm15, %v2752_v24 }
 0x428   : > { %2917 = vst.msk [vmem:[#allocation2 + $0xa0] sm:$0xff] %vm15940_vm4, %v2879_v8 }
 0x42a   : > { %v2881_v50 = vpop.permute.xlu1 %2880 }
 0x42b   : > { %v3008_v38 = vpop.permute.xlu0 %3007  ;;  %2918 = vst.msk [vmem:[#allocation2 + $0xb0] sm:$0xff] %vm15940_vm4, %v2881_v50 }
 0x42c   : > { %3046 = vst.msk [vmem:[#allocation2 + $0xa0] sm:$0xff] %vm3035_vm5, %v3008_v38 }
 0x42e   : > { %v3010_v54 = vpop.permute.xlu1 %3009 }
 0x42f   : > { %v3137_v53 = vpop.permute.xlu0 %3136  ;;  %3047 = vst.msk [vmem:[#allocation2 + $0xb0] sm:$0xff] %vm3035_vm5, %v3010_v54 }
 0x430   : > { %3175 = vst.msk [vmem:[#allocation2 + $0xa0] sm:$0xff] %vm3164_vm6, %v3137_v53 }
 0x432   : > { %v3139_v20 = vpop.permute.xlu1 %3138 }
 0x433   : > { %v3266_v56 = vpop.permute.xlu0 %3265  ;;  %3176 = vst.msk [vmem:[#allocation2 + $0xb0] sm:$0xff] %vm3164_vm6, %v3139_v20 }
 0x434   : > { %3304 = vst.msk [vmem:[#allocation2 + $0xa0] sm:$0xff] %vm3293_vm7, %v3266_v56 }
 0x436   : > { %v3268_v55 = vpop.permute.xlu1 %3267 }
 0x437   : > { %v3395_v33 = vpop.permute.xlu0 %3394  ;;  %3305 = vst.msk [vmem:[#allocation2 + $0xb0] sm:$0xff] %vm3293_vm7, %v3268_v55 }
 0x438   : > { %3433 = vst.msk [vmem:[#allocation2 + $0xa0] sm:$0xff] %vm3422_vm8, %v3395_v33 }
 0x43a   : > { %v3397_v59 = vpop.permute.xlu1 %3396 }
 0x43b   : > { %v3524_v31 = vpop.permute.xlu0 %3523  ;;  %3434 = vst.msk [vmem:[#allocation2 + $0xb0] sm:$0xff] %vm3422_vm8, %v3397_v59 }
 0x43c   : > { %3562 = vst.msk [vmem:[#allocation2 + $0xa0] sm:$0xff] %vm3551_vm9, %v3524_v31 }
 0x43e   : > { %v3526_v28 = vpop.permute.xlu1 %3525 }
 0x43f   : > { %v2496_v43 = vpop.permute.xlu0 %2495  ;;  %3563 = vst.msk [vmem:[#allocation2 + $0xb0] sm:$0xff] %vm3551_vm9, %v3526_v28 }
 0x440   : > { %2532 = vst.msk [vmem:[#allocation2 + $0xc0] sm:$0xff] %vm2519_vm13, %v2496_v43 }
 0x442   : > { %v2498_v30 = vpop.permute.xlu1 %2497 }
 0x443   : > { %v2625_v5 = vpop.permute.xlu0 %2624  ;;  %v3578_v29 = vld [vmem:[#allocation2 + $0xa0] sm:$0xff]  ;;  %2533 = vst.msk [vmem:[#allocation2 + $0xd0] sm:$0xff] %vm2519_vm13, %v2498_v30 }
 0x444   : > { %2661 = vst.msk [vmem:[#allocation2 + $0xc0] sm:$0xff] %vm2648_vm14, %v2625_v5  ;;  %9988 = vmatprep.mubr.msk.bf16.mxu1 %vm3646_vm10, %v3578_v29 }
 0x446   : > { %v2627_v37 = vpop.permute.xlu1 %2626  ;;  %v3579_v49 = vld [vmem:[#allocation2 + $0xb0] sm:$0xff] }
 0x447   : > { %v2754_v62 = vpop.permute.xlu0 %2753  ;;  %2662 = vst.msk [vmem:[#allocation2 + $0xd0] sm:$0xff] %vm2648_vm14, %v2627_v37  ;;  %9989 = vmatmul.mubr.msk.bf16.gmra.mrb[20].mxu1 %vm3646_vm10, %v3579_v49 }
 0x448   : > { %2790 = vst.msk [vmem:[#allocation2 + $0xc0] sm:$0xff] %vm15942_vm15, %v2754_v62 }
 0x44a   : > { %v2756_v40 = vpop.permute.xlu1 %2755 }
 0x44b   : > { %v2883_v4 = vpop.permute.xlu0 %2882  ;;  %2791 = vst.msk [vmem:[#allocation2 + $0xd0] sm:$0xff] %vm15942_vm15, %v2756_v40 }
 0x44c   : > { %2919 = vst.msk [vmem:[#allocation2 + $0xc0] sm:$0xff] %vm15940_vm4, %v2883_v4 }
 0x44e   : > { %v2885_v57 = vpop.permute.xlu1 %2884 }
 0x44f   : > { %v3012_v60 = vpop.permute.xlu0 %3011  ;;  %2920 = vst.msk [vmem:[#allocation2 + $0xd0] sm:$0xff] %vm15940_vm4, %v2885_v57 }
 0x450   : > { %3048 = vst.msk [vmem:[#allocation2 + $0xc0] sm:$0xff] %vm3035_vm5, %v3012_v60 }
 0x452   : > { %v3014_v39 = vpop.permute.xlu1 %3013 }
 0x453   : > { %v3141_v11 = vpop.permute.xlu0 %3140  ;;  %3049 = vst.msk [vmem:[#allocation2 + $0xd0] sm:$0xff] %vm3035_vm5, %v3014_v39 }
 0x454   : > { %3177 = vst.msk [vmem:[#allocation2 + $0xc0] sm:$0xff] %vm3164_vm6, %v3141_v11 }
 0x456   : > { %v3143_v48 = vpop.permute.xlu1 %3142 }
 0x457   : > { %v3270_v23 = vpop.permute.xlu0 %3269  ;;  %3178 = vst.msk [vmem:[#allocation2 + $0xd0] sm:$0xff] %vm3164_vm6, %v3143_v48 }
 0x458   : > { %3306 = vst.msk [vmem:[#allocation2 + $0xc0] sm:$0xff] %vm3293_vm7, %v3270_v23 }
 0x45a   : > { %v3272_v52 = vpop.permute.xlu1 %3271 }
 0x45b   : > { %v3399_v47 = vpop.permute.xlu0 %3398  ;;  %3307 = vst.msk [vmem:[#allocation2 + $0xd0] sm:$0xff] %vm3293_vm7, %v3272_v52 }
 0x45c   : > { %3435 = vst.msk [vmem:[#allocation2 + $0xc0] sm:$0xff] %vm3422_vm8, %v3399_v47 }
 0x45e   : > { %v3401_v45 = vpop.permute.xlu1 %3400 }
 0x45f   : > { %v3528_v58 = vpop.permute.xlu0 %3527  ;;  %3436 = vst.msk [vmem:[#allocation2 + $0xd0] sm:$0xff] %vm3422_vm8, %v3401_v45 }
 0x460   : > { %3564 = vst.msk [vmem:[#allocation2 + $0xc0] sm:$0xff] %vm3551_vm9, %v3528_v58 }
 0x462   : > { %v3530_v26 = vpop.permute.xlu1 %3529 }
 0x463   : > { %v2500_v34 = vpop.permute.xlu0 %2499  ;;  %3565 = vst.msk [vmem:[#allocation2 + $0xd0] sm:$0xff] %vm3551_vm9, %v3530_v26 }
 0x464   : > { %2534 = vst.msk [vmem:[#allocation2 + $0xe0] sm:$0xff] %vm2519_vm13, %v2500_v34 }
 0x466   : > { %v2502_v63 = vpop.permute.xlu1 %2501 }
 0x467   : > { %v2629_v35 = vpop.permute.xlu0 %2628  ;;  %v3580_v32 = vld [vmem:[#allocation2 + $0xc0] sm:$0xff]  ;;  %2535 = vst.msk [vmem:[#allocation2 + $0xf0] sm:$0xff] %vm2519_vm13, %v2502_v63  ;;  %v10217_v63 = vld [vmem:[#allocation13] sm:$0xff]  }
 0x468   : > { %2663 = vst.msk [vmem:[#allocation2 + $0xe0] sm:$0xff] %vm2648_vm14, %v2629_v35  ;;  %9992 = vmatprep.mubr.msk.bf16.mxu1 %vm3646_vm10, %v3580_v32 }
 0x46a   : > { %v2631_v27 = vpop.permute.xlu1 %2630  ;;  %v3581_v21 = vld [vmem:[#allocation2 + $0xd0] sm:$0xff] }
 0x46b   : > { %v2758_v0 = vpop.permute.xlu0 %2757  ;;  %2664 = vst.msk [vmem:[#allocation2 + $0xf0] sm:$0xff] %vm2648_vm14, %v2631_v27  ;;  %9993 = vmatmul.mubr.msk.bf16.gmra.mrb[24].mxu1 %vm3646_vm10, %v3581_v21  ;;  %v10946_v21 = vmov 0  }
 0x46c   : > { %2792 = vst.msk [vmem:[#allocation2 + $0xe0] sm:$0xff] %vm15942_vm15, %v2758_v0  ;;  %5490 = vmatprep.subr.bf16.mxu0 %v10946_v21  ;;  %10000 = vmatprep.subr.bf16.mxu1 %v10946_v21 }
 0x46d   : > { %5491 = vmatpush1.bf16.msra.mxu0 %v10217_v63  ;;  %10009 = vmatpush1.bf16.msra.mxu1 %v10217_v63  ;;  %v10220_v63 = vld [vmem:[#allocation13 + $0x18] sm:$0xff]  }
 0x46e   : > { %v2760_v7 = vpop.permute.xlu1 %2759  ;;  %5492 = vmatprep.subr.bf16.mxu0 %v10946_v21  ;;  %10001 = vmatprep.subr.bf16.mxu1 %v10946_v21 }
 0x46f   : > { %v2887_v8 = vpop.permute.xlu0 %2886  ;;  %2793 = vst.msk [vmem:[#allocation2 + $0xf0] sm:$0xff] %vm15942_vm15, %v2760_v7  ;;  %vm7317_vm15 = vcmask 424960  }
 0x470   : > { %2921 = vst.msk [vmem:[#allocation2 + $0xe0] sm:$0xff] %vm15940_vm4, %v2887_v8 }
 0x472   : > { %v2889_v24 = vpop.permute.xlu1 %2888 }
 0x473   : > { %v3016_v42 = vpop.permute.xlu0 %3015  ;;  %2922 = vst.msk [vmem:[#allocation2 + $0xf0] sm:$0xff] %vm15940_vm4, %v2889_v24  ;;  %vm4862_vm4 = vcmask 1048544  }
 0x474   : > { %3050 = vst.msk [vmem:[#allocation2 + $0xe0] sm:$0xff] %vm3035_vm5, %v3016_v42 }
 0x476   : > { %v3018_v38 = vpop.permute.xlu1 %3017 }
 0x477   : > { %v3145_v61 = vpop.permute.xlu0 %3144  ;;  %3051 = vst.msk [vmem:[#allocation2 + $0xf0] sm:$0xff] %vm3035_vm5, %v3018_v38  ;;  %vm4604_vm5 = vcmask 982944  }
 0x478   : > { %3179 = vst.msk [vmem:[#allocation2 + $0xe0] sm:$0xff] %vm3164_vm6, %v3145_v61 }
 0x47a   : > { %v3147_v44 = vpop.permute.xlu1 %3146 }
 0x47b   : > { %v3274_v51 = vpop.permute.xlu0 %3273  ;;  %3180 = vst.msk [vmem:[#allocation2 + $0xf0] sm:$0xff] %vm3164_vm6, %v3147_v44  ;;  %vm5055_vm6 = vcmask 64544  }
 0x47c   : > { %3308 = vst.msk [vmem:[#allocation2 + $0xe0] sm:$0xff] %vm3293_vm7, %v3274_v51 }
 0x47e   : > { %v3276_v50 = vpop.permute.xlu1 %3275 }
 0x47f   : > { %v3403_v22 = vpop.permute.xlu0 %3402  ;;  %3309 = vst.msk [vmem:[#allocation2 + $0xf0] sm:$0xff] %vm3293_vm7, %v3276_v50  ;;  %vm5184_vm7 = vcmask 97344  }
 0x480   : > { %3437 = vst.msk [vmem:[#allocation2 + $0xe0] sm:$0xff] %vm3422_vm8, %v3403_v22 }
 0x482   : > { %v3405_v46 = vpop.permute.xlu1 %3404 }
 0x483   : > { %v3532_v19 = vpop.permute.xlu0 %3531  ;;  %3438 = vst.msk [vmem:[#allocation2 + $0xf0] sm:$0xff] %vm3422_vm8, %v3405_v46  ;;  %vm5313_vm8 = vcmask 130144  }
 0x484   : > { %3566 = vst.msk [vmem:[#allocation2 + $0xe0] sm:$0xff] %vm3551_vm9, %v3532_v19 }
 0x486   : > { %v3534_v20 = vpop.permute.xlu1 %3533 }
 0x487   : > { %3567 = vst.msk [vmem:[#allocation2 + $0xf0] sm:$0xff] %vm3551_vm9, %v3534_v20  ;;  %vm4733_vm9 = vcmask 1015744  }
 0x488   : > { %v9970_v53 = vpop.f32.mrb[0].mxu1 }
 0x489   : > { %v3742_v54 = vadd.f32 %v9970_v53, %v13367_v6  ;;  %v3733_v56 = vpop.f32.mrb[1].mxu1 }
 0x48a   : > { %v3734_v33 = vadd.f32 %v13367_v6, %v3733_v56  ;;  %v9971_v55 = vpop.f32.mrb[2].mxu1 }
 0x48b   : > { %v3894_v31 = vmul.f32 %v3742_v54, %v3742_v54  ;;  %v3745_v59 = vadd.f32 %v9971_v55, %v13367_v6  ;;  %v3736_v43 = vpop.f32.mrb[3].mxu1  ;;  %v3582_v29 = vld [vmem:[#allocation2 + $0xe0] sm:$0xff]  ;;  %v3862_v19 = vmul.f32 0.5, %v3742_v54 }
 0x48c   : > { %v3892_v28 = vmul.f32 %v3734_v33, %v3734_v33  ;;  %v3737_v5 = vadd.f32 %v13367_v6, %v3736_v43  ;;  %9996 = vmatprep.mubr.msk.bf16.mxu1 %vm3646_vm10, %v3582_v29  ;;  %v3860_v46 = vmul.f32 0.5, %v3734_v33 }
 0x48d   : > { %v3926_v30 = vmul.f32 %v3894_v31, %v3742_v54  ;;  %v3895_v62 = vmul.f32 %v3745_v59, %v3745_v59  ;;  %v3863_v31 = vmul.f32 0.5, %v3745_v59 }
 0x48e   : > { %v3924_v37 = vmul.f32 %v3892_v28, %v3734_v33  ;;  %v3893_v49 = vmul.f32 %v3737_v5, %v3737_v5  ;;  %v3583_v23 = vld [vmem:[#allocation2 + $0xf0] sm:$0xff] }
 0x48f   : > { %v3958_v4 = vmul.f32 0.044715, %v3926_v30  ;;  %v3927_v40 = vmul.f32 %v3895_v62, %v3745_v59  ;;  %9997 = vmatmul.mubr.msk.bf16.gmra.mrb[28].mxu1 %vm3646_vm10, %v3583_v23  ;;  %v3861_v62 = vmul.f32 0.5, %v3737_v5  ;;  %vm5441_vm10 = vcmask 130048  }
 0x490   : > { %v3956_v60 = vmul.f32 0.044715, %v3924_v37  ;;  %v3925_v57 = vmul.f32 %v3893_v49, %v3737_v5 }
 0x491   : > { %v3990_v11 = vadd.f32 %v3958_v4, %v3742_v54  ;;  %v3959_v39 = vmul.f32 0.044715, %v3927_v40  ;;  %v10218_v4 = vld [vmem:[#allocation13 + $0x8] sm:$0xff]  }
 0x492   : > { %v3988_v48 = vadd.f32 %v3956_v60, %v3734_v33  ;;  %v3957_v47 = vmul.f32 0.044715, %v3925_v57  ;;  %5493 = vmatpush1.bf16.msra.mxu0 %v10218_v4  ;;  %10010 = vmatpush1.bf16.msra.mxu1 %v10218_v4  ;;  %v10222_v4 = vld [vmem:[#allocation13 + $0x28] sm:$0xff]  }
 0x493   : > { %v4022_v52 = vmul.f32 0.7978846, %v3990_v11  ;;  %v3991_v58 = vadd.f32 %v3959_v39, %v3745_v59  ;;  %5494 = vmatprep.subr.bf16.mxu0 %v10946_v21  ;;  %10002 = vmatprep.subr.bf16.mxu1 %v10946_v21 }
 0x494   : > { %v4020_v45 = vmul.f32 0.7978846, %v3988_v48  ;;  %v3989_v34 = vadd.f32 %v3957_v47, %v3737_v5 }
 0x495   : > { %10316 = vtanh.f32 %v4022_v52  ;;  %v4023_v26 = vmul.f32 0.7978846, %v3991_v58 }
 0x496   : > { %10318 = vtanh.f32 %v4020_v45  ;;  %v4021_v35 = vmul.f32 0.7978846, %v3989_v34  ;;  %v10219_v34 = vld [vmem:[#allocation13 + $0x10] sm:$0xff]  }
 0x497   : > { %10320 = vtanh.f32 %v4023_v26  ;;  %5495 = vmatpush1.bf16.msra.mxu0 %v10219_v34  ;;  %10011 = vmatpush1.bf16.msra.mxu1 %v10219_v34  ;;  %v10225_v34 = vld [vmem:[#allocation13 + $0x40] sm:$0xff]  }
 0x498   : > { %10322 = vtanh.f32 %v4021_v35  ;;  %v4299_v35 = vpop.permute.xlu0 %4298  ;;  %5496 = vmatprep.subr.bf16.mxu0 %v10946_v21  ;;  %10003 = vmatprep.subr.bf16.mxu1 %v10946_v21 }
 0x499   : > { %v9974_v32 = vpop.f32.mrb[4].mxu1  ;;  %4347 = vst.msk [vmem:[#allocation2] sm:$0xff] %vm4346_vm11, %v4299_v35 }
 0x49a   : > { %v13377_v0 = vadd.f32 %v9974_v32, %v13367_v6  ;;  %v3749_v27 = vpop.f32.mrb[5].mxu1 }
 0x49b   : > { %v13382_v8 = vadd.f32 %v13367_v6, %v3749_v27  ;;  %v9975_v7 = vpop.f32.mrb[6].mxu1  ;;  %5497 = vmatpush1.bf16.msra.mxu0 %v10220_v63  ;;  %10012 = vmatpush1.bf16.msra.mxu1 %v10220_v63 }
 0x49c   : > { %v3898_v42 = vmul.f32 %v13377_v0, %v13377_v0  ;;  %v13387_v24 = vadd.f32 %v9975_v7, %v13367_v6  ;;  %v3752_v61 = vpop.f32.mrb[7].mxu1  ;;  %5498 = vmatprep.subr.bf16.mxu0 %v10946_v21  ;;  %10004 = vmatprep.subr.bf16.mxu1 %v10946_v21 }
 0x49d   : > { %v3896_v38 = vmul.f32 %v13382_v8, %v13382_v8  ;;  %v13394_v51 = vadd.f32 %v13367_v6, %v3752_v61 }
 0x49e   : > { %v3930_v44 = vmul.f32 %v3898_v42, %v13377_v0  ;;  %v3899_v22 = vmul.f32 %v13387_v24, %v13387_v24 }
 0x49f   : > { %v10317_v50 = vpop.eup %10316  ;;  %v3928_v53 = vmul.f32 %v3896_v38, %v13382_v8  ;;  %v3897_v56 = vmul.f32 %v13394_v51, %v13394_v51 }
 0x4a0   : > { %v10319_v20 = vpop.eup %10318  ;;  %v4086_v55 = vadd.f32 1.0, %v10317_v50  ;;  %v3962_v43 = vmul.f32 0.044715, %v3930_v44  ;;  %v3931_v28 = vmul.f32 %v3899_v22, %v13387_v24  ;;  %v4428_v44 = vpop.permute.xlu1 %4427 }
 0x4a1   : > { %v10321_v29 = vpop.eup %10320  ;;  %v4084_v30 = vadd.f32 1.0, %v10319_v20  ;;  %v3960_v37 = vmul.f32 0.044715, %v3928_v53  ;;  %v3929_v49 = vmul.f32 %v3897_v56, %v13394_v51  ;;  %4476 = vst.msk [vmem:[#allocation2] sm:$0xff] %vm4475_vm3, %v4428_v44 }
 0x4a2   : > { %v10323_v54 = vpop.eup %10322  ;;  %v4118_v33 = vmul.f32 %v4086_v55, %v3862_v19  ;;  %v4087_v40 = vadd.f32 1.0, %v10321_v29  ;;  %v3994_v60 = vadd.f32 %v3962_v43, %v13377_v0  ;;  %v3963_v57 = vmul.f32 0.044715, %v3931_v28  ;;  %v10221_v55 = vld [vmem:[#allocation13 + $0x20] sm:$0xff]  }
 0x4a3   : > { %v4116_v11 = vmul.f32 %v4084_v30, %v3860_v46  ;;  %v4085_v39 = vadd.f32 1.0, %v10323_v54  ;;  %v3992_v59 = vadd.f32 %v3960_v37, %v13382_v8  ;;  %v3961_v23 = vmul.f32 0.044715, %v3929_v49  ;;  %5499 = vmatpush1.bf16.msra.mxu0 %v10221_v55  ;;  %10013 = vmatpush1.bf16.msra.mxu1 %v10221_v55 }
 0x4a4   : > { %4204 = vst.msk [vmem:[#allocation3 + $0x31] sm:$0xff] %vm2374_vm12, %v4118_v33  ;;  %v4119_v5 = vmul.f32 %v4087_v40, %v3863_v31  ;;  %v4026_v48 = vmul.f32 0.7978846, %v3994_v60  ;;  %v3995_v47 = vadd.f32 %v3963_v57, %v13387_v24  ;;  %v3866_v37 = vmul.f32 0.5, %v13377_v0  ;;  %5500 = vmatprep.subr.bf16.mxu0 %v10946_v21  ;;  %10005 = vmatprep.subr.bf16.mxu1 %v10946_v21 }
 0x4a5   : > { %4202 = vst.msk [vmem:[#allocation3 + $0x19] sm:$0xff] %vm2374_vm12, %v4116_v11  ;;  %v4117_v52 = vmul.f32 %v4085_v39, %v3861_v62  ;;  %v4024_v58 = vmul.f32 0.7978846, %v3992_v59  ;;  %v3993_v45 = vadd.f32 %v3961_v23, %v13394_v51  ;;  %v3864_v40 = vmul.f32 0.5, %v13382_v8  ;;  %v4557_v23 = vpop.permute.xlu1 %4556 }
 0x4a6   : > { %4205 = vst.msk [vmem:[#allocation3 + $0x39] sm:$0xff] %vm2374_vm12, %v4119_v5  ;;  %10324 = vtanh.f32 %v4026_v48  ;;  %v4027_v26 = vmul.f32 0.7978846, %v3995_v47  ;;  %v3867_v39 = vmul.f32 0.5, %v13387_v24  ;;  %v3865_v5 = vmul.f32 0.5, %v13394_v51  ;;  %v10223_v24 = vld [vmem:[#allocation13 + $0x30] sm:$0xff]  }
 0x4a7   : > { %4203 = vst.msk [vmem:[#allocation3 + $0x21] sm:$0xff] %vm2374_vm12, %v4117_v52  ;;  %10326 = vtanh.f32 %v4024_v58  ;;  %v4025_v32 = vmul.f32 0.7978846, %v3993_v45  ;;  %5501 = vmatpush1.bf16.msra.mxu0 %v10222_v4  ;;  %10014 = vmatpush1.bf16.msra.mxu1 %v10222_v4  ;;  %v10224_v51 = vld [vmem:[#allocation13 + $0x38] sm:$0xff]  }
 0x4a8   : > { %10328 = vtanh.f32 %v4027_v26  ;;  %4605 = vst.msk [vmem:[#allocation2] sm:$0xff] %vm4604_vm5, %v4557_v23  ;;  %5502 = vmatprep.subr.bf16.mxu0 %v10946_v21  ;;  %10006 = vmatprep.subr.bf16.mxu1 %v10946_v21 }
 0x4a9   : > { %10330 = vtanh.f32 %v4025_v32 }
 0x4ab   : > { %v4943_v27 = vld [vmem:[#allocation3 + $0x30] sm:$0xff]  ;;  %5503 = vmatpush1.bf16.msra.mxu0 %v10223_v24  ;;  %10015 = vmatpush1.bf16.msra.mxu1 %v10223_v24 }
 0x4ac   : > { %v13419_v61 = vld [vmem:[#allocation3 + $0x18] sm:$0xff]  ;;  %5504 = vmatprep.subr.bf16.mxu0 %v10946_v21  ;;  %10007 = vmatprep.subr.bf16.mxu1 %v10946_v21 }
 0x4ad   : > { %v4944_v7 = vld [vmem:[#allocation3 + $0x38] sm:$0xff] }
 0x4ae   : > { %v5073_v42 = vld [vmem:[#allocation3 + $0x39] sm:$0xff]  ;;  %v13423_v22 = vpack.c.bf16 %v4944_v7, %v4943_v27  ;;  %v5072_v50 = vld [vmem:[#allocation3 + $0x31] sm:$0xff]  ;;  %v13427_v53 = vld [vmem:[#allocation3 + $0x21] sm:$0xff] }
 0x4af   : > { %v13421_v38 = vld [vmem:[#allocation3 + $0x19] sm:$0xff]  ;;  %v4495_v20 = vld [vmem:[#allocation3 + $0x22] sm:$0xff]  ;;  %v5104_v0 = vpack.c.bf16 %v5073_v42, %v5072_v50  ;;  %5505 = vmatpush1.bf16.msra.mxu0 %v10224_v51  ;;  %10016 = vmatpush1.bf16.msra.mxu1 %v10224_v51 }
 0x4b0   : > { %v5201_v19 = vld [vmem:[#allocation3 + $0x32] sm:$0xff]  ;;  %v13425_v46 = vld [vmem:[#allocation3 + $0x20] sm:$0xff]  ;;  %v10325_v31 = vpop.eup %10324  ;;  %5007 = vrot.lane.b32.xlu0 %v13423_v22, %s10947_s25  ;;  %4687 = vrot.lane.b32.xlu1 %v13423_v22, %s10948_s14  ;;  %5944 = vst.msk [vmem:[#allocation3 + $0x28] sm:$0x3] %vm576_vm1, %v15980_v25 }
 0x4b1   : > { %v4494_v56 = vld [vmem:[#allocation3 + $0x1a] sm:$0xff]  ;;  %v4881_v29 = vld [vmem:[#allocation3 + $0x32] sm:$0xff]  ;;  %v10327_v62 = vpop.eup %10326  ;;  %v4090_v49 = vadd.f32 1.0, %v10325_v31  ;;  %v4267_v32 = vpack.c.bf16 %v13425_v46, %v13419_v61  ;;  %5506 = vmatprep.subr.bf16.mxu0 %v10946_v21  ;;  %10008 = vmatprep.subr.bf16.mxu1 %v10946_v21 }
 0x4b2   : > { %v5202_v43 = vld [vmem:[#allocation3 + $0x3a] sm:$0xff]  ;;  %v13433_v28 = vpack.c.bf16 %v4495_v20, %v4494_v56  ;;  %5942 = vst.msk [vmem:[#allocation3 + $0x18] sm:$0xff] %vm573_vm0, %v15980_v25  ;;  %5943 = vst.msk [vmem:[#allocation3 + $0x20] sm:$0xff] %vm573_vm0, %v15980_v25  ;;  %v10329_v33 = vpop.eup %10328  ;;  %v4088_v60 = vadd.f32 1.0, %v10327_v62 }
 0x4b3   : > { %v4882_v30 = vld [vmem:[#allocation3 + $0x3a] sm:$0xff]  ;;  %5945 = vst.msk [vmem:[#allocation3 + $0x30] sm:$0xff] %vm573_vm0, %v15980_v25  ;;  %v10331_v57 = vpop.eup %10330  ;;  %v4122_v11 = vmul.f32 %v4090_v49, %v3866_v37  ;;  %v4091_v59 = vadd.f32 1.0, %v10329_v33  ;;  %v5233_v58 = vpack.c.bf16 %v5202_v43, %v5201_v19  ;;  %v4782_v37 = vpack.c.bf16 %v13427_v53, %v13421_v38  ;;  %5507 = vmatpush1.bf16.msra.mxu0 %v10225_v34 }
 0x4b4   : > { %v4912_v54 = vpack.c.bf16 %v4882_v30, %v4881_v29  ;;  %5947 = vst.msk [vmem:[#allocation3 + $0x40] sm:$0x3] %vm576_vm1, %v15980_v25  ;;  %v4120_v8 = vmul.f32 %v4088_v60, %v3864_v40  ;;  %v4089_v48 = vadd.f32 1.0, %v10331_v57  ;;  %5136 = vrot.lane.b32.xlu0 %v5104_v0, %s15941_s24  ;;  %4816 = vrot.lane.b32.xlu1 %v5104_v0, %s10949_s30 }
 0x4b5   : > { %5946 = vst.msk [vmem:[#allocation3 + $0x38] sm:$0xff] %vm573_vm0, %v15980_v25  ;;  %v4123_v47 = vmul.f32 %v4091_v59, %v3867_v39  ;;  %10017 = vmatpush1.bf16.msra.mxu1 %v10225_v34  ;;  %9261 = vmatprep.subr.bf16.mxu0 %v10946_v21 }
 0x4b6   : > { %4927 = vst.msk [vmem:[#allocation2 + $0x8] sm:$0xff] %vm2374_vm12, %v13433_v28  ;;  %4928 = vst.msk [vmem:[#allocation2 + $0x18] sm:$0xff] %vm2374_vm12, %v4912_v54  ;;  %v4121_v52 = vmul.f32 %v4089_v48, %v3865_v5  ;;  %7370 = vmatprep.subr.bf16.mxu1 %v10946_v21 }
 0x4b7   : > { %4208 = vst.msk [vmem:[#allocation3 + $0x61] sm:$0xff] %vm2374_vm12, %v4122_v11  ;;  %4206 = vst.msk [vmem:[#allocation3 + $0x49] sm:$0xff] %vm2374_vm12, %v4120_v8 }
 0x4b8   : > { %4209 = vst.msk [vmem:[#allocation3 + $0x69] sm:$0xff] %vm2374_vm12, %v4123_v47  ;;  %4207 = vst.msk [vmem:[#allocation3 + $0x51] sm:$0xff] %vm2374_vm12, %v4121_v52  ;;  %5265 = vrot.lane.b32.xlu0 %v5233_v58, %s10950_s12  ;;  %4431 = vrot.lane.b32.xlu1 %v5104_v0, %s10943_s16 }
 0x4bb   : > { %v9978_v45 = vpop.f32.mrb[8].mxu1 }
 0x4bc   : > { %4302 = vrot.lane.b32.xlu0 %v13423_v22, %s10944_s22  ;;  %4560 = vrot.lane.b32.xlu1 %v5233_v58, %s10945_s13  ;;  %v13474_v26 = vadd.f32 %v9978_v45, %v13367_v6  ;;  %v3765_v35 = vpop.f32.mrb[9].mxu1 }
 0x4bd   : > { %v13485_v22 = vadd.f32 %v13367_v6, %v3765_v35  ;;  %v9979_v50 = vpop.f32.mrb[10].mxu1 }
 0x4be   : > { %v4947_v63 = vld [vmem:[#allocation3 + $0x60] sm:$0xff]  ;;  %v13478_v42 = vld [vmem:[#allocation3 + $0x48] sm:$0xff]  ;;  %v3902_v61 = vmul.f32 %v13474_v26, %v13474_v26  ;;  %v13494_v46 = vadd.f32 %v9979_v50, %v13367_v6  ;;  %v3768_v55 = vpop.f32.mrb[11].mxu1  ;;  %v3870_v50 = vmul.f32 0.5, %v13474_v26 }
 0x4bf   : > { %v4948_v27 = vld [vmem:[#allocation3 + $0x68] sm:$0xff]  ;;  %v13487_v56 = vld [vmem:[#allocation3 + $0x50] sm:$0xff]  ;;  %v3900_v30 = vmul.f32 %v13485_v22, %v13485_v22  ;;  %v13501_v62 = vadd.f32 %v13367_v6, %v3768_v55 }
 0x4c0   : > { %v5076_v7 = vld [vmem:[#allocation3 + $0x61] sm:$0xff]  ;;  %v13480_v44 = vld [vmem:[#allocation3 + $0x49] sm:$0xff]  ;;  %v13489_v20 = vld [vmem:[#allocation3 + $0x51] sm:$0xff]  ;;  %4300 = vrot.lane.b32.xlu0 %v4267_v32, %s10944_s22  ;;  %4685 = vrot.lane.b32.xlu1 %v4267_v32, %s10948_s14  ;;  %v3934_v33 = vmul.f32 %v3902_v61, %v13474_v26  ;;  %v3903_v38 = vmul.f32 %v13494_v46, %v13494_v46  ;;  %v4977_v53 = vpack.c.bf16 %v4948_v27, %v4947_v63 }
 0x4c1   : > { %v5205_v19 = vld [vmem:[#allocation3 + $0x62] sm:$0xff]  ;;  %v5203_v31 = vld [vmem:[#allocation3 + $0x4a] sm:$0xff]  ;;  %v5204_v43 = vld [vmem:[#allocation3 + $0x52] sm:$0xff]  ;;  %v3932_v40 = vmul.f32 %v3900_v30, %v13485_v22  ;;  %v3901_v60 = vmul.f32 %v13501_v62, %v13501_v62  ;;  %v4976_v63 = vpack.c.bf16 %v13487_v56, %v13478_v42  ;;  %v3871_v42 = vmul.f32 0.5, %v13494_v46 }
 0x4c2   : > { %v4885_v29 = vld [vmem:[#allocation3 + $0x62] sm:$0xff]  ;;  %v5206_v4 = vld [vmem:[#allocation3 + $0x6a] sm:$0xff]  ;;  %5950 = vst.msk [vmem:[#allocation3 + $0x58] sm:$0x3] %vm576_vm1, %v15980_v25  ;;  %v13525_v0 = vpack.c.bf16 %v5204_v43, %v5203_v31  ;;  %v3966_v57 = vmul.f32 0.044715, %v3934_v33  ;;  %v3935_v11 = vmul.f32 %v3903_v38, %v13494_v46  ;;  %v5105_v31 = vpack.c.bf16 %v13489_v20, %v13480_v44 }
 0x4c3   : > { %v5077_v49 = vld [vmem:[#allocation3 + $0x69] sm:$0xff]  ;;  %5948 = vst.msk [vmem:[#allocation3 + $0x48] sm:$0xff] %vm573_vm0, %v15980_v25  ;;  %5949 = vst.msk [vmem:[#allocation3 + $0x50] sm:$0xff] %vm573_vm0, %v15980_v25  ;;  %v3964_v59 = vmul.f32 0.044715, %v3932_v40  ;;  %v3933_v23 = vmul.f32 %v3901_v60, %v13501_v62  ;;  %v5235_v35 = vpack.c.bf16 %v5206_v4, %v5205_v19 }
 0x4c4   : > { %v4886_v54 = vld [vmem:[#allocation3 + $0x6a] sm:$0xff]  ;;  %5951 = vst.msk [vmem:[#allocation3 + $0x60] sm:$0xff] %vm573_vm0, %v15980_v25  ;;  %5011 = vrot.lane.b32.xlu0 %v4977_v53, %s10947_s25  ;;  %4814 = vrot.lane.b32.xlu1 %v4782_v37, %s10949_s30  ;;  %v3998_v8 = vadd.f32 %v3966_v57, %v13474_v26  ;;  %v3967_v5 = vmul.f32 0.044715, %v3935_v11  ;;  %v5106_v48 = vpack.c.bf16 %v5077_v49, %v5076_v7 }
 0x4c5   : > { %5953 = vst.msk [vmem:[#allocation3 + $0x70] sm:$0x3] %vm576_vm1, %v15980_v25  ;;  %v4914_v39 = vpack.c.bf16 %v4886_v54, %v4885_v29  ;;  %v3996_v47 = vadd.f32 %v3964_v59, %v13485_v22  ;;  %v3965_v24 = vmul.f32 0.044715, %v3933_v23 }
 0x4c6   : > { %5952 = vst.msk [vmem:[#allocation3 + $0x68] sm:$0xff] %vm573_vm0, %v15980_v25  ;;  %v4030_v52 = vmul.f32 0.7978846, %v3998_v8  ;;  %v3999_v58 = vadd.f32 %v3967_v5, %v13494_v46 }
 0x4c7   : > { %4929 = vst.msk [vmem:[#allocation2 + $0x28] sm:$0xff] %vm2374_vm12, %v13525_v0  ;;  %4930 = vst.msk [vmem:[#allocation2 + $0x38] sm:$0xff] %vm2374_vm12, %v4914_v39  ;;  %v4028_v51 = vmul.f32 0.7978846, %v3996_v47  ;;  %v3997_v45 = vadd.f32 %v3965_v24, %v13501_v62 }
 0x4c8   : > { %5140 = vrot.lane.b32.xlu0 %v5106_v48, %s15941_s24  ;;  %4429 = vrot.lane.b32.xlu1 %v4782_v37, %s10943_s16  ;;  %10332 = vtanh.f32 %v4030_v52  ;;  %v4031_v34 = vmul.f32 0.7978846, %v3999_v58  ;;  %v3869_v37 = vmul.f32 0.5, %v13501_v62 }
 0x4c9   : > { %10334 = vtanh.f32 %v4028_v51  ;;  %v4029_v32 = vmul.f32 0.7978846, %v3997_v45 }
 0x4ca   : > { %10336 = vtanh.f32 %v4031_v34 }
 0x4cb   : > { %10338 = vtanh.f32 %v4029_v32 }
 0x4cc   : > { %5269 = vrot.lane.b32.xlu0 %v5235_v35, %s10950_s12  ;;  %4558 = vrot.lane.b32.xlu1 %v13433_v28, %s10945_s13  ;;  %v3868_v28 = vmul.f32 0.5, %v13485_v22 }
 0x4d0   : > { %4306 = vrot.lane.b32.xlu0 %v4977_v53, %s10944_s22  ;;  %4691 = vrot.lane.b32.xlu1 %v4977_v53, %s10948_s14 }
 0x4d2   : > { %v10333_v27 = vpop.eup %10332 }
 0x4d3   : > { %v10335_v7 = vpop.eup %10334  ;;  %v4094_v19 = vadd.f32 1.0, %v10333_v27 }
 0x4d4   : > { %5009 = vrot.lane.b32.xlu0 %v4976_v63, %s10947_s25  ;;  %4820 = vrot.lane.b32.xlu1 %v5106_v48, %s10949_s30  ;;  %v10337_v61 = vpop.eup %10336  ;;  %v4092_v55 = vadd.f32 1.0, %v10335_v7 }
 0x4d5   : > { %v10339_v43 = vpop.eup %10338  ;;  %v4126_v29 = vmul.f32 %v4094_v19, %v3870_v50  ;;  %v4095_v56 = vadd.f32 1.0, %v10337_v61 }
 0x4d6   : > { %v4124_v30 = vmul.f32 %v4092_v55, %v3868_v28  ;;  %v4093_v49 = vadd.f32 1.0, %v10339_v43 }
 0x4d7   : > { %4212 = vst.msk [vmem:[#allocation3 + $0x91] sm:$0xff] %vm2374_vm12, %v4126_v29  ;;  %v4127_v26 = vmul.f32 %v4095_v56, %v3871_v42 }
 0x4d8   : > { %5138 = vrot.lane.b32.xlu0 %v5105_v31, %s15941_s24  ;;  %4435 = vrot.lane.b32.xlu1 %v5106_v48, %s10943_s16  ;;  %4210 = vst.msk [vmem:[#allocation3 + $0x79] sm:$0xff] %vm2374_vm12, %v4124_v30  ;;  %v4125_v22 = vmul.f32 %v4093_v49, %v3869_v37 }
 0x4d9   : > { %4213 = vst.msk [vmem:[#allocation3 + $0x99] sm:$0xff] %vm2374_vm12, %v4127_v26 }
 0x4da   : > { %4211 = vst.msk [vmem:[#allocation3 + $0x81] sm:$0xff] %vm2374_vm12, %v4125_v22 }
 0x4dc   : > { %5267 = vrot.lane.b32.xlu0 %v13525_v0, %s10950_s12  ;;  %4564 = vrot.lane.b32.xlu1 %v5235_v35, %s10945_s13 }
 0x4de   : > { %v4951_v20 = vld [vmem:[#allocation3 + $0x90] sm:$0xff] }
 0x4df   : > { %v9982_v44 = vpop.f32.mrb[12].mxu1  ;;  %v5080_v54 = vld [vmem:[#allocation3 + $0x91] sm:$0xff]  ;;  %v5078_v53 = vld [vmem:[#allocation3 + $0x79] sm:$0xff] }
 0x4e0   : > { %4304 = vrot.lane.b32.xlu0 %v4976_v63, %s10944_s22  ;;  %4689 = vrot.lane.b32.xlu1 %v4976_v63, %s10948_s14  ;;  %v13567_v46 = vadd.f32 %v9982_v44, %v13367_v6  ;;  %v3781_v62 = vpop.f32.mrb[13].mxu1  ;;  %v4952_v4 = vld [vmem:[#allocation3 + $0x98] sm:$0xff] }
 0x4e1   : > { %v5081_v33 = vld [vmem:[#allocation3 + $0x99] sm:$0xff]  ;;  %v13570_v40 = vadd.f32 %v13367_v6, %v3781_v62  ;;  %v9983_v60 = vpop.f32.mrb[14].mxu1  ;;  %v4979_v57 = vpack.c.bf16 %v4952_v4, %v4951_v20  ;;  %v5079_v59 = vld [vmem:[#allocation3 + $0x81] sm:$0xff] }
 0x4e2   : > { %v4949_v38 = vld [vmem:[#allocation3 + $0x78] sm:$0xff]  ;;  %v4950_v39 = vld [vmem:[#allocation3 + $0x80] sm:$0xff]  ;;  %v3906_v23 = vmul.f32 %v13567_v46, %v13567_v46  ;;  %v13575_v8 = vadd.f32 %v9983_v60, %v13367_v6  ;;  %v3784_v5 = vpop.f32.mrb[15].mxu1  ;;  %v5108_v27 = vpack.c.bf16 %v5081_v33, %v5080_v54  ;;  %v3874_v54 = vmul.f32 0.5, %v13567_v46 }
 0x4e3   : > { %v5209_v11 = vld [vmem:[#allocation3 + $0x92] sm:$0xff]  ;;  %v5207_v48 = vld [vmem:[#allocation3 + $0x7a] sm:$0xff]  ;;  %v5208_v47 = vld [vmem:[#allocation3 + $0x82] sm:$0xff]  ;;  %v3904_v52 = vmul.f32 %v13570_v40, %v13570_v40  ;;  %v13581_v58 = vadd.f32 %v13367_v6, %v3784_v5  ;;  %v4978_v20 = vpack.c.bf16 %v4950_v39, %v4949_v38  ;;  %v3872_v38 = vmul.f32 0.5, %v13570_v40 }
 0x4e4   : > { %4818 = vrot.lane.b32.xlu1 %v5105_v31, %s10949_s30  ;;  %v4889_v24 = vld [vmem:[#allocation3 + $0x92] sm:$0xff]  ;;  %5015 = vrot.lane.b32.xlu0 %v4979_v57, %s10947_s25  ;;  %v5210_v51 = vld [vmem:[#allocation3 + $0x9a] sm:$0xff]  ;;  %5956 = vst.msk [vmem:[#allocation3 + $0x88] sm:$0x3] %vm576_vm1, %v15980_v25  ;;  %v3938_v34 = vmul.f32 %v3906_v23, %v13567_v46  ;;  %v3907_v35 = vmul.f32 %v13575_v8, %v13575_v8  ;;  %v3875_v5 = vmul.f32 0.5, %v13575_v8 }
 0x4e5   : > { %5954 = vst.msk [vmem:[#allocation3 + $0x78] sm:$0xff] %vm573_vm0, %v15980_v25  ;;  %5955 = vst.msk [vmem:[#allocation3 + $0x80] sm:$0xff] %vm573_vm0, %v15980_v25  ;;  %v4890_v45 = vld [vmem:[#allocation3 + $0x9a] sm:$0xff]  ;;  %v3936_v32 = vmul.f32 %v3904_v52, %v13570_v40  ;;  %v3905_v63 = vmul.f32 %v13581_v58, %v13581_v58  ;;  %v13602_v7 = vpack.c.bf16 %v5208_v47, %v5207_v48  ;;  %v3873_v52 = vmul.f32 0.5, %v13581_v58 }
 0x4e6   : > { %5957 = vst.msk [vmem:[#allocation3 + $0x90] sm:$0xff] %vm573_vm0, %v15980_v25  ;;  %5958 = vst.msk [vmem:[#allocation3 + $0x98] sm:$0xff] %vm573_vm0, %v15980_v25  ;;  %v3970_v50 = vmul.f32 0.044715, %v3938_v34  ;;  %v3939_v19 = vmul.f32 %v3907_v35, %v13575_v8  ;;  %v4916_v61 = vpack.c.bf16 %v4890_v45, %v4889_v24  ;;  %v5237_v30 = vpack.c.bf16 %v5210_v51, %v5209_v11 }
 0x4e7   : > { %5959 = vst.msk [vmem:[#allocation3 + $0xa0] sm:$0x3] %vm576_vm1, %v15980_v25  ;;  %v3968_v28 = vmul.f32 0.044715, %v3936_v32  ;;  %v3937_v55 = vmul.f32 %v3905_v63, %v13581_v58 }
 0x4e8   : > { %4433 = vrot.lane.b32.xlu1 %v5105_v31, %s10943_s16  ;;  %5144 = vrot.lane.b32.xlu0 %v5108_v27, %s15941_s24  ;;  %4931 = vst.msk [vmem:[#allocation2 + $0x48] sm:$0xff] %vm2374_vm12, %v13602_v7  ;;  %v4002_v43 = vadd.f32 %v3970_v50, %v13567_v46  ;;  %v3971_v29 = vmul.f32 0.044715, %v3939_v19  ;;  %4932 = vst.msk [vmem:[#allocation2 + $0x58] sm:$0xff] %vm2374_vm12, %v4916_v61 }
 0x4e9   : > { %v4000_v42 = vadd.f32 %v3968_v28, %v13570_v40  ;;  %v3969_v56 = vmul.f32 0.044715, %v3937_v55 }
 0x4ea   : > { %v4034_v37 = vmul.f32 0.7978846, %v4002_v43  ;;  %v4003_v31 = vadd.f32 %v3971_v29, %v13575_v8 }
 0x4eb   : > { %v4032_v49 = vmul.f32 0.7978846, %v4000_v42  ;;  %v4001_v26 = vadd.f32 %v3969_v56, %v13581_v58 }
 0x4ec   : > { %4562 = vrot.lane.b32.xlu1 %v13525_v0, %s10945_s13  ;;  %5273 = vrot.lane.b32.xlu0 %v5237_v30, %s10950_s12  ;;  %10340 = vtanh.f32 %v4034_v37  ;;  %v4035_v22 = vmul.f32 0.7978846, %v4003_v31  ;;  %v13622_v0 = vpack.c.bf16 %v5079_v59, %v5078_v53 }
 0x4ed   : > { %10342 = vtanh.f32 %v4032_v49  ;;  %v4033_v44 = vmul.f32 0.7978846, %v4001_v26 }
 0x4ee   : > { %10344 = vtanh.f32 %v4035_v22 }
 0x4ef   : > { %10346 = vtanh.f32 %v4033_v44 }
 0x4f0   : > { %4695 = vrot.lane.b32.xlu1 %v4979_v57, %s10948_s14  ;;  %4310 = vrot.lane.b32.xlu0 %v4979_v57, %s10944_s22 }
 0x4f4   : > { %4824 = vrot.lane.b32.xlu1 %v5108_v27, %s10949_s30  ;;  %5013 = vrot.lane.b32.xlu0 %v4978_v20, %s10947_s25 }
 0x4f6   : > { %v10341_v62 = vpop.eup %10340 }
 0x4f7   : > { %v10343_v4 = vpop.eup %10342  ;;  %v4098_v33 = vadd.f32 1.0, %v10341_v62  ;;  %v9986_v60 = vpop.f32.mrb[16].mxu1 }
 0x4f8   : > { %4439 = vrot.lane.b32.xlu1 %v5108_v27, %s10943_s16  ;;  %5142 = vrot.lane.b32.xlu0 %v13622_v0, %s15941_s24  ;;  %v10345_v11 = vpop.eup %10344  ;;  %v4096_v57 = vadd.f32 1.0, %v10343_v4  ;;  %v13630_v39 = vadd.f32 %v9986_v60, %v13367_v6  ;;  %v3797_v53 = vpop.f32.mrb[17].mxu1 }
 0x4f9   : > { %v10347_v59 = vpop.eup %10346  ;;  %v4130_v23 = vmul.f32 %v4098_v33, %v3874_v54  ;;  %v4099_v48 = vadd.f32 1.0, %v10345_v11  ;;  %v13634_v46 = vadd.f32 %v13367_v6, %v3797_v53  ;;  %v9987_v47 = vpop.f32.mrb[18].mxu1 }
 0x4fa   : > { %v4128_v24 = vmul.f32 %v4096_v57, %v3872_v38  ;;  %v4097_v51 = vadd.f32 1.0, %v10347_v59  ;;  %v3910_v40 = vmul.f32 %v13630_v39, %v13630_v39  ;;  %v3800_v45 = vpop.f32.mrb[19].mxu1  ;;  %v13644_v35 = vadd.f32 %v9987_v47, %v13367_v6 }
 0x4fb   : > { %4216 = vst.msk [vmem:[#allocation3 + $0xc1] sm:$0xff] %vm2374_vm12, %v4130_v23  ;;  %v4131_v34 = vmul.f32 %v4099_v48, %v3875_v5  ;;  %v3908_v8 = vmul.f32 %v13634_v46, %v13634_v46  ;;  %v13651_v63 = vadd.f32 %v13367_v6, %v3800_v45 }
 0x4fc   : > { %4568 = vrot.lane.b32.xlu1 %v5237_v30, %s10945_s13  ;;  %5271 = vrot.lane.b32.xlu0 %v13602_v7, %s10950_s12  ;;  %4214 = vst.msk [vmem:[#allocation3 + $0xa9] sm:$0xff] %vm2374_vm12, %v4128_v24  ;;  %v4129_v58 = vmul.f32 %v4097_v51, %v3873_v52  ;;  %v3942_v32 = vmul.f32 %v3910_v40, %v13630_v39 }
 0x4fd   : > { %4217 = vst.msk [vmem:[#allocation3 + $0xc9] sm:$0xff] %vm2374_vm12, %v4131_v34  ;;  %v3940_v27 = vmul.f32 %v3908_v8, %v13634_v46  ;;  %v3911_v50 = vmul.f32 %v13644_v35, %v13644_v35  ;;  %v3909_v61 = vmul.f32 %v13651_v63, %v13651_v63  ;;  %v3878_v34 = vmul.f32 0.5, %v13630_v39 }
 0x4fe   : > { %4215 = vst.msk [vmem:[#allocation3 + $0xb1] sm:$0xff] %vm2374_vm12, %v4129_v58  ;;  %v3974_v19 = vmul.f32 0.044715, %v3942_v32  ;;  %v3876_v58 = vmul.f32 0.5, %v13634_v46 }
 0x4ff   : > { %v3972_v28 = vmul.f32 0.044715, %v3940_v27  ;;  %v3943_v55 = vmul.f32 %v3911_v50, %v13644_v35  ;;  %v3941_v29 = vmul.f32 %v3909_v61, %v13651_v63  ;;  %v3879_v61 = vmul.f32 0.5, %v13644_v35 }
 0x500   : > { %4693 = vrot.lane.b32.xlu1 %v4978_v20, %s10948_s14  ;;  %4308 = vrot.lane.b32.xlu0 %v4978_v20, %s10944_s22  ;;  %v4006_v43 = vadd.f32 %v3974_v19, %v13630_v39 }
 0x501   : > { %v4004_v42 = vadd.f32 %v3972_v28, %v13634_v46  ;;  %v3975_v56 = vmul.f32 0.044715, %v3943_v55  ;;  %v3973_v37 = vmul.f32 0.044715, %v3941_v29  ;;  %v3877_v55 = vmul.f32 0.5, %v13651_v63 }
 0x502   : > { %v4038_v30 = vmul.f32 0.7978846, %v4006_v43  ;;  %v4955_v26 = vld [vmem:[#allocation3 + $0xc0] sm:$0xff] }
 0x503   : > { %v4036_v31 = vmul.f32 0.7978846, %v4004_v42  ;;  %v4007_v49 = vadd.f32 %v3975_v56, %v13644_v35  ;;  %v4005_v22 = vadd.f32 %v3973_v37, %v13651_v63  ;;  %v5084_v20 = vld [vmem:[#allocation3 + $0xc1] sm:$0xff]  ;;  %v5082_v54 = vld [vmem:[#allocation3 + $0xa9] sm:$0xff] }
 0x504   : > { %4822 = vrot.lane.b32.xlu1 %v13622_v0, %s10949_s30  ;;  %10348 = vtanh.f32 %v4038_v30  ;;  %v4956_v44 = vld [vmem:[#allocation3 + $0xc8] sm:$0xff] }
 0x505   : > { %v5085_v62 = vld [vmem:[#allocation3 + $0xc9] sm:$0xff]  ;;  %10350 = vtanh.f32 %v4036_v31  ;;  %v4039_v33 = vmul.f32 0.7978846, %v4007_v49  ;;  %v4981_v60 = vpack.c.bf16 %v4956_v44, %v4955_v26  ;;  %v5083_v57 = vld [vmem:[#allocation3 + $0xb1] sm:$0xff]  ;;  %v4037_v53 = vmul.f32 0.7978846, %v4005_v22 }
 0x506   : > { %v4953_v4 = vld [vmem:[#allocation3 + $0xa8] sm:$0xff]  ;;  %v4954_v38 = vld [vmem:[#allocation3 + $0xb0] sm:$0xff]  ;;  %v5110_v52 = vpack.c.bf16 %v5085_v62, %v5084_v20  ;;  %v13707_v35 = vpack.c.bf16 %v5083_v57, %v5082_v54 }
 0x507   : > { %v5213_v11 = vld [vmem:[#allocation3 + $0xc2] sm:$0xff]  ;;  %v5211_v59 = vld [vmem:[#allocation3 + $0xaa] sm:$0xff]  ;;  %v5212_v23 = vld [vmem:[#allocation3 + $0xb2] sm:$0xff]  ;;  %10352 = vtanh.f32 %v4039_v33  ;;  %5019 = vrot.lane.b32.xlu0 %v4981_v60, %s10947_s25  ;;  %v4980_v29 = vpack.c.bf16 %v4954_v38, %v4953_v4 }
 0x508   : > { %4437 = vrot.lane.b32.xlu1 %v13622_v0, %s10943_s16  ;;  %v4893_v5 = vld [vmem:[#allocation3 + $0xc2] sm:$0xff]  ;;  %v5214_v48 = vld [vmem:[#allocation3 + $0xca] sm:$0xff]  ;;  %v13673_v47 = vpack.c.bf16 %v5212_v23, %v5211_v59  ;;  %5962 = vst.msk [vmem:[#allocation3 + $0xb8] sm:$0x3] %vm576_vm1, %v15980_v25  ;;  %10354 = vtanh.f32 %v4037_v53 }
 0x509   : > { %5960 = vst.msk [vmem:[#allocation3 + $0xa8] sm:$0xff] %vm573_vm0, %v15980_v25  ;;  %5961 = vst.msk [vmem:[#allocation3 + $0xb0] sm:$0xff] %vm573_vm0, %v15980_v25  ;;  %v4894_v24 = vld [vmem:[#allocation3 + $0xca] sm:$0xff]  ;;  %v5239_v51 = vpack.c.bf16 %v5214_v48, %v5213_v11 }
 0x50a   : > { %5963 = vst.msk [vmem:[#allocation3 + $0xc0] sm:$0xff] %vm573_vm0, %v15980_v25  ;;  %v4918_v0 = vpack.c.bf16 %v4894_v24, %v4893_v5  ;;  %5964 = vst.msk [vmem:[#allocation3 + $0xc8] sm:$0xff] %vm573_vm0, %v15980_v25  ;;  %v13738_v38 = vld [vmem:[#allocation12] ss:$0 sm:$0xff] }
 0x50b   : > { %5965 = vst.msk [vmem:[#allocation3 + $0xd0] sm:$0x3] %vm576_vm1, %v15980_v25  ;;  %5148 = vrot.lane.b32.xlu0 %v5110_v52, %s15941_s24 }
 0x50c   : > { %4933 = vst.msk [vmem:[#allocation2 + $0x68] sm:$0xff] %vm2374_vm12, %v13673_v47  ;;  %4566 = vrot.lane.b32.xlu1 %v13602_v7, %s10945_s13  ;;  %4934 = vst.msk [vmem:[#allocation2 + $0x78] sm:$0xff] %vm2374_vm12, %v4918_v0 }
 0x50e   : > { %v10349_v40 = vpop.eup %10348 }
 0x50f   : > { %v10351_v45 = vpop.eup %10350  ;;  %v4102_v8 = vadd.f32 1.0, %v10349_v40  ;;  %5277 = vrot.lane.b32.xlu0 %v5239_v51, %s10950_s12 }
 0x510   : > { %4699 = vrot.lane.b32.xlu1 %v4981_v60, %s10948_s14  ;;  %v4100_v32 = vadd.f32 1.0, %v10351_v45 }
 0x511   : > { %v10353_v27 = vpop.eup %10352  ;;  %v4134_v50 = vmul.f32 %v4102_v8, %v3878_v34 }
 0x512   : > { %v10355_v7 = vpop.eup %10354  ;;  %v4132_v19 = vmul.f32 %v4100_v32, %v3876_v58  ;;  %v4103_v28 = vadd.f32 1.0, %v10353_v27 }
 0x513   : > { %4220 = vst.msk [vmem:[#allocation3 + $0xf1] sm:$0xff] %vm2374_vm12, %v4134_v50  ;;  %v4101_v39 = vadd.f32 1.0, %v10355_v7  ;;  %4314 = vrot.lane.b32.xlu0 %v4981_v60, %s10944_s22 }
 0x514   : > { %4828 = vrot.lane.b32.xlu1 %v5110_v52, %s10949_s30  ;;  %4218 = vst.msk [vmem:[#allocation3 + $0xd9] sm:$0xff] %vm2374_vm12, %v4132_v19  ;;  %v4135_v46 = vmul.f32 %v4103_v28, %v3879_v61 }
 0x515   : > { %v4133_v43 = vmul.f32 %v4101_v39, %v3877_v55 }
 0x516   : > { %4221 = vst.msk [vmem:[#allocation3 + $0xf9] sm:$0xff] %vm2374_vm12, %v4135_v46 }
 0x517   : > { %4219 = vst.msk [vmem:[#allocation3 + $0xe1] sm:$0xff] %vm2374_vm12, %v4133_v43  ;;  %5017 = vrot.lane.b32.xlu0 %v4980_v29, %s10947_s25 }
 0x518   : > { %4443 = vrot.lane.b32.xlu1 %v5110_v52, %s10943_s16 }
 0x51a   : > { %v9990_v63 = vpop.f32.mrb[20].mxu1  ;;  %v4959_v31 = vld [vmem:[#allocation3 + $0xf0] sm:$0xff] }
 0x51b   : > { %5146 = vrot.lane.b32.xlu0 %v13707_v35, %s15941_s24  ;;  %v13713_v42 = vadd.f32 %v9990_v63, %v13367_v6  ;;  %v3813_v56 = vpop.f32.mrb[21].mxu1  ;;  %v13718_v49 = vld [vmem:[#allocation3 + $0xf1] sm:$0xff]  ;;  %v13722_v22 = vld [vmem:[#allocation3 + $0xd9] sm:$0xff] }
 0x51c   : > { %4572 = vrot.lane.b32.xlu1 %v5239_v51, %s10945_s13  ;;  %v13716_v30 = vadd.f32 %v13367_v6, %v3813_v56  ;;  %v9991_v37 = vpop.f32.mrb[22].mxu1  ;;  %v13720_v26 = vld [vmem:[#allocation3 + $0xd8] sm:$0xff] }
 0x51d   : > { %v3914_v44 = vmul.f32 %v13713_v42, %v13713_v42  ;;  %v13727_v20 = vadd.f32 %v9991_v37, %v13367_v6  ;;  %v3816_v62 = vpop.f32.mrb[23].mxu1  ;;  %v4960_v4 = vld [vmem:[#allocation3 + $0xf8] sm:$0xff] }
 0x51e   : > { %v13730_v54 = vld [vmem:[#allocation3 + $0xf2] sm:$0xff]  ;;  %v13732_v33 = vld [vmem:[#allocation3 + $0xe0] sm:$0xff]  ;;  %v3912_v11 = vmul.f32 %v13716_v30, %v13716_v30  ;;  %v13741_v57 = vadd.f32 %v13738_v38, %v3816_v62  ;;  %v4983_v46 = vpack.c.bf16 %v4960_v4, %v4959_v31 }
 0x51f   : > { %v13734_v60 = vld [vmem:[#allocation3 + $0xe1] sm:$0xff]  ;;  %5275 = vrot.lane.b32.xlu0 %v13673_v47, %s10950_s12  ;;  %v4897_v59 = vld [vmem:[#allocation3 + $0xf2] sm:$0xff]  ;;  %v3946_v23 = vmul.f32 %v3914_v44, %v13713_v42  ;;  %v3915_v5 = vmul.f32 %v13727_v20, %v13727_v20 }
 0x520   : > { %4697 = vrot.lane.b32.xlu1 %v4980_v29, %s10948_s14  ;;  %v5215_v6 = vld [vmem:[#allocation3 + $0xda] sm:$0xff]  ;;  %v5216_v53 = vld [vmem:[#allocation3 + $0xe2] sm:$0xff]  ;;  %5969 = vst.msk [vmem:[#allocation3 + $0xf0] sm:$0xff] %vm573_vm0, %v15980_v25  ;;  %v3944_v40 = vmul.f32 %v3912_v11, %v13716_v30  ;;  %v3913_v45 = vmul.f32 %v13741_v57, %v13741_v57 }
 0x521   : > { %v5089_v0 = vld [vmem:[#allocation3 + $0xf9] sm:$0xff]  ;;  %5968 = vst.msk [vmem:[#allocation3 + $0xe8] sm:$0x3] %vm576_vm1, %v15980_v25  ;;  %v3978_v34 = vmul.f32 0.044715, %v3946_v23  ;;  %v3947_v8 = vmul.f32 %v3915_v5, %v13727_v20  ;;  %v13769_v58 = vpack.c.bf16 %v5216_v53, %v5215_v6  ;;  %v3882_v23 = vmul.f32 0.5, %v13713_v42 }
 0x522   : > { %v5008_v48 = vpop.permute.xlu0 %5007  ;;  %v13748_v24 = vpop.permute.xlu1 %4687  ;;  %v5218_v52 = vld [vmem:[#allocation3 + $0xfa] sm:$0xff]  ;;  %5966 = vst.msk [vmem:[#allocation3 + $0xd8] sm:$0xff] %vm573_vm0, %v15980_v25  ;;  %5967 = vst.msk [vmem:[#allocation3 + $0xe0] sm:$0xff] %vm573_vm0, %v15980_v25  ;;  %v3976_v32 = vmul.f32 0.044715, %v3944_v40  ;;  %v3945_v27 = vmul.f32 %v3913_v45, %v13741_v57  ;;  %v5112_v4 = vpack.c.bf16 %v5089_v0, %v13718_v49  ;;  %v3880_v0 = vmul.f32 0.5, %v13716_v30 }
 0x523   : > { %v4898_v51 = vld [vmem:[#allocation3 + $0xfa] sm:$0xff]  ;;  %5056 = vst.msk [vmem:[#allocation2 + $0x8] sm:$0xff] %vm5055_vm6, %v5008_v48  ;;  %4312 = vrot.lane.b32.xlu0 %v4980_v29, %s10944_s22  ;;  %v4010_v7 = vadd.f32 %v3978_v34, %v13713_v42  ;;  %v3979_v19 = vmul.f32 0.044715, %v3947_v8  ;;  %v5241_v6 = vpack.c.bf16 %v5218_v52, %v13730_v54  ;;  %v3883_v8 = vmul.f32 0.5, %v13727_v20 }
 0x524   : > { %5971 = vst.msk [vmem:[#allocation3 + $0x100] sm:$0x3] %vm576_vm1, %v15980_v25  ;;  %4826 = vrot.lane.b32.xlu1 %v13707_v35, %s10949_s30  ;;  %v4920_v50 = vpack.c.bf16 %v4898_v51, %v4897_v59  ;;  %v4008_v55 = vadd.f32 %v3976_v32, %v13716_v30  ;;  %v3977_v39 = vmul.f32 0.044715, %v3945_v27  ;;  %v4982_v42 = vpack.c.bf16 %v13732_v33, %v13720_v26 }
 0x525   : > { %5970 = vst.msk [vmem:[#allocation3 + $0xf8] sm:$0xff] %vm573_vm0, %v15980_v25  ;;  %v4042_v43 = vmul.f32 0.7978846, %v4010_v7  ;;  %v4011_v29 = vadd.f32 %v3979_v19, %v13727_v20  ;;  %v5111_v26 = vpack.c.bf16 %v13734_v60, %v13722_v22 }
 0x526   : > { %v5137_v61 = vpop.permute.xlu0 %5136  ;;  %v13774_v28 = vpop.permute.xlu1 %4816  ;;  %4935 = vst.msk [vmem:[#allocation2 + $0x88] sm:$0xff] %vm2374_vm12, %v13769_v58  ;;  %4936 = vst.msk [vmem:[#allocation2 + $0x98] sm:$0xff] %vm2374_vm12, %v4920_v50  ;;  %v4040_v63 = vmul.f32 0.7978846, %v4008_v55  ;;  %v4009_v56 = vadd.f32 %v3977_v39, %v13741_v57  ;;  %v3881_v50 = vmul.f32 0.5, %v13741_v57 }
 0x527   : > { %5185 = vst.msk [vmem:[#allocation2 + $0x8] sm:$0xff] %vm5184_vm7, %v5137_v61  ;;  %5023 = vrot.lane.b32.xlu0 %v4983_v46, %s10947_s25  ;;  %10356 = vtanh.f32 %v4042_v43  ;;  %v4043_v37 = vmul.f32 0.7978846, %v4011_v29 }
 0x528   : > { %4441 = vrot.lane.b32.xlu1 %v13707_v35, %s10943_s16  ;;  %10358 = vtanh.f32 %v4040_v63  ;;  %v4041_v31 = vmul.f32 0.7978846, %v4009_v56 }
 0x529   : > { %10360 = vtanh.f32 %v4043_v37 }
 0x52a   : > { %v5266_v44 = vpop.permute.xlu0 %5265  ;;  %v4432_v62 = vpop.permute.xlu1 %4431  ;;  %10362 = vtanh.f32 %v4041_v31 }
 0x52b   : > { %5314 = vst.msk [vmem:[#allocation2 + $0x8] sm:$0xff] %vm5313_vm8, %v5266_v44  ;;  %5152 = vrot.lane.b32.xlu0 %v5112_v4, %s15941_s24 }
 0x52c   : > { %4570 = vrot.lane.b32.xlu1 %v13673_v47, %s10945_s13 }
 0x52e   : > { %v4303_v35 = vpop.permute.xlu0 %4302  ;;  %v4561_v11 = vpop.permute.xlu1 %4560 }
 0x52f   : > { %4349 = vst.msk [vmem:[#allocation2 + $0x20] sm:$0xff] %vm4346_vm11, %v4303_v35  ;;  %5281 = vrot.lane.b32.xlu0 %v5241_v6, %s10950_s12 }
 0x530   : > { %4478 = vst.msk [vmem:[#allocation2 + $0x20] sm:$0xff] %vm4475_vm3, %v4432_v62  ;;  %4703 = vrot.lane.b32.xlu1 %v4983_v46, %s10948_s14 }
 0x531   : > { %4607 = vst.msk [vmem:[#allocation2 + $0x20] sm:$0xff] %vm4604_vm5, %v4561_v11  ;;  %v10357_v54 = vpop.eup %10356 }
 0x532   : > { %v4301_v47 = vpop.permute.xlu0 %4300  ;;  %v4686_v49 = vpop.permute.xlu1 %4685  ;;  %v5331_v53 = vld [vmem:[#allocation2 + $0x8] sm:$0xff]  ;;  %v4106_v5 = vadd.f32 1.0, %v10357_v54 }
 0x533   : > { %4348 = vst.msk [vmem:[#allocation2 + $0x10] sm:$0xff] %vm4346_vm11, %v4301_v47  ;;  %9785 = vmatprep.mubr.msk.bf16.mxu0 %vm5441_vm10, %v5331_v53  ;;  %v10359_v59 = vpop.eup %10358  ;;  %4318 = vrot.lane.b32.xlu0 %v4983_v46, %s10944_s22 }
 0x534   : > { %4734 = vst.msk [vmem:[#allocation2] sm:$0xff] %vm4733_vm9, %v4686_v49  ;;  %4832 = vrot.lane.b32.xlu1 %v5112_v4, %s10949_s30  ;;  %v10361_v48 = vpop.eup %10360  ;;  %v4104_v52 = vadd.f32 1.0, %v10359_v59  ;;  %v4138_v34 = vmul.f32 %v4106_v5, %v3882_v23 }
 0x535   : > { %v10363_v45 = vpop.eup %10362  ;;  %v4107_v32 = vadd.f32 1.0, %v10361_v48  ;;  %v13874_v48 = vld [vmem:[#allocation3 + $0x198] sm:$0xff] }
 0x536   : > { %v5012_v51 = vpop.permute.xlu0 %5011  ;;  %v4815_v40 = vpop.permute.xlu1 %4814  ;;  %v4136_v27 = vmul.f32 %v4104_v52, %v3880_v0  ;;  %v4105_v7 = vadd.f32 1.0, %v10363_v45  ;;  %4224 = vst.msk [vmem:[#allocation3 + $0x121] sm:$0xff] %vm2374_vm12, %v4138_v34  ;;  %v13876_v0 = vld [vmem:[#allocation3 + $0x1a0] sm:$0xff] }
 0x537   : > { %5058 = vst.msk [vmem:[#allocation2 + $0x28] sm:$0xff] %vm5055_vm6, %v5012_v51  ;;  %v4139_v30 = vmul.f32 %v4107_v32, %v3883_v8  ;;  %5021 = vrot.lane.b32.xlu0 %v4982_v42, %s10947_s25 }
 0x538   : > { %4863 = vst.msk [vmem:[#allocation2] sm:$0xff] %vm4862_vm4, %v4815_v40  ;;  %4447 = vrot.lane.b32.xlu1 %v5112_v4, %s10943_s16  ;;  %v4137_v20 = vmul.f32 %v4105_v7, %v3881_v50  ;;  %v4990_v7 = vpack.c.bf16 %v13876_v0, %v13874_v48 }
 0x539   : > { %4222 = vst.msk [vmem:[#allocation3 + $0x109] sm:$0xff] %vm2374_vm12, %v4136_v27  ;;  %4225 = vst.msk [vmem:[#allocation3 + $0x129] sm:$0xff] %vm2374_vm12, %v4139_v30 }
 0x53a   : > { %v5141_v19 = vpop.permute.xlu0 %5140  ;;  %v4430_v61 = vpop.permute.xlu1 %4429  ;;  %4223 = vst.msk [vmem:[#allocation3 + $0x111] sm:$0xff] %vm2374_vm12, %v4137_v20 }
 0x53b   : > { %5187 = vst.msk [vmem:[#allocation2 + $0x28] sm:$0xff] %vm5184_vm7, %v5141_v19  ;;  %5150 = vrot.lane.b32.xlu0 %v5111_v26, %s15941_s24 }
 0x53c   : > { %4477 = vst.msk [vmem:[#allocation2 + $0x10] sm:$0xff] %vm4475_vm3, %v4430_v61  ;;  %4576 = vrot.lane.b32.xlu1 %v5241_v6, %s10945_s13 }
 0x53d   : > { %v4963_v60 = vld [vmem:[#allocation3 + $0x120] sm:$0xff] }
 0x53e   : > { %v5270_v33 = vpop.permute.xlu0 %5269  ;;  %v4559_v57 = vpop.permute.xlu1 %4558  ;;  %v5092_v39 = vld [vmem:[#allocation3 + $0x121] sm:$0xff] }
 0x53f   : > { %v5330_v55 = vld [vmem:[#allocation2] sm:$0xff]  ;;  %5316 = vst.msk [vmem:[#allocation2 + $0x28] sm:$0xff] %vm5313_vm8, %v5270_v33  ;;  %5279 = vrot.lane.b32.xlu0 %v13769_v58, %s10950_s12  ;;  %v9994_v22 = vpop.f32.mrb[24].mxu1 }
 0x540   : > { %4606 = vst.msk [vmem:[#allocation2 + $0x10] sm:$0xff] %vm4604_vm5, %v4559_v57  ;;  %5523 = vmatmul.mubr.bf16.vlgmr.msra.gmra.mrb[32].mxu0 %v5330_v55  ;;  %4701 = vrot.lane.b32.xlu1 %v4982_v42, %s10948_s14  ;;  %v13832_v46 = vadd.f32 %v13738_v38, %v9994_v22  ;;  %v3829_v29 = vpop.f32.mrb[25].mxu1  ;;  %v4964_v63 = vld [vmem:[#allocation3 + $0x128] sm:$0xff] }
 0x541   : > { %4735 = vst.msk [vmem:[#allocation2 + $0x10] sm:$0xff] %vm4733_vm9, %v13748_v24  ;;  %v5221_v56 = vld [vmem:[#allocation3 + $0x122] sm:$0xff]  ;;  %v9995_v62 = vpop.f32.mrb[26].mxu1  ;;  %v5222_v4 = vld [vmem:[#allocation3 + $0x12a] sm:$0xff]  ;;  %v5220_v59 = vld [vmem:[#allocation3 + $0x112] sm:$0xff]  ;;  %v4985_v32 = vpack.c.bf16 %v4964_v63, %v4963_v60 }
 0x542   : > { %4864 = vst.msk [vmem:[#allocation2 + $0x10] sm:$0xff] %vm4862_vm4, %v13774_v28  ;;  %v4307_v43 = vpop.permute.xlu0 %4306  ;;  %v13834_v37 = vld [vmem:[#allocation3 + $0x108] sm:$0xff]  ;;  %v13840_v28 = vadd.f32 %v13738_v38, %v3829_v29  ;;  %v13842_v44 = vpop.permute.xlu1 %4691  ;;  %v13844_v35 = vld [vmem:[#allocation3 + $0x110] sm:$0xff]  ;;  %v3918_v11 = vmul.f32 %v13832_v46, %v13832_v46  ;;  %v13851_v6 = vadd.f32 %v13738_v38, %v9995_v62  ;;  %v13854_v49 = vpack.c.bf16 %v5222_v4, %v5221_v56 }
 0x543   : > { %v13836_v24 = vld [vmem:[#allocation3 + $0x109] sm:$0xff]  ;;  %4351 = vst.msk [vmem:[#allocation2 + $0x40] sm:$0xff] %vm4346_vm11, %v4307_v43  ;;  %v3832_v47 = vpop.f32.mrb[27].mxu1  ;;  %v13856_v53 = vld [vmem:[#allocation3 + $0x111] sm:$0xff]  ;;  %4316 = vrot.lane.b32.xlu0 %v4982_v42, %s10944_s22 }
 0x544   : > { %v5093_v31 = vld [vmem:[#allocation3 + $0x129] sm:$0xff]  ;;  %5975 = vst.msk [vmem:[#allocation3 + $0x120] sm:$0xff] %vm573_vm0, %v15980_v25  ;;  %4830 = vrot.lane.b32.xlu1 %v5111_v26, %s10949_s30  ;;  %v3916_v23 = vmul.f32 %v13840_v28, %v13840_v28  ;;  %v13865_v5 = vadd.f32 %v13738_v38, %v3832_v47  ;;  %v3950_v52 = vmul.f32 %v3918_v11, %v13832_v46  ;;  %v13915_v11 = vld [vmem:[#allocation3 + $0x19a] sm:$0xff] }
 0x545   : > { %v5219_v54 = vld [vmem:[#allocation3 + $0x10a] sm:$0xff]  ;;  %5977 = vst.msk [vmem:[#allocation3 + $0x130] sm:$0x3] %vm576_vm1, %v15980_v25  ;;  %5974 = vst.msk [vmem:[#allocation3 + $0x118] sm:$0x3] %vm576_vm1, %v15980_v25  ;;  %v3919_v51 = vmul.f32 %v13851_v6, %v13851_v6  ;;  %v5114_v22 = vpack.c.bf16 %v5093_v31, %v5092_v39  ;;  %v13909_v31 = vld [vmem:[#allocation3 + $0x199] sm:$0xff] }
 0x546   : > { %5976 = vst.msk [vmem:[#allocation3 + $0x128] sm:$0xff] %vm573_vm0, %v15980_v25  ;;  %5972 = vst.msk [vmem:[#allocation3 + $0x108] sm:$0xff] %vm573_vm0, %v15980_v25  ;;  %v5010_v40 = vpop.permute.xlu0 %5009  ;;  %v3948_v45 = vmul.f32 %v3916_v23, %v13840_v28  ;;  %v3917_v34 = vmul.f32 %v13865_v5, %v13865_v5  ;;  %v13887_v8 = vpop.permute.xlu1 %4820  ;;  %v13889_v42 = vpack.c.bf16 %v5220_v59, %v5219_v54  ;;  %v3982_v27 = vmul.f32 0.044715, %v3950_v52  ;;  %v13917_v47 = vld [vmem:[#allocation3 + $0x1a2] sm:$0xff] }
 0x547   : > { %5973 = vst.msk [vmem:[#allocation3 + $0x110] sm:$0xff] %vm573_vm0, %v15980_v25  ;;  %v3951_v50 = vmul.f32 %v3919_v51, %v13851_v6  ;;  %5027 = vrot.lane.b32.xlu0 %v4985_v32, %s10947_s25  ;;  %5990 = vst.msk [vmem:[#allocation3 + $0x198] sm:$0xff] %vm573_vm0, %v15980_v25  ;;  %v5248_v48 = vpack.c.bf16 %v13917_v47, %v13915_v11 }
 0x548   : > { %4938 = vst.msk [vmem:[#allocation2 + $0xb8] sm:$0xff] %vm2374_vm12, %v13854_v49  ;;  %4445 = vrot.lane.b32.xlu1 %v5111_v26, %s10943_s16  ;;  %v3980_v30 = vmul.f32 0.044715, %v3948_v45  ;;  %v3949_v20 = vmul.f32 %v3917_v34, %v13865_v5  ;;  %4937 = vst.msk [vmem:[#allocation2 + $0xa8] sm:$0xff] %vm2374_vm12, %v13889_v42  ;;  %v4014_v19 = vadd.f32 %v3982_v27, %v13832_v46  ;;  %v5335_v27 = vld [vmem:[#allocation2 + $0x28] sm:$0xff] }
 0x549   : > { %5057 = vst.msk [vmem:[#allocation2 + $0x18] sm:$0xff] %vm5055_vm6, %v5010_v40  ;;  %v3983_v61 = vmul.f32 0.044715, %v3951_v50  ;;  %v5332_v40 = vld [vmem:[#allocation2 + $0x10] sm:$0xff]  ;;  %v4984_v45 = vpack.c.bf16 %v13844_v35, %v13834_v37  ;;  %v3884_v37 = vmul.f32 0.5, %v13840_v28 }
 0x54a   : > { %v5139_v33 = vpop.permute.xlu0 %5138  ;;  %v4012_v57 = vadd.f32 %v3980_v30, %v13840_v28  ;;  %v3981_v55 = vmul.f32 0.044715, %v3949_v20  ;;  %v4436_v26 = vpop.permute.xlu1 %4435  ;;  %v4046_v60 = vmul.f32 0.7978846, %v4014_v19 }
 0x54b   : > { %5186 = vst.msk [vmem:[#allocation2 + $0x18] sm:$0xff] %vm5184_vm7, %v5139_v33  ;;  %v4015_v43 = vadd.f32 %v3983_v61, %v13851_v6  ;;  %5156 = vrot.lane.b32.xlu0 %v5114_v22, %s15941_s24  ;;  %v3887_v33 = vmul.f32 0.5, %v13851_v6 }
 0x54c   : > { %4480 = vst.msk [vmem:[#allocation2 + $0x40] sm:$0xff] %vm4475_vm3, %v4436_v26  ;;  %4574 = vrot.lane.b32.xlu1 %v13769_v58, %s10945_s13  ;;  %v4044_v29 = vmul.f32 0.7978846, %v4012_v57  ;;  %v4013_v63 = vadd.f32 %v3981_v55, %v13865_v5  ;;  %10364 = vtanh.f32 %v4046_v60  ;;  %v13913_v58 = vld [vmem:[#allocation3 + $0x1a1] sm:$0xff]  ;;  %v3885_v60 = vmul.f32 0.5, %v13865_v5 }
 0x54d   : > { %v4047_v56 = vmul.f32 0.7978846, %v4015_v43  ;;  %5992 = vst.msk [vmem:[#allocation3 + $0x1a8] sm:$0x3] %vm576_vm1, %v15980_v25 }
 0x54e   : > { %v5268_v62 = vpop.permute.xlu0 %5267  ;;  %10366 = vtanh.f32 %v4044_v29  ;;  %v4045_v4 = vmul.f32 0.7978846, %v4013_v63  ;;  %v4565_v39 = vpop.permute.xlu1 %4564  ;;  %5991 = vst.msk [vmem:[#allocation3 + $0x1a0] sm:$0xff] %vm573_vm0, %v15980_v25 }
 0x54f   : > { %5315 = vst.msk [vmem:[#allocation2 + $0x18] sm:$0xff] %vm5313_vm8, %v5268_v62  ;;  %10368 = vtanh.f32 %v4047_v56  ;;  %5285 = vrot.lane.b32.xlu0 %v13854_v49, %s10950_s12 }
 0x550   : > { %4609 = vst.msk [vmem:[#allocation2 + $0x40] sm:$0xff] %vm4604_vm5, %v4565_v39  ;;  %4707 = vrot.lane.b32.xlu1 %v4985_v32, %s10948_s14  ;;  %10370 = vtanh.f32 %v4045_v4 }
 0x552   : > { %v4305_v54 = vpop.permute.xlu0 %4304  ;;  %v4690_v59 = vpop.permute.xlu1 %4689 }
 0x553   : > { %4350 = vst.msk [vmem:[#allocation2 + $0x30] sm:$0xff] %vm4346_vm11, %v4305_v54  ;;  %4322 = vrot.lane.b32.xlu0 %v4985_v32, %s10944_s22  ;;  %v3886_v32 = vmul.f32 0.5, %v13832_v46 }
 0x554   : > { %4736 = vst.msk [vmem:[#allocation2 + $0x20] sm:$0xff] %vm4733_vm9, %v4690_v59  ;;  %4836 = vrot.lane.b32.xlu1 %v5114_v22, %s10949_s30 }
 0x556   : > { %v5333_v23 = vld [vmem:[#allocation2 + $0x18] sm:$0xff]  ;;  %v4819_v52 = vpop.permute.xlu1 %4818  ;;  %v5016_v51 = vpop.permute.xlu0 %5015 }
 0x557   : > { %9786 = vmatprep.mubr.msk.bf16.mxu0 %vm5441_vm10, %v5333_v23  ;;  %v10365_v34 = vpop.eup %10364  ;;  %4865 = vst.msk [vmem:[#allocation2 + $0x20] sm:$0xff] %vm4862_vm4, %v4819_v52  ;;  %5025 = vrot.lane.b32.xlu0 %v4984_v45, %s10947_s25 }
 0x558   : > { %5060 = vst.msk [vmem:[#allocation2 + $0x48] sm:$0xff] %vm5055_vm6, %v5016_v51  ;;  %4451 = vrot.lane.b32.xlu1 %v5114_v22, %s10943_s16  ;;  %5531 = vmatmul.mubr.bf16.gmra.mrb[36].mxu0 %v5332_v40  ;;  %v10367_v50 = vpop.eup %10366  ;;  %v4110_v30 = vadd.f32 1.0, %v10365_v34  ;;  %v5113_v22 = vpack.c.bf16 %v13856_v53, %v13836_v24 }
 0x559   : > { %9787 = vmatprep.mubr.msk.bf16.mxu0 %vm5441_vm10, %v5335_v27  ;;  %v10369_v20 = vpop.eup %10368  ;;  %v4108_v35 = vadd.f32 1.0, %v10367_v50 }
 0x55a   : > { %v10371_v19 = vpop.eup %10370  ;;  %v4142_v61 = vmul.f32 %v4110_v30, %v3886_v32  ;;  %v4111_v57 = vadd.f32 1.0, %v10369_v20  ;;  %v4434_v55 = vpop.permute.xlu1 %4433 }
 0x55b   : > { %v5145_v26 = vpop.permute.xlu0 %5144  ;;  %v4140_v46 = vmul.f32 %v4108_v35, %v3884_v37  ;;  %v4109_v43 = vadd.f32 1.0, %v10371_v19  ;;  %4479 = vst.msk [vmem:[#allocation2 + $0x30] sm:$0xff] %vm4475_vm3, %v4434_v55  ;;  %5154 = vrot.lane.b32.xlu0 %v5113_v22, %s15941_s24 }
 0x55c   : > { %5189 = vst.msk [vmem:[#allocation2 + $0x48] sm:$0xff] %vm5184_vm7, %v5145_v26  ;;  %4580 = vrot.lane.b32.xlu1 %v13854_v49, %s10945_s13  ;;  %v4143_v28 = vmul.f32 %v4111_v57, %v3887_v33 }
 0x55d   : > { %4228 = vst.msk [vmem:[#allocation3 + $0x151] sm:$0xff] %vm2374_vm12, %v4142_v61  ;;  %4226 = vst.msk [vmem:[#allocation3 + $0x139] sm:$0xff] %vm2374_vm12, %v4140_v46  ;;  %v4141_v6 = vmul.f32 %v4109_v43, %v3885_v60 }
 0x55e   : > { %4229 = vst.msk [vmem:[#allocation3 + $0x159] sm:$0xff] %vm2374_vm12, %v4143_v28  ;;  %v4563_v24 = vpop.permute.xlu1 %4562  ;;  %v5334_v5 = vld [vmem:[#allocation2 + $0x20] sm:$0xff] }
 0x55f   : > { %v5274_v53 = vpop.permute.xlu0 %5273  ;;  %4227 = vst.msk [vmem:[#allocation3 + $0x141] sm:$0xff] %vm2374_vm12, %v4141_v6  ;;  %5283 = vrot.lane.b32.xlu0 %v13889_v42, %s10950_s12 }
 0x560   : > { %4608 = vst.msk [vmem:[#allocation2 + $0x30] sm:$0xff] %vm4604_vm5, %v4563_v24  ;;  %4705 = vrot.lane.b32.xlu1 %v4984_v45, %s10948_s14  ;;  %5539 = vmatmul.mubr.bf16.gmra.mrb[40].mxu0 %v5334_v5 }
 0x561   : > { %5318 = vst.msk [vmem:[#allocation2 + $0x48] sm:$0xff] %vm5313_vm8, %v5274_v53 }
 0x562   : > { %4737 = vst.msk [vmem:[#allocation2 + $0x30] sm:$0xff] %vm4733_vm9, %v13842_v44  ;;  %v13963_v49 = vpop.permute.xlu1 %4695  ;;  %v9998_v63 = vpop.f32.mrb[28].mxu1 }
 0x563   : > { %4866 = vst.msk [vmem:[#allocation2 + $0x30] sm:$0xff] %vm4862_vm4, %v13887_v8  ;;  %v4311_v29 = vpop.permute.xlu0 %4310  ;;  %4320 = vrot.lane.b32.xlu0 %v4984_v45, %s10944_s22  ;;  %v13969_v44 = vadd.f32 %v13738_v38, %v9998_v63  ;;  %v3845_v4 = vpop.f32.mrb[29].mxu1 }
 0x564   : > { %4353 = vst.msk [vmem:[#allocation2 + $0x60] sm:$0xff] %vm4346_vm11, %v4311_v29  ;;  %4834 = vrot.lane.b32.xlu1 %v5113_v22, %s10949_s30  ;;  %v4967_v56 = vld [vmem:[#allocation3 + $0x150] sm:$0xff]  ;;  %v13971_v59 = vld [vmem:[#allocation3 + $0x138] sm:$0xff]  ;;  %v13976_v23 = vadd.f32 %v13738_v38, %v3845_v4  ;;  %v9999_v32 = vpop.f32.mrb[30].mxu1 }
 0x565   : > { %v5096_v62 = vld [vmem:[#allocation3 + $0x151] sm:$0xff]  ;;  %v13973_v8 = vld [vmem:[#allocation3 + $0x139] sm:$0xff]  ;;  %v3922_v50 = vmul.f32 %v13969_v44, %v13969_v44  ;;  %v14001_v61 = vadd.f32 %v13738_v38, %v9999_v32  ;;  %v3848_v33 = vpop.f32.mrb[31].mxu1 }
 0x566   : > { %v4968_v39 = vld [vmem:[#allocation3 + $0x158] sm:$0xff]  ;;  %v13978_v52 = vpop.permute.xlu1 %4824  ;;  %v13982_v27 = vld [vmem:[#allocation3 + $0x140] sm:$0xff]  ;;  %v3920_v19 = vmul.f32 %v13976_v23, %v13976_v23  ;;  %v14013_v55 = vadd.f32 %v13738_v38, %v3848_v33 }
 0x567   : > { %v5225_v54 = vld [vmem:[#allocation3 + $0x152] sm:$0xff]  ;;  %v5014_v51 = vpop.permute.xlu0 %5013  ;;  %v13980_v40 = vpack.c.bf16 %v4968_v39, %v4967_v56  ;;  %v5226_v34 = vld [vmem:[#allocation3 + $0x15a] sm:$0xff]  ;;  %v5224_v35 = vld [vmem:[#allocation3 + $0x142] sm:$0xff]  ;;  %v3954_v57 = vmul.f32 %v3922_v50, %v13969_v44  ;;  %v3923_v46 = vmul.f32 %v14001_v61, %v14001_v61  ;;  %v4986_v33 = vpack.c.bf16 %v13982_v27, %v13971_v59 }
 0x568   : > { %v5097_v45 = vld [vmem:[#allocation3 + $0x159] sm:$0xff]  ;;  %5981 = vst.msk [vmem:[#allocation3 + $0x150] sm:$0xff] %vm573_vm0, %v15980_v25  ;;  %4449 = vrot.lane.b32.xlu1 %v5113_v22, %s10943_s16  ;;  %v13990_v30 = vpack.c.bf16 %v5226_v34, %v5225_v54  ;;  %v13992_v20 = vld [vmem:[#allocation3 + $0x141] sm:$0xff]  ;;  %v3952_v22 = vmul.f32 %v3920_v19, %v13976_v23  ;;  %v3921_v38 = vmul.f32 %v14013_v55, %v14013_v55 }
 0x569   : > { %5059 = vst.msk [vmem:[#allocation2 + $0x38] sm:$0xff] %vm5055_vm6, %v5014_v51  ;;  %v5223_v37 = vld [vmem:[#allocation3 + $0x13a] sm:$0xff]  ;;  %5031 = vrot.lane.b32.xlu0 %v13980_v40, %s10947_s25  ;;  %v5116_v28 = vpack.c.bf16 %v5097_v45, %v5096_v62  ;;  %v3986_v6 = vmul.f32 0.044715, %v3954_v57  ;;  %v3955_v53 = vmul.f32 %v3923_v46, %v14001_v61  ;;  %v5115_v59 = vpack.c.bf16 %v13992_v20, %v13973_v8 }
 0x56a   : > { %5983 = vst.msk [vmem:[#allocation3 + $0x160] sm:$0x3] %vm576_vm1, %v15980_v25  ;;  %5980 = vst.msk [vmem:[#allocation3 + $0x148] sm:$0x3] %vm576_vm1, %v15980_v25  ;;  %v14015_v26 = vpack.c.bf16 %v5224_v35, %v5223_v37  ;;  %v4440_v60 = vpop.permute.xlu1 %4439  ;;  %v3984_v24 = vmul.f32 0.044715, %v3952_v22  ;;  %v3953_v29 = vmul.f32 %v3921_v38, %v14013_v55 }
 0x56b   : > { %5982 = vst.msk [vmem:[#allocation3 + $0x158] sm:$0xff] %vm573_vm0, %v15980_v25  ;;  %5978 = vst.msk [vmem:[#allocation3 + $0x138] sm:$0xff] %vm573_vm0, %v15980_v25  ;;  %v5143_v43 = vpop.permute.xlu0 %5142  ;;  %v4018_v5 = vadd.f32 %v3986_v6, %v13969_v44  ;;  %v3987_v56 = vmul.f32 0.044715, %v3955_v53  ;;  %v5336_v57 = vld [vmem:[#allocation2 + $0x30] sm:$0xff]  ;;  %v5339_v22 = vld [vmem:[#allocation2 + $0x48] sm:$0xff] }
 0x56c   : > { %5979 = vst.msk [vmem:[#allocation3 + $0x140] sm:$0xff] %vm573_vm0, %v15980_v25  ;;  %4578 = vrot.lane.b32.xlu1 %v13889_v42, %s10945_s13  ;;  %v4016_v63 = vadd.f32 %v3984_v24, %v13976_v23  ;;  %v3985_v39 = vmul.f32 0.044715, %v3953_v29  ;;  %v3891_v38 = vmul.f32 0.5, %v14001_v61  ;;  %v3889_v8 = vmul.f32 0.5, %v14013_v55 }
 0x56d   : > { %4940 = vst.msk [vmem:[#allocation2 + $0xd8] sm:$0xff] %vm2374_vm12, %v13990_v30  ;;  %4939 = vst.msk [vmem:[#allocation2 + $0xc8] sm:$0xff] %vm2374_vm12, %v14015_v26  ;;  %5160 = vrot.lane.b32.xlu0 %v5116_v28, %s15941_s24  ;;  %v4050_v4 = vmul.f32 0.7978846, %v4018_v5  ;;  %v4019_v51 = vadd.f32 %v3987_v56, %v14001_v61 }
 0x56e   : > { %4482 = vst.msk [vmem:[#allocation2 + $0x60] sm:$0xff] %vm4475_vm3, %v4440_v60  ;;  %v4569_v62 = vpop.permute.xlu1 %4568  ;;  %v4048_v54 = vmul.f32 0.7978846, %v4016_v63  ;;  %v4017_v45 = vadd.f32 %v3985_v39, %v14013_v55 }
 0x56f   : > { %5188 = vst.msk [vmem:[#allocation2 + $0x38] sm:$0xff] %vm5184_vm7, %v5143_v43  ;;  %v5272_v42 = vpop.permute.xlu0 %5271  ;;  %10372 = vtanh.f32 %v4050_v4  ;;  %v4051_v34 = vmul.f32 0.7978846, %v4019_v51  ;;  %v3888_v43 = vmul.f32 0.5, %v13976_v23 }
 0x570   : > { %4611 = vst.msk [vmem:[#allocation2 + $0x60] sm:$0xff] %vm4604_vm5, %v4569_v62  ;;  %4711 = vrot.lane.b32.xlu1 %v13980_v40, %s10948_s14  ;;  %10374 = vtanh.f32 %v4048_v54  ;;  %v4049_v37 = vmul.f32 0.7978846, %v4017_v45 }
 0x571   : > { %5317 = vst.msk [vmem:[#allocation2 + $0x38] sm:$0xff] %vm5313_vm8, %v5272_v42  ;;  %5289 = vrot.lane.b32.xlu0 %v13990_v30, %s10950_s12  ;;  %10376 = vtanh.f32 %v4051_v34 }
 0x572   : > { %v4694_v50 = vpop.permute.xlu1 %4693  ;;  %10378 = vtanh.f32 %v4049_v37 }
 0x573   : > { %v4309_v32 = vpop.permute.xlu0 %4308  ;;  %4738 = vst.msk [vmem:[#allocation2 + $0x40] sm:$0xff] %vm4733_vm9, %v4694_v50 }
 0x574   : > { %4352 = vst.msk [vmem:[#allocation2 + $0x50] sm:$0xff] %vm4346_vm11, %v4309_v32  ;;  %4840 = vrot.lane.b32.xlu1 %v5116_v28, %s10949_s30 }
 0x575   : > { %4326 = vrot.lane.b32.xlu0 %v13980_v40, %s10944_s22  ;;  %v3890_v40 = vmul.f32 0.5, %v13969_v44 }
 0x576   : > { %v4823_v35 = vpop.permute.xlu1 %4822 }
 0x577   : > { %4867 = vst.msk [vmem:[#allocation2 + $0x40] sm:$0xff] %vm4862_vm4, %v4823_v35 }
 0x578   : > { %v5337_v19 = vld [vmem:[#allocation2 + $0x38] sm:$0xff]  ;;  %4455 = vrot.lane.b32.xlu1 %v5116_v28, %s10943_s16 }
 0x579   : > { %9788 = vmatprep.mubr.msk.bf16.mxu0 %vm5441_vm10, %v5337_v19  ;;  %5029 = vrot.lane.b32.xlu0 %v4986_v33, %s10947_s25  ;;  %v5020_v60 = vpop.permute.xlu0 %5019  ;;  %v10373_v27 = vpop.eup %10372 }
 0x57a   : > { %5547 = vmatmul.mubr.bf16.gmra.mrb[44].mxu0 %v5336_v57  ;;  %v4438_v46 = vpop.permute.xlu1 %4437  ;;  %5062 = vst.msk [vmem:[#allocation2 + $0x68] sm:$0xff] %vm5055_vm6, %v5020_v60  ;;  %v10375_v28 = vpop.eup %10374  ;;  %v4114_v6 = vadd.f32 1.0, %v10373_v27 }
 0x57b   : > { %9789 = vmatprep.mubr.msk.bf16.mxu0 %vm5441_vm10, %v5339_v22  ;;  %4481 = vst.msk [vmem:[#allocation2 + $0x50] sm:$0xff] %vm4475_vm3, %v4438_v46  ;;  %v4112_v44 = vadd.f32 1.0, %v10375_v28  ;;  %v10377_v24 = vpop.eup %10376 }
 0x57c   : > { %4584 = vrot.lane.b32.xlu1 %v13990_v30, %s10945_s13  ;;  %v4146_v53 = vmul.f32 %v4114_v6, %v3890_v40  ;;  %v10379_v5 = vpop.eup %10378  ;;  %v4115_v63 = vadd.f32 1.0, %v10377_v24 }
 0x57d   : > { %5158 = vrot.lane.b32.xlu0 %v5115_v59, %s15941_s24  ;;  %v5149_v23 = vpop.permute.xlu0 %5148  ;;  %v4144_v29 = vmul.f32 %v4112_v44, %v3888_v43  ;;  %v4113_v56 = vadd.f32 1.0, %v10379_v5 }
 0x57e   : > { %v4567_v20 = vpop.permute.xlu1 %4566  ;;  %5191 = vst.msk [vmem:[#allocation2 + $0x68] sm:$0xff] %vm5184_vm7, %v5149_v23  ;;  %v5338_v30 = vld [vmem:[#allocation2 + $0x40] sm:$0xff]  ;;  %v4147_v61 = vmul.f32 %v4115_v63, %v3891_v38 }
 0x57f   : > { %4610 = vst.msk [vmem:[#allocation2 + $0x50] sm:$0xff] %vm4604_vm5, %v4567_v20  ;;  %v4145_v55 = vmul.f32 %v4113_v56, %v3889_v8 }
 0x580   : > { %4709 = vrot.lane.b32.xlu1 %v4986_v33, %s10948_s14  ;;  %4232 = vst.msk [vmem:[#allocation3 + $0x181] sm:$0xff] %vm2374_vm12, %v4146_v53  ;;  %4230 = vst.msk [vmem:[#allocation3 + $0x169] sm:$0xff] %vm2374_vm12, %v4144_v29 }
 0x581   : > { %4739 = vst.msk [vmem:[#allocation2 + $0x50] sm:$0xff] %vm4733_vm9, %v13963_v49  ;;  %5287 = vrot.lane.b32.xlu0 %v14015_v26, %s10950_s12  ;;  %v5278_v42 = vpop.permute.xlu0 %5277 }
 0x582   : > { %5555 = vmatmul.mubr.bf16.gmra.mrb[48].mxu0 %v5338_v30  ;;  %4868 = vst.msk [vmem:[#allocation2 + $0x50] sm:$0xff] %vm4862_vm4, %v13978_v52  ;;  %v14077_v62 = vpop.permute.xlu1 %4699 }
 0x583   : > { %4233 = vst.msk [vmem:[#allocation3 + $0x189] sm:$0xff] %vm2374_vm12, %v4147_v61  ;;  %4231 = vst.msk [vmem:[#allocation3 + $0x171] sm:$0xff] %vm2374_vm12, %v4145_v55  ;;  %v5119_v55 = vpack.c.bf16 %v13913_v58, %v13909_v31 }
 0x584   : > { %5320 = vst.msk [vmem:[#allocation2 + $0x68] sm:$0xff] %vm5313_vm8, %v5278_v42  ;;  %4838 = vrot.lane.b32.xlu1 %v5115_v59, %s10949_s30 }
 0x585   : > { %4324 = vrot.lane.b32.xlu0 %v4986_v33, %s10944_s22  ;;  %v4315_v4 = vpop.permute.xlu0 %4314 }
 0x586   : > { %v14084_v49 = vpop.permute.xlu1 %4828  ;;  %4355 = vst.msk [vmem:[#allocation2 + $0x80] sm:$0xff] %vm4346_vm11, %v4315_v4 }
 0x587   : > { %v4971_v52 = vld [vmem:[#allocation3 + $0x180] sm:$0xff]  ;;  %v4969_v32 = vld [vmem:[#allocation3 + $0x168] sm:$0xff] }
 0x588   : > { %4453 = vrot.lane.b32.xlu1 %v5115_v59, %s10943_s16  ;;  %v5100_v39 = vld [vmem:[#allocation3 + $0x181] sm:$0xff]  ;;  %v5098_v33 = vld [vmem:[#allocation3 + $0x169] sm:$0xff] }
 0x589   : > { %v5018_v51 = vpop.permute.xlu0 %5017  ;;  %v5340_v23 = vld [vmem:[#allocation2 + $0x50] sm:$0xff] }
 0x58a   : > { %v4444_v54 = vpop.permute.xlu1 %4443  ;;  %v4972_v45 = vld [vmem:[#allocation3 + $0x188] sm:$0xff]  ;;  %5061 = vst.msk [vmem:[#allocation2 + $0x58] sm:$0xff] %vm5055_vm6, %v5018_v51  ;;  %v4970_v19 = vld [vmem:[#allocation3 + $0x170] sm:$0xff] }
 0x58b   : > { %v5101_v34 = vld [vmem:[#allocation3 + $0x189] sm:$0xff]  ;;  %4484 = vst.msk [vmem:[#allocation2 + $0x80] sm:$0xff] %vm4475_vm3, %v4444_v54  ;;  %v4989_v37 = vpack.c.bf16 %v4972_v45, %v4971_v52  ;;  %v5099_v22 = vld [vmem:[#allocation3 + $0x171] sm:$0xff]  ;;  %v4988_v43 = vpack.c.bf16 %v4970_v19, %v4969_v32  ;;  %v6025_v52 = vld [vmem:[#allocation3] sm:$0xff] }
 0x58c   : > { %v5229_v50 = vld [vmem:[#allocation3 + $0x182] sm:$0xff]  ;;  %4582 = vrot.lane.b32.xlu1 %v14015_v26, %s10945_s13  ;;  %v5230_v35 = vld [vmem:[#allocation3 + $0x18a] sm:$0xff]  ;;  %v5228_v46 = vld [vmem:[#allocation3 + $0x172] sm:$0xff]  ;;  %v5118_v26 = vpack.c.bf16 %v5101_v34, %v5100_v39  ;;  %v5117_v44 = vpack.c.bf16 %v5099_v22, %v5098_v33 }
 0x58d   : > { %5987 = vst.msk [vmem:[#allocation3 + $0x180] sm:$0xff] %vm573_vm0, %v15980_v25  ;;  %v5247_v57 = vpack.c.bf16 %v5230_v35, %v5229_v50  ;;  %v5227_v40 = vld [vmem:[#allocation3 + $0x16a] sm:$0xff]  ;;  %5988 = vst.msk [vmem:[#allocation3 + $0x188] sm:$0xff] %vm573_vm0, %v15980_v25  ;;  %5035 = vrot.lane.b32.xlu0 %v4989_v37, %s10947_s25  ;;  %v5147_v27 = vpop.permute.xlu0 %5146  ;;  %v6154_v54 = vld [vmem:[#allocation3 + $0x1] sm:$0xff] }
 0x58e   : > { %5989 = vst.msk [vmem:[#allocation3 + $0x190] sm:$0x3] %vm576_vm1, %v15980_v25  ;;  %v5246_v60 = vpack.c.bf16 %v5228_v46, %v5227_v40  ;;  %5986 = vst.msk [vmem:[#allocation3 + $0x178] sm:$0x3] %vm576_vm1, %v15980_v25  ;;  %v4573_v59 = vpop.permute.xlu1 %4572  ;;  %v5343_v5 = vld [vmem:[#allocation2 + $0x68] sm:$0xff]  ;;  %v6830_v19 = vld [vmem:[#allocation3 + $0x1a0] sm:$0xff] }
 0x58f   : > { %5984 = vst.msk [vmem:[#allocation3 + $0x168] sm:$0xff] %vm573_vm0, %v15980_v25  ;;  %5985 = vst.msk [vmem:[#allocation3 + $0x170] sm:$0xff] %vm573_vm0, %v15980_v25  ;;  %v6026_v39 = vld [vmem:[#allocation3 + $0x8] sm:$0xff] }
 0x590   : > { %4942 = vst.msk [vmem:[#allocation2 + $0xf8] sm:$0xff] %vm2374_vm12, %v5247_v57  ;;  %4715 = vrot.lane.b32.xlu1 %v4989_v37, %s10948_s14  ;;  %4941 = vst.msk [vmem:[#allocation2 + $0xe8] sm:$0xff] %vm2374_vm12, %v5246_v60  ;;  %v6057_v51 = vpack.c.bf16 %v6026_v39, %v6025_v52  ;;  %v6155_v45 = vld [vmem:[#allocation3 + $0x9] sm:$0xff]  ;;  %v6829_v37 = vld [vmem:[#allocation3 + $0x198] sm:$0xff] }
 0x591   : > { %4613 = vst.msk [vmem:[#allocation2 + $0x80] sm:$0xff] %vm4604_vm5, %v4573_v59  ;;  %5164 = vrot.lane.b32.xlu0 %v5118_v26, %s15941_s24  ;;  %v5276_v6 = vpop.permute.xlu0 %5275  ;;  %v6186_v34 = vpack.c.bf16 %v6155_v45, %v6154_v54  ;;  %v6283_v50 = vld [vmem:[#allocation3 + $0x2] sm:$0xff]  ;;  %v6284_v32 = vld [vmem:[#allocation3 + $0xa] sm:$0xff]  ;;  %v6846_v40 = vpack.c.bf16 %v6830_v19, %v6829_v37 }
 0x592   : > { %5190 = vst.msk [vmem:[#allocation2 + $0x58] sm:$0xff] %vm5184_vm7, %v5147_v27  ;;  %v4698_v28 = vpop.permute.xlu1 %4697  ;;  %v6315_v35 = vpack.c.bf16 %v6284_v32, %v6283_v50 }
 0x593   : > { %4740 = vst.msk [vmem:[#allocation2 + $0x60] sm:$0xff] %vm4733_vm9, %v4698_v28 }
 0x594   : > { %5319 = vst.msk [vmem:[#allocation2 + $0x58] sm:$0xff] %vm5313_vm8, %v5276_v6  ;;  %4713 = vrot.lane.b32.xlu1 %v4988_v43, %s10948_s14  ;;  %s10954_s14 = smov 44  }
 0x595   : > { %5293 = vrot.lane.b32.xlu0 %v5247_v57, %s10950_s12  ;;  %v4313_v24 = vpop.permute.xlu0 %4312  ;;  %7819 = vst.msk [vmem:[#allocation3] sm:$0xff] %vm573_vm0, %v15980_v25  ;;  %7820 = vst.msk [vmem:[#allocation3 + $0x8] sm:$0xff] %vm573_vm0, %v15980_v25 }
 0x596   : > { %v4827_v38 = vpop.permute.xlu1 %4826  ;;  %4354 = vst.msk [vmem:[#allocation2 + $0x70] sm:$0xff] %vm4346_vm11, %v4313_v24 }
 0x597   : > { %4869 = vst.msk [vmem:[#allocation2 + $0x60] sm:$0xff] %vm4862_vm4, %v4827_v38 }
 0x598   : > { %4842 = vrot.lane.b32.xlu1 %v5117_v44, %s10949_s30  ;;  %7821 = vst.msk [vmem:[#allocation3 + $0x10] sm:$0x3] %vm576_vm1, %v15980_v25 }
 0x599   : > { %5033 = vrot.lane.b32.xlu0 %v4988_v43, %s10947_s25  ;;  %v5024_v8 = vpop.permute.xlu0 %5023 }
 0x59a   : > { %v4442_v53 = vpop.permute.xlu1 %4441  ;;  %5064 = vst.msk [vmem:[#allocation2 + $0x88] sm:$0xff] %vm5055_vm6, %v5024_v8 }
 0x59b   : > { %v5341_v20 = vld [vmem:[#allocation2 + $0x58] sm:$0xff]  ;;  %4483 = vst.msk [vmem:[#allocation2 + $0x70] sm:$0xff] %vm4475_vm3, %v4442_v53 }
 0x59c   : > { %9790 = vmatprep.mubr.msk.bf16.mxu0 %vm5441_vm10, %v5341_v20  ;;  %4457 = vrot.lane.b32.xlu1 %v5117_v44, %s10943_s16  ;;  %s15990_s16 = smov 40  }
 0x59d   : > { %5563 = vmatmul.mubr.bf16.gmra.mrb[52].mxu0 %v5340_v23  ;;  %5162 = vrot.lane.b32.xlu0 %v5117_v44, %s15941_s24  ;;  %v5153_v63 = vpop.permute.xlu0 %5152 }
 0x59e   : > { %9791 = vmatprep.mubr.msk.bf16.mxu0 %vm5441_vm10, %v5343_v5  ;;  %v4571_v29 = vpop.permute.xlu1 %4570  ;;  %5193 = vst.msk [vmem:[#allocation2 + $0x88] sm:$0xff] %vm5184_vm7, %v5153_v63  ;;  %v5342_v61 = vld [vmem:[#allocation2 + $0x60] sm:$0xff] }
 0x59f   : > { %4612 = vst.msk [vmem:[#allocation2 + $0x70] sm:$0xff] %vm4604_vm5, %v4571_v29 }
 0x5a0   : > { %4586 = vrot.lane.b32.xlu1 %v5246_v60, %s10945_s13  ;;  %4741 = vst.msk [vmem:[#allocation2 + $0x70] sm:$0xff] %vm4733_vm9, %v14077_v62  ;;  %s10952_s13 = smov 28  }
 0x5a1   : > { %4870 = vst.msk [vmem:[#allocation2 + $0x70] sm:$0xff] %vm4862_vm4, %v14084_v49  ;;  %5291 = vrot.lane.b32.xlu0 %v5246_v60, %s10950_s12  ;;  %v5282_v56 = vpop.permute.xlu0 %5281 }
 0x5a2   : > { %v14133_v30 = vpop.permute.xlu1 %4703  ;;  %5322 = vst.msk [vmem:[#allocation2 + $0x88] sm:$0xff] %vm5313_vm8, %v5282_v56 }
 0x5a4   : > { %4844 = vrot.lane.b32.xlu1 %v5118_v26, %s10949_s30  ;;  %s15989_s30 = smov 24  }
 0x5a5   : > { %5571 = vmatmul.mubr.bf16.gmra.mrb[56].mxu0 %v5342_v61  ;;  %5037 = vrot.lane.b32.xlu0 %v4990_v7, %s10947_s25  ;;  %v4319_v42 = vpop.permute.xlu0 %4318  ;;  %s10953_s25 = smov 36  }
 0x5a6   : > { %v4833_v62 = vpop.permute.xlu1 %4832  ;;  %4357 = vst.msk [vmem:[#allocation2 + $0xa0] sm:$0xff] %vm4346_vm11, %v4319_v42 }
 0x5a8   : > { %v5344_v46 = vld [vmem:[#allocation2 + $0x70] sm:$0xff] }
 0x5a9   : > { %5166 = vrot.lane.b32.xlu0 %v5119_v55, %s15941_s24  ;;  %v5022_v4 = vpop.permute.xlu0 %5021  ;;  %v5347_v26 = vld [vmem:[#allocation2 + $0x88] sm:$0xff]  ;;  %s15992_s24 = smov 48  }
 0x5aa   : > { %v4448_v49 = vpop.permute.xlu1 %4447  ;;  %5063 = vst.msk [vmem:[#allocation2 + $0x78] sm:$0xff] %vm5055_vm6, %v5022_v4 }
 0x5ab   : > { %4486 = vst.msk [vmem:[#allocation2 + $0xa0] sm:$0xff] %vm4475_vm3, %v4448_v49 }
 0x5ad   : > { %4328 = vrot.lane.b32.xlu0 %v4988_v43, %s10944_s22  ;;  %v5151_v7 = vpop.permute.xlu0 %5150  ;;  %s15991_s22 = smov 32  }
 0x5ae   : > { %v4577_v0 = vpop.permute.xlu1 %4576  ;;  %5192 = vst.msk [vmem:[#allocation2 + $0x78] sm:$0xff] %vm5184_vm7, %v5151_v7 }
 0x5af   : > { %4615 = vst.msk [vmem:[#allocation2 + $0xa0] sm:$0xff] %vm4604_vm5, %v4577_v0 }
 0x5b1   : > { %5295 = vrot.lane.b32.xlu0 %v5248_v48, %s10950_s12  ;;  %v5280_v58 = vpop.permute.xlu0 %5279  ;;  %s10951_s12 = smov 20  }
 0x5b2   : > { %v4702_v31 = vpop.permute.xlu1 %4701  ;;  %5321 = vst.msk [vmem:[#allocation2 + $0x78] sm:$0xff] %vm5313_vm8, %v5280_v58  ;;  %6218 = vrot.lane.b32.xlu1 %v6186_v34, %s10951_s12 }
 0x5b3   : > { %4742 = vst.msk [vmem:[#allocation2 + $0x80] sm:$0xff] %vm4733_vm9, %v4702_v31 }
 0x5b5   : > { %v4317_v47 = vpop.permute.xlu0 %4316  ;;  %6089 = vrot.lane.b32.xlu0 %v6057_v51, %s10927_s26 }
 0x5b6   : > { %v4831_v11 = vpop.permute.xlu1 %4830  ;;  %4356 = vst.msk [vmem:[#allocation2 + $0x90] sm:$0xff] %vm4346_vm11, %v4317_v47  ;;  %6893 = vrot.lane.b32.xlu1 %v6846_v40, %s15990_s16 }
 0x5b7   : > { %4871 = vst.msk [vmem:[#allocation2 + $0x80] sm:$0xff] %vm4862_vm4, %v4831_v11 }
 0x5b9   : > { %v5028_v57 = vpop.permute.xlu0 %5027  ;;  %v5345_v22 = vld [vmem:[#allocation2 + $0x78] sm:$0xff]  ;;  %6347 = vrot.lane.b32.xlu0 %v6315_v35, %s15989_s30 }
 0x5ba   : > { %v4446_v33 = vpop.permute.xlu1 %4445  ;;  %5066 = vst.msk [vmem:[#allocation2 + $0xa8] sm:$0xff] %vm5055_vm6, %v5028_v57  ;;  %9792 = vmatprep.mubr.msk.bf16.mxu0 %vm5441_vm10, %v5345_v22 }
 0x5bb   : > { %4485 = vst.msk [vmem:[#allocation2 + $0x90] sm:$0xff] %vm4475_vm3, %v4446_v33  ;;  %5579 = vmatmul.mubr.bf16.gmra.mrb[60].mxu0 %v5344_v46 }
 0x5bc   : > { %9793 = vmatprep.mubr.msk.bf16.mxu0 %vm5441_vm10, %v5347_v26 }
 0x5bd   : > { %v5157_v59 = vpop.permute.xlu0 %5156 }
 0x5be   : > { %v4575_v60 = vpop.permute.xlu1 %4574  ;;  %5195 = vst.msk [vmem:[#allocation2 + $0xa8] sm:$0xff] %vm5184_vm7, %v5157_v59  ;;  %v5346_v28 = vld [vmem:[#allocation2 + $0x80] sm:$0xff]  ;;  %v14216_v59 = vld [vmem:[#allocation15] ss:$0 sm:$0xff] }
 0x5bf   : > { %4614 = vst.msk [vmem:[#allocation2 + $0x90] sm:$0xff] %vm4604_vm5, %v4575_v60 }
 0x5c0   : > { %4743 = vst.msk [vmem:[#allocation2 + $0x90] sm:$0xff] %vm4733_vm9, %v14133_v30 }
 0x5c1   : > { %4872 = vst.msk [vmem:[#allocation2 + $0x90] sm:$0xff] %vm4862_vm4, %v4833_v62  ;;  %v5286_v43 = vpop.permute.xlu0 %5285 }
 0x5c2   : > { %v4708_v27 = vpop.permute.xlu1 %4707  ;;  %5324 = vst.msk [vmem:[#allocation2 + $0xa8] sm:$0xff] %vm5313_vm8, %v5286_v43 }
 0x5c3   : > { %5587 = vmatmul.mubr.bf16.gmra.mrb[64].mxu0 %v5346_v28 }
 0x5c5   : > { %v4323_v44 = vpop.permute.xlu0 %4322 }
 0x5c6   : > { %v4837_v6 = vpop.permute.xlu1 %4836  ;;  %4359 = vst.msk [vmem:[#allocation2 + $0xc0] sm:$0xff] %vm4346_vm11, %v4323_v44 }
 0x5c8   : > { %v5348_v61 = vld [vmem:[#allocation2 + $0x90] sm:$0xff] }
 0x5c9   : > { %v5026_v24 = vpop.permute.xlu0 %5025  ;;  %v5351_v55 = vld [vmem:[#allocation2 + $0xa8] sm:$0xff] }
 0x5ca   : > { %v4452_v38 = vpop.permute.xlu1 %4451  ;;  %5065 = vst.msk [vmem:[#allocation2 + $0x98] sm:$0xff] %vm5055_vm6, %v5026_v24 }
 0x5cb   : > { %4488 = vst.msk [vmem:[#allocation2 + $0xc0] sm:$0xff] %vm4475_vm3, %v4452_v38 }
 0x5cd   : > { %v5155_v8 = vpop.permute.xlu0 %5154 }
 0x5ce   : > { %v4581_v53 = vpop.permute.xlu1 %4580  ;;  %5194 = vst.msk [vmem:[#allocation2 + $0x98] sm:$0xff] %vm5184_vm7, %v5155_v8 }
 0x5cf   : > { %4617 = vst.msk [vmem:[#allocation2 + $0xc0] sm:$0xff] %vm4604_vm5, %v4581_v53 }
 0x5d1   : > { %v5284_v23 = vpop.permute.xlu0 %5283 }
 0x5d2   : > { %v4706_v20 = vpop.permute.xlu1 %4705  ;;  %5323 = vst.msk [vmem:[#allocation2 + $0x98] sm:$0xff] %vm5313_vm8, %v5284_v23 }
 0x5d3   : > { %4744 = vst.msk [vmem:[#allocation2 + $0xa0] sm:$0xff] %vm4733_vm9, %v4706_v20 }
 0x5d5   : > { %v4321_v29 = vpop.permute.xlu0 %4320 }
 0x5d6   : > { %v4835_v5 = vpop.permute.xlu1 %4834  ;;  %4358 = vst.msk [vmem:[#allocation2 + $0xb0] sm:$0xff] %vm4346_vm11, %v4321_v29 }
 0x5d7   : > { %4873 = vst.msk [vmem:[#allocation2 + $0xa0] sm:$0xff] %vm4862_vm4, %v4835_v5 }
 0x5d9   : > { %v5349_v56 = vld [vmem:[#allocation2 + $0x98] sm:$0xff] }
 0x5da   : > { %v4450_v63 = vpop.permute.xlu1 %4449  ;;  %9794 = vmatprep.mubr.msk.bf16.mxu1 %vm5441_vm10, %v5349_v56 }
 0x5db   : > { %v5032_v30 = vpop.permute.xlu0 %5031  ;;  %4487 = vst.msk [vmem:[#allocation2 + $0xb0] sm:$0xff] %vm4475_vm3, %v4450_v63  ;;  %5595 = vmatmul.mubr.bf16.vlgmr.msra.gmra.mrb[32].mxu1 %v5348_v61 }
 0x5dc   : > { %5068 = vst.msk [vmem:[#allocation2 + $0xc8] sm:$0xff] %vm5055_vm6, %v5032_v30  ;;  %9795 = vmatprep.mubr.msk.bf16.mxu1 %vm5441_vm10, %v5351_v55 }
 0x5de   : > { %v4579_v62 = vpop.permute.xlu1 %4578  ;;  %v5350_v48 = vld [vmem:[#allocation2 + $0xa0] sm:$0xff] }
 0x5df   : > { %v5161_v42 = vpop.permute.xlu0 %5160  ;;  %4616 = vst.msk [vmem:[#allocation2 + $0xb0] sm:$0xff] %vm4604_vm5, %v4579_v62 }
 0x5e0   : > { %5197 = vst.msk [vmem:[#allocation2 + $0xc8] sm:$0xff] %vm5184_vm7, %v5161_v42 }
 0x5e1   : > { %4745 = vst.msk [vmem:[#allocation2 + $0xb0] sm:$0xff] %vm4733_vm9, %v4708_v27 }
 0x5e2   : > { %4874 = vst.msk [vmem:[#allocation2 + $0xb0] sm:$0xff] %vm4862_vm4, %v4837_v6  ;;  %v4712_v49 = vpop.permute.xlu1 %4711 }
 0x5e3   : > { %v5290_v4 = vpop.permute.xlu0 %5289  ;;  %5603 = vmatmul.mubr.bf16.gmra.mrb[36].mxu1 %v5350_v48 }
 0x5e4   : > { %5326 = vst.msk [vmem:[#allocation2 + $0xc8] sm:$0xff] %vm5313_vm8, %v5290_v4 }
 0x5e6   : > { %v4841_v0 = vpop.permute.xlu1 %4840 }
 0x5e7   : > { %v4327_v7 = vpop.permute.xlu0 %4326 }
 0x5e8   : > { %4361 = vst.msk [vmem:[#allocation2 + $0xe0] sm:$0xff] %vm4346_vm11, %v4327_v7 }
 0x5e9   : > { %v5352_v50 = vld [vmem:[#allocation2 + $0xb0] sm:$0xff] }
 0x5ea   : > { %v4456_v31 = vpop.permute.xlu1 %4455 }
 0x5eb   : > { %v5030_v58 = vpop.permute.xlu0 %5029  ;;  %4490 = vst.msk [vmem:[#allocation2 + $0xe0] sm:$0xff] %vm4475_vm3, %v4456_v31  ;;  %v5355_v32 = vld [vmem:[#allocation2 + $0xc8] sm:$0xff] }
 0x5ec   : > { %5067 = vst.msk [vmem:[#allocation2 + $0xb8] sm:$0xff] %vm5055_vm6, %v5030_v58 }
 0x5ee   : > { %v4585_v52 = vpop.permute.xlu1 %4584 }
 0x5ef   : > { %v5159_v39 = vpop.permute.xlu0 %5158  ;;  %4619 = vst.msk [vmem:[#allocation2 + $0xe0] sm:$0xff] %vm4604_vm5, %v4585_v52 }
 0x5f0   : > { %5196 = vst.msk [vmem:[#allocation2 + $0xb8] sm:$0xff] %vm5184_vm7, %v5159_v39  ;;  %v10226_v39 = vld [vmem:[#allocation16] sm:$0xff]  }
 0x5f1   : > { %7371 = vmatpush1.bf16.msra.mxu1 %v10226_v39 }
 0x5f2   : > { %v4710_v54 = vpop.permute.xlu1 %4709  ;;  %7372 = vmatprep.subr.bf16.mxu1 %v10946_v21 }
 0x5f3   : > { %v5288_v51 = vpop.permute.xlu0 %5287  ;;  %4746 = vst.msk [vmem:[#allocation2 + $0xc0] sm:$0xff] %vm4733_vm9, %v4710_v54 }
 0x5f4   : > { %5325 = vst.msk [vmem:[#allocation2 + $0xb8] sm:$0xff] %vm5313_vm8, %v5288_v51 }
 0x5f6   : > { %v4839_v45 = vpop.permute.xlu1 %4838 }
 0x5f7   : > { %v4325_v11 = vpop.permute.xlu0 %4324  ;;  %4875 = vst.msk [vmem:[#allocation2 + $0xc0] sm:$0xff] %vm4862_vm4, %v4839_v45 }
 0x5f8   : > { %4360 = vst.msk [vmem:[#allocation2 + $0xd0] sm:$0xff] %vm4346_vm11, %v4325_v11 }
 0x5fa   : > { %v4454_v47 = vpop.permute.xlu1 %4453 }
 0x5fb   : > { %v5353_v34 = vld [vmem:[#allocation2 + $0xb8] sm:$0xff]  ;;  %4489 = vst.msk [vmem:[#allocation2 + $0xd0] sm:$0xff] %vm4475_vm3, %v4454_v47 }
 0x5fc   : > { %9796 = vmatprep.mubr.msk.bf16.mxu1 %vm5441_vm10, %v5353_v34 }
 0x5fd   : > { %5611 = vmatmul.mubr.bf16.gmra.mrb[40].mxu1 %v5352_v50 }
 0x5fe   : > { %9797 = vmatprep.mubr.msk.bf16.mxu1 %vm5441_vm10, %v5355_v32  ;;  %v4583_v37 = vpop.permute.xlu1 %4582  ;;  %v5354_v57 = vld [vmem:[#allocation2 + $0xc0] sm:$0xff] }
 0x5ff   : > { %4618 = vst.msk [vmem:[#allocation2 + $0xd0] sm:$0xff] %vm4604_vm5, %v4583_v37  ;;  %v5036_v35 = vpop.permute.xlu0 %5035 }
 0x600   : > { %4747 = vst.msk [vmem:[#allocation2 + $0xd0] sm:$0xff] %vm4733_vm9, %v4712_v49 }
 0x601   : > { %5070 = vst.msk [vmem:[#allocation2 + $0xe8] sm:$0xff] %vm5055_vm6, %v5036_v35 }
 0x602   : > { %4876 = vst.msk [vmem:[#allocation2 + $0xd0] sm:$0xff] %vm4862_vm4, %v4841_v0  ;;  %v4716_v19 = vpop.permute.xlu1 %4715 }
 0x603   : > { %v5165_v33 = vpop.permute.xlu0 %5164 }
 0x604   : > { %5199 = vst.msk [vmem:[#allocation2 + $0xe8] sm:$0xff] %vm5184_vm7, %v5165_v33 }
 0x605   : > { %5619 = vmatmul.mubr.bf16.gmra.mrb[44].mxu1 %v5354_v57 }
 0x606   : > { %v4714_v22 = vpop.permute.xlu1 %4713 }
 0x607   : > { %v5294_v40 = vpop.permute.xlu0 %5293  ;;  %4748 = vst.msk [vmem:[#allocation2 + $0xe0] sm:$0xff] %vm4733_vm9, %v4714_v22  ;;  %v10227_v22 = vld [vmem:[#allocation16 + $0x8] sm:$0xff]  }
 0x608   : > { %5328 = vst.msk [vmem:[#allocation2 + $0xe8] sm:$0xff] %vm5313_vm8, %v5294_v40  ;;  %7373 = vmatpush1.bf16.msra.mxu1 %v10227_v22 }
 0x609   : > { %v5356_v48 = vld [vmem:[#allocation2 + $0xd0] sm:$0xff]  ;;  %7374 = vmatprep.subr.bf16.mxu1 %v10946_v21 }
 0x60a   : > { %v4843_v46 = vpop.permute.xlu1 %4842 }
 0x60b   : > { %v5034_v26 = vpop.permute.xlu0 %5033  ;;  %4877 = vst.msk [vmem:[#allocation2 + $0xe0] sm:$0xff] %vm4862_vm4, %v4843_v46 }
 0x60c   : > { %5069 = vst.msk [vmem:[#allocation2 + $0xd8] sm:$0xff] %vm5055_vm6, %v5034_v26 }
 0x60e   : > { %v4458_v8 = vpop.permute.xlu1 %4457 }
 0x60f   : > { %v5163_v60 = vpop.permute.xlu0 %5162  ;;  %v5359_v42 = vld [vmem:[#allocation2 + $0xe8] sm:$0xff] }
 0x610   : > { %5198 = vst.msk [vmem:[#allocation2 + $0xd8] sm:$0xff] %vm5184_vm7, %v5163_v60 }
 0x612   : > { %v4587_v62 = vpop.permute.xlu1 %4586  ;;  %v5358_v58 = vld [vmem:[#allocation2 + $0xe0] sm:$0xff] }
 0x613   : > { %v5524_v27 = vpop.f32.mrb[32].mxu0  ;;  %v5292_v6 = vpop.permute.xlu0 %5291 }
 0x614   : > { %v5525_v43 = vadd.f32 %v14216_v59, %v5524_v27  ;;  %v5526_v28 = vpop.f32.mrb[33].mxu0  ;;  %5327 = vst.msk [vmem:[#allocation2 + $0xd8] sm:$0xff] %vm5313_vm8, %v5292_v6 }
 0x615   : > { %v5527_v44 = vpop.f32.mrb[34].mxu0 }
 0x616   : > { %v5683_v38 = vmul.f32 %v5525_v43, %v5525_v43  ;;  %v5528_v24 = vadd.f32 %v14216_v59, %v5527_v44  ;;  %v5529_v53 = vpop.f32.mrb[35].mxu0  ;;  %v4845_v31 = vpop.permute.xlu1 %4844  ;;  %v5651_v51 = vmul.f32 0.5, %v5525_v43  ;;  %v10228_v44 = vld [vmem:[#allocation16 + $0x10] sm:$0xff]  }
 0x617   : > { %v5038_v5 = vpop.permute.xlu0 %5037  ;;  %7375 = vmatpush1.bf16.msra.mxu1 %v10228_v44 }
 0x618   : > { %v5715_v20 = vmul.f32 %v5683_v38, %v5525_v43  ;;  %v5684_v23 = vmul.f32 %v5528_v24, %v5528_v24  ;;  %5071 = vst.msk [vmem:[#allocation2 + $0xf8] sm:$0xff] %vm5055_vm6, %v5038_v5  ;;  %v5652_v32 = vmul.f32 0.5, %v5528_v24  ;;  %7376 = vmatprep.subr.bf16.mxu1 %v10946_v21  ;;  %vm6524_vm6 = vcmask 261344  }
 0x61a   : > { %v5747_v29 = vmul.f32 0.044715, %v5715_v20  ;;  %v5716_v63 = vmul.f32 %v5684_v23, %v5528_v24 }
 0x61b   : > { %v5357_v61 = vld [vmem:[#allocation2 + $0xd8] sm:$0xff]  ;;  %v5167_v55 = vpop.permute.xlu0 %5166 }
 0x61c   : > { %v5779_v30 = vadd.f32 %v5747_v29, %v5525_v43  ;;  %v5748_v56 = vmul.f32 0.044715, %v5716_v63  ;;  %9798 = vmatprep.mubr.msk.bf16.mxu1 %vm5441_vm10, %v5357_v61  ;;  %5200 = vst.msk [vmem:[#allocation2 + $0xf8] sm:$0xff] %vm5184_vm7, %v5167_v55  ;;  %v10229_v63 = vld [vmem:[#allocation16 + $0x18] sm:$0xff]   ;;  %vm6653_vm7 = vcmask 294144  }
 0x61d   : > { %5627 = vmatmul.mubr.bf16.gmra.mrb[48].mxu1 %v5356_v48 }
 0x61e   : > { %v5811_v49 = vmul.f32 0.7978846, %v5779_v30  ;;  %v5780_v4 = vadd.f32 %v5748_v56, %v5528_v24  ;;  %9799 = vmatprep.mubr.msk.bf16.mxu1 %vm5441_vm10, %v5359_v42  ;;  %7377 = vmatpush1.bf16.msra.mxu1 %v10229_v63 }
 0x61f   : > { %v4329_v7 = vpop.permute.xlu0 %4328  ;;  %7378 = vmatprep.subr.bf16.mxu1 %v10946_v21 }
 0x620   : > { %10380 = vtanh.f32 %v5811_v49  ;;  %v5812_v0 = vmul.f32 0.7978846, %v5780_v4  ;;  %4362 = vst.msk [vmem:[#allocation2 + $0xf0] sm:$0xff] %vm4346_vm11, %v4329_v7  ;;  %vm6266_vm11 = vcmask 195744  }
 0x621   : > { %4491 = vst.msk [vmem:[#allocation2 + $0xf0] sm:$0xff] %vm4475_vm3, %v4458_v8  ;;  %vm6395_vm3 = vcmask 228544  }
 0x622   : > { %10382 = vtanh.f32 %v5812_v0  ;;  %4620 = vst.msk [vmem:[#allocation2 + $0xf0] sm:$0xff] %vm4604_vm5, %v4587_v62  ;;  %vm7366_vm5 = vcmask 1041408  }
 0x623   : > { %4749 = vst.msk [vmem:[#allocation2 + $0xf0] sm:$0xff] %vm4733_vm9, %v4716_v19  ;;  %v5296_v52 = vpop.permute.xlu0 %5295  ;;  %vm6911_vm9 = vcmask 359744  }
 0x624   : > { %5329 = vst.msk [vmem:[#allocation2 + $0xf8] sm:$0xff] %vm5313_vm8, %v5296_v52  ;;  %v6219_v6 = vpop.permute.xlu1 %6218  ;;  %vm6782_vm8 = vcmask 326944  }
 0x625   : > { %4878 = vst.msk [vmem:[#allocation2 + $0xf0] sm:$0xff] %vm4862_vm4, %v4845_v31  ;;  %5635 = vmatmul.mubr.bf16.gmra.mrb[52].mxu1 %v5358_v58  ;;  %vm6137_vm4 = vcmask 162944  }
 0x627   : > { %v6090_v34 = vpop.permute.xlu0 %6089 }
 0x628   : > { %6138 = vst.msk [vmem:[#allocation2 + $0x8] sm:$0xff] %vm6137_vm4, %v6090_v34 }
 0x629   : > { %6267 = vst.msk [vmem:[#allocation2 + $0x8] sm:$0xff] %vm6266_vm11, %v6219_v6 }
 0x62a   : > { %v10381_v54 = vpop.eup %10380 }
 0x62b   : > { %v5875_v45 = vadd.f32 1.0, %v10381_v54  ;;  %v5532_v47 = vpop.f32.mrb[36].mxu0  ;;  %v5361_v33 = vld [vmem:[#allocation2 + $0xf8] sm:$0xff]  ;;  %v6348_v38 = vpop.permute.xlu0 %6347 }
 0x62c   : > { %v10383_v11 = vpop.eup %10382  ;;  %v14234_v35 = vadd.f32 %v14216_v59, %v5532_v47  ;;  %v5534_v19 = vpop.f32.mrb[37].mxu0  ;;  %v5360_v57 = vld [vmem:[#allocation2 + $0xf0] sm:$0xff]  ;;  %9800 = vmatprep.mubr.msk.bf16.mxu1 %vm5441_vm10, %v5361_v33  ;;  %6396 = vst.msk [vmem:[#allocation2 + $0x8] sm:$0xff] %vm6395_vm3, %v6348_v38  ;;  %v10230_v54 = vld [vmem:[#allocation16 + $0x20] sm:$0xff]   ;;  %vm7040_vm10 = vcmask 392544  }
 0x62d   : > { %v5907_v50 = vmul.f32 %v5875_v45, %v5651_v51  ;;  %v5876_v37 = vadd.f32 1.0, %v10383_v11  ;;  %v5535_v40 = vpop.f32.mrb[38].mxu0  ;;  %5643 = vmatmul.mubr.bf16.gmra.mrb[56].mxu1 %v5360_v57  ;;  %v10232_v57 = vld [vmem:[#allocation16 + $0x30] sm:$0xff]  }
 0x62e   : > { %v5685_v26 = vmul.f32 %v14234_v35, %v14234_v35  ;;  %v14241_v60 = vadd.f32 %v14216_v59, %v5535_v40  ;;  %v5537_v27 = vpop.f32.mrb[39].mxu0  ;;  %7379 = vmatpush1.bf16.msra.mxu1 %v10230_v54 }
 0x62f   : > { %5993 = vst.msk [vmem:[#allocation3 + $0x19] sm:$0xff] %vm2374_vm12, %v5907_v50  ;;  %v5908_v46 = vmul.f32 %v5876_v37, %v5652_v32  ;;  %7380 = vmatprep.subr.bf16.mxu1 %v10946_v21  ;;  %v10231_v50 = vld [vmem:[#allocation16 + $0x28] sm:$0xff]  }
 0x630   : > { %v5717_v43 = vmul.f32 %v5685_v26, %v14234_v35  ;;  %v5686_v28 = vmul.f32 %v14241_v60, %v14241_v60  ;;  %v5654_v6 = vmul.f32 0.5, %v14241_v60 }
 0x631   : > { %5994 = vst.msk [vmem:[#allocation3 + $0x21] sm:$0xff] %vm2374_vm12, %v5908_v46  ;;  %v5653_v46 = vmul.f32 0.5, %v14234_v35 }
 0x632   : > { %v5749_v24 = vmul.f32 0.044715, %v5717_v43  ;;  %v5718_v53 = vmul.f32 %v5686_v28, %v14241_v60  ;;  %7381 = vmatpush1.bf16.msra.mxu1 %v10231_v50  ;;  %v10233_v43 = vld [vmem:[#allocation16 + $0x38] sm:$0xff]  }
 0x633   : > { %v5540_v8 = vpop.f32.mrb[40].mxu0  ;;  %7382 = vmatprep.subr.bf16.mxu1 %v10946_v21 }
 0x634   : > { %v5781_v20 = vadd.f32 %v5749_v24, %v14234_v35  ;;  %v5750_v23 = vmul.f32 0.044715, %v5718_v53  ;;  %v14254_v5 = vadd.f32 %v14216_v59, %v5540_v8  ;;  %v5542_v29 = vpop.f32.mrb[41].mxu0  ;;  %v10234_v35 = vld [vmem:[#allocation16 + $0x40] sm:$0xff]  }
 0x635   : > { %v5543_v30 = vpop.f32.mrb[42].mxu0 }
 0x636   : > { %v5813_v56 = vmul.f32 0.7978846, %v5781_v20  ;;  %v5782_v61 = vadd.f32 %v5750_v23, %v14241_v60  ;;  %v5687_v55 = vmul.f32 %v14254_v5, %v14254_v5  ;;  %v5545_v62 = vpop.f32.mrb[43].mxu0  ;;  %v6541_v42 = vld [vmem:[#allocation3 + $0x19] sm:$0xff]  ;;  %v14261_v4 = vadd.f32 %v14216_v59, %v5543_v30  ;;  %7383 = vmatpush1.bf16.msra.mxu1 %v10232_v57  ;;  %v10235_v23 = vld [vmem:[#allocation16 + $0x48] sm:$0xff]  }
 0x637   : > { %v6412_v49 = vld [vmem:[#allocation3 + $0x18] sm:$0xff]  ;;  %7384 = vmatprep.subr.bf16.mxu1 %v10946_v21  ;;  %v5655_v53 = vmul.f32 0.5, %v14254_v5 }
 0x638   : > { %v6542_v48 = vld [vmem:[#allocation3 + $0x21] sm:$0xff]  ;;  %10384 = vtanh.f32 %v5813_v56  ;;  %v5814_v31 = vmul.f32 0.7978846, %v5782_v61  ;;  %v5719_v58 = vmul.f32 %v5687_v55, %v14254_v5  ;;  %v5688_v51 = vmul.f32 %v14261_v4, %v14261_v4 }
 0x639   : > { %v6413_v0 = vld [vmem:[#allocation3 + $0x20] sm:$0xff]  ;;  %v6573_v52 = vpack.c.bf16 %v6542_v48, %v6541_v42  ;;  %v5656_v56 = vmul.f32 0.5, %v14261_v4 }
 0x63a   : > { %v6670_v7 = vld [vmem:[#allocation3 + $0x1a] sm:$0xff]  ;;  %v6671_v39 = vld [vmem:[#allocation3 + $0x22] sm:$0xff]  ;;  %v6444_v45 = vpack.c.bf16 %v6413_v0, %v6412_v49  ;;  %10386 = vtanh.f32 %v5814_v31  ;;  %v5751_v11 = vmul.f32 0.044715, %v5719_v58  ;;  %v5720_v47 = vmul.f32 %v5688_v51, %v14261_v4  ;;  %7385 = vmatpush1.bf16.msra.mxu1 %v10233_v43  ;;  %v10236_v51 = vld [vmem:[#allocation16 + $0x50] sm:$0xff]  }
 0x63b   : > { %7822 = vst.msk [vmem:[#allocation3 + $0x18] sm:$0xff] %vm573_vm0, %v15980_v25  ;;  %7823 = vst.msk [vmem:[#allocation3 + $0x20] sm:$0xff] %vm573_vm0, %v15980_v25  ;;  %6605 = vrot.lane.b32.xlu0 %v6573_v52, %s15991_s22  ;;  %v6702_v37 = vpack.c.bf16 %v6671_v39, %v6670_v7  ;;  %7386 = vmatprep.subr.bf16.mxu1 %v10946_v21 }
 0x63c   : > { %7824 = vst.msk [vmem:[#allocation3 + $0x28] sm:$0x3] %vm576_vm1, %v15980_v25  ;;  %6476 = vrot.lane.b32.xlu1 %v6444_v45, %s10952_s13  ;;  %v5783_v34 = vadd.f32 %v5751_v11, %v14254_v5  ;;  %v5752_v32 = vmul.f32 0.044715, %v5720_v47 }
 0x63e   : > { %v5815_v19 = vmul.f32 0.7978846, %v5783_v34  ;;  %v5784_v33 = vadd.f32 %v5752_v32, %v14261_v4  ;;  %7387 = vmatpush1.bf16.msra.mxu1 %v10234_v35  ;;  %v10237_v34 = vld [vmem:[#allocation16 + $0x58] ss:$0 sps:$4 sm:$0x33]  }
 0x63f   : > { %6091 = vrot.lane.b32.xlu0 %v6444_v45, %s10927_s26  ;;  %7388 = vmatprep.subr.bf16.mxu1 %v10946_v21  ;;  %v7368_v57 = vsel %vm7366_vm5, %v10237_v34, 0  ;;  %vm7169_vm5 = vcmask 425344  }
 0x640   : > { %6734 = vrot.lane.b32.xlu1 %v6702_v37, %s10953_s25  ;;  %10388 = vtanh.f32 %v5815_v19  ;;  %v5816_v22 = vmul.f32 0.7978846, %v5784_v33 }
 0x642   : > { %v10385_v40 = vpop.eup %10384  ;;  %10390 = vtanh.f32 %v5816_v22  ;;  %7389 = vmatpush1.bf16.msra.mxu1 %v10235_v23 }
 0x643   : > { %6220 = vrot.lane.b32.xlu0 %v6573_v52, %s10951_s12  ;;  %v5877_v26 = vadd.f32 1.0, %v10385_v40  ;;  %7390 = vmatprep.subr.bf16.mxu1 %v10946_v21 }
 0x644   : > { %6349 = vrot.lane.b32.xlu1 %v6702_v37, %s15989_s30  ;;  %v10387_v27 = vpop.eup %10386 }
 0x645   : > { %v5909_v28 = vmul.f32 %v5877_v26, %v5653_v46  ;;  %v5878_v44 = vadd.f32 1.0, %v10387_v27 }
 0x646   : > { %7391 = vmatpush1.bf16.msra.mxu1 %v10236_v51 }
 0x647   : > { %5995 = vst.msk [vmem:[#allocation3 + $0x31] sm:$0xff] %vm2374_vm12, %v5909_v28  ;;  %v5910_v38 = vmul.f32 %v5878_v44, %v5654_v6  ;;  %7392 = vmatprep.subr.bf16.mxu1 %v10946_v21 }
 0x649   : > { %5996 = vst.msk [vmem:[#allocation3 + $0x39] sm:$0xff] %vm2374_vm12, %v5910_v38 }
 0x64a   : > { %v10389_v24 = vpop.eup %10388  ;;  %7393 = vmatpush1.bf16.msra.mxu1 %v7368_v57 }
 0x64b   : > { %v5879_v8 = vadd.f32 1.0, %v10389_v24 }
 0x64c   : > { %v10391_v60 = vpop.eup %10390 }
 0x64d   : > { %v5548_v20 = vpop.f32.mrb[44].mxu0  ;;  %v5911_v29 = vmul.f32 %v5879_v8, %v5655_v53  ;;  %v5880_v61 = vadd.f32 1.0, %v10391_v60 }
 0x64e   : > { %v14293_v63 = vadd.f32 %v14216_v59, %v5548_v20  ;;  %v5550_v30 = vpop.f32.mrb[45].mxu0  ;;  %v6799_v49 = vld [vmem:[#allocation3 + $0x30] sm:$0xff] }
 0x64f   : > { %v5551_v55 = vpop.f32.mrb[46].mxu0  ;;  %5997 = vst.msk [vmem:[#allocation3 + $0x49] sm:$0xff] %vm2374_vm12, %v5911_v29  ;;  %v6928_v48 = vld [vmem:[#allocation3 + $0x31] sm:$0xff]  ;;  %v5912_v0 = vmul.f32 %v5880_v61, %v5656_v56 }
 0x650   : > { %v5689_v5 = vmul.f32 %v14293_v63, %v14293_v63  ;;  %v14300_v62 = vadd.f32 %v14216_v59, %v5551_v55  ;;  %v5553_v42 = vpop.f32.mrb[47].mxu0  ;;  %v6800_v7 = vld [vmem:[#allocation3 + $0x38] sm:$0xff] }
 0x651   : > { %v6929_v31 = vld [vmem:[#allocation3 + $0x39] sm:$0xff]  ;;  %v6831_v39 = vpack.c.bf16 %v6800_v7, %v6799_v49  ;;  %5998 = vst.msk [vmem:[#allocation3 + $0x51] sm:$0xff] %vm2374_vm12, %v5912_v0 }
 0x652   : > { %v7057_v58 = vld [vmem:[#allocation3 + $0x32] sm:$0xff]  ;;  %v5721_v4 = vmul.f32 %v5689_v5, %v14293_v63  ;;  %v5690_v52 = vmul.f32 %v14300_v62, %v14300_v62  ;;  %v7058_v54 = vld [vmem:[#allocation3 + $0x3a] sm:$0xff]  ;;  %v6960_v45 = vpack.c.bf16 %v6929_v31, %v6928_v48  ;;  %v5657_v48 = vmul.f32 0.5, %v14293_v63 }
 0x653   : > { %7825 = vst.msk [vmem:[#allocation3 + $0x30] sm:$0xff] %vm573_vm0, %v15980_v25  ;;  %7826 = vst.msk [vmem:[#allocation3 + $0x38] sm:$0xff] %vm573_vm0, %v15980_v25  ;;  %6863 = vrot.lane.b32.xlu0 %v6831_v39, %s15990_s16  ;;  %v7089_v40 = vpack.c.bf16 %v7058_v54, %v7057_v58 }
 0x654   : > { %7827 = vst.msk [vmem:[#allocation3 + $0x40] sm:$0x3] %vm576_vm1, %v15980_v25  ;;  %v5753_v11 = vmul.f32 0.044715, %v5721_v4  ;;  %v5722_v47 = vmul.f32 %v5690_v52, %v14300_v62  ;;  %6992 = vrot.lane.b32.xlu1 %v6960_v45, %s10954_s14  ;;  %v5658_v4 = vmul.f32 0.5, %v14300_v62 }
 0x655   : > { %v5556_v50 = vpop.f32.mrb[48].mxu0 }
 0x656   : > { %v5785_v32 = vadd.f32 %v5753_v11, %v14293_v63  ;;  %v5754_v37 = vmul.f32 0.044715, %v5722_v47  ;;  %v5557_v19 = vadd.f32 %v14216_v59, %v5556_v50  ;;  %v5558_v33 = vpop.f32.mrb[49].mxu0  ;;  %v6930_v6 = vld [vmem:[#allocation3 + $0x49] sm:$0xff] }
 0x657   : > { %v5559_v22 = vpop.f32.mrb[50].mxu0  ;;  %6478 = vrot.lane.b32.xlu0 %v6831_v39, %s10952_s13  ;;  %v6801_v44 = vld [vmem:[#allocation3 + $0x48] sm:$0xff] }
 0x658   : > { %v5817_v46 = vmul.f32 0.7978846, %v5785_v32  ;;  %v5786_v26 = vadd.f32 %v5754_v37, %v14300_v62  ;;  %v5691_v27 = vmul.f32 %v5557_v19, %v5557_v19  ;;  %v5561_v43 = vpop.f32.mrb[51].mxu0  ;;  %v5560_v28 = vadd.f32 %v14216_v59, %v5559_v22  ;;  %7121 = vrot.lane.b32.xlu1 %v7089_v40, %s15992_s24  ;;  %v6931_v24 = vld [vmem:[#allocation3 + $0x51] sm:$0xff] }
 0x659   : > { %v7059_v53 = vld [vmem:[#allocation3 + $0x4a] sm:$0xff]  ;;  %v7060_v8 = vld [vmem:[#allocation3 + $0x52] sm:$0xff]  ;;  %v6961_v5 = vpack.c.bf16 %v6931_v24, %v6930_v6  ;;  %v5659_v51 = vmul.f32 0.5, %v5557_v19 }
 0x65a   : > { %10392 = vtanh.f32 %v5817_v46  ;;  %v5818_v38 = vmul.f32 0.7978846, %v5786_v26  ;;  %v5723_v35 = vmul.f32 %v5691_v27, %v5557_v19  ;;  %v5692_v20 = vmul.f32 %v5560_v28, %v5560_v28  ;;  %v6802_v23 = vld [vmem:[#allocation3 + $0x50] sm:$0xff]  ;;  %7830 = vst.msk [vmem:[#allocation3 + $0x58] sm:$0x3] %vm576_vm1, %v15980_v25 }
 0x65b   : > { %7828 = vst.msk [vmem:[#allocation3 + $0x48] sm:$0xff] %vm573_vm0, %v15980_v25  ;;  %6736 = vrot.lane.b32.xlu0 %v7089_v40, %s10953_s25  ;;  %7829 = vst.msk [vmem:[#allocation3 + $0x50] sm:$0xff] %vm573_vm0, %v15980_v25  ;;  %v7090_v31 = vpack.c.bf16 %v7060_v8, %v7059_v53  ;;  %v6832_v54 = vpack.c.bf16 %v6802_v23, %v6801_v44  ;;  %v5660_v47 = vmul.f32 0.5, %v5560_v28 }
 0x65c   : > { %10394 = vtanh.f32 %v5818_v38  ;;  %v5755_v60 = vmul.f32 0.044715, %v5723_v35  ;;  %v5724_v29 = vmul.f32 %v5692_v20, %v5560_v28  ;;  %6607 = vrot.lane.b32.xlu1 %v6960_v45, %s15991_s22 }
 0x65e   : > { %v5787_v30 = vadd.f32 %v5755_v60, %v5557_v19  ;;  %v5756_v56 = vmul.f32 0.044715, %v5724_v29 }
 0x65f   : > { %6351 = vrot.lane.b32.xlu0 %v7089_v40, %s15989_s30 }
 0x660   : > { %v5819_v61 = vmul.f32 0.7978846, %v5787_v30  ;;  %v5788_v55 = vadd.f32 %v5756_v56, %v5560_v28  ;;  %6093 = vrot.lane.b32.xlu1 %v6831_v39, %s10927_s26 }
 0x662   : > { %10396 = vtanh.f32 %v5819_v61  ;;  %v5820_v42 = vmul.f32 0.7978846, %v5788_v55 }
 0x663   : > { %6994 = vrot.lane.b32.xlu0 %v6961_v5, %s10954_s14 }
 0x664   : > { %v10393_v49 = vpop.eup %10392  ;;  %10398 = vtanh.f32 %v5820_v42  ;;  %6222 = vrot.lane.b32.xlu1 %v6960_v45, %s10951_s12 }
 0x665   : > { %v5881_v0 = vadd.f32 1.0, %v10393_v49 }
 0x666   : > { %v10395_v7 = vpop.eup %10394 }
 0x667   : > { %v5913_v58 = vmul.f32 %v5881_v0, %v5657_v48  ;;  %v5882_v52 = vadd.f32 1.0, %v10395_v7  ;;  %7123 = vrot.lane.b32.xlu0 %v7090_v31, %s15992_s24 }
 0x668   : > { %6865 = vrot.lane.b32.xlu1 %v6832_v54, %s15990_s16 }
 0x669   : > { %5999 = vst.msk [vmem:[#allocation3 + $0x61] sm:$0xff] %vm2374_vm12, %v5913_v58  ;;  %v5914_v39 = vmul.f32 %v5882_v52, %v5658_v4 }
 0x66b   : > { %6000 = vst.msk [vmem:[#allocation3 + $0x69] sm:$0xff] %vm2374_vm12, %v5914_v39  ;;  %6609 = vrot.lane.b32.xlu0 %v6961_v5, %s15991_s22 }
 0x66c   : > { %v10397_v63 = vpop.eup %10396  ;;  %6480 = vrot.lane.b32.xlu1 %v6832_v54, %s10952_s13 }
 0x66d   : > { %v5883_v45 = vadd.f32 1.0, %v10397_v63 }
 0x66e   : > { %v10399_v11 = vpop.eup %10398 }
 0x66f   : > { %v5915_v62 = vmul.f32 %v5883_v45, %v5659_v51  ;;  %v5884_v34 = vadd.f32 1.0, %v10399_v11  ;;  %6095 = vrot.lane.b32.xlu0 %v6832_v54, %s10927_s26 }
 0x670   : > { %6738 = vrot.lane.b32.xlu1 %v7090_v31, %s10953_s25  ;;  %v5564_v50 = vpop.f32.mrb[52].mxu0  ;;  %v6803_v19 = vld [vmem:[#allocation3 + $0x60] sm:$0xff] }
 0x671   : > { %6001 = vst.msk [vmem:[#allocation3 + $0x79] sm:$0xff] %vm2374_vm12, %v5915_v62  ;;  %v5916_v32 = vmul.f32 %v5884_v34, %v5660_v47  ;;  %v14347_v37 = vadd.f32 %v14216_v59, %v5564_v50  ;;  %v5566_v33 = vpop.f32.mrb[53].mxu0  ;;  %v6932_v57 = vld [vmem:[#allocation3 + $0x61] sm:$0xff] }
 0x672   : > { %v7061_v22 = vld [vmem:[#allocation3 + $0x62] sm:$0xff]  ;;  %v5567_v40 = vpop.f32.mrb[54].mxu0  ;;  %v7062_v27 = vld [vmem:[#allocation3 + $0x6a] sm:$0xff] }
 0x673   : > { %v6804_v46 = vld [vmem:[#allocation3 + $0x68] sm:$0xff]  ;;  %7831 = vst.msk [vmem:[#allocation3 + $0x60] sm:$0xff] %vm573_vm0, %v15980_v25  ;;  %v5693_v43 = vmul.f32 %v14347_v37, %v14347_v37  ;;  %v14355_v28 = vadd.f32 %v14216_v59, %v5567_v40  ;;  %6224 = vrot.lane.b32.xlu0 %v6961_v5, %s10951_s12  ;;  %v5569_v6 = vpop.f32.mrb[55].mxu0  ;;  %v7091_v5 = vpack.c.bf16 %v7062_v27, %v7061_v22 }
 0x674   : > { %v6933_v26 = vld [vmem:[#allocation3 + $0x69] sm:$0xff]  ;;  %6002 = vst.msk [vmem:[#allocation3 + $0x81] sm:$0xff] %vm2374_vm12, %v5916_v32  ;;  %6353 = vrot.lane.b32.xlu1 %v7090_v31, %s15989_s30  ;;  %v6833_v35 = vpack.c.bf16 %v6804_v46, %v6803_v19  ;;  %v5661_v19 = vmul.f32 0.5, %v14347_v37 }
 0x675   : > { %7833 = vst.msk [vmem:[#allocation3 + $0x70] sm:$0x3] %vm576_vm1, %v15980_v25  ;;  %v5725_v44 = vmul.f32 %v5693_v43, %v14347_v37  ;;  %v5694_v38 = vmul.f32 %v14355_v28, %v14355_v28  ;;  %v6962_v24 = vpack.c.bf16 %v6933_v26, %v6932_v57  ;;  %v5662_v26 = vmul.f32 0.5, %v14355_v28 }
 0x676   : > { %7832 = vst.msk [vmem:[#allocation3 + $0x68] sm:$0xff] %vm573_vm0, %v15980_v25 }
 0x677   : > { %v5757_v53 = vmul.f32 0.044715, %v5725_v44  ;;  %v5726_v8 = vmul.f32 %v5694_v38, %v14355_v28  ;;  %6867 = vrot.lane.b32.xlu0 %v6833_v35, %s15990_s16 }
 0x678   : > { %6996 = vrot.lane.b32.xlu1 %v6962_v24, %s10954_s14  ;;  %v5572_v20 = vpop.f32.mrb[56].mxu0  ;;  %v6934_v56 = vld [vmem:[#allocation3 + $0x79] sm:$0xff] }
 0x679   : > { %v5789_v23 = vadd.f32 %v5757_v53, %v14347_v37  ;;  %v5758_v60 = vmul.f32 0.044715, %v5726_v8  ;;  %v5573_v29 = vadd.f32 %v14216_v59, %v5572_v20  ;;  %v5574_v30 = vpop.f32.mrb[57].mxu0  ;;  %v6805_v61 = vld [vmem:[#allocation3 + $0x78] sm:$0xff] }
 0x67a   : > { %v5575_v55 = vpop.f32.mrb[58].mxu0 }
 0x67b   : > { %v6935_v42 = vld [vmem:[#allocation3 + $0x81] sm:$0xff]  ;;  %v5821_v0 = vmul.f32 0.7978846, %v5789_v23  ;;  %v5790_v7 = vadd.f32 %v5758_v60, %v14355_v28  ;;  %v5695_v31 = vmul.f32 %v5573_v29, %v5573_v29  ;;  %6482 = vrot.lane.b32.xlu0 %v6833_v35, %s10952_s13  ;;  %v5577_v58 = vpop.f32.mrb[59].mxu0  ;;  %v5576_v52 = vadd.f32 %v14216_v59, %v5575_v55 }
 0x67c   : > { %v7063_v49 = vld [vmem:[#allocation3 + $0x7a] sm:$0xff]  ;;  %v7064_v48 = vld [vmem:[#allocation3 + $0x82] sm:$0xff]  ;;  %7125 = vrot.lane.b32.xlu1 %v7091_v5, %s15992_s24  ;;  %v6963_v50 = vpack.c.bf16 %v6935_v42, %v6934_v56  ;;  %v5663_v44 = vmul.f32 0.5, %v5573_v29 }
 0x67d   : > { %v6806_v4 = vld [vmem:[#allocation3 + $0x80] sm:$0xff]  ;;  %7836 = vst.msk [vmem:[#allocation3 + $0x88] sm:$0x3] %vm576_vm1, %v15980_v25  ;;  %10400 = vtanh.f32 %v5821_v0  ;;  %v5822_v54 = vmul.f32 0.7978846, %v5790_v7  ;;  %v5727_v39 = vmul.f32 %v5695_v31, %v5573_v29  ;;  %v5696_v63 = vmul.f32 %v5576_v52, %v5576_v52 }
 0x67e   : > { %7834 = vst.msk [vmem:[#allocation3 + $0x78] sm:$0xff] %vm573_vm0, %v15980_v25  ;;  %7835 = vst.msk [vmem:[#allocation3 + $0x80] sm:$0xff] %vm573_vm0, %v15980_v25  ;;  %v7092_v40 = vpack.c.bf16 %v7064_v48, %v7063_v49  ;;  %v6834_v43 = vpack.c.bf16 %v6806_v4, %v6805_v61  ;;  %v5664_v23 = vmul.f32 0.5, %v5576_v52 }
 0x67f   : > { %10402 = vtanh.f32 %v5822_v54  ;;  %v5759_v51 = vmul.f32 0.044715, %v5727_v39  ;;  %6740 = vrot.lane.b32.xlu0 %v7091_v5, %s10953_s25  ;;  %v5728_v45 = vmul.f32 %v5696_v63, %v5576_v52 }
 0x680   : > { %6611 = vrot.lane.b32.xlu1 %v6962_v24, %s15991_s22 }
 0x681   : > { %v5791_v11 = vadd.f32 %v5759_v51, %v5573_v29  ;;  %v5760_v62 = vmul.f32 0.044715, %v5728_v45 }
 0x683   : > { %v5823_v47 = vmul.f32 0.7978846, %v5791_v11  ;;  %6355 = vrot.lane.b32.xlu0 %v7091_v5, %s15989_s30  ;;  %v5792_v34 = vadd.f32 %v5760_v62, %v5576_v52 }
 0x684   : > { %6097 = vrot.lane.b32.xlu1 %v6833_v35, %s10927_s26 }
 0x685   : > { %10404 = vtanh.f32 %v5823_v47  ;;  %v5824_v32 = vmul.f32 0.7978846, %v5792_v34 }
 0x687   : > { %v10401_v33 = vpop.eup %10400  ;;  %6998 = vrot.lane.b32.xlu0 %v6963_v50, %s10954_s14  ;;  %10406 = vtanh.f32 %v5824_v32 }
 0x688   : > { %v5885_v57 = vadd.f32 1.0, %v10401_v33  ;;  %6226 = vrot.lane.b32.xlu1 %v6962_v24, %s10951_s12 }
 0x689   : > { %v10403_v22 = vpop.eup %10402 }
 0x68a   : > { %v5917_v46 = vmul.f32 %v5885_v57, %v5661_v19  ;;  %v5886_v27 = vadd.f32 1.0, %v10403_v22 }
 0x68b   : > { %7127 = vrot.lane.b32.xlu0 %v7092_v40, %s15992_s24 }
 0x68c   : > { %6003 = vst.msk [vmem:[#allocation3 + $0x91] sm:$0xff] %vm2374_vm12, %v5917_v46  ;;  %v5918_v6 = vmul.f32 %v5886_v27, %v5662_v26  ;;  %6869 = vrot.lane.b32.xlu1 %v6834_v43, %s15990_s16 }
 0x68e   : > { %6004 = vst.msk [vmem:[#allocation3 + $0x99] sm:$0xff] %vm2374_vm12, %v5918_v6  ;;  %v5580_v35 = vpop.f32.mrb[60].mxu0 }
 0x68f   : > { %v10405_v37 = vpop.eup %10404  ;;  %6613 = vrot.lane.b32.xlu0 %v6963_v50, %s15991_s22  ;;  %v14396_v28 = vadd.f32 %v14216_v59, %v5580_v35  ;;  %v5582_v24 = vpop.f32.mrb[61].mxu0 }
 0x690   : > { %v5887_v38 = vadd.f32 1.0, %v10405_v37  ;;  %6484 = vrot.lane.b32.xlu1 %v6834_v43, %s10952_s13  ;;  %v5583_v20 = vpop.f32.mrb[62].mxu0 }
 0x691   : > { %v10407_v53 = vpop.eup %10406  ;;  %v5697_v30 = vmul.f32 %v14396_v28, %v14396_v28  ;;  %v14401_v56 = vadd.f32 %v14216_v59, %v5583_v20  ;;  %v5585_v29 = vpop.f32.mrb[63].mxu0 }
 0x692   : > { %v5919_v8 = vmul.f32 %v5887_v38, %v5663_v44  ;;  %v5888_v60 = vadd.f32 1.0, %v10407_v53  ;;  %v5665_v29 = vmul.f32 0.5, %v14396_v28 }
 0x693   : > { %6099 = vrot.lane.b32.xlu0 %v6834_v43, %s10927_s26  ;;  %v5729_v55 = vmul.f32 %v5697_v30, %v14396_v28  ;;  %v5698_v5 = vmul.f32 %v14401_v56, %v14401_v56  ;;  %v6807_v42 = vld [vmem:[#allocation3 + $0x90] sm:$0xff]  ;;  %v14452_v30 = vpop.permute.xlu1 %6893 }
 0x694   : > { %6005 = vst.msk [vmem:[#allocation3 + $0xa9] sm:$0xff] %vm2374_vm12, %v5919_v8  ;;  %6742 = vrot.lane.b32.xlu1 %v7092_v40, %s10953_s25  ;;  %v5920_v61 = vmul.f32 %v5888_v60, %v5664_v23  ;;  %v6936_v49 = vld [vmem:[#allocation3 + $0x91] sm:$0xff] }
 0x695   : > { %v7065_v48 = vld [vmem:[#allocation3 + $0x92] sm:$0xff]  ;;  %v7066_v31 = vld [vmem:[#allocation3 + $0x9a] sm:$0xff]  ;;  %v5761_v58 = vmul.f32 0.044715, %v5729_v55  ;;  %v5730_v4 = vmul.f32 %v5698_v5, %v14401_v56 }
 0x696   : > { %v6808_v0 = vld [vmem:[#allocation3 + $0x98] sm:$0xff]  ;;  %7837 = vst.msk [vmem:[#allocation3 + $0x90] sm:$0xff] %vm573_vm0, %v15980_v25  ;;  %v5588_v52 = vpop.f32.mrb[64].mxu0  ;;  %v7093_v26 = vpack.c.bf16 %v7066_v31, %v7065_v48 }
 0x697   : > { %v6937_v7 = vld [vmem:[#allocation3 + $0x99] sm:$0xff]  ;;  %6006 = vst.msk [vmem:[#allocation3 + $0xb1] sm:$0xff] %vm2374_vm12, %v5920_v61  ;;  %6228 = vrot.lane.b32.xlu0 %v6963_v50, %s10951_s12  ;;  %v5793_v54 = vadd.f32 %v5761_v58, %v14396_v28  ;;  %v5762_v39 = vmul.f32 0.044715, %v5730_v4  ;;  %v5589_v63 = vadd.f32 %v14216_v59, %v5588_v52  ;;  %v5590_v51 = vpop.f32.mrb[65].mxu0  ;;  %v6835_v45 = vpack.c.bf16 %v6808_v0, %v6807_v42 }
 0x698   : > { %7839 = vst.msk [vmem:[#allocation3 + $0xa0] sm:$0x3] %vm576_vm1, %v15980_v25  ;;  %6357 = vrot.lane.b32.xlu1 %v7092_v40, %s15989_s30  ;;  %v5591_v11 = vpop.f32.mrb[66].mxu0  ;;  %v6964_v62 = vpack.c.bf16 %v6937_v7, %v6936_v49  ;;  %v5666_v42 = vmul.f32 0.5, %v14401_v56 }
 0x699   : > { %7838 = vst.msk [vmem:[#allocation3 + $0x98] sm:$0xff] %vm573_vm0, %v15980_v25  ;;  %v5825_v47 = vmul.f32 0.7978846, %v5793_v54  ;;  %v5794_v34 = vadd.f32 %v5762_v39, %v14401_v56  ;;  %v5699_v50 = vmul.f32 %v5589_v63, %v5589_v63  ;;  %v5593_v32 = vpop.f32.mrb[67].mxu0  ;;  %v14424_v33 = vadd.f32 %v14216_v59, %v5591_v11 }
 0x69a   : > { %v5667_v31 = vmul.f32 0.5, %v5589_v63 }
 0x69b   : > { %6871 = vrot.lane.b32.xlu0 %v6835_v45, %s15990_s16  ;;  %10408 = vtanh.f32 %v5825_v47  ;;  %v5826_v19 = vmul.f32 0.7978846, %v5794_v34  ;;  %v5731_v57 = vmul.f32 %v5699_v50, %v5589_v63  ;;  %v14427_v22 = vld [vmem:[#allocation3 + $0xa9] sm:$0xff]  ;;  %v5700_v46 = vmul.f32 %v14424_v33, %v14424_v33 }
 0x69c   : > { %7000 = vrot.lane.b32.xlu1 %v6964_v62, %s10954_s14  ;;  %v6809_v40 = vld [vmem:[#allocation3 + $0xa8] sm:$0xff] }
 0x69d   : > { %10410 = vtanh.f32 %v5826_v19  ;;  %v5763_v37 = vmul.f32 0.044715, %v5731_v57  ;;  %v5732_v38 = vmul.f32 %v5700_v46, %v14424_v33 }
 0x69e   : > { %v14431_v27 = vld [vmem:[#allocation3 + $0xb1] sm:$0xff] }
 0x69f   : > { %v14433_v43 = vld [vmem:[#allocation3 + $0xaa] sm:$0xff]  ;;  %v14435_v6 = vld [vmem:[#allocation3 + $0xb2] sm:$0xff]  ;;  %6486 = vrot.lane.b32.xlu0 %v6835_v45, %s10952_s13  ;;  %v5795_v24 = vadd.f32 %v5763_v37, %v5589_v63  ;;  %v5764_v53 = vmul.f32 0.044715, %v5732_v38 }
 0x6a0   : > { %v6810_v44 = vld [vmem:[#allocation3 + $0xb0] sm:$0xff]  ;;  %7842 = vst.msk [vmem:[#allocation3 + $0xb8] sm:$0x3] %vm576_vm1, %v15980_v25  ;;  %7129 = vrot.lane.b32.xlu1 %v7093_v26, %s15992_s24 }
 0x6a1   : > { %7840 = vst.msk [vmem:[#allocation3 + $0xa8] sm:$0xff] %vm573_vm0, %v15980_v25  ;;  %v14444_v35 = vpack.c.bf16 %v6810_v44, %v6809_v40  ;;  %7841 = vst.msk [vmem:[#allocation3 + $0xb0] sm:$0xff] %vm573_vm0, %v15980_v25  ;;  %v5827_v8 = vmul.f32 0.7978846, %v5795_v24  ;;  %v5796_v20 = vadd.f32 %v5764_v53, %v14424_v33 }
 0x6a3   : > { %6744 = vrot.lane.b32.xlu0 %v7093_v26, %s10953_s25  ;;  %10412 = vtanh.f32 %v5827_v8  ;;  %v5828_v23 = vmul.f32 0.7978846, %v5796_v20 }
 0x6a4   : > { %6615 = vrot.lane.b32.xlu1 %v6964_v62, %s15991_s22 }
 0x6a5   : > { %v10409_v60 = vpop.eup %10408  ;;  %10414 = vtanh.f32 %v5828_v23 }
 0x6a6   : > { %v5889_v61 = vadd.f32 1.0, %v10409_v60 }
 0x6a7   : > { %6359 = vrot.lane.b32.xlu0 %v7093_v26, %s15989_s30  ;;  %v10411_v55 = vpop.eup %10410 }
 0x6a8   : > { %6101 = vrot.lane.b32.xlu1 %v6835_v45, %s10927_s26  ;;  %v5921_v5 = vmul.f32 %v5889_v61, %v5665_v29  ;;  %v5890_v49 = vadd.f32 1.0, %v10411_v55 }
 0x6aa   : > { %6007 = vst.msk [vmem:[#allocation3 + $0xc1] sm:$0xff] %vm2374_vm12, %v5921_v5  ;;  %v5922_v48 = vmul.f32 %v5890_v49, %v5666_v42 }
 0x6ac   : > { %6230 = vrot.lane.b32.xlu1 %v6964_v62, %s10951_s12  ;;  %6008 = vst.msk [vmem:[#allocation3 + $0xc9] sm:$0xff] %vm2374_vm12, %v5922_v48  ;;  %v5668_v62 = vmul.f32 0.5, %v14424_v33 }
 0x6ad   : > { %v6606_v0 = vpop.permute.xlu0 %6605  ;;  %v10413_v28 = vpop.eup %10412 }
 0x6ae   : > { %v6477_v7 = vpop.permute.xlu1 %6476  ;;  %v5891_v56 = vadd.f32 1.0, %v10413_v28  ;;  %v5596_v4 = vpop.f32.mrb[32].mxu1 }
 0x6af   : > { %6525 = vst.msk [vmem:[#allocation2 + $0x8] sm:$0xff] %vm6524_vm6, %v6477_v7  ;;  %v14464_v52 = vadd.f32 %v14216_v59, %v5596_v4  ;;  %v5598_v39 = vpop.f32.mrb[33].mxu1  ;;  %v10415_v51 = vpop.eup %10414  ;;  %v14500_v7 = vld [vmem:[#allocation15] ss:$0 sm:$0xff] }
 0x6b0   : > { %6654 = vst.msk [vmem:[#allocation2 + $0x8] sm:$0xff] %vm6653_vm7, %v6606_v0  ;;  %v5923_v45 = vmul.f32 %v5891_v56, %v5667_v31  ;;  %v5599_v11 = vpop.f32.mrb[34].mxu1  ;;  %v5892_v47 = vadd.f32 1.0, %v10415_v51 }
 0x6b1   : > { %v6092_v58 = vpop.permute.xlu0 %6091  ;;  %v5701_v63 = vmul.f32 %v14464_v52, %v14464_v52  ;;  %v14471_v34 = vadd.f32 %v14216_v59, %v5599_v11  ;;  %v5601_v50 = vpop.f32.mrb[35].mxu1  ;;  %v14474_v19 = vld [vmem:[#allocation3 + $0xc1] sm:$0xff] }
 0x6b2   : > { %6139 = vst.msk [vmem:[#allocation2 + $0x18] sm:$0xff] %vm6137_vm4, %v6092_v58  ;;  %v6735_v54 = vpop.permute.xlu1 %6734  ;;  %v5924_v57 = vmul.f32 %v5892_v47, %v5668_v62  ;;  %v6811_v26 = vld [vmem:[#allocation3 + $0xc0] sm:$0xff] }
 0x6b3   : > { %6783 = vst.msk [vmem:[#allocation2 + $0x8] sm:$0xff] %vm6782_vm8, %v6735_v54  ;;  %v5733_v40 = vmul.f32 %v5701_v63, %v14464_v52  ;;  %v5702_v46 = vmul.f32 %v14471_v34, %v14471_v34  ;;  %v6812_v37 = vld [vmem:[#allocation3 + $0xc8] sm:$0xff] }
 0x6b4   : > { %6009 = vst.msk [vmem:[#allocation3 + $0xd9] sm:$0xff] %vm2374_vm12, %v5923_v45  ;;  %v14480_v44 = vld [vmem:[#allocation3 + $0xc2] sm:$0xff]  ;;  %v14485_v24 = vpack.c.bf16 %v6812_v37, %v6811_v26  ;;  %v14487_v53 = vld [vmem:[#allocation3 + $0xca] sm:$0xff]  ;;  %6010 = vst.msk [vmem:[#allocation3 + $0xe1] sm:$0xff] %vm2374_vm12, %v5924_v57  ;;  %v5669_v37 = vmul.f32 0.5, %v14464_v52 }
 0x6b5   : > { %v6221_v32 = vpop.permute.xlu0 %6220  ;;  %v14483_v38 = vld [vmem:[#allocation3 + $0xc9] sm:$0xff]  ;;  %7843 = vst.msk [vmem:[#allocation3 + $0xc0] sm:$0xff] %vm573_vm0, %v15980_v25  ;;  %v5765_v8 = vmul.f32 0.044715, %v5733_v40  ;;  %v5734_v20 = vmul.f32 %v5702_v46, %v14471_v34 }
 0x6b6   : > { %6268 = vst.msk [vmem:[#allocation2 + $0x18] sm:$0xff] %vm6266_vm11, %v6221_v32  ;;  %v6350_v33 = vpop.permute.xlu1 %6349  ;;  %v5604_v23 = vpop.f32.mrb[36].mxu1 }
 0x6b7   : > { %6397 = vst.msk [vmem:[#allocation2 + $0x18] sm:$0xff] %vm6395_vm3, %v6350_v33  ;;  %v5797_v60 = vadd.f32 %v5765_v8, %v14464_v52  ;;  %v5766_v29 = vmul.f32 0.044715, %v5734_v20  ;;  %v5605_v61 = vadd.f32 %v14216_v59, %v5604_v23  ;;  %v5606_v55 = vpop.f32.mrb[37].mxu1 }
 0x6b8   : > { %7845 = vst.msk [vmem:[#allocation3 + $0xd0] sm:$0x3] %vm576_vm1, %v15980_v25  ;;  %v5607_v5 = vpop.f32.mrb[38].mxu1 }
 0x6b9   : > { %7844 = vst.msk [vmem:[#allocation3 + $0xc8] sm:$0xff] %vm573_vm0, %v15980_v25  ;;  %v5829_v42 = vmul.f32 0.7978846, %v5797_v60  ;;  %v5798_v49 = vadd.f32 %v5766_v29, %v14471_v34  ;;  %v5703_v48 = vmul.f32 %v5605_v61, %v5605_v61  ;;  %v5609_v0 = vpop.f32.mrb[39].mxu1  ;;  %v5608_v28 = vadd.f32 %v14500_v7, %v5607_v5 }
 0x6ba   : > { %v5670_v29 = vmul.f32 0.5, %v14471_v34  ;;  %v5671_v0 = vmul.f32 0.5, %v5605_v61 }
 0x6bb   : > { %10416 = vtanh.f32 %v5829_v42  ;;  %v5830_v31 = vmul.f32 0.7978846, %v5798_v49  ;;  %v5735_v56 = vmul.f32 %v5703_v48, %v5605_v61  ;;  %v14503_v58 = vld [vmem:[#allocation3 + $0xd9] sm:$0xff]  ;;  %v5704_v54 = vmul.f32 %v5608_v28, %v5608_v28  ;;  %v14505_v39 = vld [vmem:[#allocation3 + $0xe1] sm:$0xff] }
 0x6bc   : > { %v6813_v4 = vld [vmem:[#allocation3 + $0xd8] sm:$0xff]  ;;  %v14509_v51 = vld [vmem:[#allocation3 + $0xe2] sm:$0xff] }
 0x6bd   : > { %v14507_v59 = vld [vmem:[#allocation3 + $0xda] sm:$0xff]  ;;  %10418 = vtanh.f32 %v5830_v31  ;;  %v5767_v45 = vmul.f32 0.044715, %v5735_v56  ;;  %7848 = vst.msk [vmem:[#allocation3 + $0xe8] sm:$0x3] %vm576_vm1, %v15980_v25  ;;  %v5736_v62 = vmul.f32 %v5704_v54, %v5608_v28 }
 0x6be   : > { %v6814_v11 = vld [vmem:[#allocation3 + $0xe0] sm:$0xff]  ;;  %7846 = vst.msk [vmem:[#allocation3 + $0xd8] sm:$0xff] %vm573_vm0, %v15980_v25 }
 0x6bf   : > { %v14515_v47 = vpack.c.bf16 %v6814_v11, %v6813_v4  ;;  %7847 = vst.msk [vmem:[#allocation3 + $0xe0] sm:$0xff] %vm573_vm0, %v15980_v25  ;;  %v5799_v63 = vadd.f32 %v5767_v45, %v5605_v61  ;;  %v5768_v50 = vmul.f32 0.044715, %v5736_v62 }
 0x6c1   : > { %v5831_v32 = vmul.f32 0.7978846, %v5799_v63  ;;  %v5800_v57 = vadd.f32 %v5768_v50, %v5608_v28 }
 0x6c3   : > { %10420 = vtanh.f32 %v5831_v32  ;;  %v5832_v46 = vmul.f32 0.7978846, %v5800_v57  ;;  %v5672_v32 = vmul.f32 0.5, %v5608_v28 }
 0x6c5   : > { %v6864_v40 = vpop.permute.xlu0 %6863  ;;  %v10417_v26 = vpop.eup %10416  ;;  %10422 = vtanh.f32 %v5832_v46 }
 0x6c6   : > { %6912 = vst.msk [vmem:[#allocation2 + $0x8] sm:$0xff] %vm6911_vm9, %v6864_v40  ;;  %v6993_v33 = vpop.permute.xlu1 %6992  ;;  %v5893_v8 = vadd.f32 1.0, %v10417_v26 }
 0x6c7   : > { %7041 = vst.msk [vmem:[#allocation2 + $0x8] sm:$0xff] %vm7040_vm10, %v6993_v33  ;;  %v10419_v20 = vpop.eup %10418  ;;  %v7186_v33 = vld [vmem:[#allocation2] sm:$0xff] }
 0x6c8   : > { %v5925_v60 = vmul.f32 %v5893_v8, %v5669_v37  ;;  %v5894_v55 = vadd.f32 1.0, %v10419_v20 }
 0x6c9   : > { %v6479_v23 = vpop.permute.xlu0 %6478 }
 0x6ca   : > { %6526 = vst.msk [vmem:[#allocation2 + $0x18] sm:$0xff] %vm6524_vm6, %v6479_v23  ;;  %v7122_v5 = vpop.permute.xlu1 %7121  ;;  %v5926_v42 = vmul.f32 %v5894_v55, %v5670_v29 }
 0x6cb   : > { %7170 = vst.msk [vmem:[#allocation2 + $0x8] sm:$0xff] %vm7169_vm5, %v7122_v5 }
 0x6cc   : > { %6011 = vst.msk [vmem:[#allocation3 + $0xf1] sm:$0xff] %vm2374_vm12, %v5925_v60  ;;  %6012 = vst.msk [vmem:[#allocation3 + $0xf9] sm:$0xff] %vm2374_vm12, %v5926_v42 }
 0x6cd   : > { %v6737_v49 = vpop.permute.xlu0 %6736  ;;  %v10421_v48 = vpop.eup %10420 }
 0x6ce   : > { %v6608_v52 = vpop.permute.xlu1 %6607  ;;  %v5895_v31 = vadd.f32 1.0, %v10421_v48 }
 0x6cf   : > { %6655 = vst.msk [vmem:[#allocation2 + $0x18] sm:$0xff] %vm6653_vm7, %v6608_v52  ;;  %v10423_v45 = vpop.eup %10422 }
 0x6d0   : > { %6784 = vst.msk [vmem:[#allocation2 + $0x18] sm:$0xff] %vm6782_vm8, %v6737_v49  ;;  %v5612_v34 = vpop.f32.mrb[40].mxu1  ;;  %v5927_v11 = vmul.f32 %v5895_v31, %v5671_v0  ;;  %v5896_v57 = vadd.f32 1.0, %v10423_v45 }
 0x6d1   : > { %v14530_v56 = vadd.f32 %v14500_v7, %v5612_v34  ;;  %v6352_v4 = vpop.permute.xlu0 %6351  ;;  %v5614_v54 = vpop.f32.mrb[41].mxu1 }
 0x6d2   : > { %v6094_v62 = vpop.permute.xlu1 %6093  ;;  %v5615_v63 = vpop.f32.mrb[42].mxu1  ;;  %v7187_v50 = vld [vmem:[#allocation2 + $0x8] sm:$0xff]  ;;  %6013 = vst.msk [vmem:[#allocation3 + $0x109] sm:$0xff] %vm2374_vm12, %v5927_v11  ;;  %v5928_v8 = vmul.f32 %v5896_v57, %v5672_v32 }
 0x6d3   : > { %v5705_v61 = vmul.f32 %v14530_v56, %v14530_v56  ;;  %6140 = vst.msk [vmem:[#allocation2 + $0x28] sm:$0xff] %vm6137_vm4, %v6094_v62  ;;  %v14536_v40 = vadd.f32 %v14500_v7, %v5615_v63  ;;  %9814 = vmatprep.mubr.msk.bf16.mxu1 %vm7317_vm15, %v7187_v50  ;;  %v5617_v46 = vpop.f32.mrb[43].mxu1  ;;  %v6815_v26 = vld [vmem:[#allocation3 + $0xf0] sm:$0xff]  ;;  %v6816_v60 = vld [vmem:[#allocation3 + $0xf8] sm:$0xff] }
 0x6d4   : > { %7403 = vmatmul.mubr.bf16.vlgmr.msra.gmra.mrb[60].mxu1 %v7186_v33  ;;  %v6944_v37 = vld [vmem:[#allocation3 + $0xf1] sm:$0xff]  ;;  %v6945_v29 = vld [vmem:[#allocation3 + $0xf9] sm:$0xff]  ;;  %v6839_v42 = vpack.c.bf16 %v6816_v60, %v6815_v26  ;;  %6014 = vst.msk [vmem:[#allocation3 + $0x111] sm:$0xff] %vm2374_vm12, %v5928_v8 }
 0x6d5   : > { %v5737_v28 = vmul.f32 %v5705_v61, %v14530_v56  ;;  %v5706_v20 = vmul.f32 %v14536_v40, %v14536_v40  ;;  %v6995_v23 = vpop.permute.xlu0 %6994  ;;  %v7073_v55 = vld [vmem:[#allocation3 + $0xf2] sm:$0xff]  ;;  %v14543_v49 = vpack.c.bf16 %v6945_v29, %v6944_v37  ;;  %v7074_v52 = vld [vmem:[#allocation3 + $0xfa] sm:$0xff] }
 0x6d6   : > { %v6223_v5 = vpop.permute.xlu1 %6222  ;;  %7849 = vst.msk [vmem:[#allocation3 + $0xf0] sm:$0xff] %vm573_vm0, %v15980_v25  ;;  %7850 = vst.msk [vmem:[#allocation3 + $0xf8] sm:$0xff] %vm573_vm0, %v15980_v25  ;;  %6879 = vrot.lane.b32.xlu0 %v6839_v42, %s15990_s16  ;;  %v7097_v32 = vpack.c.bf16 %v7074_v52, %v7073_v55 }
 0x6d7   : > { %v5769_v48 = vmul.f32 0.044715, %v5737_v28  ;;  %v5738_v0 = vmul.f32 %v5706_v20, %v14536_v40  ;;  %6269 = vst.msk [vmem:[#allocation2 + $0x28] sm:$0xff] %vm6266_vm11, %v6223_v5  ;;  %7008 = vrot.lane.b32.xlu1 %v14543_v49, %s10954_s14 }
 0x6d8   : > { %7851 = vst.msk [vmem:[#allocation3 + $0x100] sm:$0x3] %vm576_vm1, %v15980_v25  ;;  %v5620_v31 = vpop.f32.mrb[44].mxu1 }
 0x6d9   : > { %6398 = vst.msk [vmem:[#allocation2 + $0x28] sm:$0xff] %vm6395_vm3, %v6352_v4  ;;  %v5801_v34 = vadd.f32 %v5769_v48, %v14530_v56  ;;  %v5770_v54 = vmul.f32 0.044715, %v5738_v0  ;;  %v14560_v45 = vadd.f32 %v14500_v7, %v5620_v31  ;;  %v7124_v11 = vpop.permute.xlu0 %7123  ;;  %v5622_v62 = vpop.f32.mrb[45].mxu1  ;;  %v14576_v60 = vld [vmem:[#allocation3 + $0x109] sm:$0xff] }
 0x6da   : > { %v6866_v63 = vpop.permute.xlu1 %6865  ;;  %v5623_v50 = vpop.f32.mrb[46].mxu1  ;;  %6494 = vrot.lane.b32.xlu0 %v6839_v42, %s10952_s13 }
 0x6db   : > { %v5833_v57 = vmul.f32 0.7978846, %v5801_v34  ;;  %v5802_v4 = vadd.f32 %v5770_v54, %v14536_v40  ;;  %v5707_v61 = vmul.f32 %v14560_v45, %v14560_v45  ;;  %6913 = vst.msk [vmem:[#allocation2 + $0x18] sm:$0xff] %vm6911_vm9, %v6866_v63  ;;  %v5625_v46 = vpop.f32.mrb[47].mxu1  ;;  %v14568_v33 = vadd.f32 %v14500_v7, %v5623_v50  ;;  %7137 = vrot.lane.b32.xlu1 %v7097_v32, %s15992_s24  ;;  %v14580_v29 = vld [vmem:[#allocation3 + $0x10a] sm:$0xff]  ;;  %v14587_v48 = vld [vmem:[#allocation3 + $0x112] sm:$0xff] }
 0x6dc   : > { %7042 = vst.msk [vmem:[#allocation2 + $0x18] sm:$0xff] %vm7040_vm10, %v6995_v23  ;;  %v14578_v23 = vld [vmem:[#allocation3 + $0x108] sm:$0xff]  ;;  %v14583_v5 = vld [vmem:[#allocation3 + $0x111] sm:$0xff] }
 0x6dd   : > { %10424 = vtanh.f32 %v5833_v57  ;;  %v5834_v26 = vmul.f32 0.7978846, %v5802_v4  ;;  %v5739_v37 = vmul.f32 %v5707_v61, %v14560_v45  ;;  %7171 = vst.msk [vmem:[#allocation2 + $0x18] sm:$0xff] %vm7169_vm5, %v7124_v11  ;;  %v6610_v8 = vpop.permute.xlu0 %6609  ;;  %v5708_v28 = vmul.f32 %v14568_v33, %v14568_v33  ;;  %v14585_v52 = vld [vmem:[#allocation3 + $0x110] sm:$0xff] }
 0x6de   : > { %v6481_v20 = vpop.permute.xlu1 %6480  ;;  %7852 = vst.msk [vmem:[#allocation3 + $0x108] sm:$0xff] %vm573_vm0, %v15980_v25  ;;  %6752 = vrot.lane.b32.xlu0 %v7097_v32, %s10953_s25  ;;  %7853 = vst.msk [vmem:[#allocation3 + $0x110] sm:$0xff] %vm573_vm0, %v15980_v25  ;;  %v7188_v4 = vld [vmem:[#allocation2 + $0x10] sm:$0xff] }
 0x6df   : > { %10426 = vtanh.f32 %v5834_v26  ;;  %v5771_v55 = vmul.f32 0.044715, %v5739_v37  ;;  %6527 = vst.msk [vmem:[#allocation2 + $0x28] sm:$0xff] %vm6524_vm6, %v6481_v20  ;;  %v5740_v0 = vmul.f32 %v5708_v28, %v14568_v33  ;;  %6623 = vrot.lane.b32.xlu1 %v14543_v49, %s15991_s22  ;;  %v14610_v26 = vpack.c.bf16 %v14431_v27, %v14427_v22 }
 0x6e0   : > { %6656 = vst.msk [vmem:[#allocation2 + $0x28] sm:$0xff] %vm6653_vm7, %v6610_v8 }
 0x6e1   : > { %7854 = vst.msk [vmem:[#allocation3 + $0x118] sm:$0x3] %vm576_vm1, %v15980_v25  ;;  %v5803_v31 = vadd.f32 %v5771_v55, %v14560_v45  ;;  %v6096_v34 = vpop.permute.xlu0 %6095  ;;  %v5772_v54 = vmul.f32 0.044715, %v5740_v0  ;;  %v5674_v55 = vmul.f32 0.5, %v14536_v40 }
 0x6e2   : > { %6141 = vst.msk [vmem:[#allocation2 + $0x38] sm:$0xff] %vm6137_vm4, %v6096_v34  ;;  %v6739_v11 = vpop.permute.xlu1 %6738  ;;  %6367 = vrot.lane.b32.xlu0 %v7097_v32, %s15989_s30 }
 0x6e3   : > { %v5835_v62 = vmul.f32 0.7978846, %v5803_v31  ;;  %6785 = vst.msk [vmem:[#allocation2 + $0x28] sm:$0xff] %vm6782_vm8, %v6739_v11  ;;  %v5804_v63 = vadd.f32 %v5772_v54, %v14568_v33  ;;  %6109 = vrot.lane.b32.xlu1 %v6839_v42, %s10927_s26  ;;  %v5673_v42 = vmul.f32 0.5, %v14530_v56  ;;  %v7094_v56 = vpack.c.bf16 %v14435_v6, %v14433_v43 }
 0x6e4   : > { %v7189_v50 = vld [vmem:[#allocation2 + $0x18] sm:$0xff]  ;;  %v5675_v43 = vmul.f32 0.5, %v14560_v45 }
 0x6e5   : > { %10428 = vtanh.f32 %v5835_v62  ;;  %9815 = vmatprep.mubr.msk.bf16.mxu1 %vm7317_vm15, %v7189_v50  ;;  %v6225_v57 = vpop.permute.xlu0 %6224  ;;  %v5836_v61 = vmul.f32 0.7978846, %v5804_v63 }
 0x6e6   : > { %6270 = vst.msk [vmem:[#allocation2 + $0x38] sm:$0xff] %vm6266_vm11, %v6225_v57  ;;  %7411 = vmatmul.mubr.bf16.gmra.mrb[64].mxu1 %v7188_v4  ;;  %v6354_v46 = vpop.permute.xlu1 %6353  ;;  %7002 = vrot.lane.b32.xlu0 %v14610_v26, %s10954_s14  ;;  %v5676_v4 = vmul.f32 0.5, %v14568_v33 }
 0x6e7   : > { %v10425_v37 = vpop.eup %10424  ;;  %6399 = vst.msk [vmem:[#allocation2 + $0x38] sm:$0xff] %vm6395_vm3, %v6354_v46  ;;  %10430 = vtanh.f32 %v5836_v61  ;;  %6238 = vrot.lane.b32.xlu1 %v14543_v49, %s10951_s12 }
 0x6e8   : > { %v5897_v32 = vadd.f32 1.0, %v10425_v37 }
 0x6e9   : > { %v10427_v8 = vpop.eup %10426  ;;  %v6868_v28 = vpop.permute.xlu0 %6867 }
 0x6ea   : > { %v5929_v20 = vmul.f32 %v5897_v32, %v5673_v42  ;;  %v5898_v22 = vadd.f32 1.0, %v10427_v8  ;;  %6914 = vst.msk [vmem:[#allocation2 + $0x28] sm:$0xff] %vm6911_vm9, %v6868_v28  ;;  %v6997_v27 = vpop.permute.xlu1 %6996  ;;  %7131 = vrot.lane.b32.xlu0 %v7094_v56, %s15992_s24 }
 0x6eb   : > { %7043 = vst.msk [vmem:[#allocation2 + $0x28] sm:$0xff] %vm7040_vm10, %v6997_v27  ;;  %6873 = vrot.lane.b32.xlu1 %v14444_v35, %s15990_s16 }
 0x6ec   : > { %6015 = vst.msk [vmem:[#allocation3 + $0x121] sm:$0xff] %vm2374_vm12, %v5929_v20  ;;  %v5930_v0 = vmul.f32 %v5898_v22, %v5674_v55 }
 0x6ed   : > { %v6483_v49 = vpop.permute.xlu0 %6482 }
 0x6ee   : > { %6016 = vst.msk [vmem:[#allocation3 + $0x129] sm:$0xff] %vm2374_vm12, %v5930_v0  ;;  %v7126_v40 = vpop.permute.xlu1 %7125  ;;  %6617 = vrot.lane.b32.xlu0 %v14610_v26, %s15991_s22 }
 0x6ef   : > { %6528 = vst.msk [vmem:[#allocation2 + $0x38] sm:$0xff] %vm6524_vm6, %v6483_v49  ;;  %v10429_v31 = vpop.eup %10428  ;;  %6488 = vrot.lane.b32.xlu1 %v14444_v35, %s10952_s13 }
 0x6f0   : > { %7172 = vst.msk [vmem:[#allocation2 + $0x28] sm:$0xff] %vm7169_vm5, %v7126_v40  ;;  %v5899_v6 = vadd.f32 1.0, %v10429_v31  ;;  %v5628_v34 = vpop.f32.mrb[48].mxu1  ;;  %v7190_v31 = vld [vmem:[#allocation2 + $0x20] sm:$0xff] }
 0x6f1   : > { %v6741_v54 = vpop.permute.xlu0 %6740  ;;  %v10431_v11 = vpop.eup %10430  ;;  %v14636_v63 = vadd.f32 %v14500_v7, %v5628_v34 }
 0x6f2   : > { %v5931_v62 = vmul.f32 %v5899_v6, %v5675_v43  ;;  %v5630_v50 = vpop.f32.mrb[49].mxu1  ;;  %v6612_v57 = vpop.permute.xlu1 %6611  ;;  %v5900_v61 = vadd.f32 1.0, %v10431_v11  ;;  %6103 = vrot.lane.b32.xlu0 %v14444_v35, %s10927_s26 }
 0x6f3   : > { %6657 = vst.msk [vmem:[#allocation2 + $0x38] sm:$0xff] %vm6653_vm7, %v6612_v57  ;;  %v5631_v45 = vpop.f32.mrb[50].mxu1  ;;  %v5709_v46 = vmul.f32 %v14636_v63, %v14636_v63  ;;  %6746 = vrot.lane.b32.xlu1 %v7094_v56, %s10953_s25  ;;  %v14650_v33 = vld [vmem:[#allocation3 + $0x120] sm:$0xff]  ;;  %v14681_v57 = vpack.c.bf16 %v14583_v5, %v14576_v60 }
 0x6f4   : > { %6017 = vst.msk [vmem:[#allocation3 + $0x139] sm:$0xff] %vm2374_vm12, %v5931_v62  ;;  %v14645_v37 = vadd.f32 %v14500_v7, %v5631_v45  ;;  %v5633_v42 = vpop.f32.mrb[51].mxu1  ;;  %v5932_v32 = vmul.f32 %v5900_v61, %v5676_v4  ;;  %v14654_v20 = vld [vmem:[#allocation3 + $0x121] sm:$0xff] }
 0x6f5   : > { %6786 = vst.msk [vmem:[#allocation2 + $0x38] sm:$0xff] %vm6782_vm8, %v6741_v54  ;;  %v6356_v8 = vpop.permute.xlu0 %6355  ;;  %v14652_v28 = vld [vmem:[#allocation3 + $0x128] sm:$0xff]  ;;  %v5741_v22 = vmul.f32 %v5709_v46, %v14636_v63 }
 0x6f6   : > { %v14656_v55 = vld [vmem:[#allocation3 + $0x122] sm:$0xff]  ;;  %v5710_v27 = vmul.f32 %v14645_v37, %v14645_v37  ;;  %v6098_v0 = vpop.permute.xlu1 %6097  ;;  %v14663_v40 = vld [vmem:[#allocation3 + $0x12a] sm:$0xff]  ;;  %6018 = vst.msk [vmem:[#allocation3 + $0x141] sm:$0xff] %vm2374_vm12, %v5932_v32  ;;  %6232 = vrot.lane.b32.xlu0 %v14610_v26, %s10951_s12  ;;  %v6840_v26 = vpack.c.bf16 %v14585_v52, %v14578_v23 }
 0x6f7   : > { %v7191_v49 = vld [vmem:[#allocation2 + $0x28] sm:$0xff]  ;;  %7855 = vst.msk [vmem:[#allocation3 + $0x120] sm:$0xff] %vm573_vm0, %v15980_v25  ;;  %v5773_v43 = vmul.f32 0.044715, %v5741_v22  ;;  %6361 = vrot.lane.b32.xlu1 %v7094_v56, %s15989_s30 }
 0x6f8   : > { %v14661_v35 = vld [vmem:[#allocation3 + $0x129] sm:$0xff]  ;;  %6142 = vst.msk [vmem:[#allocation2 + $0x48] sm:$0xff] %vm6137_vm4, %v6098_v0  ;;  %9816 = vmatprep.mubr.msk.bf16.mxu1 %vm7317_vm15, %v7191_v49  ;;  %v5742_v6 = vmul.f32 %v5710_v27, %v14645_v37  ;;  %v5636_v54 = vpop.f32.mrb[52].mxu1 }
 0x6f9   : > { %7857 = vst.msk [vmem:[#allocation3 + $0x130] sm:$0x3] %vm576_vm1, %v15980_v25  ;;  %7419 = vmatmul.mubr.bf16.gmra.mrb[68].mxu1 %v7190_v31  ;;  %v6999_v34 = vpop.permute.xlu0 %6998  ;;  %v5805_v11 = vadd.f32 %v5773_v43, %v14636_v63  ;;  %v14684_v4 = vadd.f32 %v14500_v7, %v5636_v54  ;;  %v5638_v61 = vpop.f32.mrb[53].mxu1 }
 0x6fa   : > { %7856 = vst.msk [vmem:[#allocation3 + $0x128] sm:$0xff] %vm573_vm0, %v15980_v25  ;;  %v5774_v62 = vmul.f32 0.044715, %v5742_v6  ;;  %v6227_v50 = vpop.permute.xlu1 %6226  ;;  %v5639_v56 = vpop.f32.mrb[54].mxu1  ;;  %7010 = vrot.lane.b32.xlu0 %v14681_v57, %s10954_s14 }
 0x6fb   : > { %6271 = vst.msk [vmem:[#allocation2 + $0x48] sm:$0xff] %vm6266_vm11, %v6227_v50  ;;  %v5837_v45 = vmul.f32 0.7978846, %v5805_v11  ;;  %v5711_v60 = vmul.f32 %v14684_v4, %v14684_v4  ;;  %v5641_v5 = vpop.f32.mrb[55].mxu1  ;;  %6881 = vrot.lane.b32.xlu1 %v6840_v26, %s15990_s16  ;;  %v14697_v32 = vadd.f32 %v14500_v7, %v5639_v56  ;;  %v14699_v23 = vld [vmem:[#allocation3 + $0x139] sm:$0xff] }
 0x6fc   : > { %v5806_v46 = vadd.f32 %v5774_v62, %v14645_v37  ;;  %6400 = vst.msk [vmem:[#allocation2 + $0x48] sm:$0xff] %vm6395_vm3, %v6356_v8  ;;  %v7098_v8 = vpack.c.bf16 %v14587_v48, %v14580_v29  ;;  %v6821_v0 = vld [vmem:[#allocation3 + $0x138] sm:$0xff] }
 0x6fd   : > { %v7128_v42 = vpop.permute.xlu0 %7127  ;;  %10432 = vtanh.f32 %v5837_v45  ;;  %v5743_v27 = vmul.f32 %v5711_v60, %v14684_v4  ;;  %v6822_v49 = vld [vmem:[#allocation3 + $0x140] sm:$0xff]  ;;  %v5712_v43 = vmul.f32 %v14697_v32, %v14697_v32 }
 0x6fe   : > { %v5838_v52 = vmul.f32 0.7978846, %v5806_v46  ;;  %v6870_v22 = vpop.permute.xlu1 %6869  ;;  %v14704_v31 = vld [vmem:[#allocation3 + $0x13a] sm:$0xff]  ;;  %v14711_v54 = vpack.c.bf16 %v6822_v49, %v6821_v0  ;;  %v14713_v11 = vld [vmem:[#allocation3 + $0x142] sm:$0xff]  ;;  %7139 = vrot.lane.b32.xlu0 %v7098_v8, %s15992_s24 }
 0x6ff   : > { %6915 = vst.msk [vmem:[#allocation2 + $0x38] sm:$0xff] %vm6911_vm9, %v6870_v22  ;;  %v14709_v6 = vld [vmem:[#allocation3 + $0x141] sm:$0xff]  ;;  %v5775_v29 = vmul.f32 0.044715, %v5743_v27  ;;  %6496 = vrot.lane.b32.xlu1 %v6840_v26, %s10952_s13  ;;  %v5744_v62 = vmul.f32 %v5712_v43, %v14697_v32 }
 0x700   : > { %7858 = vst.msk [vmem:[#allocation3 + $0x138] sm:$0xff] %vm573_vm0, %v15980_v25  ;;  %10434 = vtanh.f32 %v5838_v52  ;;  %7859 = vst.msk [vmem:[#allocation3 + $0x140] sm:$0xff] %vm573_vm0, %v15980_v25  ;;  %v5644_v50 = vpop.f32.mrb[56].mxu1 }
 0x701   : > { %7044 = vst.msk [vmem:[#allocation2 + $0x38] sm:$0xff] %vm7040_vm10, %v6999_v34  ;;  %v6614_v48 = vpop.permute.xlu0 %6613  ;;  %v5807_v34 = vadd.f32 %v5775_v29, %v14684_v4  ;;  %v14728_v56 = vadd.f32 %v14500_v7, %v5644_v50  ;;  %v5646_v45 = vpop.f32.mrb[57].mxu1  ;;  %v5776_v46 = vmul.f32 0.044715, %v5744_v62 }
 0x702   : > { %7860 = vst.msk [vmem:[#allocation3 + $0x148] sm:$0x3] %vm576_vm1, %v15980_v25  ;;  %v6485_v61 = vpop.permute.xlu1 %6484  ;;  %v5647_v60 = vpop.f32.mrb[58].mxu1  ;;  %6625 = vrot.lane.b32.xlu0 %v14681_v57, %s15991_s22  ;;  %v14750_v45 = vld [vmem:[#allocation3 + $0x1a1] sm:$0xff] }
 0x703   : > { %7173 = vst.msk [vmem:[#allocation2 + $0x38] sm:$0xff] %vm7169_vm5, %v7128_v42  ;;  %v5839_v5 = vmul.f32 0.7978846, %v5807_v34  ;;  %v5713_v42 = vmul.f32 %v14728_v56, %v14728_v56  ;;  %v14737_v52 = vadd.f32 %v14500_v7, %v5647_v60  ;;  %v5649_v22 = vpop.f32.mrb[59].mxu1  ;;  %6754 = vrot.lane.b32.xlu1 %v7098_v8, %s10953_s25  ;;  %v5808_v0 = vadd.f32 %v5776_v46, %v14697_v32  ;;  %v14748_v34 = vld [vmem:[#allocation3 + $0x199] sm:$0xff] }
 0x704   : > { %6529 = vst.msk [vmem:[#allocation2 + $0x48] sm:$0xff] %vm6524_vm6, %v6485_v61  ;;  %v5677_v46 = vmul.f32 0.5, %v14636_v63  ;;  %v14757_v22 = vld [vmem:[#allocation3 + $0x19a] sm:$0xff] }
 0x705   : > { %6658 = vst.msk [vmem:[#allocation2 + $0x48] sm:$0xff] %vm6653_vm7, %v6614_v48  ;;  %v6100_v27 = vpop.permute.xlu0 %6099  ;;  %10436 = vtanh.f32 %v5839_v5  ;;  %v5745_v43 = vmul.f32 %v5713_v42, %v14728_v56  ;;  %v5714_v29 = vmul.f32 %v14737_v52, %v14737_v52  ;;  %v5840_v48 = vmul.f32 0.7978846, %v5808_v0  ;;  %v7192_v42 = vld [vmem:[#allocation2 + $0x30] sm:$0xff] }
 0x706   : > { %6143 = vst.msk [vmem:[#allocation2 + $0x58] sm:$0xff] %vm6137_vm4, %v6100_v27  ;;  %v6743_v49 = vpop.permute.xlu1 %6742  ;;  %6111 = vrot.lane.b32.xlu0 %v6840_v26, %s10927_s26  ;;  %v6975_v26 = vpack.c.bf16 %v14750_v45, %v14748_v34  ;;  %v14759_v27 = vld [vmem:[#allocation3 + $0x1a2] sm:$0xff] }
 0x707   : > { %6787 = vst.msk [vmem:[#allocation2 + $0x48] sm:$0xff] %vm6782_vm8, %v6743_v49  ;;  %v10433_v7 = vpop.eup %10432  ;;  %v5777_v50 = vmul.f32 0.044715, %v5745_v43  ;;  %v5746_v61 = vmul.f32 %v5714_v29, %v14737_v52  ;;  %6369 = vrot.lane.b32.xlu1 %v7098_v8, %s15989_s30  ;;  %10438 = vtanh.f32 %v5840_v48  ;;  %v7104_v43 = vpack.c.bf16 %v14759_v27, %v14757_v22  ;;  %v8163_v22 = vld [vmem:[#allocation3 + $0x2] sm:$0xff]  ;;  %v8164_v27 = vld [vmem:[#allocation3 + $0xa] sm:$0xff] }
 0x708   : > { %v5901_v60 = vadd.f32 1.0, %v10433_v7  ;;  %7870 = vst.msk [vmem:[#allocation3 + $0x198] sm:$0xff] %vm573_vm0, %v15980_v25  ;;  %7871 = vst.msk [vmem:[#allocation3 + $0x1a0] sm:$0xff] %vm573_vm0, %v15980_v25  ;;  %v5678_v48 = vmul.f32 0.5, %v14645_v37  ;;  %v7198_v34 = vld [vmem:[#allocation2 + $0x60] sm:$0xff] }
 0x709   : > { %v6229_v5 = vpop.permute.xlu0 %6228  ;;  %v5809_v49 = vadd.f32 %v5777_v50, %v14728_v56  ;;  %v5778_v8 = vmul.f32 0.044715, %v5746_v61  ;;  %7872 = vst.msk [vmem:[#allocation3 + $0x1a8] sm:$0x3] %vm576_vm1, %v15980_v25 }
 0x70a   : > { %v7193_v62 = vld [vmem:[#allocation2 + $0x38] sm:$0xff]  ;;  %v10435_v0 = vpop.eup %10434  ;;  %6272 = vst.msk [vmem:[#allocation2 + $0x58] sm:$0xff] %vm6266_vm11, %v6229_v5  ;;  %v6358_v63 = vpop.permute.xlu1 %6357  ;;  %v5933_v29 = vmul.f32 %v5901_v60, %v5677_v46  ;;  %6240 = vrot.lane.b32.xlu0 %v14681_v57, %s10951_s12 }
 0x70b   : > { %9817 = vmatprep.mubr.msk.bf16.mxu1 %vm7317_vm15, %v7193_v62  ;;  %v5902_v7 = vadd.f32 1.0, %v10435_v0  ;;  %6401 = vst.msk [vmem:[#allocation2 + $0x58] sm:$0xff] %vm6395_vm3, %v6358_v63  ;;  %v6966_v62 = vpack.c.bf16 %v14483_v38, %v14474_v19  ;;  %v5841_v50 = vmul.f32 0.7978846, %v5809_v49  ;;  %v5810_v61 = vadd.f32 %v5778_v8, %v14737_v52 }
 0x70c   : > { %7427 = vmatmul.mubr.bf16.gmra.mrb[72].mxu1 %v7192_v42  ;;  %6019 = vst.msk [vmem:[#allocation3 + $0x151] sm:$0xff] %vm2374_vm12, %v5933_v29  ;;  %v7095_v19 = vpack.c.bf16 %v14487_v53, %v14480_v44  ;;  %v5679_v38 = vmul.f32 0.5, %v14684_v4  ;;  %v5680_v49 = vmul.f32 0.5, %v14697_v32 }
 0x70d   : > { %v5934_v5 = vmul.f32 %v5902_v7, %v5678_v48  ;;  %7004 = vrot.lane.b32.xlu1 %v6966_v62, %s10954_s14  ;;  %v6872_v46 = vpop.permute.xlu0 %6871  ;;  %10440 = vtanh.f32 %v5841_v50  ;;  %v5842_v60 = vmul.f32 0.7978846, %v5810_v61  ;;  %v5681_v61 = vmul.f32 0.5, %v14728_v56 }
 0x70e   : > { %6916 = vst.msk [vmem:[#allocation2 + $0x48] sm:$0xff] %vm6911_vm9, %v6872_v46  ;;  %v7001_v37 = vpop.permute.xlu1 %7000  ;;  %6875 = vrot.lane.b32.xlu0 %v14485_v24, %s15990_s16 }
 0x70f   : > { %6020 = vst.msk [vmem:[#allocation3 + $0x159] sm:$0xff] %vm2374_vm12, %v5934_v5  ;;  %v10437_v57 = vpop.eup %10436  ;;  %10442 = vtanh.f32 %v5842_v60 }
 0x710   : > { %7045 = vst.msk [vmem:[#allocation2 + $0x48] sm:$0xff] %vm7040_vm10, %v7001_v37  ;;  %v5903_v0 = vadd.f32 1.0, %v10437_v57 }
 0x711   : > { %7133 = vrot.lane.b32.xlu1 %v7095_v19, %s15992_s24  ;;  %v6487_v42 = vpop.permute.xlu0 %6486  ;;  %v10439_v8 = vpop.eup %10438 }
 0x712   : > { %6530 = vst.msk [vmem:[#allocation2 + $0x58] sm:$0xff] %vm6524_vm6, %v6487_v42  ;;  %v7130_v63 = vpop.permute.xlu1 %7129  ;;  %v5935_v44 = vmul.f32 %v5903_v0, %v5679_v38  ;;  %6490 = vrot.lane.b32.xlu0 %v14485_v24, %s10952_s13  ;;  %v5904_v53 = vadd.f32 1.0, %v10439_v8  ;;  %v5682_v38 = vmul.f32 0.5, %v14737_v52 }
 0x713   : > { %7174 = vst.msk [vmem:[#allocation2 + $0x48] sm:$0xff] %vm7169_vm5, %v7130_v63  ;;  %v14796_v7 = vld [vmem:[#allocation3 + $0x151] sm:$0xff]  ;;  %v7194_v63 = vld [vmem:[#allocation2 + $0x40] sm:$0xff] }
 0x714   : > { %6021 = vst.msk [vmem:[#allocation3 + $0x169] sm:$0xff] %vm2374_vm12, %v5935_v44  ;;  %v5936_v48 = vmul.f32 %v5904_v53, %v5680_v49  ;;  %v14798_v50 = vld [vmem:[#allocation3 + $0x150] sm:$0xff]  ;;  %v6841_v53 = vpack.c.bf16 %v14652_v28, %v14650_v33 }
 0x715   : > { %6619 = vrot.lane.b32.xlu1 %v6966_v62, %s15991_s22  ;;  %v6745_v4 = vpop.permute.xlu0 %6744 }
 0x716   : > { %v6616_v29 = vpop.permute.xlu1 %6615  ;;  %v14800_v32 = vld [vmem:[#allocation3 + $0x152] sm:$0xff]  ;;  %v14808_v37 = vld [vmem:[#allocation3 + $0x15a] sm:$0xff]  ;;  %6748 = vrot.lane.b32.xlu0 %v7095_v19, %s10953_s25  ;;  %6022 = vst.msk [vmem:[#allocation3 + $0x171] sm:$0xff] %vm2374_vm12, %v5936_v48 }
 0x717   : > { %6659 = vst.msk [vmem:[#allocation2 + $0x58] sm:$0xff] %vm6653_vm7, %v6616_v29  ;;  %v14804_v5 = vld [vmem:[#allocation3 + $0x159] sm:$0xff]  ;;  %v10441_v60 = vpop.eup %10440  ;;  %v6970_v29 = vpack.c.bf16 %v14661_v35, %v14654_v20  ;;  %v7099_v20 = vpack.c.bf16 %v14663_v40, %v14656_v55  ;;  %v6967_v55 = vpack.c.bf16 %v14505_v39, %v14503_v58  ;;  %v7096_v40 = vpack.c.bf16 %v14509_v51, %v14507_v59 }
 0x718   : > { %v14806_v46 = vld [vmem:[#allocation3 + $0x158] sm:$0xff]  ;;  %7861 = vst.msk [vmem:[#allocation3 + $0x150] sm:$0xff] %vm573_vm0, %v15980_v25  ;;  %v5905_v56 = vadd.f32 1.0, %v10441_v60  ;;  %v7100_v58 = vpack.c.bf16 %v14713_v11, %v14704_v31 }
 0x719   : > { %6788 = vst.msk [vmem:[#allocation2 + $0x58] sm:$0xff] %vm6782_vm8, %v6745_v4  ;;  %6105 = vrot.lane.b32.xlu1 %v14485_v24, %s10927_s26  ;;  %v10443_v57 = vpop.eup %10442  ;;  %v6360_v4 = vpop.permute.xlu0 %6359 }
 0x71a   : > { %7863 = vst.msk [vmem:[#allocation3 + $0x160] sm:$0x3] %vm576_vm1, %v15980_v25  ;;  %v6102_v42 = vpop.permute.xlu1 %6101  ;;  %v7195_v0 = vld [vmem:[#allocation2 + $0x48] sm:$0xff]  ;;  %v5937_v49 = vmul.f32 %v5905_v56, %v5681_v61  ;;  %v5906_v8 = vadd.f32 1.0, %v10443_v57  ;;  %6363 = vrot.lane.b32.xlu0 %v7095_v19, %s15989_s30 }
 0x71b   : > { %7862 = vst.msk [vmem:[#allocation3 + $0x158] sm:$0xff] %vm573_vm0, %v15980_v25  ;;  %9818 = vmatprep.mubr.msk.bf16.mxu1 %vm7317_vm15, %v7195_v0  ;;  %v6825_v44 = vld [vmem:[#allocation3 + $0x168] sm:$0xff] }
 0x71c   : > { %6144 = vst.msk [vmem:[#allocation2 + $0x68] sm:$0xff] %vm6137_vm4, %v6102_v42  ;;  %7435 = vmatmul.mubr.bf16.gmra.mrb[76].mxu1 %v7194_v63  ;;  %v5938_v24 = vmul.f32 %v5906_v8, %v5682_v38  ;;  %v14833_v48 = vld [vmem:[#allocation3 + $0x169] sm:$0xff] }
 0x71d   : > { %6234 = vrot.lane.b32.xlu1 %v6966_v62, %s10951_s12  ;;  %6023 = vst.msk [vmem:[#allocation3 + $0x181] sm:$0xff] %vm2374_vm12, %v5937_v49  ;;  %v6826_v19 = vld [vmem:[#allocation3 + $0x170] sm:$0xff]  ;;  %v6843_v49 = vpack.c.bf16 %v14806_v46, %v14798_v50 }
 0x71e   : > { %v6231_v52 = vpop.permute.xlu1 %6230  ;;  %6024 = vst.msk [vmem:[#allocation3 + $0x189] sm:$0xff] %vm2374_vm12, %v5938_v24  ;;  %v14835_v62 = vld [vmem:[#allocation3 + $0x16a] sm:$0xff]  ;;  %6883 = vrot.lane.b32.xlu0 %v6841_v53, %s15990_s16  ;;  %v14841_v33 = vpack.c.bf16 %v6826_v19, %v6825_v44  ;;  %v14843_v28 = vld [vmem:[#allocation3 + $0x172] sm:$0xff] }
 0x71f   : > { %6273 = vst.msk [vmem:[#allocation2 + $0x68] sm:$0xff] %vm6266_vm11, %v6231_v52  ;;  %v14839_v61 = vld [vmem:[#allocation3 + $0x171] sm:$0xff] }
 0x720   : > { %6402 = vst.msk [vmem:[#allocation2 + $0x68] sm:$0xff] %vm6395_vm3, %v6360_v4  ;;  %v6973_v44 = vpack.c.bf16 %v14839_v61, %v14833_v48 }
 0x721   : > { %7864 = vst.msk [vmem:[#allocation3 + $0x168] sm:$0xff] %vm573_vm0, %v15980_v25  ;;  %7012 = vrot.lane.b32.xlu1 %v6970_v29, %s10954_s14  ;;  %7865 = vst.msk [vmem:[#allocation3 + $0x170] sm:$0xff] %vm573_vm0, %v15980_v25 }
 0x722   : > { %7866 = vst.msk [vmem:[#allocation3 + $0x178] sm:$0x3] %vm576_vm1, %v15980_v25  ;;  %6498 = vrot.lane.b32.xlu0 %v6841_v53, %s10952_s13 }
 0x724   : > { %v6827_v35 = vld [vmem:[#allocation3 + $0x180] sm:$0xff] }
 0x725   : > { %7141 = vrot.lane.b32.xlu1 %v7099_v20, %s15992_s24  ;;  %v14856_v60 = vld [vmem:[#allocation3 + $0x181] sm:$0xff]  ;;  %v14860_v57 = vld [vmem:[#allocation3 + $0x189] sm:$0xff] }
 0x726   : > { %v6828_v56 = vld [vmem:[#allocation3 + $0x188] sm:$0xff]  ;;  %6756 = vrot.lane.b32.xlu0 %v7099_v20, %s10953_s25 }
 0x727   : > { %v14858_v38 = vld [vmem:[#allocation3 + $0x182] sm:$0xff]  ;;  %v14862_v42 = vpack.c.bf16 %v6828_v56, %v6827_v35  ;;  %v14864_v0 = vld [vmem:[#allocation3 + $0x18a] sm:$0xff]  ;;  %v6974_v56 = vpack.c.bf16 %v14860_v57, %v14856_v60 }
 0x728   : > { %7867 = vst.msk [vmem:[#allocation3 + $0x180] sm:$0xff] %vm573_vm0, %v15980_v25  ;;  %7868 = vst.msk [vmem:[#allocation3 + $0x188] sm:$0xff] %vm573_vm0, %v15980_v25 }
 0x729   : > { %7869 = vst.msk [vmem:[#allocation3 + $0x190] sm:$0x3] %vm576_vm1, %v15980_v25  ;;  %6627 = vrot.lane.b32.xlu1 %v6970_v29, %s15991_s22  ;;  %v6971_v25 = vpack.c.bf16 %v14709_v6, %v14699_v23  ;;  %v6972_v6 = vpack.c.bf16 %v14804_v5, %v14796_v7  ;;  %vm8017_vm1 = vcmask 458144  }
 0x72a   : > { %6371 = vrot.lane.b32.xlu0 %v7099_v20, %s15989_s30 }
 0x72d   : > { %6113 = vrot.lane.b32.xlu1 %v6841_v53, %s10927_s26  ;;  %v7196_v53 = vld [vmem:[#allocation2 + $0x50] sm:$0xff] }
 0x72e   : > { %7006 = vrot.lane.b32.xlu0 %v6967_v55, %s10954_s14 }
 0x731   : > { %6242 = vrot.lane.b32.xlu1 %v6970_v29, %s10951_s12  ;;  %v7102_v29 = vpack.c.bf16 %v14843_v28, %v14835_v62 }
 0x732   : > { %7135 = vrot.lane.b32.xlu0 %v7096_v40, %s15992_s24 }
 0x735   : > { %6877 = vrot.lane.b32.xlu1 %v14515_v47, %s15990_s16 }
 0x736   : > { %6621 = vrot.lane.b32.xlu0 %v6967_v55, %s15991_s22 }
 0x739   : > { %6492 = vrot.lane.b32.xlu1 %v14515_v47, %s10952_s13 }
 0x73a   : > { %6107 = vrot.lane.b32.xlu0 %v14515_v47, %s10927_s26 }
 0x73d   : > { %6750 = vrot.lane.b32.xlu1 %v7096_v40, %s10953_s25 }
 0x73e   : > { %6236 = vrot.lane.b32.xlu0 %v6967_v55, %s10951_s12 }
 0x741   : > { %6365 = vrot.lane.b32.xlu1 %v7096_v40, %s15989_s30 }
 0x742   : > { %7014 = vrot.lane.b32.xlu0 %v6971_v25, %s10954_s14 }
 0x745   : > { %6885 = vrot.lane.b32.xlu1 %v14711_v54, %s15990_s16 }
 0x746   : > { %7143 = vrot.lane.b32.xlu0 %v7100_v58, %s15992_s24 }
 0x748   : > { %v14903_v39 = vpop.permute.xlu0 %6879 }
 0x749   : > { %6500 = vrot.lane.b32.xlu1 %v14711_v54, %s10952_s13  ;;  %v14905_v59 = vpop.permute.xlu1 %7008 }
 0x74a   : > { %6629 = vrot.lane.b32.xlu0 %v6971_v25, %s15991_s22 }
 0x74c   : > { %v14909_v51 = vpop.permute.xlu0 %6494 }
 0x74d   : > { %6758 = vrot.lane.b32.xlu1 %v7100_v58, %s10953_s25  ;;  %v14911_v47 = vpop.permute.xlu1 %7137 }
 0x74e   : > { %6115 = vrot.lane.b32.xlu0 %v14711_v54, %s10927_s26  ;;  %v7101_v54 = vpack.c.bf16 %v14808_v37, %v14800_v32 }
 0x750   : > { %v14916_v23 = vpop.permute.xlu0 %6752 }
 0x751   : > { %6373 = vrot.lane.b32.xlu1 %v7100_v58, %s15989_s30  ;;  %v14918_v31 = vpop.permute.xlu1 %6623  ;;  %v8034_v58 = vld [vmem:[#allocation3 + $0x1] sm:$0xff] }
 0x752   : > { %6244 = vrot.lane.b32.xlu0 %v6971_v25, %s10951_s12 }
 0x754   : > { %v6368_v11 = vpop.permute.xlu0 %6367 }
 0x755   : > { %7016 = vrot.lane.b32.xlu1 %v6972_v6, %s10954_s14  ;;  %v6110_v63 = vpop.permute.xlu1 %6109 }
 0x756   : > { %6148 = vst.msk [vmem:[#allocation2 + $0xa8] sm:$0xff] %vm6137_vm4, %v6110_v63  ;;  %6887 = vrot.lane.b32.xlu0 %v6843_v49, %s15990_s16 }
 0x758   : > { %v7003_v8 = vpop.permute.xlu0 %7002 }
 0x759   : > { %7145 = vrot.lane.b32.xlu1 %v7101_v54, %s15992_s24  ;;  %v6239_v7 = vpop.permute.xlu1 %6238 }
 0x75a   : > { %6277 = vst.msk [vmem:[#allocation2 + $0xa8] sm:$0xff] %vm6266_vm11, %v6239_v7  ;;  %6502 = vrot.lane.b32.xlu0 %v6843_v49, %s10952_s13 }
 0x75b   : > { %6406 = vst.msk [vmem:[#allocation2 + $0xa8] sm:$0xff] %vm6395_vm3, %v6368_v11 }
 0x75c   : > { %v7132_v50 = vpop.permute.xlu0 %7131 }
 0x75d   : > { %6631 = vrot.lane.b32.xlu1 %v6972_v6, %s15991_s22  ;;  %v6874_v5 = vpop.permute.xlu1 %6873 }
 0x75e   : > { %6917 = vst.msk [vmem:[#allocation2 + $0x58] sm:$0xff] %vm6911_vm9, %v6874_v5  ;;  %6760 = vrot.lane.b32.xlu0 %v7101_v54, %s10953_s25 }
 0x75f   : > { %7046 = vst.msk [vmem:[#allocation2 + $0x58] sm:$0xff] %vm7040_vm10, %v7003_v8 }
 0x760   : > { %7175 = vst.msk [vmem:[#allocation2 + $0x58] sm:$0xff] %vm7169_vm5, %v7132_v50  ;;  %v6618_v32 = vpop.permute.xlu0 %6617 }
 0x761   : > { %6117 = vrot.lane.b32.xlu1 %v6843_v49, %s10927_s26  ;;  %v6489_v46 = vpop.permute.xlu1 %6488  ;;  %v8708_v49 = vld [vmem:[#allocation3 + $0x198] sm:$0xff] }
 0x762   : > { %6531 = vst.msk [vmem:[#allocation2 + $0x68] sm:$0xff] %vm6524_vm6, %v6489_v46  ;;  %6375 = vrot.lane.b32.xlu0 %v7101_v54, %s15989_s30  ;;  %v8709_v54 = vld [vmem:[#allocation3 + $0x1a0] sm:$0xff]  ;;  %v8195_v46 = vpack.c.bf16 %v8164_v27, %v8163_v22 }
 0x763   : > { %6660 = vst.msk [vmem:[#allocation2 + $0x68] sm:$0xff] %vm6653_vm7, %v6618_v32 }
 0x764   : > { %v6104_v37 = vpop.permute.xlu0 %6103 }
 0x765   : > { %6246 = vrot.lane.b32.xlu1 %v6972_v6, %s10951_s12  ;;  %v6747_v24 = vpop.permute.xlu1 %6746  ;;  %6145 = vst.msk [vmem:[#allocation2 + $0x78] sm:$0xff] %vm6137_vm4, %v6104_v37  ;;  %v8035_v6 = vld [vmem:[#allocation3 + $0x9] sm:$0xff] }
 0x766   : > { %6789 = vst.msk [vmem:[#allocation2 + $0x68] sm:$0xff] %vm6782_vm8, %v6747_v24  ;;  %7018 = vrot.lane.b32.xlu0 %v6973_v44, %s10954_s14  ;;  %v8066_v11 = vpack.c.bf16 %v8035_v6, %v8034_v58  ;;  %v10239_v58 = vld [vmem:[#allocation19 + $0x8] sm:$0xff]  }
 0x767   : > { %v7197_v52 = vld [vmem:[#allocation2 + $0x58] sm:$0xff] }
 0x768   : > { %9819 = vmatprep.mubr.msk.bf16.mxu1 %vm7317_vm15, %v7197_v52  ;;  %v6233_v4 = vpop.permute.xlu0 %6232 }
 0x769   : > { %6889 = vrot.lane.b32.xlu1 %v14841_v33, %s15990_s16  ;;  %7443 = vmatmul.mubr.bf16.gmra.mrb[80].mxu1 %v7196_v53  ;;  %6274 = vst.msk [vmem:[#allocation2 + $0x78] sm:$0xff] %vm6266_vm11, %v6233_v4  ;;  %v6362_v48 = vpop.permute.xlu1 %6361 }
 0x76a   : > { %6403 = vst.msk [vmem:[#allocation2 + $0x78] sm:$0xff] %vm6395_vm3, %v6362_v48  ;;  %7147 = vrot.lane.b32.xlu0 %v7102_v29, %s15992_s24 }
 0x76c   : > { %v14959_v19 = vpop.permute.xlu0 %7010 }
 0x76d   : > { %6504 = vrot.lane.b32.xlu1 %v14841_v33, %s10952_s13  ;;  %v14961_v61 = vpop.permute.xlu1 %6881 }
 0x76e   : > { %6633 = vrot.lane.b32.xlu0 %v6973_v44, %s15991_s22 }
 0x770   : > { %v14965_v20 = vpop.permute.xlu0 %7139 }
 0x771   : > { %6762 = vrot.lane.b32.xlu1 %v7102_v29, %s10953_s25  ;;  %v6497_v62 = vpop.permute.xlu1 %6496 }
 0x772   : > { %6535 = vst.msk [vmem:[#allocation2 + $0xa8] sm:$0xff] %vm6524_vm6, %v6497_v62  ;;  %6119 = vrot.lane.b32.xlu0 %v14841_v33, %s10927_s26  ;;  %v7103_v33 = vpack.c.bf16 %v14864_v0, %v14858_v38  ;;  %v7906_v0 = vld [vmem:[#allocation3 + $0x8] sm:$0xff]  ;;  %s15993_s26 = smov 56  }
 0x774   : > { %v6626_v28 = vpop.permute.xlu0 %6625 }
 0x775   : > { %6377 = vrot.lane.b32.xlu1 %v7102_v29, %s15989_s30  ;;  %6664 = vst.msk [vmem:[#allocation2 + $0xa8] sm:$0xff] %vm6653_vm7, %v6626_v28  ;;  %v6755_v35 = vpop.permute.xlu1 %6754  ;;  %s10957_s30 = smov 68  }
 0x776   : > { %6793 = vst.msk [vmem:[#allocation2 + $0xa8] sm:$0xff] %vm6782_vm8, %v6755_v35  ;;  %6248 = vrot.lane.b32.xlu0 %v6973_v44, %s10951_s12  ;;  %s10956_s12 = smov 60   ;;  %v15020_v35 = vld [vmem:[#allocation18] ss:$0 sm:$0xff] }
 0x778   : > { %v6112_v55 = vpop.permute.xlu0 %6111 }
 0x779   : > { %7020 = vrot.lane.b32.xlu1 %v6974_v56, %s10954_s14  ;;  %6149 = vst.msk [vmem:[#allocation2 + $0xb8] sm:$0xff] %vm6137_vm4, %v6112_v55  ;;  %v6370_v40 = vpop.permute.xlu1 %6369 }
 0x77a   : > { %6891 = vrot.lane.b32.xlu0 %v14862_v42, %s15990_s16  ;;  %s15994_s16 = smov 64  }
 0x77c   : > { %v6241_v25 = vpop.permute.xlu0 %6240 }
 0x77d   : > { %7149 = vrot.lane.b32.xlu1 %v7103_v33, %s15992_s24  ;;  %6278 = vst.msk [vmem:[#allocation2 + $0xb8] sm:$0xff] %vm6266_vm11, %v6241_v25 }
 0x77e   : > { %6407 = vst.msk [vmem:[#allocation2 + $0xb8] sm:$0xff] %vm6395_vm3, %v6370_v40  ;;  %6506 = vrot.lane.b32.xlu0 %v14862_v42, %s10952_s13  ;;  %v7905_v42 = vld [vmem:[#allocation3] sm:$0xff]  ;;  %s15996_s13 = smov 84  }
 0x77f   : > { %v7005_v60 = vpop.permute.xlu1 %7004  ;;  %v7937_v7 = vpack.c.bf16 %v7906_v0, %v7905_v42 }
 0x780   : > { %v6876_v57 = vpop.permute.xlu0 %6875 }
 0x781   : > { %6635 = vrot.lane.b32.xlu1 %v6974_v56, %s15991_s22  ;;  %6918 = vst.msk [vmem:[#allocation2 + $0x68] sm:$0xff] %vm6911_vm9, %v6876_v57  ;;  %s15995_s22 = smov 80  }
 0x782   : > { %7047 = vst.msk [vmem:[#allocation2 + $0x68] sm:$0xff] %vm7040_vm10, %v7005_v60  ;;  %6764 = vrot.lane.b32.xlu0 %v7103_v33, %s10953_s25  ;;  %v10238_v33 = vld [vmem:[#allocation19] sm:$0xff]   ;;  %s16012_s25 = sshll.u32 %s11362_s15, 8 }
 0x783   : > { %v7134_v38 = vpop.permute.xlu1 %7133  ;;  %9262 = vmatpush1.bf16.msra.mxu0 %v10238_v33 }
 0x784   : > { %7176 = vst.msk [vmem:[#allocation2 + $0x68] sm:$0xff] %vm7169_vm5, %v7134_v38  ;;  %v6491_v63 = vpop.permute.xlu0 %6490  ;;  %9263 = vmatprep.subr.bf16.mxu0 %v10946_v21 }
 0x785   : > { %7151 = vrot.lane.b32.xlu1 %v7104_v43, %s15992_s24  ;;  %6532 = vst.msk [vmem:[#allocation2 + $0x78] sm:$0xff] %vm6524_vm6, %v6491_v63  ;;  %v8725_v43 = vpack.c.bf16 %v8709_v54, %v8708_v49  ;;  %s10955_s24 = smov 52   ;;  %v10240_v54 = vld [vmem:[#allocation19 + $0x10] sm:$0xff]  }
 0x786   : > { %7022 = vrot.lane.b32.xlu0 %v6975_v26, %s10954_s14  ;;  %s15618_s14 = scalar_lea.vmem [#allocation22], %s16012_s25 }
 0x787   : > { %v6620_v8 = vpop.permute.xlu1 %6619  ;;  %9264 = vmatpush1.bf16.msra.mxu0 %v10239_v58 }
 0x788   : > { %6661 = vst.msk [vmem:[#allocation2 + $0x78] sm:$0xff] %vm6653_vm7, %v6620_v8  ;;  %v6749_v50 = vpop.permute.xlu0 %6748  ;;  %9265 = vmatprep.subr.bf16.mxu0 %v10946_v21 }
 0x789   : > { %8098 = vrot.lane.b32.xlu1 %v8066_v11, %s15993_s26  ;;  %6790 = vst.msk [vmem:[#allocation2 + $0x78] sm:$0xff] %vm6782_vm8, %v6749_v50 }
 0x78a   : > { %7969 = vrot.lane.b32.xlu0 %v7937_v7, %s10955_s24 }
 0x78b   : > { %v6106_v5 = vpop.permute.xlu1 %6105  ;;  %v7199_v32 = vld [vmem:[#allocation2 + $0x68] sm:$0xff]  ;;  %9266 = vmatpush1.bf16.msra.mxu0 %v10240_v54 }
 0x78c   : > { %6146 = vst.msk [vmem:[#allocation2 + $0x88] sm:$0xff] %vm6137_vm4, %v6106_v5  ;;  %9820 = vmatprep.mubr.msk.bf16.mxu1 %vm7317_vm15, %v7199_v32  ;;  %v6364_v45 = vpop.permute.xlu0 %6363  ;;  %v10241_v32 = vld [vmem:[#allocation19 + $0x18] sm:$0xff]   ;;  %9267 = vmatprep.subr.bf16.mxu0 %v10946_v21 }
 0x78d   : > { %8772 = vrot.lane.b32.xlu1 %v8725_v43, %s10935_s1  ;;  %7451 = vmatmul.mubr.bf16.gmra.mrb[84].mxu1 %v7198_v34 }
 0x78e   : > { %8227 = vrot.lane.b32.xlu0 %v8195_v46, %s10956_s12 }
 0x78f   : > { %v6235_v26 = vpop.permute.xlu1 %6234  ;;  %9268 = vmatpush1.bf16.msra.mxu0 %v10241_v32 }
 0x790   : > { %6275 = vst.msk [vmem:[#allocation2 + $0x88] sm:$0xff] %vm6266_vm11, %v6235_v26  ;;  %v6884_v37 = vpop.permute.xlu0 %6883  ;;  %v7200_v26 = vld [vmem:[#allocation2 + $0x70] sm:$0xff]  ;;  %9269 = vmatprep.subr.bf16.mxu0 %v10946_v21 }
 0x791   : > { %6404 = vst.msk [vmem:[#allocation2 + $0x88] sm:$0xff] %vm6395_vm3, %v6364_v45 }
 0x792   : > { %6922 = vst.msk [vmem:[#allocation2 + $0xa8] sm:$0xff] %vm6911_vm9, %v6884_v37 }
 0x793   : > { %v7013_v24 = vpop.permute.xlu1 %7012 }
 0x794   : > { %7051 = vst.msk [vmem:[#allocation2 + $0xa8] sm:$0xff] %vm7040_vm10, %v7013_v24  ;;  %v6499_v44 = vpop.permute.xlu0 %6498 }
 0x795   : > { %6536 = vst.msk [vmem:[#allocation2 + $0xb8] sm:$0xff] %vm6524_vm6, %v6499_v44 }
 0x797   : > { %v7142_v52 = vpop.permute.xlu1 %7141 }
 0x798   : > { %7180 = vst.msk [vmem:[#allocation2 + $0xa8] sm:$0xff] %vm7169_vm5, %v7142_v52  ;;  %v6757_v53 = vpop.permute.xlu0 %6756 }
 0x79b   : > { %v6628_v4 = vpop.permute.xlu1 %6627 }
 0x79c   : > { %6665 = vst.msk [vmem:[#allocation2 + $0xb8] sm:$0xff] %vm6653_vm7, %v6628_v4  ;;  %v6372_v29 = vpop.permute.xlu0 %6371 }
 0x79d   : > { %6794 = vst.msk [vmem:[#allocation2 + $0xb8] sm:$0xff] %vm6782_vm8, %v6757_v53  ;;  %v7202_v53 = vld [vmem:[#allocation2 + $0x80] sm:$0xff] }
 0x79f   : > { %v6114_v48 = vpop.permute.xlu1 %6113 }
 0x7a0   : > { %6150 = vst.msk [vmem:[#allocation2 + $0xc8] sm:$0xff] %vm6137_vm4, %v6114_v48  ;;  %v7007_v62 = vpop.permute.xlu0 %7006 }
 0x7a3   : > { %v6243_v28 = vpop.permute.xlu1 %6242 }
 0x7a4   : > { %6279 = vst.msk [vmem:[#allocation2 + $0xc8] sm:$0xff] %vm6266_vm11, %v6243_v28  ;;  %v7136_v56 = vpop.permute.xlu0 %7135 }
 0x7a5   : > { %6408 = vst.msk [vmem:[#allocation2 + $0xc8] sm:$0xff] %vm6395_vm3, %v6372_v29 }
 0x7a7   : > { %v7404_v55 = vpop.f32.mrb[60].mxu1  ;;  %v6878_v40 = vpop.permute.xlu1 %6877 }
 0x7a8   : > { %v15023_v25 = vadd.f32 %v15020_v35, %v7404_v55  ;;  %6919 = vst.msk [vmem:[#allocation2 + $0x78] sm:$0xff] %vm6911_vm9, %v6878_v40  ;;  %v7406_v60 = vpop.f32.mrb[61].mxu1  ;;  %v6622_v0 = vpop.permute.xlu0 %6621 }
 0x7a9   : > { %7048 = vst.msk [vmem:[#allocation2 + $0x78] sm:$0xff] %vm7040_vm10, %v7007_v62  ;;  %v7407_v57 = vpop.f32.mrb[62].mxu1 }
 0x7aa   : > { %v7563_v6 = vmul.f32 %v15023_v25, %v15023_v25  ;;  %7177 = vst.msk [vmem:[#allocation2 + $0x78] sm:$0xff] %vm7169_vm5, %v7136_v56  ;;  %v15031_v38 = vadd.f32 %v15020_v35, %v7407_v57  ;;  %v7409_v42 = vpop.f32.mrb[63].mxu1  ;;  %v7531_v55 = vmul.f32 0.5, %v15023_v25 }
 0x7ab   : > { %v6493_v11 = vpop.permute.xlu1 %6492 }
 0x7ac   : > { %v7595_v63 = vmul.f32 %v7563_v6, %v15023_v25  ;;  %v7564_v49 = vmul.f32 %v15031_v38, %v15031_v38  ;;  %6533 = vst.msk [vmem:[#allocation2 + $0x88] sm:$0xff] %vm6524_vm6, %v6493_v11  ;;  %v6108_v22 = vpop.permute.xlu0 %6107  ;;  %v7532_v42 = vmul.f32 0.5, %v15031_v38 }
 0x7ad   : > { %6662 = vst.msk [vmem:[#allocation2 + $0x88] sm:$0xff] %vm6653_vm7, %v6622_v0 }
 0x7ae   : > { %v7627_v8 = vmul.f32 0.044715, %v7595_v63  ;;  %v7596_v7 = vmul.f32 %v7564_v49, %v15031_v38  ;;  %6147 = vst.msk [vmem:[#allocation2 + $0x98] sm:$0xff] %vm6137_vm4, %v6108_v22  ;;  %v10243_v63 = vld [vmem:[#allocation19 + $0x28] sm:$0xff]   ;;  %v7204_v22 = vld [vmem:[#allocation2 + $0x90] sm:$0xff] }
 0x7af   : > { %v6751_v27 = vpop.permute.xlu1 %6750 }
 0x7b0   : > { %v7659_v43 = vadd.f32 %v7627_v8, %v15023_v25  ;;  %v7628_v50 = vmul.f32 0.044715, %v7596_v7  ;;  %6791 = vst.msk [vmem:[#allocation2 + $0x88] sm:$0xff] %vm6782_vm8, %v6751_v27  ;;  %v6237_v45 = vpop.permute.xlu0 %6236 }
 0x7b1   : > { %6920 = vst.msk [vmem:[#allocation2 + $0x88] sm:$0xff] %vm6911_vm9, %v14903_v39  ;;  %v7201_v5 = vld [vmem:[#allocation2 + $0x78] sm:$0xff] }
 0x7b2   : > { %v7691_v46 = vmul.f32 0.7978846, %v7659_v43  ;;  %v7660_v34 = vadd.f32 %v7628_v50, %v15031_v38  ;;  %7049 = vst.msk [vmem:[#allocation2 + $0x88] sm:$0xff] %vm7040_vm10, %v14905_v59  ;;  %9821 = vmatprep.mubr.msk.bf16.mxu1 %vm7317_vm15, %v7201_v5  ;;  %v10242_v59 = vld [vmem:[#allocation19 + $0x20] sm:$0xff]   ;;  %v7207_v43 = vld [vmem:[#allocation2 + $0xa8] sm:$0xff] }
 0x7b3   : > { %7178 = vst.msk [vmem:[#allocation2 + $0x88] sm:$0xff] %vm7169_vm5, %v14911_v47  ;;  %7459 = vmatmul.mubr.bf16.gmra.mrb[88].mxu1 %v7200_v26  ;;  %v6366_v39 = vpop.permute.xlu1 %6365  ;;  %9270 = vmatpush1.bf16.msra.mxu0 %v10242_v59  ;;  %v10244_v50 = vld [vmem:[#allocation19 + $0x30] sm:$0xff]  }
 0x7b4   : > { %6276 = vst.msk [vmem:[#allocation2 + $0x98] sm:$0xff] %vm6266_vm11, %v6237_v45  ;;  %10444 = vtanh.f32 %v7691_v46  ;;  %v7692_v37 = vmul.f32 0.7978846, %v7660_v34  ;;  %v7015_v24 = vpop.permute.xlu0 %7014  ;;  %9271 = vmatprep.subr.bf16.mxu0 %v10946_v21  ;;  %v10245_v34 = vld [vmem:[#allocation19 + $0x38] sm:$0xff]  }
 0x7b5   : > { %6405 = vst.msk [vmem:[#allocation2 + $0x98] sm:$0xff] %vm6395_vm3, %v6366_v39 }
 0x7b6   : > { %6534 = vst.msk [vmem:[#allocation2 + $0x98] sm:$0xff] %vm6524_vm6, %v14909_v51  ;;  %10446 = vtanh.f32 %v7692_v37  ;;  %v7206_v37 = vld [vmem:[#allocation2 + $0xa0] sm:$0xff] }
 0x7b7   : > { %6663 = vst.msk [vmem:[#allocation2 + $0x98] sm:$0xff] %vm6653_vm7, %v14918_v31  ;;  %v6886_v47 = vpop.permute.xlu1 %6885  ;;  %9272 = vmatpush1.bf16.msra.mxu0 %v10243_v63 }
 0x7b8   : > { %6792 = vst.msk [vmem:[#allocation2 + $0x98] sm:$0xff] %vm6782_vm8, %v14916_v23  ;;  %v7144_v44 = vpop.permute.xlu0 %7143  ;;  %9273 = vmatprep.subr.bf16.mxu0 %v10946_v21 }
 0x7b9   : > { %6921 = vst.msk [vmem:[#allocation2 + $0x98] sm:$0xff] %vm6911_vm9, %v14961_v61  ;;  %6923 = vst.msk [vmem:[#allocation2 + $0xb8] sm:$0xff] %vm6911_vm9, %v6886_v47  ;;  %v7412_v51 = vpop.f32.mrb[64].mxu1 }
 0x7ba   : > { %7050 = vst.msk [vmem:[#allocation2 + $0x98] sm:$0xff] %vm7040_vm10, %v14959_v19  ;;  %7052 = vst.msk [vmem:[#allocation2 + $0xb8] sm:$0xff] %vm7040_vm10, %v7015_v24  ;;  %v15071_v31 = vadd.f32 %v15020_v35, %v7412_v51  ;;  %v7414_v23 = vpop.f32.mrb[65].mxu1  ;;  %v7203_v52 = vld [vmem:[#allocation2 + $0x88] sm:$0xff] }
 0x7bb   : > { %7179 = vst.msk [vmem:[#allocation2 + $0x98] sm:$0xff] %vm7169_vm5, %v14965_v20  ;;  %7181 = vst.msk [vmem:[#allocation2 + $0xb8] sm:$0xff] %vm7169_vm5, %v7144_v44  ;;  %v7415_v61 = vpop.f32.mrb[66].mxu1  ;;  %9822 = vmatprep.mubr.msk.bf16.mxu1 %vm7317_vm15, %v7203_v52  ;;  %v6501_v19 = vpop.permute.xlu1 %6500  ;;  %9274 = vmatpush1.bf16.msra.mxu0 %v10244_v50  ;;  %v10248_v50 = vld [vmem:[#allocation19 + $0x50] sm:$0xff]  }
 0x7bc   : > { %v7565_v4 = vmul.f32 %v15071_v31, %v15071_v31  ;;  %v15079_v20 = vadd.f32 %v15020_v35, %v7415_v61  ;;  %6537 = vst.msk [vmem:[#allocation2 + $0xc8] sm:$0xff] %vm6524_vm6, %v6501_v19  ;;  %v7417_v29 = vpop.f32.mrb[67].mxu1  ;;  %7467 = vmatmul.mubr.bf16.gmra.mrb[92].mxu1 %v7202_v53  ;;  %v6630_v56 = vpop.permute.xlu0 %6629  ;;  %9275 = vmatprep.subr.bf16.mxu0 %v10946_v21 }
 0x7bd   : > { %6666 = vst.msk [vmem:[#allocation2 + $0xc8] sm:$0xff] %vm6653_vm7, %v6630_v56 }
 0x7be   : > { %v10445_v48 = vpop.eup %10444  ;;  %v7597_v62 = vmul.f32 %v7565_v4, %v15071_v31  ;;  %v7566_v28 = vmul.f32 %v15079_v20, %v15079_v20  ;;  %v10246_v4 = vld [vmem:[#allocation19 + $0x40] sm:$0xff]  }
 0x7bf   : > { %v7755_v40 = vadd.f32 1.0, %v10445_v48  ;;  %v6759_v33 = vpop.permute.xlu1 %6758  ;;  %9276 = vmatpush1.bf16.msra.mxu0 %v10245_v34 }
 0x7c0   : > { %v10447_v60 = vpop.eup %10446  ;;  %v7629_v57 = vmul.f32 0.044715, %v7597_v62  ;;  %v7598_v58 = vmul.f32 %v7566_v28, %v15079_v20  ;;  %6795 = vst.msk [vmem:[#allocation2 + $0xc8] sm:$0xff] %vm6782_vm8, %v6759_v33  ;;  %v6116_v25 = vpop.permute.xlu0 %6115  ;;  %9277 = vmatprep.subr.bf16.mxu0 %v10946_v21 }
 0x7c1   : > { %v7787_v6 = vmul.f32 %v7755_v40, %v7531_v55  ;;  %v7756_v0 = vadd.f32 1.0, %v10447_v60  ;;  %6151 = vst.msk [vmem:[#allocation2 + $0xd8] sm:$0xff] %vm6137_vm4, %v6116_v25 }
 0x7c2   : > { %v7205_v11 = vld [vmem:[#allocation2 + $0x98] sm:$0xff]  ;;  %v7661_v49 = vadd.f32 %v7629_v57, %v15071_v31  ;;  %v7630_v54 = vmul.f32 0.044715, %v7598_v58  ;;  %v7533_v58 = vmul.f32 0.5, %v15071_v31 }
 0x7c3   : > { %9823 = vmatprep.mubr.msk.bf16.mxu1 %vm7317_vm15, %v7205_v11  ;;  %7873 = vst.msk [vmem:[#allocation3 + $0x19] sm:$0xff] %vm2374_vm12, %v7787_v6  ;;  %v7788_v8 = vmul.f32 %v7756_v0, %v7532_v42  ;;  %v6374_v7 = vpop.permute.xlu1 %6373  ;;  %v7209_v59 = vld [vmem:[#allocation2 + $0xb8] sm:$0xff]  ;;  %9278 = vmatpush1.bf16.msra.mxu0 %v10246_v4  ;;  %v10247_v0 = vld [vmem:[#allocation19 + $0x48] sm:$0xff]  }
 0x7c4   : > { %v7693_v27 = vmul.f32 0.7978846, %v7661_v49  ;;  %v7662_v38 = vadd.f32 %v7630_v54, %v15079_v20  ;;  %7475 = vmatmul.mubr.bf16.gmra.mrb[96].mxu1 %v7204_v22  ;;  %v6245_v32 = vpop.permute.xlu0 %6244  ;;  %9279 = vmatprep.subr.bf16.mxu0 %v10946_v21  ;;  %v7208_v22 = vld [vmem:[#allocation2 + $0xb0] sm:$0xff] }
 0x7c5   : > { %7874 = vst.msk [vmem:[#allocation3 + $0x21] sm:$0xff] %vm2374_vm12, %v7788_v8  ;;  %9824 = vmatprep.mubr.msk.bf16.mxu1 %vm7317_vm15, %v7207_v43  ;;  %v7534_v8 = vmul.f32 0.5, %v15079_v20 }
 0x7c6   : > { %10448 = vtanh.f32 %v7693_v27  ;;  %v7694_v5 = vmul.f32 0.7978846, %v7662_v38  ;;  %6280 = vst.msk [vmem:[#allocation2 + $0xd8] sm:$0xff] %vm6266_vm11, %v6245_v32 }
 0x7c7   : > { %v7017_v46 = vpop.permute.xlu1 %7016  ;;  %6409 = vst.msk [vmem:[#allocation2 + $0xd8] sm:$0xff] %vm6395_vm3, %v6374_v7  ;;  %9280 = vmatpush1.bf16.msra.mxu0 %v10247_v0 }
 0x7c8   : > { %10450 = vtanh.f32 %v7694_v5  ;;  %v6888_v45 = vpop.permute.xlu0 %6887  ;;  %9281 = vmatprep.subr.bf16.mxu0 %v10946_v21 }
 0x7c9   : > { %6924 = vst.msk [vmem:[#allocation2 + $0xc8] sm:$0xff] %vm6911_vm9, %v6888_v45 }
 0x7ca   : > { %v8421_v24 = vld [vmem:[#allocation3 + $0x19] sm:$0xff]  ;;  %7053 = vst.msk [vmem:[#allocation2 + $0xc8] sm:$0xff] %vm7040_vm10, %v7017_v46 }
 0x7cb   : > { %v7146_v39 = vpop.permute.xlu1 %7145  ;;  %v8292_v44 = vld [vmem:[#allocation3 + $0x18] sm:$0xff]  ;;  %9282 = vmatpush1.bf16.msra.mxu0 %v10248_v50 }
 0x7cc   : > { %v7420_v26 = vpop.f32.mrb[68].mxu1  ;;  %7483 = vmatmul.mubr.bf16.gmra.mrb[100].mxu1 %v7206_v37  ;;  %v8422_v23 = vld [vmem:[#allocation3 + $0x21] sm:$0xff]  ;;  %7182 = vst.msk [vmem:[#allocation2 + $0xc8] sm:$0xff] %vm7169_vm5, %v7146_v39  ;;  %v6503_v28 = vpop.permute.xlu0 %6502  ;;  %9283 = vmatprep.subr.bf16.mxu0 %v10946_v21 }
 0x7cd   : > { %v15104_v47 = vadd.f32 %v15020_v35, %v7420_v26  ;;  %v7422_v51 = vpop.f32.mrb[69].mxu1  ;;  %v8293_v52 = vld [vmem:[#allocation3 + $0x20] sm:$0xff]  ;;  %9825 = vmatprep.mubr.msk.bf16.mxu1 %vm7317_vm15, %v7209_v59  ;;  %v8453_v19 = vpack.c.bf16 %v8422_v23, %v8421_v24  ;;  %6538 = vst.msk [vmem:[#allocation2 + $0xd8] sm:$0xff] %vm6524_vm6, %v6503_v28  ;;  %v10249_v26 = vld [vmem:[#allocation19 + $0x58] sm:$0xff]   ;;  %v10250_v24 = vld [vmem:[#allocation19 + $0x60] sm:$0xff]  }
 0x7ce   : > { %v7423_v61 = vpop.f32.mrb[70].mxu1  ;;  %v8324_v53 = vpack.c.bf16 %v8293_v52, %v8292_v44  ;;  %v8550_v56 = vld [vmem:[#allocation3 + $0x1a] sm:$0xff]  ;;  %v8551_v55 = vld [vmem:[#allocation3 + $0x22] sm:$0xff] }
 0x7cf   : > { %v7567_v29 = vmul.f32 %v15104_v47, %v15104_v47  ;;  %v15112_v48 = vadd.f32 %v15020_v35, %v7423_v61  ;;  %v7425_v62 = vpop.f32.mrb[71].mxu1  ;;  %8485 = vrot.lane.b32.xlu0 %v8453_v19, %s10957_s30  ;;  %v6632_v40 = vpop.permute.xlu1 %6631  ;;  %v8582_v42 = vpack.c.bf16 %v8551_v55, %v8550_v56  ;;  %v7210_v59 = vld [vmem:[#allocation2 + $0xc0] sm:$0xff]  ;;  %9284 = vmatpush1.bf16.msra.mxu0 %v10249_v26 }
 0x7d0   : > { %8356 = vrot.lane.b32.xlu1 %v8324_v53, %s15994_s16  ;;  %v10449_v33 = vpop.eup %10448  ;;  %6667 = vst.msk [vmem:[#allocation2 + $0xd8] sm:$0xff] %vm6653_vm7, %v6632_v40  ;;  %v6761_v54 = vpop.permute.xlu0 %6760  ;;  %9285 = vmatprep.subr.bf16.mxu0 %v10946_v21  ;;  %v10251_v44 = vld [vmem:[#allocation19 + $0x68] ss:$0 sps:$4 sm:$0xff]  }
 0x7d1   : > { %v7599_v60 = vmul.f32 %v7567_v29, %v15104_v47  ;;  %v7568_v57 = vmul.f32 %v15112_v48, %v15112_v48  ;;  %v7757_v6 = vadd.f32 1.0, %v10449_v33  ;;  %6796 = vst.msk [vmem:[#allocation2 + $0xd8] sm:$0xff] %vm6782_vm8, %v6761_v54 }
 0x7d2   : > { %v10451_v11 = vpop.eup %10450 }
 0x7d3   : > { %v7631_v63 = vmul.f32 0.044715, %v7599_v60  ;;  %v7600_v49 = vmul.f32 %v7568_v57, %v15112_v48  ;;  %v7789_v25 = vmul.f32 %v7757_v6, %v7533_v58  ;;  %v7758_v7 = vadd.f32 1.0, %v10451_v11  ;;  %7971 = vrot.lane.b32.xlu0 %v8324_v53, %s10955_s24  ;;  %v6118_v31 = vpop.permute.xlu1 %6117  ;;  %v7211_v43 = vld [vmem:[#allocation2 + $0xc8] sm:$0xff]  ;;  %9286 = vmatpush1.bf16.msra.mxu0 %v10250_v24 }
 0x7d4   : > { %8614 = vrot.lane.b32.xlu1 %v8582_v42, %s10934_s21  ;;  %6152 = vst.msk [vmem:[#allocation2 + $0xe8] sm:$0xff] %vm6137_vm4, %v6118_v31  ;;  %7491 = vmatmul.mubr.bf16.gmra.mrb[104].mxu1 %v7208_v22  ;;  %v6376_v46 = vpop.permute.xlu0 %6375  ;;  %v9259_v6 = vsel %vm1867_vm2, %v10251_v44, 0  ;;  %vm8146_vm2 = vcmask 490944  }
 0x7d5   : > { %v7663_v27 = vadd.f32 %v7631_v63, %v15104_v47  ;;  %v7632_v38 = vmul.f32 0.044715, %v7600_v49  ;;  %7875 = vst.msk [vmem:[#allocation3 + $0x31] sm:$0xff] %vm2374_vm12, %v7789_v25  ;;  %v7790_v20 = vmul.f32 %v7758_v7, %v7534_v8  ;;  %9826 = vmatprep.mubr.msk.bf16.mxu1 %vm7317_vm15, %v7211_v43  ;;  %9287 = vmatprep.subr.bf16.mxu0 %v10946_v21  ;;  %v7535_v49 = vmul.f32 0.5, %v15104_v47 }
 0x7d7   : > { %v7695_v5 = vmul.f32 0.7978846, %v7663_v27  ;;  %v7664_v32 = vadd.f32 %v7632_v38, %v15112_v48  ;;  %7876 = vst.msk [vmem:[#allocation3 + $0x39] sm:$0xff] %vm2374_vm12, %v7790_v20  ;;  %8100 = vrot.lane.b32.xlu0 %v8453_v19, %s15993_s26  ;;  %v6247_v34 = vpop.permute.xlu1 %6246  ;;  %9288 = vmatpush1.bf16.msra.mxu0 %v9259_v6  ;;  %v7536_v38 = vmul.f32 0.5, %v15112_v48 }
 0x7d8   : > { %8229 = vrot.lane.b32.xlu1 %v8582_v42, %s10956_s12  ;;  %6281 = vst.msk [vmem:[#allocation2 + $0xe8] sm:$0xff] %vm6266_vm11, %v6247_v34  ;;  %v7019_v39 = vpop.permute.xlu0 %7018 }
 0x7d9   : > { %10452 = vtanh.f32 %v7695_v5  ;;  %v7696_v45 = vmul.f32 0.7978846, %v7664_v32  ;;  %6410 = vst.msk [vmem:[#allocation2 + $0xe8] sm:$0xff] %vm6395_vm3, %v6376_v46  ;;  %v7212_v46 = vld [vmem:[#allocation2 + $0xd0] sm:$0xff] }
 0x7db   : > { %10454 = vtanh.f32 %v7696_v45  ;;  %v6890_v37 = vpop.permute.xlu1 %6889 }
 0x7dc   : > { %6925 = vst.msk [vmem:[#allocation2 + $0xd8] sm:$0xff] %vm6911_vm9, %v6890_v37  ;;  %7499 = vmatmul.mubr.bf16.gmra.mrb[108].mxu1 %v7210_v59  ;;  %v8678_v23 = vld [vmem:[#allocation3 + $0x30] sm:$0xff]  ;;  %v7148_v19 = vpop.permute.xlu0 %7147 }
 0x7dd   : > { %7054 = vst.msk [vmem:[#allocation2 + $0xd8] sm:$0xff] %vm7040_vm10, %v7019_v39  ;;  %v8806_v4 = vld [vmem:[#allocation3 + $0x31] sm:$0xff] }
 0x7de   : > { %v8679_v53 = vld [vmem:[#allocation3 + $0x38] sm:$0xff]  ;;  %7183 = vst.msk [vmem:[#allocation2 + $0xd8] sm:$0xff] %vm7169_vm5, %v7148_v19 }
 0x7df   : > { %v7428_v51 = vpop.f32.mrb[72].mxu1  ;;  %v8807_v29 = vld [vmem:[#allocation3 + $0x39] sm:$0xff]  ;;  %v6505_v28 = vpop.permute.xlu1 %6504  ;;  %v8710_v56 = vpack.c.bf16 %v8679_v53, %v8678_v23 }
 0x7e0   : > { %v15144_v52 = vadd.f32 %v15020_v35, %v7428_v51  ;;  %v7430_v61 = vpop.f32.mrb[73].mxu1  ;;  %v15147_v55 = vpack.c.bf16 %v8807_v29, %v8806_v4  ;;  %6539 = vst.msk [vmem:[#allocation2 + $0xe8] sm:$0xff] %vm6524_vm6, %v6505_v28  ;;  %v8934_v57 = vld [vmem:[#allocation3 + $0x32] sm:$0xff]  ;;  %v8935_v58 = vld [vmem:[#allocation3 + $0x3a] sm:$0xff]  ;;  %v6634_v63 = vpop.permute.xlu0 %6633 }
 0x7e1   : > { %v7431_v62 = vpop.f32.mrb[74].mxu1  ;;  %8742 = vrot.lane.b32.xlu0 %v8710_v56, %s10935_s1  ;;  %6668 = vst.msk [vmem:[#allocation2 + $0xe8] sm:$0xff] %vm6653_vm7, %v6634_v63  ;;  %v8966_v8 = vpack.c.bf16 %v8935_v58, %v8934_v57 }
 0x7e2   : > { %v7569_v40 = vmul.f32 %v15144_v52, %v15144_v52  ;;  %v15152_v33 = vadd.f32 %v15020_v35, %v7431_v62  ;;  %v7433_v60 = vpop.f32.mrb[75].mxu1  ;;  %8870 = vrot.lane.b32.xlu1 %v15147_v55, %s15995_s22 }
 0x7e3   : > { %v10453_v42 = vpop.eup %10452  ;;  %v6763_v25 = vpop.permute.xlu1 %6762 }
 0x7e4   : > { %v7601_v0 = vmul.f32 %v7569_v40, %v15144_v52  ;;  %v7570_v11 = vmul.f32 %v15152_v33, %v15152_v33  ;;  %v7759_v54 = vadd.f32 1.0, %v10453_v42  ;;  %6797 = vst.msk [vmem:[#allocation2 + $0xe8] sm:$0xff] %vm6782_vm8, %v6763_v25  ;;  %v6120_v20 = vpop.permute.xlu0 %6119 }
 0x7e5   : > { %v10455_v7 = vpop.eup %10454  ;;  %8358 = vrot.lane.b32.xlu0 %v8710_v56, %s15994_s16  ;;  %v7213_v50 = vld [vmem:[#allocation2 + $0xd8] sm:$0xff]  ;;  %6153 = vst.msk [vmem:[#allocation2 + $0xf8] sm:$0xff] %vm6137_vm4, %v6120_v20  ;;  %vm8275_vm4 = vcmask 523744  }
 0x7e6   : > { %v7633_v31 = vmul.f32 0.044715, %v7601_v0  ;;  %v7602_v22 = vmul.f32 %v7570_v11, %v15152_v33  ;;  %v7791_v27 = vmul.f32 %v7759_v54, %v7535_v49  ;;  %v7760_v43 = vadd.f32 1.0, %v10455_v7  ;;  %8998 = vrot.lane.b32.xlu1 %v8966_v8, %s15996_s13  ;;  %9827 = vmatprep.mubr.msk.bf16.mxu1 %vm7317_vm15, %v7213_v50 }
 0x7e7   : > { %v6378_v32 = vpop.permute.xlu1 %6377  ;;  %7507 = vmatmul.mubr.bf16.gmra.mrb[112].mxu1 %v7212_v46  ;;  %v7537_v11 = vmul.f32 0.5, %v15144_v52 }
 0x7e8   : > { %v7665_v21 = vadd.f32 %v7633_v31, %v15144_v52  ;;  %v7634_v47 = vmul.f32 0.044715, %v7602_v22  ;;  %7877 = vst.msk [vmem:[#allocation3 + $0x49] sm:$0xff] %vm2374_vm12, %v7791_v27  ;;  %v7792_v5 = vmul.f32 %v7760_v43, %v7536_v38  ;;  %v6249_v26 = vpop.permute.xlu0 %6248  ;;  %v7538_v22 = vmul.f32 0.5, %v15152_v33 }
 0x7e9   : > { %8616 = vrot.lane.b32.xlu0 %v8966_v8, %s10934_s21  ;;  %6282 = vst.msk [vmem:[#allocation2 + $0xf8] sm:$0xff] %vm6266_vm11, %v6249_v26  ;;  %vm8533_vm11 = vcmask 589344  }
 0x7ea   : > { %v7697_v48 = vmul.f32 0.7978846, %v7665_v21  ;;  %v7666_v34 = vadd.f32 %v7634_v47, %v15152_v33  ;;  %7878 = vst.msk [vmem:[#allocation3 + $0x51] sm:$0xff] %vm2374_vm12, %v7792_v5  ;;  %8487 = vrot.lane.b32.xlu1 %v15147_v55, %s10957_s30  ;;  %v7214_v33 = vld [vmem:[#allocation2 + $0xe0] sm:$0xff] }
 0x7eb   : > { %v7021_v39 = vpop.permute.xlu1 %7020  ;;  %6411 = vst.msk [vmem:[#allocation2 + $0xf8] sm:$0xff] %vm6395_vm3, %v6378_v32  ;;  %vm15997_vm3 = vcmask 687744  }
 0x7ec   : > { %10456 = vtanh.f32 %v7697_v48  ;;  %v7698_v45 = vmul.f32 0.7978846, %v7666_v34  ;;  %v6892_v37 = vpop.permute.xlu0 %6891 }
 0x7ed   : > { %8231 = vrot.lane.b32.xlu0 %v8966_v8, %s10956_s12  ;;  %6926 = vst.msk [vmem:[#allocation2 + $0xe8] sm:$0xff] %vm6911_vm9, %v6892_v37 }
 0x7ee   : > { %10458 = vtanh.f32 %v7698_v45  ;;  %7973 = vrot.lane.b32.xlu1 %v8710_v56, %s10955_s24  ;;  %7055 = vst.msk [vmem:[#allocation2 + $0xe8] sm:$0xff] %vm7040_vm10, %v7021_v39 }
 0x7ef   : > { %v7436_v59 = vpop.f32.mrb[76].mxu1  ;;  %v7150_v24 = vpop.permute.xlu1 %7149  ;;  %v8808_v44 = vld [vmem:[#allocation3 + $0x49] sm:$0xff] }
 0x7f0   : > { %v15186_v51 = vadd.f32 %v15020_v35, %v7436_v59  ;;  %v7438_v23 = vpop.f32.mrb[77].mxu1  ;;  %7184 = vst.msk [vmem:[#allocation2 + $0xe8] sm:$0xff] %vm7169_vm5, %v7150_v24  ;;  %v6507_v56 = vpop.permute.xlu0 %6506  ;;  %v8680_v40 = vld [vmem:[#allocation3 + $0x48] sm:$0xff]  ;;  %v7216_v59 = vld [vmem:[#allocation2 + $0xf0] sm:$0xff] }
 0x7f1   : > { %v8809_v61 = vld [vmem:[#allocation3 + $0x51] sm:$0xff]  ;;  %v7439_v53 = vpop.f32.mrb[78].mxu1  ;;  %6540 = vst.msk [vmem:[#allocation2 + $0xf8] sm:$0xff] %vm6524_vm6, %v6507_v56  ;;  %vm15998_vm6 = vcmask 720544  }
 0x7f2   : > { %v8681_v19 = vld [vmem:[#allocation3 + $0x50] sm:$0xff]  ;;  %8102 = vrot.lane.b32.xlu1 %v15147_v55, %s15993_s26  ;;  %v15191_v4 = vpack.c.bf16 %v8809_v61, %v8808_v44  ;;  %v7571_v29 = vmul.f32 %v15186_v51, %v15186_v51  ;;  %v15196_v62 = vadd.f32 %v15020_v35, %v7439_v53  ;;  %v7441_v28 = vpop.f32.mrb[79].mxu1  ;;  %v7539_v53 = vmul.f32 0.5, %v15186_v51 }
 0x7f3   : > { %v8936_v60 = vld [vmem:[#allocation3 + $0x4a] sm:$0xff]  ;;  %v8937_v57 = vld [vmem:[#allocation3 + $0x52] sm:$0xff]  ;;  %v6636_v58 = vpop.permute.xlu1 %6635  ;;  %v8711_v55 = vpack.c.bf16 %v8681_v19, %v8680_v40 }
 0x7f4   : > { %8872 = vrot.lane.b32.xlu0 %v15191_v4, %s15995_s22  ;;  %v7603_v42 = vmul.f32 %v7571_v29, %v15186_v51  ;;  %v7572_v0 = vmul.f32 %v15196_v62, %v15196_v62  ;;  %6669 = vst.msk [vmem:[#allocation2 + $0xf8] sm:$0xff] %vm6653_vm7, %v6636_v58  ;;  %v8967_v49 = vpack.c.bf16 %v8937_v57, %v8936_v60  ;;  %v6765_v7 = vpop.permute.xlu0 %6764  ;;  %v7540_v40 = vmul.f32 0.5, %v15196_v62 }
 0x7f5   : > { %6798 = vst.msk [vmem:[#allocation2 + $0xf8] sm:$0xff] %vm6782_vm8, %v6765_v7  ;;  %vm9209_vm7 = vcmask 719872   ;;  %vm15999_vm8 = vmmov %vm15997_vm3 }
 0x7f6   : > { %v10457_v6 = vpop.eup %10456  ;;  %8744 = vrot.lane.b32.xlu1 %v8711_v55, %s10935_s1  ;;  %v7635_v25 = vmul.f32 0.044715, %v7603_v42  ;;  %v7604_v8 = vmul.f32 %v7572_v0, %v15196_v62  ;;  %6927 = vst.msk [vmem:[#allocation2 + $0xf8] sm:$0xff] %vm6911_vm9, %v14452_v30  ;;  %vm16000_vm9 = vmmov %vm15998_vm6 }
 0x7f7   : > { %v7761_v63 = vadd.f32 1.0, %v10457_v6  ;;  %v7215_v43 = vld [vmem:[#allocation2 + $0xe8] sm:$0xff]  ;;  %v7152_v47 = vpop.permute.xlu1 %7151 }
 0x7f8   : > { %v10459_v54 = vpop.eup %10458  ;;  %9000 = vrot.lane.b32.xlu0 %v8967_v49, %s15996_s13  ;;  %v7667_v38 = vadd.f32 %v7635_v25, %v15186_v51  ;;  %v7636_v52 = vmul.f32 0.044715, %v7604_v8  ;;  %9828 = vmatprep.mubr.msk.bf16.mxu1 %vm7317_vm15, %v7215_v43  ;;  %v7023_v5 = vpop.permute.xlu0 %7022 }
 0x7f9   : > { %v7793_v31 = vmul.f32 %v7761_v63, %v7537_v11  ;;  %v7762_v27 = vadd.f32 1.0, %v10459_v54  ;;  %7515 = vmatmul.mubr.bf16.gmra.mrb[116].mxu1 %v7214_v33  ;;  %7056 = vst.msk [vmem:[#allocation2 + $0xf8] sm:$0xff] %vm7040_vm10, %v7023_v5  ;;  %vm16001_vm10 = vmmov %vm15997_vm3 }
 0x7fa   : > { %8360 = vrot.lane.b32.xlu1 %v8711_v55, %s15994_s16  ;;  %v7699_v20 = vmul.f32 0.7978846, %v7667_v38  ;;  %v7668_v50 = vadd.f32 %v7636_v52, %v15196_v62  ;;  %7185 = vst.msk [vmem:[#allocation2 + $0xf8] sm:$0xff] %vm7169_vm5, %v7152_v47  ;;  %vm16002_vm5 = vmmov %vm15998_vm6 }
 0x7fb   : > { %7879 = vst.msk [vmem:[#allocation3 + $0x61] sm:$0xff] %vm2374_vm12, %v7793_v31  ;;  %v7794_v21 = vmul.f32 %v7762_v27, %v7538_v22  ;;  %v8099_v46 = vpop.permute.xlu1 %8098 }
 0x7fc   : > { %8489 = vrot.lane.b32.xlu0 %v15191_v4, %s10957_s30  ;;  %10460 = vtanh.f32 %v7699_v20  ;;  %v7700_v30 = vmul.f32 0.7978846, %v7668_v50  ;;  %v7970_v32 = vpop.permute.xlu0 %7969 }
 0x7fd   : > { %7880 = vst.msk [vmem:[#allocation3 + $0x69] sm:$0xff] %vm2374_vm12, %v7794_v21 }
 0x7fe   : > { %8618 = vrot.lane.b32.xlu1 %v8967_v49, %s10934_s21  ;;  %10462 = vtanh.f32 %v7700_v30  ;;  %8018 = vst.msk [vmem:[#allocation2 + $0x8] sm:$0xff] %vm8017_vm1, %v7970_v32 }
 0x7ff   : > { %8147 = vst.msk [vmem:[#allocation2 + $0x8] sm:$0xff] %vm8146_vm2, %v8099_v46 }
 0x800   : > { %7975 = vrot.lane.b32.xlu0 %v8711_v55, %s10955_s24  ;;  %v8228_v26 = vpop.permute.xlu0 %8227 }
 0x801   : > { %v7217_v37 = vld [vmem:[#allocation2 + $0xf8] sm:$0xff]  ;;  %8276 = vst.msk [vmem:[#allocation2 + $0x8] sm:$0xff] %vm8275_vm4, %v8228_v26 }
 0x802   : > { %8233 = vrot.lane.b32.xlu1 %v8967_v49, %s10956_s12  ;;  %v8810_v48 = vld [vmem:[#allocation3 + $0x61] sm:$0xff]  ;;  %9829 = vmatprep.mubr.msk.bf16.mxu1 %vm7317_vm15, %v7217_v37  ;;  %v15254_v49 = vpop.permute.xlu1 %8772  ;;  %vm8404_vm15 = vcmask 556544  }
 0x803   : > { %v8682_v24 = vld [vmem:[#allocation3 + $0x60] sm:$0xff]  ;;  %7523 = vmatmul.mubr.bf16.gmra.mrb[120].mxu1 %v7216_v59 }
 0x804   : > { %v8811_v34 = vld [vmem:[#allocation3 + $0x69] sm:$0xff]  ;;  %8104 = vrot.lane.b32.xlu0 %v15191_v4, %s15993_s26 }
 0x805   : > { %v8683_v45 = vld [vmem:[#allocation3 + $0x68] sm:$0xff]  ;;  %v8840_v39 = vpack.c.bf16 %v8811_v34, %v8810_v48 }
 0x806   : > { %v8938_v23 = vld [vmem:[#allocation3 + $0x62] sm:$0xff]  ;;  %v8939_v44 = vld [vmem:[#allocation3 + $0x6a] sm:$0xff]  ;;  %v8712_v61 = vpack.c.bf16 %v8683_v45, %v8682_v24  ;;  %v10461_v19 = vpop.eup %10460 }
 0x807   : > { %8874 = vrot.lane.b32.xlu1 %v8840_v39, %s15995_s22  ;;  %v7763_v29 = vadd.f32 1.0, %v10461_v19  ;;  %v8968_v4 = vpack.c.bf16 %v8939_v44, %v8938_v23 }
 0x808   : > { %8746 = vrot.lane.b32.xlu0 %v8712_v61, %s10935_s1  ;;  %v10463_v28 = vpop.eup %10462 }
 0x809   : > { %v7795_v56 = vmul.f32 %v7763_v29, %v7539_v53  ;;  %v7764_v60 = vadd.f32 1.0, %v10463_v28 }
 0x80b   : > { %9002 = vrot.lane.b32.xlu1 %v8968_v4, %s15996_s13  ;;  %7881 = vst.msk [vmem:[#allocation3 + $0x79] sm:$0xff] %vm2374_vm12, %v7795_v56  ;;  %v7796_v57 = vmul.f32 %v7764_v60, %v7540_v40 }
 0x80c   : > { %8362 = vrot.lane.b32.xlu0 %v8712_v61, %s15994_s16 }
 0x80d   : > { %7882 = vst.msk [vmem:[#allocation3 + $0x81] sm:$0xff] %vm2374_vm12, %v7796_v57  ;;  %v9062_v57 = vld [vmem:[#allocation2] sm:$0xff] }
 0x80f   : > { %8491 = vrot.lane.b32.xlu1 %v8840_v39, %s10957_s30 }
 0x810   : > { %8620 = vrot.lane.b32.xlu0 %v8968_v4, %s10934_s21 }
 0x812   : > { %v8812_v51 = vld [vmem:[#allocation3 + $0x79] sm:$0xff] }
 0x813   : > { %7977 = vrot.lane.b32.xlu1 %v8712_v61, %s10955_s24  ;;  %v8684_v6 = vld [vmem:[#allocation3 + $0x78] sm:$0xff] }
 0x814   : > { %8235 = vrot.lane.b32.xlu0 %v8968_v4, %s10956_s12  ;;  %v8813_v62 = vld [vmem:[#allocation3 + $0x81] sm:$0xff] }
 0x815   : > { %v8685_v58 = vld [vmem:[#allocation3 + $0x80] sm:$0xff]  ;;  %v8841_v55 = vpack.c.bf16 %v8813_v62, %v8812_v51 }
 0x816   : > { %v8940_v42 = vld [vmem:[#allocation3 + $0x7a] sm:$0xff]  ;;  %v8941_v0 = vld [vmem:[#allocation3 + $0x82] sm:$0xff]  ;;  %v8713_v11 = vpack.c.bf16 %v8685_v58, %v8684_v6 }
 0x817   : > { %8106 = vrot.lane.b32.xlu1 %v8840_v39, %s15993_s26  ;;  %v8969_v63 = vpack.c.bf16 %v8941_v0, %v8940_v42 }
 0x818   : > { %8876 = vrot.lane.b32.xlu0 %v8841_v55, %s15995_s22 }
 0x81b   : > { %8748 = vrot.lane.b32.xlu1 %v8713_v11, %s10935_s1 }
 0x81c   : > { %9004 = vrot.lane.b32.xlu0 %v8969_v63, %s15996_s13 }
 0x81f   : > { %8364 = vrot.lane.b32.xlu1 %v8713_v11, %s15994_s16 }
 0x820   : > { %8493 = vrot.lane.b32.xlu0 %v8841_v55, %s10957_s30 }
 0x823   : > { %8622 = vrot.lane.b32.xlu1 %v8969_v63, %s10934_s21 }
 0x824   : > { %7979 = vrot.lane.b32.xlu0 %v8713_v11, %s10955_s24 }
 0x827   : > { %8237 = vrot.lane.b32.xlu1 %v8969_v63, %s10956_s12 }
 0x828   : > { %8108 = vrot.lane.b32.xlu0 %v8841_v55, %s15993_s26 }
 0x83c   : > { %v7444_v54 = vpop.f32.mrb[80].mxu1 }
 0x83d   : > { %v7445_v25 = vadd.f32 %v15020_v35, %v7444_v54  ;;  %v7446_v8 = vpop.f32.mrb[81].mxu1 }
 0x83e   : > { %v7447_v7 = vpop.f32.mrb[82].mxu1 }
 0x83f   : > { %v7573_v31 = vmul.f32 %v7445_v25, %v7445_v25  ;;  %v7448_v22 = vadd.f32 %v15020_v35, %v7447_v7  ;;  %v7449_v27 = vpop.f32.mrb[83].mxu1  ;;  %v7541_v59 = vmul.f32 0.5, %v7445_v25 }
 0x841   : > { %v8486_v38 = vpop.permute.xlu0 %8485  ;;  %v7605_v43 = vmul.f32 %v7573_v31, %v7445_v25  ;;  %v7574_v21 = vmul.f32 %v7448_v22, %v7448_v22  ;;  %v7542_v61 = vmul.f32 0.5, %v7448_v22 }
 0x842   : > { %v8357_v52 = vpop.permute.xlu1 %8356 }
 0x843   : > { %8405 = vst.msk [vmem:[#allocation2 + $0x8] sm:$0xff] %vm8404_vm15, %v8357_v52  ;;  %v7637_v33 = vmul.f32 0.044715, %v7605_v43  ;;  %v7606_v47 = vmul.f32 %v7574_v21, %v7448_v22 }
 0x844   : > { %8534 = vst.msk [vmem:[#allocation2 + $0x8] sm:$0xff] %vm8533_vm11, %v8486_v38 }
 0x845   : > { %v7972_v20 = vpop.permute.xlu0 %7971  ;;  %v7669_v5 = vadd.f32 %v7637_v33, %v7445_v25  ;;  %v7638_v30 = vmul.f32 0.044715, %v7606_v47 }
 0x846   : > { %v8615_v50 = vpop.permute.xlu1 %8614  ;;  %8019 = vst.msk [vmem:[#allocation2 + $0x18] sm:$0xff] %vm8017_vm1, %v7972_v20 }
 0x847   : > { %8662 = vst.msk [vmem:[#allocation2 + $0x8] sm:$0xff] %vm2519_vm13, %v8615_v50  ;;  %v7701_v32 = vmul.f32 0.7978846, %v7669_v5  ;;  %v7670_v46 = vadd.f32 %v7638_v30, %v7448_v22 }
 0x849   : > { %v8101_v48 = vpop.permute.xlu0 %8100  ;;  %10464 = vtanh.f32 %v7701_v32  ;;  %v7702_v45 = vmul.f32 0.7978846, %v7670_v46 }
 0x84a   : > { %v8230_v34 = vpop.permute.xlu1 %8229  ;;  %8148 = vst.msk [vmem:[#allocation2 + $0x18] sm:$0xff] %vm8146_vm2, %v8101_v48 }
 0x84b   : > { %8277 = vst.msk [vmem:[#allocation2 + $0x18] sm:$0xff] %vm8275_vm4, %v8230_v34  ;;  %10466 = vtanh.f32 %v7702_v45 }
 0x853   : > { %v8743_v26 = vpop.permute.xlu0 %8742  ;;  %v10465_v37 = vpop.eup %10464 }
 0x854   : > { %v8871_v39 = vpop.permute.xlu1 %8870  ;;  %8790 = vst.msk [vmem:[#allocation2 + $0x8] sm:$0xff] %vm2648_vm14, %v8743_v26  ;;  %v7765_v24 = vadd.f32 1.0, %v10465_v37 }
 0x855   : > { %8918 = vst.msk [vmem:[#allocation2 + $0x8] sm:$0xff] %vm15997_vm3, %v8871_v39  ;;  %v10467_v23 = vpop.eup %10466 }
 0x856   : > { %v7797_v44 = vmul.f32 %v7765_v24, %v7541_v59  ;;  %v7766_v19 = vadd.f32 1.0, %v10467_v23  ;;  %v9064_v59 = vld [vmem:[#allocation2 + $0x10] sm:$0xff] }
 0x857   : > { %v8359_v53 = vpop.permute.xlu0 %8358 }
 0x858   : > { %v8999_v29 = vpop.permute.xlu1 %8998  ;;  %8406 = vst.msk [vmem:[#allocation2 + $0x18] sm:$0xff] %vm8404_vm15, %v8359_v53  ;;  %v7798_v4 = vmul.f32 %v7766_v19, %v7542_v61 }
 0x859   : > { %9046 = vst.msk [vmem:[#allocation2 + $0x8] sm:$0xff] %vm15998_vm6, %v8999_v29  ;;  %vm16003_vm6 = vmmov %vm16002_vm5 }
 0x85a   : > { %7883 = vst.msk [vmem:[#allocation3 + $0x91] sm:$0xff] %vm2374_vm12, %v7797_v44  ;;  %7884 = vst.msk [vmem:[#allocation3 + $0x99] sm:$0xff] %vm2374_vm12, %v7798_v4 }
 0x85b   : > { %v8617_v28 = vpop.permute.xlu0 %8616 }
 0x85c   : > { %v8488_v56 = vpop.permute.xlu1 %8487 }
 0x85d   : > { %8535 = vst.msk [vmem:[#allocation2 + $0x18] sm:$0xff] %vm8533_vm11, %v8488_v56 }
 0x85e   : > { %8663 = vst.msk [vmem:[#allocation2 + $0x18] sm:$0xff] %vm2519_vm13, %v8617_v28 }
 0x85f   : > { %v8232_v51 = vpop.permute.xlu0 %8231 }
 0x860   : > { %v7974_v40 = vpop.permute.xlu1 %7973  ;;  %v9063_v60 = vld [vmem:[#allocation2 + $0x8] sm:$0xff]  ;;  %v7452_v62 = vpop.f32.mrb[84].mxu1 }
 0x861   : > { %8020 = vst.msk [vmem:[#allocation2 + $0x28] sm:$0xff] %vm8017_vm1, %v7974_v40  ;;  %9845 = vmatprep.mubr.msk.bf16.mxu0 %vm9209_vm7, %v9063_v60  ;;  %v8686_v58 = vld [vmem:[#allocation3 + $0x90] sm:$0xff]  ;;  %v7453_v55 = vadd.f32 %v15020_v35, %v7452_v62  ;;  %v7454_v6 = vpop.f32.mrb[85].mxu1  ;;  %v8687_v42 = vld [vmem:[#allocation3 + $0x98] sm:$0xff] }
 0x862   : > { %9294 = vmatmul.mubr.bf16.vlgmr.msra.gmra.mrb[68].mxu0 %v9062_v57  ;;  %v8814_v0 = vld [vmem:[#allocation3 + $0x91] sm:$0xff]  ;;  %v8815_v11 = vld [vmem:[#allocation3 + $0x99] sm:$0xff]  ;;  %v7455_v54 = vpop.f32.mrb[86].mxu1  ;;  %v8714_v25 = vpack.c.bf16 %v8687_v42, %v8686_v58 }
 0x863   : > { %v8842_v8 = vpack.c.bf16 %v8815_v11, %v8814_v0  ;;  %v7575_v7 = vmul.f32 %v7453_v55, %v7453_v55  ;;  %v7456_v31 = vadd.f32 %v15020_v35, %v7455_v54  ;;  %v7457_v22 = vpop.f32.mrb[87].mxu1  ;;  %v8942_v27 = vld [vmem:[#allocation3 + $0x92] sm:$0xff]  ;;  %v8943_v38 = vld [vmem:[#allocation3 + $0x9a] sm:$0xff]  ;;  %v7543_v19 = vmul.f32 0.5, %v7453_v55 }
 0x864   : > { %v8103_v63 = vpop.permute.xlu1 %8102  ;;  %8750 = vrot.lane.b32.xlu0 %v8714_v25, %s10935_s1  ;;  %v8970_v47 = vpack.c.bf16 %v8943_v38, %v8942_v27  ;;  %v9066_v42 = vld [vmem:[#allocation2 + $0x20] sm:$0xff] }
 0x865   : > { %8149 = vst.msk [vmem:[#allocation2 + $0x28] sm:$0xff] %vm8146_vm2, %v8103_v63  ;;  %8878 = vrot.lane.b32.xlu1 %v8842_v8, %s15995_s22  ;;  %v7607_v43 = vmul.f32 %v7575_v7, %v7453_v55  ;;  %v7576_v21 = vmul.f32 %v7456_v31, %v7456_v31  ;;  %v7544_v56 = vmul.f32 0.5, %v7456_v31  ;;  %v15307_v7 = vld [vmem:[#allocation18] ss:$0 sm:$0xff] }
 0x866   : > { %8278 = vst.msk [vmem:[#allocation2 + $0x28] sm:$0xff] %vm8275_vm4, %v8232_v51  ;;  %v8873_v52 = vpop.permute.xlu0 %8872 }
 0x867   : > { %v7639_v20 = vmul.f32 0.044715, %v7607_v43  ;;  %v7608_v50 = vmul.f32 %v7576_v21, %v7456_v31 }
 0x868   : > { %v8745_v33 = vpop.permute.xlu1 %8744  ;;  %8366 = vrot.lane.b32.xlu0 %v8714_v25, %s15994_s16 }
 0x869   : > { %8791 = vst.msk [vmem:[#allocation2 + $0x18] sm:$0xff] %vm2648_vm14, %v8745_v33  ;;  %9006 = vrot.lane.b32.xlu1 %v8970_v47, %s15996_s13  ;;  %v7671_v5 = vadd.f32 %v7639_v20, %v7453_v55  ;;  %v7640_v30 = vmul.f32 0.044715, %v7608_v50 }
 0x86a   : > { %8919 = vst.msk [vmem:[#allocation2 + $0x18] sm:$0xff] %vm15999_vm8, %v8873_v52  ;;  %v9001_v35 = vpop.permute.xlu0 %9000  ;;  %vm16004_vm8 = vmmov %vm15997_vm3 }
 0x86b   : > { %9047 = vst.msk [vmem:[#allocation2 + $0x18] sm:$0xff] %vm16000_vm9, %v9001_v35  ;;  %v7703_v46 = vmul.f32 0.7978846, %v7671_v5  ;;  %v7672_v48 = vadd.f32 %v7640_v30, %v7456_v31  ;;  %vm16005_vm9 = vmmov %vm16002_vm5 }
 0x86c   : > { %v8361_v32 = vpop.permute.xlu1 %8360  ;;  %8624 = vrot.lane.b32.xlu0 %v8970_v47, %s10934_s21 }
 0x86d   : > { %8407 = vst.msk [vmem:[#allocation2 + $0x28] sm:$0xff] %vm8404_vm15, %v8361_v32  ;;  %8495 = vrot.lane.b32.xlu1 %v8842_v8, %s10957_s30  ;;  %10468 = vtanh.f32 %v7703_v46  ;;  %v7704_v45 = vmul.f32 0.7978846, %v7672_v48 }
 0x86e   : > { %v8490_v34 = vpop.permute.xlu0 %8489 }
 0x86f   : > { %8536 = vst.msk [vmem:[#allocation2 + $0x28] sm:$0xff] %vm8533_vm11, %v8490_v34  ;;  %10470 = vtanh.f32 %v7704_v45 }
 0x870   : > { %v8619_v26 = vpop.permute.xlu1 %8618  ;;  %8239 = vrot.lane.b32.xlu0 %v8970_v47, %s10956_s12 }
 0x871   : > { %8664 = vst.msk [vmem:[#allocation2 + $0x28] sm:$0xff] %vm2519_vm13, %v8619_v26  ;;  %7981 = vrot.lane.b32.xlu1 %v8714_v25, %s10955_s24 }
 0x872   : > { %v7976_v39 = vpop.permute.xlu0 %7975  ;;  %v9065_v37 = vld [vmem:[#allocation2 + $0x18] sm:$0xff] }
 0x873   : > { %8021 = vst.msk [vmem:[#allocation2 + $0x38] sm:$0xff] %vm8017_vm1, %v7976_v39  ;;  %9846 = vmatprep.mubr.msk.bf16.mxu0 %vm9209_vm7, %v9065_v37 }
 0x874   : > { %9302 = vmatmul.mubr.bf16.gmra.mrb[72].mxu0 %v9064_v59  ;;  %v8234_v24 = vpop.permute.xlu1 %8233 }
 0x875   : > { %8110 = vrot.lane.b32.xlu1 %v8842_v8, %s15993_s26 }
 0x876   : > { %v8105_v23 = vpop.permute.xlu0 %8104 }
 0x877   : > { %8150 = vst.msk [vmem:[#allocation2 + $0x38] sm:$0xff] %vm8146_vm2, %v8105_v23  ;;  %v10469_v61 = vpop.eup %10468 }
 0x878   : > { %8279 = vst.msk [vmem:[#allocation2 + $0x38] sm:$0xff] %vm8275_vm4, %v8234_v24  ;;  %v7767_v53 = vadd.f32 1.0, %v10469_v61 }
 0x879   : > { %v8875_v44 = vpop.permute.xlu1 %8874  ;;  %v10471_v4 = vpop.eup %10470 }
 0x87a   : > { %v8747_v29 = vpop.permute.xlu0 %8746  ;;  %v7799_v28 = vmul.f32 %v7767_v53, %v7543_v19  ;;  %v7768_v40 = vadd.f32 1.0, %v10471_v4 }
 0x87b   : > { %8792 = vst.msk [vmem:[#allocation2 + $0x28] sm:$0xff] %vm2648_vm14, %v8747_v29 }
 0x87c   : > { %8920 = vst.msk [vmem:[#allocation2 + $0x28] sm:$0xff] %vm16001_vm10, %v8875_v44  ;;  %v7800_v57 = vmul.f32 %v7768_v40, %v7544_v56  ;;  %vm16006_vm10 = vmmov %vm15997_vm3 }
 0x87d   : > { %v9003_v60 = vpop.permute.xlu1 %9002  ;;  %7885 = vst.msk [vmem:[#allocation3 + $0xa9] sm:$0xff] %vm2374_vm12, %v7799_v28 }
 0x87e   : > { %9048 = vst.msk [vmem:[#allocation2 + $0x28] sm:$0xff] %vm16002_vm5, %v9003_v60  ;;  %v8363_v51 = vpop.permute.xlu0 %8362 }
 0x87f   : > { %8408 = vst.msk [vmem:[#allocation2 + $0x38] sm:$0xff] %vm8404_vm15, %v8363_v51 }
 0x880   : > { %7886 = vst.msk [vmem:[#allocation3 + $0xb1] sm:$0xff] %vm2374_vm12, %v7800_v57 }
 0x881   : > { %v8492_v62 = vpop.permute.xlu1 %8491 }
 0x882   : > { %8537 = vst.msk [vmem:[#allocation2 + $0x38] sm:$0xff] %vm8533_vm11, %v8492_v62  ;;  %v8621_v58 = vpop.permute.xlu0 %8620 }
 0x883   : > { %8665 = vst.msk [vmem:[#allocation2 + $0x38] sm:$0xff] %vm2519_vm13, %v8621_v58 }
 0x884   : > { %v8816_v11 = vld [vmem:[#allocation3 + $0xa9] sm:$0xff] }
 0x885   : > { %v7978_v55 = vpop.permute.xlu1 %7977  ;;  %v9067_v6 = vld [vmem:[#allocation2 + $0x28] sm:$0xff] }
 0x886   : > { %8022 = vst.msk [vmem:[#allocation2 + $0x48] sm:$0xff] %vm8017_vm1, %v7978_v55  ;;  %9847 = vmatprep.mubr.msk.bf16.mxu0 %vm9209_vm7, %v9067_v6  ;;  %v8236_v0 = vpop.permute.xlu0 %8235  ;;  %v7460_v63 = vpop.f32.mrb[88].mxu1  ;;  %v8688_v25 = vld [vmem:[#allocation3 + $0xa8] sm:$0xff]  ;;  %v9068_v6 = vld [vmem:[#allocation2 + $0x30] sm:$0xff] }
 0x887   : > { %9310 = vmatmul.mubr.bf16.gmra.mrb[76].mxu0 %v9066_v42  ;;  %v8817_v54 = vld [vmem:[#allocation3 + $0xb1] sm:$0xff]  ;;  %v15310_v31 = vadd.f32 %v15307_v7, %v7460_v63  ;;  %v7462_v22 = vpop.f32.mrb[89].mxu1 }
 0x888   : > { %v8689_v8 = vld [vmem:[#allocation3 + $0xb0] sm:$0xff]  ;;  %v15312_v38 = vpack.c.bf16 %v8817_v54, %v8816_v11  ;;  %v7463_v43 = vpop.f32.mrb[90].mxu1 }
 0x889   : > { %v8107_v27 = vpop.permute.xlu1 %8106  ;;  %v8715_v52 = vpack.c.bf16 %v8689_v8, %v8688_v25  ;;  %v8944_v21 = vld [vmem:[#allocation3 + $0xaa] sm:$0xff]  ;;  %v8945_v33 = vld [vmem:[#allocation3 + $0xb2] sm:$0xff]  ;;  %v7577_v47 = vmul.f32 %v15310_v31, %v15310_v31  ;;  %v15319_v20 = vadd.f32 %v15307_v7, %v7463_v43  ;;  %v7465_v35 = vpop.f32.mrb[91].mxu1 }
 0x88a   : > { %8151 = vst.msk [vmem:[#allocation2 + $0x48] sm:$0xff] %vm8146_vm2, %v8107_v27  ;;  %v8877_v50 = vpop.permute.xlu0 %8876  ;;  %8880 = vrot.lane.b32.xlu0 %v15312_v38, %s15995_s22  ;;  %v8971_v46 = vpack.c.bf16 %v8945_v33, %v8944_v21 }
 0x88b   : > { %8280 = vst.msk [vmem:[#allocation2 + $0x48] sm:$0xff] %vm8275_vm4, %v8236_v0  ;;  %8752 = vrot.lane.b32.xlu1 %v8715_v52, %s10935_s1  ;;  %v7609_v5 = vmul.f32 %v7577_v47, %v15310_v31  ;;  %v7578_v30 = vmul.f32 %v15319_v20, %v15319_v20 }
 0x88d   : > { %v8749_v32 = vpop.permute.xlu1 %8748  ;;  %v7641_v48 = vmul.f32 0.044715, %v7609_v5  ;;  %v7610_v34 = vmul.f32 %v7578_v30, %v15319_v20  ;;  %v7545_v5 = vmul.f32 0.5, %v15310_v31 }
 0x88e   : > { %8793 = vst.msk [vmem:[#allocation2 + $0x38] sm:$0xff] %vm2648_vm14, %v8749_v32  ;;  %v9005_v45 = vpop.permute.xlu0 %9004  ;;  %9008 = vrot.lane.b32.xlu0 %v8971_v46, %s15996_s13 }
 0x88f   : > { %8921 = vst.msk [vmem:[#allocation2 + $0x38] sm:$0xff] %vm15997_vm3, %v8877_v50  ;;  %8368 = vrot.lane.b32.xlu1 %v8715_v52, %s15994_s16  ;;  %v7673_v26 = vadd.f32 %v7641_v48, %v15310_v31  ;;  %v7642_v39 = vmul.f32 0.044715, %v7610_v34  ;;  %v7468_v37 = vpop.f32.mrb[92].mxu1  ;;  %v7546_v48 = vmul.f32 0.5, %v15319_v20 }
 0x890   : > { %9049 = vst.msk [vmem:[#allocation2 + $0x38] sm:$0xff] %vm16003_vm6, %v9005_v45  ;;  %v15335_v24 = vadd.f32 %v15307_v7, %v7468_v37  ;;  %v7470_v23 = vpop.f32.mrb[93].mxu1 }
 0x891   : > { %v8365_v59 = vpop.permute.xlu1 %8364  ;;  %v7705_v44 = vmul.f32 0.7978846, %v7673_v26  ;;  %v7674_v61 = vadd.f32 %v7642_v39, %v15319_v20  ;;  %v7471_v53 = vpop.f32.mrb[94].mxu1 }
 0x892   : > { %8409 = vst.msk [vmem:[#allocation2 + $0x48] sm:$0xff] %vm8404_vm15, %v8365_v59  ;;  %v8494_v19 = vpop.permute.xlu0 %8493  ;;  %8497 = vrot.lane.b32.xlu0 %v15312_v38, %s10957_s30  ;;  %v7579_v29 = vmul.f32 %v15335_v24, %v15335_v24  ;;  %v15346_v4 = vadd.f32 %v15307_v7, %v7471_v53  ;;  %v7473_v28 = vpop.f32.mrb[95].mxu1 }
 0x893   : > { %8626 = vrot.lane.b32.xlu1 %v8971_v46, %s10934_s21  ;;  %8538 = vst.msk [vmem:[#allocation2 + $0x48] sm:$0xff] %vm8533_vm11, %v8494_v19  ;;  %10472 = vtanh.f32 %v7705_v44  ;;  %v7706_v56 = vmul.f32 0.7978846, %v7674_v61 }
 0x894   : > { %v7611_v60 = vmul.f32 %v7579_v29, %v15335_v24  ;;  %v7580_v57 = vmul.f32 %v15346_v4, %v15346_v4 }
 0x895   : > { %v8623_v40 = vpop.permute.xlu1 %8622  ;;  %10474 = vtanh.f32 %v7706_v56 }
 0x896   : > { %8666 = vst.msk [vmem:[#allocation2 + $0x48] sm:$0xff] %vm2519_vm13, %v8623_v40  ;;  %v7980_v51 = vpop.permute.xlu0 %7979  ;;  %7983 = vrot.lane.b32.xlu0 %v8715_v52, %s10955_s24  ;;  %v7643_v58 = vmul.f32 0.044715, %v7611_v60  ;;  %v7612_v55 = vmul.f32 %v7580_v57, %v15346_v4 }
 0x897   : > { %8241 = vrot.lane.b32.xlu1 %v8971_v46, %s10956_s12  ;;  %v9069_v62 = vld [vmem:[#allocation2 + $0x38] sm:$0xff]  ;;  %8023 = vst.msk [vmem:[#allocation2 + $0x58] sm:$0xff] %vm8017_vm1, %v7980_v51  ;;  %v7476_v42 = vpop.f32.mrb[96].mxu1 }
 0x898   : > { %9848 = vmatprep.mubr.msk.bf16.mxu0 %vm9209_vm7, %v9069_v62  ;;  %v7675_v0 = vadd.f32 %v7643_v58, %v15335_v24  ;;  %v7644_v11 = vmul.f32 0.044715, %v7612_v55  ;;  %v15359_v63 = vadd.f32 %v15307_v7, %v7476_v42  ;;  %v7478_v54 = vpop.f32.mrb[97].mxu1  ;;  %v7547_v62 = vmul.f32 0.5, %v15335_v24 }
 0x899   : > { %9318 = vmatmul.mubr.bf16.gmra.mrb[80].mxu0 %v9068_v6  ;;  %v7479_v8 = vpop.f32.mrb[98].mxu1  ;;  %v8238_v43 = vpop.permute.xlu1 %8237 }
 0x89a   : > { %v8109_v25 = vpop.permute.xlu0 %8108  ;;  %8112 = vrot.lane.b32.xlu0 %v15312_v38, %s15993_s26  ;;  %v7707_v22 = vmul.f32 0.7978846, %v7675_v0  ;;  %v7676_v27 = vadd.f32 %v7644_v11, %v15346_v4  ;;  %v7581_v52 = vmul.f32 %v15359_v63, %v15359_v63  ;;  %v7481_v21 = vpop.f32.mrb[99].mxu1  ;;  %v15369_v33 = vadd.f32 %v15307_v7, %v7479_v8 }
 0x89b   : > { %8152 = vst.msk [vmem:[#allocation2 + $0x58] sm:$0xff] %vm8146_vm2, %v8109_v25  ;;  %v7548_v8 = vmul.f32 0.5, %v15346_v4 }
 0x89c   : > { %8281 = vst.msk [vmem:[#allocation2 + $0x58] sm:$0xff] %vm8275_vm4, %v8238_v43  ;;  %10476 = vtanh.f32 %v7707_v22  ;;  %v7708_v47 = vmul.f32 0.7978846, %v7676_v27  ;;  %v7613_v50 = vmul.f32 %v7581_v52, %v15359_v63  ;;  %v7582_v35 = vmul.f32 %v15369_v33, %v15369_v33 }
 0x89d   : > { %v10473_v38 = vpop.eup %10472 }
 0x89e   : > { %v7769_v30 = vadd.f32 1.0, %v10473_v38  ;;  %10478 = vtanh.f32 %v7708_v47  ;;  %v7645_v32 = vmul.f32 0.044715, %v7613_v50  ;;  %v7614_v34 = vmul.f32 %v7582_v35, %v15369_v33 }
 0x89f   : > { %v10475_v46 = vpop.eup %10474  ;;  %v7484_v45 = vpop.f32.mrb[100].mxu1 }
 0x8a0   : > { %v7801_v26 = vmul.f32 %v7769_v30, %v7545_v5  ;;  %v7770_v39 = vadd.f32 1.0, %v10475_v46  ;;  %v7677_v37 = vadd.f32 %v7645_v32, %v15359_v63  ;;  %v15379_v59 = vadd.f32 %v15307_v7, %v7484_v45  ;;  %v7486_v23 = vpop.f32.mrb[101].mxu1 }
 0x8a1   : > { %v7646_v44 = vmul.f32 0.044715, %v7614_v34  ;;  %v7487_v61 = vpop.f32.mrb[102].mxu1 }
 0x8a2   : > { %7887 = vst.msk [vmem:[#allocation3 + $0xc1] sm:$0xff] %vm2374_vm12, %v7801_v26  ;;  %v7802_v31 = vmul.f32 %v7770_v39, %v7546_v48  ;;  %v7709_v19 = vmul.f32 0.7978846, %v7677_v37  ;;  %v7583_v20 = vmul.f32 %v15379_v59, %v15379_v59  ;;  %v7489_v53 = vpop.f32.mrb[103].mxu1  ;;  %v15386_v28 = vadd.f32 %v15307_v7, %v7487_v61 }
 0x8a3   : > { %v7678_v29 = vadd.f32 %v7646_v44, %v15369_v33  ;;  %v7549_v61 = vmul.f32 0.5, %v15359_v63  ;;  %v7550_v63 = vmul.f32 0.5, %v15369_v33 }
 0x8a4   : > { %7888 = vst.msk [vmem:[#allocation3 + $0xc9] sm:$0xff] %vm2374_vm12, %v7802_v31  ;;  %10480 = vtanh.f32 %v7709_v19  ;;  %v7615_v56 = vmul.f32 %v7583_v20, %v15379_v59  ;;  %v7584_v60 = vmul.f32 %v15386_v28, %v15386_v28 }
 0x8a5   : > { %v7710_v40 = vmul.f32 0.7978846, %v7678_v29 }
 0x8a6   : > { %v10477_v57 = vpop.eup %10476  ;;  %v7647_v51 = vmul.f32 0.044715, %v7615_v56  ;;  %v7616_v55 = vmul.f32 %v7584_v60, %v15386_v28 }
 0x8a7   : > { %v7771_v58 = vadd.f32 1.0, %v10477_v57  ;;  %10482 = vtanh.f32 %v7710_v40  ;;  %v7492_v6 = vpop.f32.mrb[104].mxu1 }
 0x8a8   : > { %v10479_v42 = vpop.eup %10478  ;;  %v7679_v0 = vadd.f32 %v7647_v51, %v15379_v59  ;;  %v15396_v11 = vadd.f32 %v15307_v7, %v7492_v6  ;;  %v7494_v54 = vpop.f32.mrb[105].mxu1  ;;  %v7648_v27 = vmul.f32 0.044715, %v7616_v55 }
 0x8a9   : > { %v7803_v25 = vmul.f32 %v7771_v58, %v7547_v62  ;;  %v7772_v22 = vadd.f32 1.0, %v10479_v42  ;;  %v7495_v52 = vpop.f32.mrb[106].mxu1  ;;  %v8690_v32 = vld [vmem:[#allocation3 + $0xc0] sm:$0xff] }
 0x8aa   : > { %v7711_v43 = vmul.f32 0.7978846, %v7679_v0  ;;  %v7585_v24 = vmul.f32 %v15396_v11, %v15396_v11  ;;  %v15402_v21 = vadd.f32 %v15307_v7, %v7495_v52  ;;  %v7497_v47 = vpop.f32.mrb[107].mxu1  ;;  %v7680_v38 = vadd.f32 %v7648_v27, %v15386_v28  ;;  %v8818_v46 = vld [vmem:[#allocation3 + $0xc1] sm:$0xff] }
 0x8ab   : > { %7889 = vst.msk [vmem:[#allocation3 + $0xd9] sm:$0xff] %vm2374_vm12, %v7803_v25  ;;  %v7804_v50 = vmul.f32 %v7772_v22, %v7548_v8  ;;  %v8691_v35 = vld [vmem:[#allocation3 + $0xc8] sm:$0xff]  ;;  %v7551_v27 = vmul.f32 0.5, %v15379_v59 }
 0x8ac   : > { %v8819_v5 = vld [vmem:[#allocation3 + $0xc9] sm:$0xff]  ;;  %10484 = vtanh.f32 %v7711_v43  ;;  %v7617_v4 = vmul.f32 %v7585_v24, %v15396_v11  ;;  %v7586_v30 = vmul.f32 %v15402_v21, %v15402_v21  ;;  %v7712_v48 = vmul.f32 0.7978846, %v7680_v38 }
 0x8ad   : > { %7890 = vst.msk [vmem:[#allocation3 + $0xe1] sm:$0xff] %vm2374_vm12, %v7804_v50  ;;  %v8716_v34 = vpack.c.bf16 %v8691_v35, %v8690_v32  ;;  %v15410_v45 = vpack.c.bf16 %v8819_v5, %v8818_v46  ;;  %v8946_v23 = vld [vmem:[#allocation3 + $0xc2] sm:$0xff]  ;;  %v8947_v44 = vld [vmem:[#allocation3 + $0xca] sm:$0xff]  ;;  %v7552_v5 = vmul.f32 0.5, %v15386_v28 }
 0x8ae   : > { %v10481_v26 = vpop.eup %10480  ;;  %v7649_v39 = vmul.f32 0.044715, %v7617_v4  ;;  %v7618_v37 = vmul.f32 %v7586_v30, %v15402_v21  ;;  %10486 = vtanh.f32 %v7712_v48  ;;  %v8972_v51 = vpack.c.bf16 %v8947_v44, %v8946_v23 }
 0x8af   : > { %v7773_v31 = vadd.f32 1.0, %v10481_v26  ;;  %8754 = vrot.lane.b32.xlu0 %v8716_v34, %s10935_s1  ;;  %8882 = vrot.lane.b32.xlu1 %v15410_v45, %s15995_s22  ;;  %v7500_v19 = vpop.f32.mrb[108].mxu1 }
 0x8b0   : > { %v7681_v20 = vadd.f32 %v7649_v39, %v15396_v11  ;;  %v7650_v53 = vmul.f32 0.044715, %v7618_v37  ;;  %v15419_v29 = vadd.f32 %v15307_v7, %v7500_v19  ;;  %v7502_v56 = vpop.f32.mrb[109].mxu1 }
 0x8b1   : > { %v10483_v40 = vpop.eup %10482  ;;  %v7805_v60 = vmul.f32 %v7773_v31, %v7549_v61  ;;  %v7503_v57 = vpop.f32.mrb[110].mxu1 }
 0x8b2   : > { %v7774_v62 = vadd.f32 1.0, %v10483_v40  ;;  %v7713_v58 = vmul.f32 0.7978846, %v7681_v20  ;;  %v7682_v55 = vadd.f32 %v7650_v53, %v15402_v21  ;;  %v7505_v6 = vpop.f32.mrb[111].mxu1  ;;  %v7587_v42 = vmul.f32 %v15419_v29, %v15419_v29  ;;  %v8820_v37 = vld [vmem:[#allocation3 + $0xd9] sm:$0xff] }
 0x8b3   : > { %7891 = vst.msk [vmem:[#allocation3 + $0xf1] sm:$0xff] %vm2374_vm12, %v7805_v60  ;;  %v15427_v0 = vadd.f32 %v15307_v7, %v7503_v57  ;;  %8370 = vrot.lane.b32.xlu0 %v8716_v34, %s15994_s16  ;;  %9010 = vrot.lane.b32.xlu1 %v8972_v51, %s15996_s13  ;;  %v7553_v40 = vmul.f32 0.5, %v15396_v11 }
 0x8b4   : > { %v7806_v54 = vmul.f32 %v7774_v62, %v7550_v63  ;;  %10488 = vtanh.f32 %v7713_v58  ;;  %v7714_v33 = vmul.f32 0.7978846, %v7682_v55  ;;  %v7619_v25 = vmul.f32 %v7587_v42, %v15419_v29  ;;  %v8821_v30 = vld [vmem:[#allocation3 + $0xe1] sm:$0xff]  ;;  %v8692_v58 = vld [vmem:[#allocation3 + $0xd8] sm:$0xff] }
 0x8b5   : > { %v7588_v8 = vmul.f32 %v15427_v0, %v15427_v0  ;;  %v8845_v23 = vpack.c.bf16 %v8821_v30, %v8820_v37  ;;  %v8948_v20 = vld [vmem:[#allocation3 + $0xda] sm:$0xff]  ;;  %v8949_v53 = vld [vmem:[#allocation3 + $0xe2] sm:$0xff] }
 0x8b6   : > { %v10485_v22 = vpop.eup %10484  ;;  %7892 = vst.msk [vmem:[#allocation3 + $0xf9] sm:$0xff] %vm2374_vm12, %v7806_v54  ;;  %10490 = vtanh.f32 %v7714_v33  ;;  %v7651_v43 = vmul.f32 0.044715, %v7619_v25  ;;  %v8693_v56 = vld [vmem:[#allocation3 + $0xe0] sm:$0xff]  ;;  %v8973_v42 = vpack.c.bf16 %v8949_v53, %v8948_v20 }
 0x8b7   : > { %v7775_v52 = vadd.f32 1.0, %v10485_v22  ;;  %v7620_v24 = vmul.f32 %v7588_v8, %v15427_v0  ;;  %8628 = vrot.lane.b32.xlu0 %v8972_v51, %s10934_s21  ;;  %8499 = vrot.lane.b32.xlu1 %v15410_v45, %s10957_s30  ;;  %v8717_v11 = vpack.c.bf16 %v8693_v56, %v8692_v58 }
 0x8b8   : > { %v10487_v47 = vpop.eup %10486  ;;  %v7683_v38 = vadd.f32 %v7651_v43, %v15419_v29 }
 0x8b9   : > { %v7807_v50 = vmul.f32 %v7775_v52, %v7551_v27  ;;  %v7652_v35 = vmul.f32 0.044715, %v7620_v24  ;;  %v7776_v4 = vadd.f32 1.0, %v10487_v47  ;;  %v7555_v52 = vmul.f32 0.5, %v15419_v29 }
 0x8ba   : > { %v7715_v59 = vmul.f32 0.7978846, %v7683_v38  ;;  %v7508_v46 = vpop.f32.mrb[112].mxu1  ;;  %v7556_v38 = vmul.f32 0.5, %v15427_v0  ;;  %v8694_v37 = vld [vmem:[#allocation3 + $0xf0] sm:$0xff] }
 0x8bb   : > { %7893 = vst.msk [vmem:[#allocation3 + $0x109] sm:$0xff] %vm2374_vm12, %v7807_v50  ;;  %v7684_v32 = vadd.f32 %v7652_v35, %v15427_v0  ;;  %8243 = vrot.lane.b32.xlu0 %v8972_v51, %s10956_s12  ;;  %7985 = vrot.lane.b32.xlu1 %v8716_v34, %s10955_s24  ;;  %v7808_v48 = vmul.f32 %v7776_v4, %v7552_v5  ;;  %v7510_v39 = vpop.f32.mrb[113].mxu1  ;;  %v7554_v51 = vmul.f32 0.5, %v15402_v21 }
 0x8bc   : > { %v15447_v26 = vadd.f32 %v15307_v7, %v7508_v46  ;;  %10492 = vtanh.f32 %v7715_v59  ;;  %v7511_v44 = vpop.f32.mrb[114].mxu1 }
 0x8bd   : > { %v7716_v28 = vmul.f32 0.7978846, %v7684_v32  ;;  %7894 = vst.msk [vmem:[#allocation3 + $0x111] sm:$0xff] %vm2374_vm12, %v7808_v48  ;;  %v15453_v19 = vadd.f32 %v15307_v7, %v7511_v44  ;;  %v7513_v34 = vpop.f32.mrb[115].mxu1  ;;  %v8695_v59 = vld [vmem:[#allocation3 + $0xf8] sm:$0xff] }
 0x8be   : > { %v10489_v61 = vpop.eup %10488  ;;  %v7589_v31 = vmul.f32 %v15447_v26, %v15447_v26  ;;  %v8823_v32 = vld [vmem:[#allocation3 + $0xf9] sm:$0xff]  ;;  %v8718_v44 = vpack.c.bf16 %v8695_v59, %v8694_v37  ;;  %v7557_v56 = vmul.f32 0.5, %v15447_v26 }
 0x8bf   : > { %v7777_v60 = vadd.f32 1.0, %v10489_v61  ;;  %10494 = vtanh.f32 %v7716_v28  ;;  %8884 = vrot.lane.b32.xlu0 %v8845_v23, %s15995_s22  ;;  %8114 = vrot.lane.b32.xlu1 %v15410_v45, %s15993_s26  ;;  %v7590_v62 = vmul.f32 %v15453_v19, %v15453_v19  ;;  %v8822_v28 = vld [vmem:[#allocation3 + $0xf1] sm:$0xff]  ;;  %v8951_v53 = vld [vmem:[#allocation3 + $0xfa] sm:$0xff] }
 0x8c0   : > { %v10491_v57 = vpop.eup %10490  ;;  %v7621_v63 = vmul.f32 %v7589_v31, %v15447_v26  ;;  %v15488_v61 = vpack.c.bf16 %v8823_v32, %v8822_v28  ;;  %v8950_v20 = vld [vmem:[#allocation3 + $0xf2] sm:$0xff] }
 0x8c1   : > { %v7809_v55 = vmul.f32 %v7777_v60, %v7553_v40  ;;  %v7778_v6 = vadd.f32 1.0, %v10491_v57  ;;  %v7622_v33 = vmul.f32 %v7590_v62, %v15453_v19  ;;  %v7558_v62 = vmul.f32 0.5, %v15453_v19 }
 0x8c2   : > { %v7653_v54 = vmul.f32 0.044715, %v7621_v63  ;;  %v8824_v59 = vld [vmem:[#allocation3 + $0x109] sm:$0xff] }
 0x8c3   : > { %7895 = vst.msk [vmem:[#allocation3 + $0x121] sm:$0xff] %vm2374_vm12, %v7809_v55  ;;  %v7810_v25 = vmul.f32 %v7778_v6, %v7554_v51  ;;  %9012 = vrot.lane.b32.xlu0 %v8973_v42, %s15996_s13  ;;  %8756 = vrot.lane.b32.xlu1 %v8717_v11, %s10935_s1  ;;  %v7654_v45 = vmul.f32 0.044715, %v7622_v33  ;;  %v8974_v55 = vpack.c.bf16 %v8951_v53, %v8950_v20 }
 0x8c4   : > { %v7685_v21 = vadd.f32 %v7653_v54, %v15447_v26  ;;  %v8953_v37 = vld [vmem:[#allocation3 + $0x112] sm:$0xff] }
 0x8c5   : > { %7896 = vst.msk [vmem:[#allocation3 + $0x129] sm:$0xff] %vm2374_vm12, %v7810_v25  ;;  %v7686_v22 = vadd.f32 %v7654_v45, %v15453_v19  ;;  %v8697_v28 = vld [vmem:[#allocation3 + $0x110] sm:$0xff] }
 0x8c6   : > { %v7717_v8 = vmul.f32 0.7978846, %v7685_v21  ;;  %v10493_v27 = vpop.eup %10492 }
 0x8c7   : > { %8501 = vrot.lane.b32.xlu0 %v8845_v23, %s10957_s30  ;;  %8372 = vrot.lane.b32.xlu1 %v8717_v11, %s15994_s16  ;;  %v7779_v43 = vadd.f32 1.0, %v10493_v27  ;;  %v7718_v24 = vmul.f32 0.7978846, %v7686_v22 }
 0x8c8   : > { %10496 = vtanh.f32 %v7717_v8 }
 0x8c9   : > { %v10495_v47 = vpop.eup %10494  ;;  %v7811_v50 = vmul.f32 %v7779_v43, %v7555_v52  ;;  %10498 = vtanh.f32 %v7718_v24 }
 0x8ca   : > { %v7780_v35 = vadd.f32 1.0, %v10495_v47 }
 0x8cb   : > { %7987 = vrot.lane.b32.xlu0 %v8717_v11, %s10955_s24  ;;  %8630 = vrot.lane.b32.xlu1 %v8973_v42, %s10934_s21  ;;  %7897 = vst.msk [vmem:[#allocation3 + $0x139] sm:$0xff] %vm2374_vm12, %v7811_v50 }
 0x8cc   : > { %v7812_v5 = vmul.f32 %v7780_v35, %v7556_v38  ;;  %v7516_v4 = vpop.f32.mrb[116].mxu1  ;;  %v8825_v35 = vld [vmem:[#allocation3 + $0x111] sm:$0xff] }
 0x8cd   : > { %v15479_v29 = vadd.f32 %v15307_v7, %v7516_v4  ;;  %v7518_v30 = vpop.f32.mrb[117].mxu1 }
 0x8ce   : > { %7898 = vst.msk [vmem:[#allocation3 + $0x141] sm:$0xff] %vm2374_vm12, %v7812_v5  ;;  %v7519_v0 = vpop.f32.mrb[118].mxu1 }
 0x8cf   : > { %8116 = vrot.lane.b32.xlu0 %v8845_v23, %s15993_s26  ;;  %8245 = vrot.lane.b32.xlu1 %v8973_v42, %s10956_s12  ;;  %v7591_v46 = vmul.f32 %v15479_v29, %v15479_v29  ;;  %v15486_v48 = vadd.f32 %v15307_v7, %v7519_v0  ;;  %v7521_v39 = vpop.f32.mrb[119].mxu1 }
 0x8d0   : > { %v8952_v39 = vld [vmem:[#allocation3 + $0x10a] sm:$0xff] }
 0x8d1   : > { %v7623_v34 = vmul.f32 %v7591_v46, %v15479_v29  ;;  %v7592_v23 = vmul.f32 %v15486_v48, %v15486_v48  ;;  %v8847_v46 = vpack.c.bf16 %v8825_v35, %v8824_v59 }
 0x8d2   : > { %v10497_v31 = vpop.eup %10496 }
 0x8d3   : > { %v7781_v40 = vadd.f32 1.0, %v10497_v31  ;;  %8758 = vrot.lane.b32.xlu0 %v8718_v44, %s10935_s1  ;;  %8886 = vrot.lane.b32.xlu1 %v15488_v61, %s15995_s22  ;;  %v10499_v60 = vpop.eup %10498  ;;  %v7655_v57 = vmul.f32 0.044715, %v7623_v34  ;;  %v7624_v51 = vmul.f32 %v7592_v23, %v15486_v48 }
 0x8d4   : > { %v7782_v58 = vadd.f32 1.0, %v10499_v60  ;;  %v7559_v60 = vmul.f32 0.5, %v15479_v29 }
 0x8d5   : > { %v7813_v63 = vmul.f32 %v7781_v40, %v7557_v56  ;;  %v7687_v6 = vadd.f32 %v7655_v57, %v15479_v29  ;;  %v7656_v42 = vmul.f32 0.044715, %v7624_v51  ;;  %v8975_v56 = vpack.c.bf16 %v8953_v37, %v8952_v39  ;;  %v8957_v39 = vld [vmem:[#allocation3 + $0x142] sm:$0xff] }
 0x8d6   : > { %v7814_v26 = vmul.f32 %v7782_v58, %v7558_v62  ;;  %v8751_v11 = vpop.permute.xlu0 %8750  ;;  %v7524_v19 = vpop.f32.mrb[120].mxu1  ;;  %v8701_v37 = vld [vmem:[#allocation3 + $0x140] sm:$0xff] }
 0x8d7   : > { %7899 = vst.msk [vmem:[#allocation3 + $0x151] sm:$0xff] %vm2374_vm12, %v7813_v63  ;;  %8374 = vrot.lane.b32.xlu0 %v8718_v44, %s15994_s16  ;;  %9014 = vrot.lane.b32.xlu1 %v8974_v55, %s15996_s13  ;;  %v8879_v54 = vpop.permute.xlu1 %8878  ;;  %v7719_v33 = vmul.f32 0.7978846, %v7687_v6  ;;  %v7688_v25 = vadd.f32 %v7656_v42, %v15486_v48  ;;  %v15508_v21 = vadd.f32 %v15307_v7, %v7524_v19  ;;  %v7526_v45 = vpop.f32.mrb[121].mxu1  ;;  %v9070_v63 = vld [vmem:[#allocation2 + $0x40] sm:$0xff] }
 0x8d8   : > { %8794 = vst.msk [vmem:[#allocation2 + $0x48] sm:$0xff] %vm2648_vm14, %v8751_v11  ;;  %v7527_v22 = vpop.f32.mrb[122].mxu1  ;;  %v8699_v45 = vld [vmem:[#allocation3 + $0x128] sm:$0xff] }
 0x8d9   : > { %7900 = vst.msk [vmem:[#allocation3 + $0x159] sm:$0xff] %vm2374_vm12, %v7814_v26  ;;  %10500 = vtanh.f32 %v7719_v33  ;;  %v7720_v8 = vmul.f32 0.7978846, %v7688_v25  ;;  %v7593_v27 = vmul.f32 %v15508_v21, %v15508_v21  ;;  %v15516_v52 = vadd.f32 %v15307_v7, %v7527_v22  ;;  %v7529_v24 = vpop.f32.mrb[123].mxu1 }
 0x8da   : > { %8922 = vst.msk [vmem:[#allocation2 + $0x48] sm:$0xff] %vm16004_vm8, %v8879_v54  ;;  %v8367_v43 = vpop.permute.xlu0 %8366  ;;  %v7561_v26 = vmul.f32 0.5, %v15508_v21 }
 0x8db   : > { %8632 = vrot.lane.b32.xlu0 %v8974_v55, %s10934_s21  ;;  %8503 = vrot.lane.b32.xlu1 %v15488_v61, %s10957_s30  ;;  %10502 = vtanh.f32 %v7720_v8  ;;  %8410 = vst.msk [vmem:[#allocation2 + $0x58] sm:$0xff] %vm8404_vm15, %v8367_v43  ;;  %v9007_v47 = vpop.permute.xlu1 %9006  ;;  %v7625_v50 = vmul.f32 %v7593_v27, %v15508_v21  ;;  %v7594_v38 = vmul.f32 %v15516_v52, %v15516_v52  ;;  %v7562_v25 = vmul.f32 0.5, %v15516_v52  ;;  %v8827_v8 = vld [vmem:[#allocation3 + $0x129] sm:$0xff]  ;;  %v8698_v27 = vld [vmem:[#allocation3 + $0x120] sm:$0xff] }
 0x8dc   : > { %9050 = vst.msk [vmem:[#allocation2 + $0x48] sm:$0xff] %vm16005_vm9, %v9007_v47  ;;  %v8826_v43 = vld [vmem:[#allocation3 + $0x121] sm:$0xff]  ;;  %v8720_v24 = vpack.c.bf16 %v8699_v45, %v8698_v27 }
 0x8dd   : > { %v7657_v5 = vmul.f32 0.044715, %v7625_v50  ;;  %v7626_v4 = vmul.f32 %v7594_v38, %v15516_v52  ;;  %v8848_v47 = vpack.c.bf16 %v8827_v8, %v8826_v43  ;;  %v8955_v50 = vld [vmem:[#allocation3 + $0x12a] sm:$0xff] }
 0x8de   : > { %v8625_v7 = vpop.permute.xlu0 %8624 }
 0x8df   : > { %8247 = vrot.lane.b32.xlu0 %v8974_v55, %s10956_s12  ;;  %7989 = vrot.lane.b32.xlu1 %v8718_v44, %s10955_s24  ;;  %v8496_v30 = vpop.permute.xlu1 %8495  ;;  %v7689_v32 = vadd.f32 %v7657_v5, %v15508_v21  ;;  %v7658_v0 = vmul.f32 0.044715, %v7626_v4  ;;  %v8696_v44 = vld [vmem:[#allocation3 + $0x108] sm:$0xff] }
 0x8e0   : > { %8539 = vst.msk [vmem:[#allocation2 + $0x58] sm:$0xff] %vm8533_vm11, %v8496_v30  ;;  %v8719_v40 = vpack.c.bf16 %v8697_v28, %v8696_v44  ;;  %v8954_v21 = vld [vmem:[#allocation3 + $0x122] sm:$0xff]  ;;  %v9072_v44 = vld [vmem:[#allocation2 + $0x50] sm:$0xff] }
 0x8e1   : > { %8667 = vst.msk [vmem:[#allocation2 + $0x58] sm:$0xff] %vm2519_vm13, %v8625_v7  ;;  %v7721_v31 = vmul.f32 0.7978846, %v7689_v32  ;;  %v7690_v34 = vadd.f32 %v7658_v0, %v15516_v52  ;;  %v8976_v52 = vpack.c.bf16 %v8955_v50, %v8954_v21  ;;  %v8829_v7 = vld [vmem:[#allocation3 + $0x141] sm:$0xff]  ;;  %v8828_v32 = vld [vmem:[#allocation3 + $0x139] sm:$0xff] }
 0x8e2   : > { %v8240_v42 = vpop.permute.xlu0 %8239  ;;  %v8849_v0 = vpack.c.bf16 %v8829_v7, %v8828_v32  ;;  %v9074_v50 = vld [vmem:[#allocation2 + $0x60] sm:$0xff] }
 0x8e3   : > { %8888 = vrot.lane.b32.xlu0 %v8847_v46, %s15995_s22  ;;  %8118 = vrot.lane.b32.xlu1 %v15488_v61, %s15993_s26  ;;  %v10501_v23 = vpop.eup %10500  ;;  %v7982_v20 = vpop.permute.xlu1 %7981  ;;  %v9071_v53 = vld [vmem:[#allocation2 + $0x48] sm:$0xff]  ;;  %10504 = vtanh.f32 %v7721_v31  ;;  %v7722_v51 = vmul.f32 0.7978846, %v7690_v34  ;;  %v7560_v61 = vmul.f32 0.5, %v15486_v48  ;;  %v8700_v34 = vld [vmem:[#allocation3 + $0x138] sm:$0xff] }
 0x8e4   : > { %v7783_v57 = vadd.f32 1.0, %v10501_v23  ;;  %8024 = vst.msk [vmem:[#allocation2 + $0x68] sm:$0xff] %vm8017_vm1, %v7982_v20  ;;  %9849 = vmatprep.mubr.msk.bf16.mxu0 %vm9209_vm7, %v9071_v53  ;;  %v8721_v20 = vpack.c.bf16 %v8701_v37, %v8700_v34 }
 0x8e5   : > { %v10503_v62 = vpop.eup %10502  ;;  %9326 = vmatmul.mubr.bf16.gmra.mrb[84].mxu0 %v9070_v63  ;;  %10506 = vtanh.f32 %v7722_v51  ;;  %v8830_v51 = vld [vmem:[#allocation3 + $0x151] sm:$0xff] }
 0x8e6   : > { %v7815_v58 = vmul.f32 %v7783_v57, %v7559_v60  ;;  %v7784_v55 = vadd.f32 1.0, %v10503_v62  ;;  %v8831_v60 = vld [vmem:[#allocation3 + $0x159] sm:$0xff]  ;;  %v8702_v57 = vld [vmem:[#allocation3 + $0x150] sm:$0xff] }
 0x8e7   : > { %9016 = vrot.lane.b32.xlu0 %v8975_v56, %s15996_s13  ;;  %8760 = vrot.lane.b32.xlu1 %v8719_v40, %s10935_s1  ;;  %v8111_v29 = vpop.permute.xlu1 %8110  ;;  %v8850_v62 = vpack.c.bf16 %v8831_v60, %v8830_v51 }
 0x8e8   : > { %7901 = vst.msk [vmem:[#allocation3 + $0x169] sm:$0xff] %vm2374_vm12, %v7815_v58  ;;  %v7816_v6 = vmul.f32 %v7784_v55, %v7560_v61  ;;  %v8958_v58 = vld [vmem:[#allocation3 + $0x152] sm:$0xff]  ;;  %v8959_v61 = vld [vmem:[#allocation3 + $0x15a] sm:$0xff] }
 0x8e9   : > { %8153 = vst.msk [vmem:[#allocation2 + $0x68] sm:$0xff] %vm8146_vm2, %v8111_v29  ;;  %v8978_v55 = vpack.c.bf16 %v8959_v61, %v8958_v58 }
 0x8ea   : > { %8282 = vst.msk [vmem:[#allocation2 + $0x68] sm:$0xff] %vm8275_vm4, %v8240_v42 }
 0x8eb   : > { %7902 = vst.msk [vmem:[#allocation3 + $0x171] sm:$0xff] %vm2374_vm12, %v7816_v6  ;;  %8505 = vrot.lane.b32.xlu0 %v8847_v46, %s10957_s30  ;;  %8376 = vrot.lane.b32.xlu1 %v8719_v40, %s15994_s16 }
 0x8ed   : > { %v10505_v48 = vpop.eup %10504 }
 0x8ee   : > { %v7785_v11 = vadd.f32 1.0, %v10505_v48 }
 0x8ef   : > { %7991 = vrot.lane.b32.xlu0 %v8719_v40, %s10955_s24  ;;  %8634 = vrot.lane.b32.xlu1 %v8975_v56, %s10934_s21  ;;  %v10507_v54 = vpop.eup %10506  ;;  %v8703_v40 = vld [vmem:[#allocation3 + $0x158] sm:$0xff] }
 0x8f0   : > { %v7817_v33 = vmul.f32 %v7785_v11, %v7561_v26  ;;  %v7786_v19 = vadd.f32 1.0, %v10507_v54  ;;  %v8722_v63 = vpack.c.bf16 %v8703_v40, %v8702_v57  ;;  %v8832_v11 = vld [vmem:[#allocation3 + $0x169] sm:$0xff] }
 0x8f2   : > { %7903 = vst.msk [vmem:[#allocation3 + $0x181] sm:$0xff] %vm2374_vm12, %v7817_v33  ;;  %v7818_v22 = vmul.f32 %v7786_v19, %v7562_v25  ;;  %v8833_v26 = vld [vmem:[#allocation3 + $0x171] sm:$0xff] }
 0x8f3   : > { %8120 = vrot.lane.b32.xlu0 %v8847_v46, %s15993_s26  ;;  %8249 = vrot.lane.b32.xlu1 %v8975_v56, %s10956_s12  ;;  %v8956_v46 = vld [vmem:[#allocation3 + $0x13a] sm:$0xff]  ;;  %v8851_v25 = vpack.c.bf16 %v8833_v26, %v8832_v11  ;;  %v8960_v19 = vld [vmem:[#allocation3 + $0x16a] sm:$0xff]  ;;  %v8961_v45 = vld [vmem:[#allocation3 + $0x172] sm:$0xff] }
 0x8f4   : > { %7904 = vst.msk [vmem:[#allocation3 + $0x189] sm:$0xff] %vm2374_vm12, %v7818_v22  ;;  %vm16007_vm12 = vmmov %vm16002_vm5  ;;  %v8977_v23 = vpack.c.bf16 %v8957_v39, %v8956_v46  ;;  %v8705_v8 = vld [vmem:[#allocation3 + $0x170] sm:$0xff]  ;;  %v8704_v22 = vld [vmem:[#allocation3 + $0x168] sm:$0xff] }
 0x8f5   : > { %vm16008_vm5 = vmmov %vm15997_vm3  ;;  %v8723_v21 = vpack.c.bf16 %v8705_v8, %v8704_v22 }
 0x8f6   : > { %vm16009_vm3 = vmmov %vm16003_vm6 }
 0x8f7   : > { %8762 = vrot.lane.b32.xlu0 %v8720_v24, %s10935_s1  ;;  %8890 = vrot.lane.b32.xlu1 %v8848_v47, %s15995_s22  ;;  %vm16010_vm6 = vmmov %vm16008_vm5 }
 0x8f8   : > { %vm16011_vm8 = vmmov %vm16009_vm3 }
 0x8f9   : > { %vm16013_vm9 = vmmov %vm16008_vm5 }
 0x8fb   : > { %8378 = vrot.lane.b32.xlu0 %v8720_v24, %s15994_s16  ;;  %9018 = vrot.lane.b32.xlu1 %v8976_v52, %s15996_s13  ;;  %v8962_v51 = vld [vmem:[#allocation3 + $0x182] sm:$0xff] }
 0x8fc   : > { %v8881_v38 = vpop.permute.xlu0 %8880 }
 0x8fd   : > { %v8753_v35 = vpop.permute.xlu1 %8752 }
 0x8fe   : > { %8795 = vst.msk [vmem:[#allocation2 + $0x58] sm:$0xff] %vm2648_vm14, %v8753_v35  ;;  %v15602_v35 = vld [vmem:[#allocation21] ss:$0 sm:$0xff] }
 0x8ff   : > { %8923 = vst.msk [vmem:[#allocation2 + $0x58] sm:$0xff] %vm16006_vm10, %v8881_v38  ;;  %8636 = vrot.lane.b32.xlu0 %v8976_v52, %s10934_s21  ;;  %8507 = vrot.lane.b32.xlu1 %v8848_v47, %s10957_s30  ;;  %vm16014_vm10 = vmmov %vm16009_vm3 }
 0x900   : > { %v9009_v5 = vpop.permute.xlu0 %9008 }
 0x901   : > { %v8369_v4 = vpop.permute.xlu1 %8368  ;;  %9051 = vst.msk [vmem:[#allocation2 + $0x58] sm:$0xff] %vm16007_vm12, %v9009_v5  ;;  %vm16015_vm12 = vmmov %vm16008_vm5 }
 0x902   : > { %8411 = vst.msk [vmem:[#allocation2 + $0x68] sm:$0xff] %vm8404_vm15, %v8369_v4 }
 0x903   : > { %8251 = vrot.lane.b32.xlu0 %v8976_v52, %s10956_s12  ;;  %7993 = vrot.lane.b32.xlu1 %v8720_v24, %s10955_s24 }
 0x904   : > { %v8498_v30 = vpop.permute.xlu0 %8497 }
 0x905   : > { %v8627_v59 = vpop.permute.xlu1 %8626  ;;  %8540 = vst.msk [vmem:[#allocation2 + $0x68] sm:$0xff] %vm8533_vm11, %v8498_v30 }
 0x906   : > { %8668 = vst.msk [vmem:[#allocation2 + $0x68] sm:$0xff] %vm2519_vm13, %v8627_v59 }
 0x907   : > { %8892 = vrot.lane.b32.xlu0 %v8849_v0, %s15995_s22  ;;  %8122 = vrot.lane.b32.xlu1 %v8848_v47, %s15993_s26  ;;  %v8979_v47 = vpack.c.bf16 %v8961_v45, %v8960_v19 }
 0x908   : > { %v7984_v28 = vpop.permute.xlu0 %7983  ;;  %v9073_v31 = vld [vmem:[#allocation2 + $0x58] sm:$0xff] }
 0x909   : > { %8025 = vst.msk [vmem:[#allocation2 + $0x78] sm:$0xff] %vm8017_vm1, %v7984_v28  ;;  %9850 = vmatprep.mubr.msk.bf16.mxu0 %vm9209_vm7, %v9073_v31  ;;  %v8242_v56 = vpop.permute.xlu1 %8241 }
 0x90a   : > { %9334 = vmatmul.mubr.bf16.gmra.mrb[88].mxu0 %v9072_v44  ;;  %v8707_v44 = vld [vmem:[#allocation3 + $0x188] sm:$0xff] }
 0x90b   : > { %9020 = vrot.lane.b32.xlu0 %v8977_v23, %s15996_s13  ;;  %8764 = vrot.lane.b32.xlu1 %v8721_v20, %s10935_s1 }
 0x90c   : > { %v8113_v53 = vpop.permute.xlu0 %8112 }
 0x90d   : > { %8154 = vst.msk [vmem:[#allocation2 + $0x78] sm:$0xff] %vm8146_vm2, %v8113_v53  ;;  %v8834_v53 = vld [vmem:[#allocation3 + $0x181] sm:$0xff] }
 0x90e   : > { %8283 = vst.msk [vmem:[#allocation2 + $0x78] sm:$0xff] %vm8275_vm4, %v8242_v56 }
 0x90f   : > { %8509 = vrot.lane.b32.xlu0 %v8849_v0, %s10957_s30  ;;  %8380 = vrot.lane.b32.xlu1 %v8721_v20, %s15994_s16 }
 0x913   : > { %7995 = vrot.lane.b32.xlu0 %v8721_v20, %s10955_s24  ;;  %8638 = vrot.lane.b32.xlu1 %v8977_v23, %s10934_s21  ;;  %v8706_v20 = vld [vmem:[#allocation3 + $0x180] sm:$0xff] }
 0x914   : > { %v8724_v60 = vpack.c.bf16 %v8707_v44, %v8706_v20 }
 0x917   : > { %8124 = vrot.lane.b32.xlu0 %v8849_v0, %s15993_s26  ;;  %8253 = vrot.lane.b32.xlu1 %v8977_v23, %s10956_s12  ;;  %v8835_v23 = vld [vmem:[#allocation3 + $0x189] sm:$0xff] }
 0x918   : > { %v8852_v57 = vpack.c.bf16 %v8835_v23, %v8834_v53 }
 0x91b   : > { %8766 = vrot.lane.b32.xlu0 %v8722_v63, %s10935_s1  ;;  %8894 = vrot.lane.b32.xlu1 %v8850_v62, %s15995_s22 }
 0x91f   : > { %8382 = vrot.lane.b32.xlu0 %v8722_v63, %s15994_s16  ;;  %9022 = vrot.lane.b32.xlu1 %v8978_v55, %s15996_s13 }
 0x921   : > { %v8755_v29 = vpop.permute.xlu0 %8754  ;;  %v8883_v6 = vpop.permute.xlu1 %8882 }
 0x922   : > { %8796 = vst.msk [vmem:[#allocation2 + $0x68] sm:$0xff] %vm2648_vm14, %v8755_v29  ;;  %v8836_v29 = vld [vmem:[#allocation3 + $0x199] sm:$0xff] }
 0x923   : > { %8924 = vst.msk [vmem:[#allocation2 + $0x68] sm:$0xff] %vm16008_vm5, %v8883_v6  ;;  %8640 = vrot.lane.b32.xlu0 %v8978_v55, %s10934_s21  ;;  %8511 = vrot.lane.b32.xlu1 %v8850_v62, %s10957_s30  ;;  %v8837_v6 = vld [vmem:[#allocation3 + $0x1a1] sm:$0xff]  ;;  %vm16016_vm5 = vmmov %vm16009_vm3 }
 0x924   : > { %v8853_v19 = vpack.c.bf16 %v8837_v6, %v8836_v29 }
 0x925   : > { %v8371_v42 = vpop.permute.xlu0 %8370  ;;  %v9011_v48 = vpop.permute.xlu1 %9010 }
 0x926   : > { %8412 = vst.msk [vmem:[#allocation2 + $0x78] sm:$0xff] %vm8404_vm15, %v8371_v42  ;;  %v8964_v42 = vld [vmem:[#allocation3 + $0x19a] sm:$0xff] }
 0x927   : > { %9052 = vst.msk [vmem:[#allocation2 + $0x68] sm:$0xff] %vm16009_vm3, %v9011_v48  ;;  %8255 = vrot.lane.b32.xlu0 %v8978_v55, %s10956_s12  ;;  %7997 = vrot.lane.b32.xlu1 %v8722_v63, %s10955_s24  ;;  %v8963_v63 = vld [vmem:[#allocation3 + $0x18a] sm:$0xff]  ;;  %v8965_v48 = vld [vmem:[#allocation3 + $0x1a2] sm:$0xff]  ;;  %vm16017_vm3 = vmmov %vm16010_vm6 }
 0x928   : > { %v8980_v55 = vpack.c.bf16 %v8963_v63, %v8962_v51  ;;  %v8981_v45 = vpack.c.bf16 %v8965_v48, %v8964_v42 }
 0x929   : > { %v8629_v54 = vpop.permute.xlu0 %8628  ;;  %v8500_v33 = vpop.permute.xlu1 %8499 }
 0x92a   : > { %8541 = vst.msk [vmem:[#allocation2 + $0x78] sm:$0xff] %vm8533_vm11, %v8500_v33 }
 0x92b   : > { %8669 = vst.msk [vmem:[#allocation2 + $0x78] sm:$0xff] %vm2519_vm13, %v8629_v54  ;;  %8896 = vrot.lane.b32.xlu0 %v8851_v25, %s15995_s22  ;;  %8126 = vrot.lane.b32.xlu1 %v8850_v62, %s15993_s26 }
 0x92d   : > { %v8244_v27 = vpop.permute.xlu0 %8243  ;;  %v7986_v43 = vpop.permute.xlu1 %7985 }
 0x92e   : > { %v9075_v24 = vld [vmem:[#allocation2 + $0x68] sm:$0xff]  ;;  %8026 = vst.msk [vmem:[#allocation2 + $0x88] sm:$0xff] %vm8017_vm1, %v7986_v43 }
 0x92f   : > { %9851 = vmatprep.mubr.msk.bf16.mxu0 %vm9209_vm7, %v9075_v24  ;;  %9024 = vrot.lane.b32.xlu0 %v8979_v47, %s15996_s13 }
 0x930   : > { %8768 = vrot.lane.b32.xlu1 %v8723_v21, %s10935_s1  ;;  %9342 = vmatmul.mubr.bf16.gmra.mrb[92].mxu0 %v9074_v50 }
 0x931   : > { %v8885_v52 = vpop.permute.xlu0 %8884  ;;  %v8115_v38 = vpop.permute.xlu1 %8114 }
 0x932   : > { %8155 = vst.msk [vmem:[#allocation2 + $0x88] sm:$0xff] %vm8146_vm2, %v8115_v38 }
 0x933   : > { %8284 = vst.msk [vmem:[#allocation2 + $0x88] sm:$0xff] %vm8275_vm4, %v8244_v27  ;;  %8513 = vrot.lane.b32.xlu0 %v8851_v25, %s10957_s30 }
 0x934   : > { %8384 = vrot.lane.b32.xlu1 %v8723_v21, %s15994_s16 }
 0x935   : > { %v9295_v5 = vpop.f32.mrb[68].mxu0  ;;  %v9013_v4 = vpop.permute.xlu0 %9012 }
 0x936   : > { %v9296_v7 = vadd.f32 %v15602_v35, %v9295_v5  ;;  %v8757_v30 = vpop.permute.xlu1 %8756  ;;  %v9297_v59 = vpop.f32.mrb[69].mxu0 }
 0x937   : > { %8797 = vst.msk [vmem:[#allocation2 + $0x78] sm:$0xff] %vm2648_vm14, %v8757_v30  ;;  %7999 = vrot.lane.b32.xlu0 %v8723_v21, %s10955_s24  ;;  %v9298_v0 = vpop.f32.mrb[70].mxu0  ;;  %v9078_v30 = vld [vmem:[#allocation2 + $0x80] sm:$0xff] }
 0x938   : > { %v9422_v32 = vmul.f32 0.2, %v9296_v7  ;;  %8925 = vst.msk [vmem:[#allocation2 + $0x78] sm:$0xff] %vm16010_vm6, %v8885_v52  ;;  %8642 = vrot.lane.b32.xlu1 %v8979_v47, %s10934_s21  ;;  %v9299_v46 = vadd.f32 %v15602_v35, %v9298_v0  ;;  %v9300_v39 = vpop.f32.mrb[71].mxu0  ;;  %vm16018_vm6 = vmmov %vm16016_vm5 }
 0x939   : > { %9053 = vst.msk [vmem:[#allocation2 + $0x78] sm:$0xff] %vm16011_vm8, %v9013_v4  ;;  %v8502_v28 = vpop.permute.xlu0 %8501  ;;  %vm16019_vm8 = vmmov %vm16017_vm3 }
 0x93a   : > { %v9454_v37 = vadd.f32 %v9422_v32, %v11503_v1  ;;  %v8373_v31 = vpop.permute.xlu1 %8372  ;;  %v9423_v34 = vmul.f32 0.2, %v9299_v46 }
 0x93b   : > { %8413 = vst.msk [vmem:[#allocation2 + $0x88] sm:$0xff] %vm8404_vm15, %v8373_v31  ;;  %8128 = vrot.lane.b32.xlu0 %v8851_v25, %s15993_s26 }
 0x93c   : > { %9486 = vst.msk [vmem:[%s15618_s14] sm:$0xff] %vm573_vm0, %v9454_v37  ;;  %8257 = vrot.lane.b32.xlu1 %v8979_v47, %s10956_s12  ;;  %v9455_v1 = vadd.f32 %v9423_v34, %v11506_v2  ;;  %v9076_v2 = vld [vmem:[#allocation2 + $0x70] sm:$0xff]  ;;  %s16047_s12 = sld [smem:[#allocation51_spill]] }
 0x93d   : > { %8542 = vst.msk [vmem:[#allocation2 + $0x88] sm:$0xff] %vm8533_vm11, %v8502_v28  ;;  %v7988_v56 = vpop.permute.xlu0 %7987 }
 0x93e   : > { %v8631_v40 = vpop.permute.xlu1 %8630  ;;  %9487 = vst.msk [vmem:[%s15618_s14 + $0x8] sm:$0xff] %vm573_vm0, %v9455_v1 }
 0x93f   : > { %8027 = vst.msk [vmem:[#allocation2 + $0x98] sm:$0xff] %vm8017_vm1, %v7988_v56  ;;  %8770 = vrot.lane.b32.xlu0 %v8724_v60, %s10935_s1  ;;  %s9532_s1 = sshll.u32 %s15618_s14, 4  ;;  %s15838_s1 = int_to_ptr.vmem [resolvable:$true] %s9532_s1 }
 0x940   : > { %8670 = vst.msk [vmem:[#allocation2 + $0x88] sm:$0xff] %vm2519_vm13, %v8631_v40  ;;  %8898 = vrot.lane.b32.xlu1 %v8852_v57, %s15995_s22  ;;  %v9077_v62 = vld [vmem:[#allocation2 + $0x78] sm:$0xff] }
 0x941   : > { %9852 = vmatprep.mubr.msk.bf16.mxu0 %vm9209_vm7, %v9077_v62  ;;  %v8117_v58 = vpop.permute.xlu0 %8116 }
 0x942   : > { %9350 = vmatmul.mubr.bf16.gmra.mrb[96].mxu0 %v9076_v2  ;;  %v8246_v61 = vpop.permute.xlu1 %8245  ;;  %8156 = vst.msk [vmem:[#allocation2 + $0x98] sm:$0xff] %vm8146_vm2, %v8117_v58 }
 0x943   : > { %8285 = vst.msk [vmem:[#allocation2 + $0x98] sm:$0xff] %vm8275_vm4, %v8246_v61  ;;  %8386 = vrot.lane.b32.xlu0 %v8724_v60, %s15994_s16  ;;  %s10822_s16 = scalar_lea.vmem %s15838_s1, 4096 }
 0x944   : > { %9026 = vrot.lane.b32.xlu1 %v8980_v55, %s15996_s13  ;;  %p10823_p13 = scmp.ne.s32.totalorder %s15838_s1, %s10822_s16 }
 0x945   : > { %v8759_v26 = vpop.permute.xlu0 %8758 }
 0x946   : > { %v8887_v11 = vpop.permute.xlu1 %8886  ;;  %8798 = vst.msk [vmem:[#allocation2 + $0x88] sm:$0xff] %vm2648_vm14, %v8759_v26  ;;  %p10824_p2 = pnand %p10823_p13, %p16048_p0 }
 0x947   : > { %v9303_v54 = vpop.f32.mrb[72].mxu0  ;;  %8926 = vst.msk [vmem:[#allocation2 + $0x88] sm:$0xff] %vm16013_vm9, %v8887_v11  ;;  %8644 = vrot.lane.b32.xlu0 %v8980_v55, %s10934_s21  ;;  %vm16020_vm9 = vmmov %vm16016_vm5  ;;  %s9867_s21 = sshll.u32 %s11041_s23, 12  ;;  %s9519_s23 = scalar_lea.sflag [#allocation6], %s11362_s15 }
 0x948   : > { %v9304_v33 = vadd.f32 %v15602_v35, %v9303_v54  ;;  %8515 = vrot.lane.b32.xlu1 %v8852_v57, %s10957_s30  ;;  %v9305_v25 = vpop.f32.mrb[73].mxu0  ;;  %v9080_v57 = vld [vmem:[#allocation2 + $0x90] sm:$0xff]  ;;  %s15833_s30 = scalar_lea.hbm %s16047_s12, %s9867_s21  ;;  %p10825_p8 = pneg %p10824_p2 }
 0x949   : > { %v9306_v8 = vpop.f32.mrb[74].mxu0  ;;  %v8375_v27 = vpop.permute.xlu0 %8374 }
 0x94a   : > { %v9424_v22 = vmul.f32 0.2, %v9304_v33  ;;  %v9307_v43 = vadd.f32 %v15602_v35, %v9306_v8  ;;  %v9015_v24 = vpop.permute.xlu1 %9014  ;;  %8414 = vst.msk [vmem:[#allocation2 + $0x98] sm:$0xff] %vm8404_vm15, %v8375_v27  ;;  %v9308_v47 = vpop.f32.mrb[75].mxu0 }
 0x94b   : > { %9054 = vst.msk [vmem:[#allocation2 + $0x88] sm:$0xff] %vm16014_vm10, %v9015_v24  ;;  %8900 = vrot.lane.b32.xlu0 %v8853_v19, %s15995_s22  ;;  %vm16021_vm10 = vmmov %vm16017_vm3  ;;  %s10958_s22 = smov [#allocation22]  }
 0x94c   : > { %v9456_v21 = vadd.f32 %v9424_v22, %v11509_v3  ;;  %v9425_v50 = vmul.f32 0.2, %v9307_v43  ;;  %9028 = vrot.lane.b32.xlu1 %v8981_v45, %s15996_s13  ;;  %s10826_s13 = sshll.u32 %s10958_s22, 4  ;;  %s10827_s13 = int_to_ptr.vmem [resolvable:$false] %s10826_s13 }
 0x94d   : > { %v8633_v38 = vpop.permute.xlu0 %8632  ;;  %s10828_s25 = scalar_lea.vmem %s10827_s13, 8192  ;;  %p10829_p4 = scmp.lt.s32.totalorder %s15838_s1, %s10827_s13 }
 0x94e   : > { %9488 = vst.msk [vmem:[%s15618_s14 + $0x10] sm:$0xff] %vm573_vm0, %v9456_v21  ;;  %v9457_v52 = vadd.f32 %v9425_v50, %v11518_v9  ;;  %v8504_v5 = vpop.permute.xlu1 %8503  ;;  %p10830_p10 = scmp.lt.s32.totalorder %s10828_s25, %s10822_s16 }
 0x94f   : > { %8543 = vst.msk [vmem:[#allocation2 + $0x98] sm:$0xff] %vm8533_vm11, %v8504_v5  ;;  %v9084_v5 = vld [vmem:[#allocation2 + $0xb0] sm:$0xff] }
 0x950   : > { %9489 = vst.msk [vmem:[%s15618_s14 + $0x18] sm:$0xff] %vm573_vm0, %v9457_v52  ;;  %p10831_p11 = por %p10830_p10, %p10829_p4 }
 0x951   : > { %8671 = vst.msk [vmem:[#allocation2 + $0x98] sm:$0xff] %vm2519_vm13, %v8633_v38  ;;  %v8248_v4 = vpop.permute.xlu0 %8247 }
 0x952   : > { %v7990_v7 = vpop.permute.xlu1 %7989  ;;  %v9079_v3 = vld [vmem:[#allocation2 + $0x88] sm:$0xff]  ;;  %p10832_p3 = pnand %p10831_p11, %p10825_p8 }
 0x953   : > { %8028 = vst.msk [vmem:[#allocation2 + $0xa8] sm:$0xff] %vm8017_vm1, %v7990_v7  ;;  %9853 = vmatprep.mubr.msk.bf16.mxu0 %vm9209_vm7, %v9079_v3 }
 0x954   : > { %9358 = vmatmul.mubr.bf16.gmra.mrb[100].mxu0 %v9078_v30 }
 0x955   : > { %v8889_v59 = vpop.permute.xlu0 %8888 }
 0x956   : > { %v8119_v32 = vpop.permute.xlu1 %8118 }
 0x957   : > { %8157 = vst.msk [vmem:[#allocation2 + $0xa8] sm:$0xff] %vm8146_vm2, %v8119_v32 }
 0x958   : > { %8286 = vst.msk [vmem:[#allocation2 + $0xa8] sm:$0xff] %vm8275_vm4, %v8248_v4 }
 0x959   : > { %v9017_v0 = vpop.permute.xlu0 %9016 }
 0x95a   : > { %v9311_v9 = vpop.f32.mrb[76].mxu0  ;;  %v8761_v39 = vpop.permute.xlu1 %8760 }
 0x95b   : > { %v9312_v46 = vadd.f32 %v15602_v35, %v9311_v9  ;;  %8799 = vst.msk [vmem:[#allocation2 + $0x98] sm:$0xff] %vm2648_vm14, %v8761_v39  ;;  %v9313_v37 = vpop.f32.mrb[77].mxu0 }
 0x95c   : > { %8927 = vst.msk [vmem:[#allocation2 + $0x98] sm:$0xff] %vm16015_vm12, %v8889_v59  ;;  %v9314_v31 = vpop.f32.mrb[78].mxu0  ;;  %vm16022_vm12 = vmmov %vm16016_vm5 }
 0x95d   : > { %v9426_v28 = vmul.f32 0.2, %v9312_v46  ;;  %9055 = vst.msk [vmem:[#allocation2 + $0x98] sm:$0xff] %vm16016_vm5, %v9017_v0  ;;  %v9315_v34 = vadd.f32 %v15602_v35, %v9314_v31  ;;  %v9316_v44 = vpop.f32.mrb[79].mxu0  ;;  %v8506_v1 = vpop.permute.xlu0 %8505  ;;  %vm16023_vm5 = vmmov %vm16017_vm3 }
 0x95e   : > { %v8377_v20 = vpop.permute.xlu1 %8376 }
 0x95f   : > { %v9458_v23 = vadd.f32 %v9426_v28, %v11521_v10  ;;  %v9427_v53 = vmul.f32 0.2, %v9315_v34  ;;  %8415 = vst.msk [vmem:[#allocation2 + $0xa8] sm:$0xff] %vm8404_vm15, %v8377_v20  ;;  %v9086_v28 = vld [vmem:[#allocation2 + $0xc0] sm:$0xff] }
 0x960   : > { %8544 = vst.msk [vmem:[#allocation2 + $0xa8] sm:$0xff] %vm8533_vm11, %v8506_v1 }
 0x961   : > { %9490 = vst.msk [vmem:[%s15618_s14 + $0x20] sm:$0xff] %vm573_vm0, %v9458_v23  ;;  %v9459_v56 = vadd.f32 %v9427_v53, %v11528_v12  ;;  %v7992_v40 = vpop.permute.xlu0 %7991 }
 0x962   : > { %v8635_v60 = vpop.permute.xlu1 %8634  ;;  %8029 = vst.msk [vmem:[#allocation2 + $0xb8] sm:$0xff] %vm8017_vm1, %v7992_v40 }
 0x963   : > { %9491 = vst.msk [vmem:[%s15618_s14 + $0x28] sm:$0xff] %vm573_vm0, %v9459_v56 }
 0x964   : > { %8672 = vst.msk [vmem:[#allocation2 + $0xa8] sm:$0xff] %vm2519_vm13, %v8635_v60  ;;  %v9081_v10 = vld [vmem:[#allocation2 + $0x98] sm:$0xff]  ;;  %v9088_v60 = vld [vmem:[#allocation2 + $0xd0] sm:$0xff] }
 0x965   : > { %9854 = vmatprep.mubr.msk.bf16.mxu0 %vm9209_vm7, %v9081_v10  ;;  %v8121_v51 = vpop.permute.xlu0 %8120 }
 0x966   : > { %9366 = vmatmul.mubr.bf16.gmra.mrb[104].mxu0 %v9080_v57  ;;  %v8250_v63 = vpop.permute.xlu1 %8249  ;;  %8158 = vst.msk [vmem:[#allocation2 + $0xb8] sm:$0xff] %vm8146_vm2, %v8121_v51 }
 0x967   : > { %8287 = vst.msk [vmem:[#allocation2 + $0xb8] sm:$0xff] %vm8275_vm4, %v8250_v63 }
 0x969   : > { %v8763_v12 = vpop.permute.xlu0 %8762 }
 0x96a   : > { %v8891_v62 = vpop.permute.xlu1 %8890  ;;  %8800 = vst.msk [vmem:[#allocation2 + $0xa8] sm:$0xff] %vm2648_vm14, %v8763_v12 }
 0x96b   : > { %8928 = vst.msk [vmem:[#allocation2 + $0xa8] sm:$0xff] %vm16017_vm3, %v8891_v62  ;;  %vm16024_vm3 = vmmov %vm16018_vm6 }
 0x96c   : > { %v9319_v2 = vpop.f32.mrb[80].mxu0 }
 0x96d   : > { %v9320_v58 = vadd.f32 %v15602_v35, %v9319_v2  ;;  %v9321_v61 = vpop.f32.mrb[81].mxu0  ;;  %v8379_v6 = vpop.permute.xlu0 %8378 }
 0x96e   : > { %v9322_v55 = vpop.f32.mrb[82].mxu0  ;;  %v9019_v48 = vpop.permute.xlu1 %9018  ;;  %8416 = vst.msk [vmem:[#allocation2 + $0xb8] sm:$0xff] %vm8404_vm15, %v8379_v6 }
 0x96f   : > { %v9428_v29 = vmul.f32 0.2, %v9320_v58  ;;  %v9323_v42 = vadd.f32 %v15602_v35, %v9322_v55  ;;  %9056 = vst.msk [vmem:[#allocation2 + $0xa8] sm:$0xff] %vm16018_vm6, %v9019_v48  ;;  %v9324_v26 = vpop.f32.mrb[83].mxu0  ;;  %vm16025_vm6 = vmmov %vm16023_vm5 }
 0x971   : > { %v9460_v11 = vadd.f32 %v9428_v29, %v11533_v13  ;;  %v9429_v54 = vmul.f32 0.2, %v9323_v42  ;;  %v8637_v25 = vpop.permute.xlu0 %8636  ;;  %v9082_v13 = vld [vmem:[#allocation2 + $0xa0] sm:$0xff] }
 0x972   : > { %v8508_v19 = vpop.permute.xlu1 %8507 }
 0x973   : > { %9492 = vst.msk [vmem:[%s15618_s14 + $0x30] sm:$0xff] %vm573_vm0, %v9460_v11  ;;  %v9461_v33 = vadd.f32 %v9429_v54, %v11536_v14 }
 0x974   : > { %8545 = vst.msk [vmem:[#allocation2 + $0xb8] sm:$0xff] %vm8533_vm11, %v8508_v19 }
 0x975   : > { %9493 = vst.msk [vmem:[%s15618_s14 + $0x38] sm:$0xff] %vm573_vm0, %v9461_v33  ;;  %v8252_v45 = vpop.permute.xlu0 %8251 }
 0x976   : > { %8673 = vst.msk [vmem:[#allocation2 + $0xb8] sm:$0xff] %vm2519_vm13, %v8637_v25  ;;  %v7994_v8 = vpop.permute.xlu1 %7993  ;;  %v9083_v22 = vld [vmem:[#allocation2 + $0xa8] sm:$0xff]  ;;  %v9090_v25 = vld [vmem:[#allocation2 + $0xe0] sm:$0xff] }
 0x977   : > { %8030 = vst.msk [vmem:[#allocation2 + $0xc8] sm:$0xff] %vm8017_vm1, %v7994_v8  ;;  %9855 = vmatprep.mubr.msk.bf16.mxu0 %vm9209_vm7, %v9083_v22  ;;  %v9092_v22 = vld [vmem:[#allocation2 + $0xf0] sm:$0xff] }
 0x978   : > { %9374 = vmatmul.mubr.bf16.gmra.mrb[108].mxu0 %v9082_v13 }
 0x979   : > { %v8893_v27 = vpop.permute.xlu0 %8892 }
 0x97a   : > { %v8123_v43 = vpop.permute.xlu1 %8122 }
 0x97b   : > { %8159 = vst.msk [vmem:[#allocation2 + $0xc8] sm:$0xff] %vm8146_vm2, %v8123_v43 }
 0x97c   : > { %8288 = vst.msk [vmem:[#allocation2 + $0xc8] sm:$0xff] %vm8275_vm4, %v8252_v45 }
 0x97d   : > { %v9021_v14 = vpop.permute.xlu0 %9020 }
 0x97e   : > { %v8765_v24 = vpop.permute.xlu1 %8764 }
 0x97f   : > { %8801 = vst.msk [vmem:[#allocation2 + $0xb8] sm:$0xff] %vm2648_vm14, %v8765_v24 }
 0x980   : > { %8929 = vst.msk [vmem:[#allocation2 + $0xb8] sm:$0xff] %vm16019_vm8, %v8893_v27 }
 0x981   : > { %9057 = vst.msk [vmem:[#allocation2 + $0xb8] sm:$0xff] %vm16020_vm9, %v9021_v14  ;;  %v8510_v47 = vpop.permute.xlu0 %8509 }
 0x982   : > { %v8381_v21 = vpop.permute.xlu1 %8380 }
 0x983   : > { %8417 = vst.msk [vmem:[#allocation2 + $0xc8] sm:$0xff] %vm8404_vm15, %v8381_v21 }
 0x984   : > { %8546 = vst.msk [vmem:[#allocation2 + $0xc8] sm:$0xff] %vm8533_vm11, %v8510_v47 }
 0x985   : > { %v7996_v50 = vpop.permute.xlu0 %7995 }
 0x986   : > { %v8639_v52 = vpop.permute.xlu1 %8638  ;;  %8031 = vst.msk [vmem:[#allocation2 + $0xd8] sm:$0xff] %vm8017_vm1, %v7996_v50 }
 0x987   : > { %8674 = vst.msk [vmem:[#allocation2 + $0xc8] sm:$0xff] %vm2519_vm13, %v8639_v52 }
 0x988   : > { %v9085_v38 = vld [vmem:[#allocation2 + $0xb8] sm:$0xff] }
 0x989   : > { %9856 = vmatprep.mubr.msk.bf16.mxu0 %vm9209_vm7, %v9085_v38  ;;  %v8125_v4 = vpop.permute.xlu0 %8124 }
 0x98a   : > { %9382 = vmatmul.mubr.bf16.gmra.mrb[112].mxu0 %v9084_v5  ;;  %v8254_v7 = vpop.permute.xlu1 %8253  ;;  %8160 = vst.msk [vmem:[#allocation2 + $0xd8] sm:$0xff] %vm8146_vm2, %v8125_v4 }
 0x98b   : > { %8289 = vst.msk [vmem:[#allocation2 + $0xd8] sm:$0xff] %vm8275_vm4, %v8254_v7 }
 0x98d   : > { %v8767_v3 = vpop.permute.xlu0 %8766 }
 0x98e   : > { %v8895_v30 = vpop.permute.xlu1 %8894  ;;  %8802 = vst.msk [vmem:[#allocation2 + $0xc8] sm:$0xff] %vm2648_vm14, %v8767_v3 }
 0x98f   : > { %8930 = vst.msk [vmem:[#allocation2 + $0xc8] sm:$0xff] %vm16021_vm10, %v8895_v30 }
 0x991   : > { %v8383_v59 = vpop.permute.xlu0 %8382 }
 0x992   : > { %v9023_v32 = vpop.permute.xlu1 %9022  ;;  %8418 = vst.msk [vmem:[#allocation2 + $0xd8] sm:$0xff] %vm8404_vm15, %v8383_v59  ;;  %v16029_v59 = vld [vmem:[#allocation31_spill] sm:$0xff] }
 0x993   : > { %9058 = vst.msk [vmem:[#allocation2 + $0xc8] sm:$0xff] %vm16022_vm12, %v9023_v32 }
 0x995   : > { %v8641_v9 = vpop.permute.xlu0 %8640 }
 0x996   : > { %v8512_v0 = vpop.permute.xlu1 %8511 }
 0x997   : > { %8547 = vst.msk [vmem:[#allocation2 + $0xd8] sm:$0xff] %vm8533_vm11, %v8512_v0 }
 0x998   : > { %8675 = vst.msk [vmem:[#allocation2 + $0xd8] sm:$0xff] %vm2519_vm13, %v8641_v9  ;;  %v16030_v9 = vld [vmem:[#allocation32_spill] sm:$0xff] }
 0x999   : > { %v8256_v46 = vpop.permute.xlu0 %8255 }
 0x99a   : > { %v7998_v39 = vpop.permute.xlu1 %7997  ;;  %v9087_v37 = vld [vmem:[#allocation2 + $0xc8] sm:$0xff] }
 0x99b   : > { %8032 = vst.msk [vmem:[#allocation2 + $0xe8] sm:$0xff] %vm8017_vm1, %v7998_v39  ;;  %9857 = vmatprep.mubr.msk.bf16.mxu0 %vm9209_vm7, %v9087_v37 }
 0x99c   : > { %9390 = vmatmul.mubr.bf16.gmra.mrb[116].mxu0 %v9086_v28 }
 0x99d   : > { %v8897_v31 = vpop.permute.xlu0 %8896 }
 0x99e   : > { %v8127_v34 = vpop.permute.xlu1 %8126 }
 0x99f   : > { %8161 = vst.msk [vmem:[#allocation2 + $0xe8] sm:$0xff] %vm8146_vm2, %v8127_v34 }
 0x9a0   : > { %8290 = vst.msk [vmem:[#allocation2 + $0xe8] sm:$0xff] %vm8275_vm4, %v8256_v46 }
 0x9a1   : > { %v9025_v44 = vpop.permute.xlu0 %9024 }
 0x9a2   : > { %v8769_v23 = vpop.permute.xlu1 %8768 }
 0x9a3   : > { %8803 = vst.msk [vmem:[#allocation2 + $0xd8] sm:$0xff] %vm2648_vm14, %v8769_v23 }
 0x9a4   : > { %8931 = vst.msk [vmem:[#allocation2 + $0xd8] sm:$0xff] %vm16023_vm5, %v8897_v31 }
 0x9a5   : > { %9059 = vst.msk [vmem:[#allocation2 + $0xd8] sm:$0xff] %vm16024_vm3, %v9025_v44  ;;  %v8514_v1 = vpop.permute.xlu0 %8513  ;;  %v16031_v44 = vld [vmem:[#allocation33_spill] sm:$0xff] }
 0x9a6   : > { %v8385_v20 = vpop.permute.xlu1 %8384 }
 0x9a7   : > { %8419 = vst.msk [vmem:[#allocation2 + $0xe8] sm:$0xff] %vm8404_vm15, %v8385_v20  ;;  %v16032_v20 = vld [vmem:[#allocation34_spill] sm:$0xff] }
 0x9a8   : > { %8548 = vst.msk [vmem:[#allocation2 + $0xe8] sm:$0xff] %vm8533_vm11, %v8514_v1 }
 0x9a9   : > { %v8000_v53 = vpop.permute.xlu0 %7999 }
 0x9aa   : > { %v8643_v56 = vpop.permute.xlu1 %8642  ;;  %8033 = vst.msk [vmem:[#allocation2 + $0xf8] sm:$0xff] %vm8017_vm1, %v8000_v53  ;;  %vm16026_vm1 = vmmov %vm16024_vm3 }
 0x9ab   : > { %8676 = vst.msk [vmem:[#allocation2 + $0xe8] sm:$0xff] %vm2519_vm13, %v8643_v56 }
 0x9ac   : > { %v9089_v40 = vld [vmem:[#allocation2 + $0xd8] sm:$0xff] }
 0x9ad   : > { %9858 = vmatprep.mubr.msk.bf16.mxu0 %vm9209_vm7, %v9089_v40  ;;  %v8129_v10 = vpop.permute.xlu0 %8128 }
 0x9ae   : > { %9398 = vmatmul.mubr.bf16.gmra.mrb[120].mxu0 %v9088_v60  ;;  %v8258_v57 = vpop.permute.xlu1 %8257  ;;  %8162 = vst.msk [vmem:[#allocation2 + $0xf8] sm:$0xff] %vm8146_vm2, %v8129_v10  ;;  %vm16027_vm2 = vmmov %vm16023_vm5 }
 0x9af   : > { %8291 = vst.msk [vmem:[#allocation2 + $0xf8] sm:$0xff] %vm8275_vm4, %v8258_v57 }
 0x9b1   : > { %v8771_v51 = vpop.permute.xlu0 %8770 }
 0x9b2   : > { %v8899_v63 = vpop.permute.xlu1 %8898  ;;  %8804 = vst.msk [vmem:[#allocation2 + $0xe8] sm:$0xff] %vm2648_vm14, %v8771_v51 }
 0x9b3   : > { %8932 = vst.msk [vmem:[#allocation2 + $0xe8] sm:$0xff] %vm16025_vm6, %v8899_v63 }
 0x9b5   : > { %v8387_v12 = vpop.permute.xlu0 %8386 }
 0x9b6   : > { %v9027_v62 = vpop.permute.xlu1 %9026  ;;  %8420 = vst.msk [vmem:[#allocation2 + $0xf8] sm:$0xff] %vm8404_vm15, %v8387_v12  ;;  %v16033_v12 = vld [vmem:[#allocation35_spill] sm:$0xff] }
 0x9b7   : > { %9060 = vst.msk [vmem:[#allocation2 + $0xe8] sm:$0xff] %vm16026_vm1, %v9027_v62 }
 0x9b8   : > { %v9327_v61 = vpop.f32.mrb[84].mxu0 }
 0x9b9   : > { %v8645_v2 = vpop.permute.xlu0 %8644  ;;  %v9328_v55 = vadd.f32 %v15602_v35, %v9327_v61  ;;  %v9329_v29 = vpop.f32.mrb[85].mxu0 }
 0x9ba   : > { %v8516_v58 = vpop.permute.xlu1 %8515  ;;  %v9330_v6 = vpop.f32.mrb[86].mxu0 }
 0x9bb   : > { %8549 = vst.msk [vmem:[#allocation2 + $0xf8] sm:$0xff] %vm8533_vm11, %v8516_v58  ;;  %v9430_v42 = vmul.f32 0.2, %v9328_v55  ;;  %v9331_v48 = vadd.f32 %v15602_v35, %v9330_v6  ;;  %v9332_v11 = vpop.f32.mrb[87].mxu0  ;;  %v16034_v58 = vld [vmem:[#allocation36_spill] sm:$0xff] }
 0x9bc   : > { %8677 = vst.msk [vmem:[#allocation2 + $0xf8] sm:$0xff] %vm2519_vm13, %v8645_v2  ;;  %vm16028_vm13 = vmmov %vm16026_vm1 }
 0x9bd   : > { %8805 = vst.msk [vmem:[#allocation2 + $0xf8] sm:$0xff] %vm2648_vm14, %v15254_v49  ;;  %v8901_v26 = vpop.permute.xlu0 %8900  ;;  %v9462_v19 = vadd.f32 %v9430_v42, %v11546_v15  ;;  %v9431_v45 = vmul.f32 0.2, %v9331_v48 }
 0x9be   : > { %v9091_v54 = vld [vmem:[#allocation2 + $0xe8] sm:$0xff]  ;;  %8933 = vst.msk [vmem:[#allocation2 + $0xf8] sm:$0xff] %vm16027_vm2, %v8901_v26  ;;  %v9029_v33 = vpop.permute.xlu1 %9028 }
 0x9bf   : > { %9859 = vmatprep.mubr.msk.bf16.mxu0 %vm9209_vm7, %v9091_v54  ;;  %9061 = vst.msk [vmem:[#allocation2 + $0xf8] sm:$0xff] %vm16028_vm13, %v9029_v33  ;;  %v9463_v49 = vadd.f32 %v9431_v45, %v11549_v16  ;;  %v16035_v54 = vld [vmem:[#allocation37_spill] sm:$0xff] }
 0x9c0   : > { %9406 = vmatmul.mubr.bf16.gmra.mrb[124].mxu0 %v9090_v25  ;;  %9494 = vst.msk [vmem:[%s15618_s14 + $0x40] sm:$0xff] %vm573_vm0, %v9462_v19  ;;  %v16036_v19 = vld [vmem:[#allocation38_spill] sm:$0xff] }
 0x9c1   : > { %9495 = vst.msk [vmem:[%s15618_s14 + $0x48] sm:$0xff] %vm573_vm0, %v9463_v49 }
 0x9c6   : > { %v9093_v8 = vld [vmem:[#allocation2 + $0xf8] sm:$0xff] }
 0x9c7   : > { %9860 = vmatprep.mubr.msk.bf16.mxu0 %vm9209_vm7, %v9093_v8 }
 0x9c8   : > { %9414 = vmatmul.mubr.bf16.gmra.mrb[128].mxu0 %v9092_v22 }
 0x9dd   : > { %v9335_v13 = vpop.f32.mrb[88].mxu0 }
 0x9de   : > { %v9336_v15 = vadd.f32 %v15602_v35, %v9335_v13  ;;  %v9337_v27 = vpop.f32.mrb[89].mxu0 }
 0x9df   : > { %v9338_v43 = vpop.f32.mrb[90].mxu0 }
 0x9e0   : > { %v9432_v14 = vmul.f32 0.2, %v9336_v15  ;;  %v9339_v24 = vadd.f32 %v15602_v35, %v9338_v43  ;;  %v9340_v47 = vpop.f32.mrb[91].mxu0 }
 0x9e2   : > { %v9464_v16 = vadd.f32 %v9432_v14, %v11552_v17  ;;  %v9433_v21 = vmul.f32 0.2, %v9339_v24  ;;  %v16037_v14 = vld [vmem:[#allocation39_spill] sm:$0xff] }
 0x9e4   : > { %9496 = vst.msk [vmem:[%s15618_s14 + $0x50] sm:$0xff] %vm573_vm0, %v9464_v16  ;;  %v9465_v50 = vadd.f32 %v9433_v21, %v11560_v18  ;;  %v16038_v16 = vld [vmem:[#allocation40_spill] sm:$0xff] }
 0x9e6   : > { %9497 = vst.msk [vmem:[%s15618_s14 + $0x58] sm:$0xff] %vm573_vm0, %v9465_v50 }
 0xa03   : > { %v9343_v52 = vpop.f32.mrb[92].mxu0 }
 0xa04   : > { %v9344_v38 = vadd.f32 %v15602_v35, %v9343_v52  ;;  %v9345_v5 = vpop.f32.mrb[93].mxu0 }
 0xa05   : > { %v9346_v4 = vpop.f32.mrb[94].mxu0 }
 0xa06   : > { %v9434_v7 = vmul.f32 0.2, %v9344_v38  ;;  %v9347_v3 = vadd.f32 %v15602_v35, %v9346_v4  ;;  %v9348_v30 = vpop.f32.mrb[95].mxu0 }
 0xa07   : > { %v16039_v30 = vld [vmem:[#allocation41_spill] sm:$0xff] }
 0xa08   : > { %v9466_v17 = vadd.f32 %v9434_v7, %v16029_v59  ;;  %v9435_v32 = vmul.f32 0.2, %v9347_v3 }
 0xa0a   : > { %9498 = vst.msk [vmem:[%s15618_s14 + $0x60] sm:$0xff] %vm573_vm0, %v9466_v17  ;;  %v9467_v18 = vadd.f32 %v9435_v32, %v16030_v9  ;;  %v16040_v32 = vld [vmem:[#allocation42_spill] sm:$0xff] }
 0xa0c   : > { %9499 = vst.msk [vmem:[%s15618_s14 + $0x68] sm:$0xff] %vm573_vm0, %v9467_v18 }
 0xa15   : > { %v9351_v0 = vpop.f32.mrb[96].mxu0 }
 0xa16   : > { %v9352_v46 = vadd.f32 %v15602_v35, %v9351_v0  ;;  %v9353_v39 = vpop.f32.mrb[97].mxu0 }
 0xa17   : > { %v9354_v37 = vpop.f32.mrb[98].mxu0 }
 0xa18   : > { %v9436_v28 = vmul.f32 0.2, %v9352_v46  ;;  %v9355_v31 = vadd.f32 %v15602_v35, %v9354_v37  ;;  %v9356_v34 = vpop.f32.mrb[99].mxu0 }
 0xa19   : > { %v16041_v34 = vld [vmem:[#allocation43_spill] sm:$0xff] }
 0xa1a   : > { %v9468_v23 = vadd.f32 %v9436_v28, %v16031_v44  ;;  %v9437_v1 = vmul.f32 0.2, %v9355_v31 }
 0xa1c   : > { %9500 = vst.msk [vmem:[%s15618_s14 + $0x70] sm:$0xff] %vm573_vm0, %v9468_v23  ;;  %v9469_v53 = vadd.f32 %v9437_v1, %v16032_v20  ;;  %v16042_v1 = vld [vmem:[#allocation44_spill] sm:$0xff] }
 0xa1e   : > { %9501 = vst.msk [vmem:[%s15618_s14 + $0x78] sm:$0xff] %vm573_vm0, %v9469_v53 }
 0xa27   : > { %v9359_v56 = vpop.f32.mrb[100].mxu0 }
 0xa28   : > { %v9360_v40 = vadd.f32 %v15602_v35, %v9359_v56  ;;  %v9361_v60 = vpop.f32.mrb[101].mxu0 }
 0xa29   : > { %v9362_v10 = vpop.f32.mrb[102].mxu0 }
 0xa2a   : > { %v9438_v57 = vmul.f32 0.2, %v9360_v40  ;;  %v9363_v51 = vadd.f32 %v15602_v35, %v9362_v10  ;;  %v9364_v63 = vpop.f32.mrb[103].mxu0 }
 0xa2b   : > { %v16043_v63 = vld [vmem:[#allocation45_spill] sm:$0xff] }
 0xa2c   : > { %v9470_v62 = vadd.f32 %v9438_v57, %v16033_v12  ;;  %v9439_v2 = vmul.f32 0.2, %v9363_v51 }
 0xa2e   : > { %9502 = vst.msk [vmem:[%s15618_s14 + $0x80] sm:$0xff] %vm573_vm0, %v9470_v62  ;;  %v9471_v61 = vadd.f32 %v9439_v2, %v16034_v58  ;;  %v16044_v2 = vld [vmem:[#allocation46_spill] sm:$0xff] }
 0xa30   : > { %9503 = vst.msk [vmem:[%s15618_s14 + $0x88] sm:$0xff] %vm573_vm0, %v9471_v61 }
 0xa39   : > { %v9367_v55 = vpop.f32.mrb[104].mxu0 }
 0xa3a   : > { %v9368_v29 = vadd.f32 %v15602_v35, %v9367_v55  ;;  %v9369_v6 = vpop.f32.mrb[105].mxu0 }
 0xa3b   : > { %v9370_v42 = vpop.f32.mrb[106].mxu0 }
 0xa3c   : > { %v9440_v48 = vmul.f32 0.2, %v9368_v29  ;;  %v9371_v26 = vadd.f32 %v15602_v35, %v9370_v42  ;;  %v9372_v11 = vpop.f32.mrb[107].mxu0 }
 0xa3d   : > { %v16045_v11 = vld [vmem:[#allocation47_spill] sm:$0xff] }
 0xa3e   : > { %v9472_v33 = vadd.f32 %v9440_v48, %v16035_v54  ;;  %v9441_v25 = vmul.f32 0.2, %v9371_v26 }
 0xa40   : > { %9504 = vst.msk [vmem:[%s15618_s14 + $0x90] sm:$0xff] %vm573_vm0, %v9472_v33  ;;  %v9473_v45 = vadd.f32 %v9441_v25, %v16036_v19  ;;  %v16046_v25 = vld [vmem:[#allocation48_spill] sm:$0xff] }
 0xa42   : > { %9505 = vst.msk [vmem:[%s15618_s14 + $0x98] sm:$0xff] %vm573_vm0, %v9473_v45 }
 0xa4b   : > { %v9375_v49 = vpop.f32.mrb[108].mxu0 }
 0xa4c   : > { %v9376_v8 = vadd.f32 %v15602_v35, %v9375_v49  ;;  %v9377_v22 = vpop.f32.mrb[109].mxu0 }
 0xa4d   : > { %v9378_v13 = vpop.f32.mrb[110].mxu0 }
 0xa4e   : > { %v9442_v15 = vmul.f32 0.2, %v9376_v8  ;;  %v9379_v27 = vadd.f32 %v15602_v35, %v9378_v13  ;;  %v9380_v43 = vpop.f32.mrb[111].mxu0 }
 0xa50   : > { %v9474_v24 = vadd.f32 %v9442_v15, %v16037_v14  ;;  %v9443_v47 = vmul.f32 0.2, %v9379_v27 }
 0xa52   : > { %9506 = vst.msk [vmem:[%s15618_s14 + $0xa0] sm:$0xff] %vm573_vm0, %v9474_v24  ;;  %v9475_v21 = vadd.f32 %v9443_v47, %v16038_v16 }
 0xa54   : > { %9507 = vst.msk [vmem:[%s15618_s14 + $0xa8] sm:$0xff] %vm573_vm0, %v9475_v21 }
 0xa5d   : > { %v9383_v50 = vpop.f32.mrb[112].mxu0 }
 0xa5e   : > { %v9384_v52 = vadd.f32 %v15602_v35, %v9383_v50  ;;  %v9385_v38 = vpop.f32.mrb[113].mxu0 }
 0xa5f   : > { %v9386_v5 = vpop.f32.mrb[114].mxu0 }
 0xa60   : > { %v9444_v4 = vmul.f32 0.2, %v9384_v52  ;;  %v9387_v7 = vadd.f32 %v15602_v35, %v9386_v5  ;;  %v9388_v3 = vpop.f32.mrb[115].mxu0 }
 0xa62   : > { %v9476_v59 = vadd.f32 %v9444_v4, %v16039_v30  ;;  %v9445_v17 = vmul.f32 0.2, %v9387_v7 }
 0xa64   : > { %9508 = vst.msk [vmem:[%s15618_s14 + $0xb0] sm:$0xff] %vm573_vm0, %v9476_v59  ;;  %v9477_v9 = vadd.f32 %v9445_v17, %v16040_v32 }
 0xa66   : > { %9509 = vst.msk [vmem:[%s15618_s14 + $0xb8] sm:$0xff] %vm573_vm0, %v9477_v9 }
 0xa6f   : > { %v9391_v18 = vpop.f32.mrb[116].mxu0 }
 0xa70   : > { %v9392_v0 = vadd.f32 %v15602_v35, %v9391_v18  ;;  %v9393_v46 = vpop.f32.mrb[117].mxu0 }
 0xa71   : > { %v9394_v39 = vpop.f32.mrb[118].mxu0 }
 0xa72   : > { %v9446_v37 = vmul.f32 0.2, %v9392_v0  ;;  %v9395_v28 = vadd.f32 %v15602_v35, %v9394_v39  ;;  %v9396_v31 = vpop.f32.mrb[119].mxu0 }
 0xa74   : > { %v9478_v44 = vadd.f32 %v9446_v37, %v16041_v34  ;;  %v9447_v23 = vmul.f32 0.2, %v9395_v28 }
 0xa76   : > { %9510 = vst.msk [vmem:[%s15618_s14 + $0xc0] sm:$0xff] %vm573_vm0, %v9478_v44  ;;  %v9479_v20 = vadd.f32 %v9447_v23, %v16042_v1 }
 0xa78   : > { %9511 = vst.msk [vmem:[%s15618_s14 + $0xc8] sm:$0xff] %vm573_vm0, %v9479_v20 }
 0xa81   : > { %v9399_v53 = vpop.f32.mrb[120].mxu0 }
 0xa82   : > { %v9400_v56 = vadd.f32 %v15602_v35, %v9399_v53  ;;  %v9401_v40 = vpop.f32.mrb[121].mxu0 }
 0xa83   : > { %v9402_v60 = vpop.f32.mrb[122].mxu0 }
 0xa84   : > { %v9448_v10 = vmul.f32 0.2, %v9400_v56  ;;  %v9403_v57 = vadd.f32 %v15602_v35, %v9402_v60  ;;  %v9404_v51 = vpop.f32.mrb[123].mxu0 }
 0xa86   : > { %v9480_v12 = vadd.f32 %v9448_v10, %v16043_v63  ;;  %v9449_v62 = vmul.f32 0.2, %v9403_v57 }
 0xa88   : > { %9512 = vst.msk [vmem:[%s15618_s14 + $0xd0] sm:$0xff] %vm573_vm0, %v9480_v12  ;;  %v9481_v58 = vadd.f32 %v9449_v62, %v16044_v2 }
 0xa8a   : > { %9513 = vst.msk [vmem:[%s15618_s14 + $0xd8] sm:$0xff] %vm573_vm0, %v9481_v58 }
 0xa93   : > { %v9407_v61 = vpop.f32.mrb[124].mxu0 }
 0xa94   : > { %v9408_v55 = vadd.f32 %v15602_v35, %v9407_v61  ;;  %v9409_v29 = vpop.f32.mrb[125].mxu0 }
 0xa95   : > { %v9410_v6 = vpop.f32.mrb[126].mxu0 }
 0xa96   : > { %v9450_v42 = vmul.f32 0.2, %v9408_v55  ;;  %v9411_v48 = vadd.f32 %v15602_v35, %v9410_v6  ;;  %v9412_v26 = vpop.f32.mrb[127].mxu0 }
 0xa98   : > { %v9482_v54 = vadd.f32 %v9450_v42, %v16045_v11  ;;  %v9451_v33 = vmul.f32 0.2, %v9411_v48 }
 0xa9a   : > { %9514 = vst.msk [vmem:[%s15618_s14 + $0xe0] sm:$0xff] %vm573_vm0, %v9482_v54  ;;  %v9483_v19 = vadd.f32 %v9451_v33, %v16046_v25 }
 0xa9b   : > { %v9415_v45 = vpop.f32.mrb[128].mxu0 }
 0xa9c   : > { %9515 = vst.msk [vmem:[%s15618_s14 + $0xe8] sm:$0xff] %vm573_vm0, %v9483_v19  ;;  %v9416_v49 = vadd.f32 %v15602_v35, %v9415_v45  ;;  %v9417_v8 = vpop.f32.mrb[129].mxu0 }
 0xa9d   : > { %v9418_v22 = vpop.f32.mrb[130].mxu0 }
 0xa9e   : > { %v9452_v13 = vmul.f32 0.2, %v9416_v49  ;;  %v9419_v15 = vadd.f32 %v15602_v35, %v9418_v22  ;;  %v9420_v27 = vpop.f32.mrb[131].mxu0 }
 0xaa0   : > { %v9484_v43 = vadd.f32 %v9452_v13, %v12036_v36  ;;  %v9453_v14 = vmul.f32 0.2, %v9419_v15 }
 0xaa2   : > { %9516 = vst.msk [vmem:[%s15618_s14 + $0xf0] sm:$0xff] %vm573_vm0, %v9484_v43  ;;  %v9485_v24 = vadd.f32 %v9453_v14, %v12039_v41 }
 0xaa4   : > { %9517 = vst.msk [vmem:[%s15618_s14 + $0xf8] sm:$0xff] %vm573_vm0, %v9485_v24 }
 0xaa5   : > { %10835 = shalt.err (!%p10832_p3)
}
 0xaa6   : > { %s10836_s14 = scalar_lea.hbm %s15833_s30, 4096  ;;  %s10840_s24 = scalar_lea.hbm %s16047_s12, 8192 }
 0xaa7   : > { %p10837_p5 = scmp.ne.s32.totalorder %s15833_s30, %s10836_s14  ;;  %p10841_p9 = scmp.lt.u32.totalorder %s15833_s30, %s16047_s12 }
 0xaa8   : > { %p10842_p12 = scmp.lt.u32.totalorder %s10840_s24, %s10836_s14  ;;  %p10844_p13 = scmp.lt.u32.totalorder %s10836_s14, %s15833_s30 }
 0xaa9   : > { %p10838_p7 = pnand %p10837_p5, %p16048_p0 }
 0xaaa   : > { %p10843_p1 = por %p10842_p12, %p10841_p9 }
 0xaab   : > { %p10839_p6 = pneg %p10838_p7 }
 0xaac   : > { %p10845_p2 = por %p10844_p13, %p10843_p1 }
 0xaae   : > { %p10846_p8 = pnand %p10845_p2, %p10839_p6 }
 0xab0   : > { %10849 = shalt.err (!%p10846_p8)
}
 0xab1   : > { %s10959_s16 = smov 128   ;;  %s16049_s25 = smov 8  }
 0xab2   : > { %10062 = dma.vmem_to_hbm [thread:$0]  (%p16048_p0), %s15838_s1, 4096, %s15833_s30, %s9519_s23, %s10959_s16, %s10959_s16, %s16049_s25  }
 0xab3 PF: > { %s9547_s21 = sand.u32 1, %s10896_s17   ;;  %p16050_p4 = scmp.ne.s32.totalorder %s15955_s11, 0 }
 0xab4   : > { %p16051_p10 = scmp.ge.s32.totalorder %s10908_s20, 2  ;;  %s9548_s14 = scalar_lea.sflag [#allocation6], %s9547_s21 }
 0xab6   : > { %p10100_p11 = pnand %p16051_p10, %p16050_p4 }
 0xab8   : > { %10891 = dma.done.wait (!%p10100_p11), %s9548_s14, 4096  }
 0xab9   : > { %10893 = vsyncadd (!%p10100_p11), %s9548_s14, 4294963200  ;;  %p29_p3 = scmp.ge.s32.totalorder %s11283_s27, 4   ;;  %s16052_s17 = smov %s10900_s18 }
 0xaba   : > { %s16053_s18 = smov %s10904_s19  ;;  %s16054_s19 = smov %s11294_s0 }
 0xabb   : > { %s16055_s20 = smov %s11283_s27  ;;  %31 = sbr.rel (!%p29_p3) target bundleno = 14 (0xe), region = 151 }
 0xac2   :  { %9553 = vsyncpa [#allocation5], 1 }
 0xac3   :  { %9555 = vsyncpa [#allocation5 + $0x1], 1 }
 0xac4   :  { %9556 = vsyncpa [#allocation8], 1 }
 0xac5   :  { %9557 = vsyncpa [#allocation11], 1 }
 0xac6   :  { %9558 = vsyncpa [#allocation14], 1 }
 0xac7   :  { %9559 = vsyncpa [#allocation17], 1 }
 0xac8   :  { %9560 = vsyncpa [#allocation20], 1 }
 0xac9   :  { %9561 = vsyncpa [#allocation6], 1 }
 0xaca   :  { %9563 = vsyncpa [#allocation6 + $0x1], 1 }

</bundles_post_ra>
